<compile_context>
chip_gen: v5e
topology: v5e:2x2
jax: 0.10.0
libtpu: 0.0.40
codegen_flags: <defaults>
</compile_context>

<pallas_src>
import jax
import jax.numpy as jnp
import numpy as np
from jax.experimental import pallas as pl
from jax.experimental.pallas import tpu as pltpu

EPS = 1e-5
IN_FEATURES = 3 * 128 * 128          # 49152
HIDDEN = (1024, 512, 256)
OUT_FEATURES = 100
OUT_PADDED = 128                     # lane-dense padded final width


def _bn_relu(y, gamma, beta):
    """BatchNorm1d (training-mode stats over the batch axis) + ReLU."""
    mean = jnp.mean(y, axis=0, keepdims=True)
    var = jnp.mean((y - mean) ** 2, axis=0, keepdims=True)
    y = (y - mean) * jax.lax.rsqrt(var + EPS)
    return jnp.maximum(y * gamma + beta, 0.0)


# ---------------------------------------------------------------------------
# Kernel 1: layer 1 (x @ W1 + b1 -> BN -> ReLU).
# Grid = (N blocks, K blocks); K is the reduction axis (innermost, "arbitrary"),
# N is "parallel" so v7x megacore splits the dominant weight stream.
# The output block is resident across K and doubles as the accumulator.
# ---------------------------------------------------------------------------
def _layer1_kernel(x_ref, w_ref, b_ref, g_ref, be_ref, o_ref):
    k = pl.program_id(1)

    @pl.when(k == 0)
    def _():
        o_ref[...] = jnp.zeros_like(o_ref)

    # bf16 x bf16 -> f32 accumulation on the MXU (weights streamed as bf16).
    o_ref[...] += jnp.dot(
        x_ref[...].astype(jnp.bfloat16),
        w_ref[...],
        preferred_element_type=jnp.float32,
    )

    @pl.when(k == pl.num_programs(1) - 1)
    def _():
        y = o_ref[...] + b_ref[...]
        o_ref[...] = _bn_relu(y, g_ref[...], be_ref[...])


def layer1(x, w1, b1, g1, be1, *, tk=4096, tn=512):
    B, K = x.shape
    Kw, N = w1.shape
    assert K == Kw == IN_FEATURES, (K, Kw)
    assert K % tk == 0 and N % tn == 0, (K, tk, N, tn)
    nk, nj = K // tk, N // tn

    return pl.pallas_call(
        _layer1_kernel,
        out_shape=jax.ShapeDtypeStruct((B, N), jnp.float32),
        grid_spec=pl.GridSpec(
            grid=(nj, nk),
            in_specs=[
                pl.BlockSpec((B, tk), lambda j, k: (0, k)),    # activations
                pl.BlockSpec((tk, tn), lambda j, k: (k, j)),   # bf16 weights
                pl.BlockSpec((1, tn), lambda j, k: (0, j)),    # bias
                pl.BlockSpec((1, tn), lambda j, k: (0, j)),    # BN gamma
                pl.BlockSpec((1, tn), lambda j, k: (0, j)),    # BN beta
            ],
            out_specs=pl.BlockSpec((B, tn), lambda j, k: (0, j)),
        ),
        compiler_params=pltpu.CompilerParams(
            dimension_semantics=("parallel", "arbitrary"),
            vmem_limit_bytes=32 * 1024 * 1024,
        ),
    )(x, w1, b1, g1, be1)


# ---------------------------------------------------------------------------
# Kernel 2: layers 2-4 fused into one single-step call.  All weights/params
# are VMEM-resident full blocks; intermediates never touch HBM.
# ---------------------------------------------------------------------------
def _tail_kernel(h_ref, w2_ref, b2_ref, g2_ref, be2_ref,
                 w3_ref, b3_ref, g3_ref, be3_ref,
                 w4_ref, b4_ref, o_ref):
    h2 = _bn_relu(
        jnp.dot(h_ref[...], w2_ref[...], preferred_element_type=jnp.float32)
        + b2_ref[...],
        g2_ref[...], be2_ref[...])
    h3 = _bn_relu(
        jnp.dot(h2, w3_ref[...], preferred_element_type=jnp.float32)
        + b3_ref[...],
        g3_ref[...], be3_ref[...])
    o_ref[...] = (
        jnp.dot(h3, w4_ref[...], preferred_element_type=jnp.float32)
        + b4_ref[...]
    ).astype(o_ref.dtype)


def tail_layers(h1, p2, p3, p4):
    B = h1.shape[0]
    (w2, b2, g2, be2) = p2
    (w3, b3, g3, be3) = p3
    (w4, b4) = p4

    def full(shape):
        return pl.BlockSpec(shape, lambda i: (0, 0))

    return pl.pallas_call(
        _tail_kernel,
        out_shape=jax.ShapeDtypeStruct((B, OUT_PADDED), jnp.float32),
        grid_spec=pl.GridSpec(
            grid=(1,),
            in_specs=[
                full((B, HIDDEN[0])),
                full(w2.shape), full(b2.shape), full(g2.shape), full(be2.shape),
                full(w3.shape), full(b3.shape), full(g3.shape), full(be3.shape),
                full(w4.shape), full(b4.shape),
            ],
            out_specs=full((B, OUT_PADDED)),
        ),
        compiler_params=pltpu.CompilerParams(
            dimension_semantics=("arbitrary",),
            vmem_limit_bytes=32 * 1024 * 1024,
        ),
    )(h1, w2, b2, g2, be2, w3, b3, g3, be3, w4, b4)


# ---------------------------------------------------------------------------
# Parameters & forward
# ---------------------------------------------------------------------------
def init_params(key):
    """Deterministic parameter init (PyTorch-Linear-style uniform)."""
    dims = [IN_FEATURES, 1024, 512, 256, OUT_FEATURES]
    layers = []
    for i in range(4):
        key, kw, kb = jax.random.split(key, 3)
        fan_in, fan_out = dims[i], dims[i + 1]
        bound = 1.0 / np.sqrt(fan_in)
        w = jax.random.uniform(kw, (fan_in, fan_out), jnp.float32, -bound, bound)
        b = jax.random.uniform(kb, (1, fan_out), jnp.float32, -bound, bound)
        gamma = jnp.ones((1, fan_out), jnp.float32)   # BN weight init
        beta = jnp.zeros((1, fan_out), jnp.float32)   # BN bias init
        layers.append([w, b, gamma, beta])

    # Layer 1: store / stream the big weight matrix as bf16 (one-time cast at
    # init; kernel accumulates in f32 and the BatchNorm renormalizes).
    layers[0][0] = layers[0][0].astype(jnp.bfloat16)

    # Layer 4: zero-pad 100 -> 128 output features for lane-dense stores.
    w4, b4, _, _ = layers[3]
    w4p = jnp.zeros((dims[3], OUT_PADDED), jnp.float32).at[:, :OUT_FEATURES].set(w4)
    b4p = jnp.zeros((1, OUT_PADDED), jnp.float32).at[:, :OUT_FEATURES].set(b4)

    return (tuple(layers[0]), tuple(layers[1]), tuple(layers[2]), (w4p, b4p))


@jax.jit
def reconstructor_forward(x_nchw, params):
    p1, p2, p3, p4 = params
    B = x_nchw.shape[0]
    x = x_nchw.reshape(B, -1)            # nn.Flatten (row-major over C, H, W)
    h1 = layer1(x, *p1)                  # Linear + BN + ReLU (fused, K-tiled)
    out = tail_layers(h1, p2, p3, p4)    # layers 2-4 fused in one call
    return out[:, :OUT_FEATURES].reshape(-1, OUT_FEATURES, 1, 1)


def reconstructor_reference(x_nchw, params):
    """Pure-JAX reference (same bf16 layer-1 weight stream) for sanity check."""
    p1, p2, p3, p4 = params
    x = x_nchw.reshape(x_nchw.shape[0], -1)
    w1, b1, g1, be1 = p1
    h = jnp.dot(x.astype(jnp.bfloat16), w1,
                preferred_element_type=jnp.float32) + b1
    h = _bn_relu(h, g1, be1)
    for (w, b, g, be) in (p2, p3):
        h = _bn_relu(h @ w + b, g, be)
    w4, b4 = p4
    out = (h @ w4 + b4)[:, :OUT_FEATURES]
    return out.reshape(-1, OUT_FEATURES, 1, 1)


if __name__ == "__main__":
    key = jax.random.PRNGKey(0)
    key, kx = jax.random.split(key)

    # Input spatial size is fixed by Linear(3*128*128, ...); keep batch small
    # (>1 so BatchNorm1d training-mode statistics are well defined).
    B = 4
    x = jax.random.normal(kx, (B, 3, 128, 128), jnp.float32)

    params = init_params(key)

    out = jax.block_until_ready(reconstructor_forward(x, params))
    assert out.shape == (B, OUT_FEATURES, 1, 1), out.shape

    ref = jax.block_until_ready(reconstructor_reference(x, params))
    err = float(jnp.max(jnp.abs(out - ref)))
    assert err < 5e-2, f"max abs error vs reference: {err}"

    print("KERNEL_OK")
</pallas_src>

<mosaic_0001>
module attributes {stable_mosaic.version = 11 : i64} {
  func.func @_tail_kernel(%arg0: i32, %arg1: memref<4x1024xf32, #tpu.memory_space<vmem>>, %arg2: memref<1024x512xf32, #tpu.memory_space<vmem>>, %arg3: memref<1x512xf32, #tpu.memory_space<vmem>>, %arg4: memref<1x512xf32, #tpu.memory_space<vmem>>, %arg5: memref<1x512xf32, #tpu.memory_space<vmem>>, %arg6: memref<512x256xf32, #tpu.memory_space<vmem>>, %arg7: memref<1x256xf32, #tpu.memory_space<vmem>>, %arg8: memref<1x256xf32, #tpu.memory_space<vmem>>, %arg9: memref<1x256xf32, #tpu.memory_space<vmem>>, %arg10: memref<256x128xf32, #tpu.memory_space<vmem>>, %arg11: memref<1x128xf32, #tpu.memory_space<vmem>>, %arg12: memref<4x128xf32, #tpu.memory_space<vmem>>) attributes {dimension_semantics = [#tpu.dimension_semantics<arbitrary>], iteration_bounds = array<i64: 1>, scalar_prefetch = 0 : i64, scratch_operands = 0 : i64, tpu.core_type = #tpu.core_type<tc>, window_params = [{pipeline_mode = #tpu.pipeline_mode<synchronous>, transform_indices = @transform_0, window_bounds = array<i64: 4, 1024>}, {pipeline_mode = #tpu.pipeline_mode<synchronous>, transform_indices = @transform_1, window_bounds = array<i64: 1024, 512>}, {pipeline_mode = #tpu.pipeline_mode<synchronous>, transform_indices = @transform_2, window_bounds = array<i64: 1, 512>}, {pipeline_mode = #tpu.pipeline_mode<synchronous>, transform_indices = @transform_3, window_bounds = array<i64: 1, 512>}, {pipeline_mode = #tpu.pipeline_mode<synchronous>, transform_indices = @transform_4, window_bounds = array<i64: 1, 512>}, {pipeline_mode = #tpu.pipeline_mode<synchronous>, transform_indices = @transform_5, window_bounds = array<i64: 512, 256>}, {pipeline_mode = #tpu.pipeline_mode<synchronous>, transform_indices = @transform_6, window_bounds = array<i64: 1, 256>}, {pipeline_mode = #tpu.pipeline_mode<synchronous>, transform_indices = @transform_7, window_bounds = array<i64: 1, 256>}, {pipeline_mode = #tpu.pipeline_mode<synchronous>, transform_indices = @transform_8, window_bounds = array<i64: 1, 256>}, {pipeline_mode = #tpu.pipeline_mode<synchronous>, transform_indices = @transform_9, window_bounds = array<i64: 256, 128>}, {pipeline_mode = #tpu.pipeline_mode<synchronous>, transform_indices = @transform_10, window_bounds = array<i64: 1, 128>}, {pipeline_mode = #tpu.pipeline_mode<synchronous>, transform_indices = @transform_11, window_bounds = array<i64: 4, 128>}]} {
    %c0 = arith.constant 0 : index
    %c0_0 = arith.constant 0 : index
    %0 = vector.load %arg1[%c0, %c0_0] : memref<4x1024xf32, #tpu.memory_space<vmem>>, vector<4x1024xf32>
    %c0_1 = arith.constant 0 : index
    %c0_2 = arith.constant 0 : index
    %1 = vector.load %arg2[%c0_1, %c0_2] : memref<1024x512xf32, #tpu.memory_space<vmem>>, vector<1024x512xf32>
    %cst = arith.constant dense<0.000000e+00> : vector<4x512xf32>
    %2 = tpu.matmul %0, %1, %cst {dimension_numbers = #tpu.dot_dimension_numbers<[1], [0], [0], [1], [0, 0, 1, 1], [], []>} : vector<4x1024xf32>, vector<1024x512xf32>, vector<4x512xf32> -> vector<4x512xf32>
    %c0_3 = arith.constant 0 : index
    %c0_4 = arith.constant 0 : index
    %3 = vector.load %arg3[%c0_3, %c0_4] : memref<1x512xf32, #tpu.memory_space<vmem>>, vector<1x512xf32>
    %4 = vector.broadcast %3 : vector<1x512xf32> to vector<4x512xf32>
    %5 = arith.addf %2, %4 : vector<4x512xf32>
    %c0_5 = arith.constant 0 : index
    %c0_6 = arith.constant 0 : index
    %6 = vector.load %arg4[%c0_5, %c0_6] : memref<1x512xf32, #tpu.memory_space<vmem>>, vector<1x512xf32>
    %c0_7 = arith.constant 0 : index
    %c0_8 = arith.constant 0 : index
    %7 = vector.load %arg5[%c0_7, %c0_8] : memref<1x512xf32, #tpu.memory_space<vmem>>, vector<1x512xf32>
    %cst_9 = arith.constant dense<0.000000e+00> : vector<512xf32>
    %8 = vector.multi_reduction <add>, %5, %cst_9 [0] : vector<4x512xf32> to vector<512xf32>
    %9 = vector.shape_cast %8 : vector<512xf32> to vector<1x512xf32>
    %cst_10 = arith.constant 4.000000e+00 : f32
    %10 = vector.broadcast %cst_10 : f32 to vector<1x512xf32>
    %11 = arith.divf %9, %10 : vector<1x512xf32>
    %12 = vector.broadcast %11 : vector<1x512xf32> to vector<4x512xf32>
    %13 = arith.subf %5, %12 : vector<4x512xf32>
    %14 = arith.mulf %13, %13 : vector<4x512xf32>
    %cst_11 = arith.constant dense<0.000000e+00> : vector<512xf32>
    %15 = vector.multi_reduction <add>, %14, %cst_11 [0] : vector<4x512xf32> to vector<512xf32>
    %16 = vector.shape_cast %15 : vector<512xf32> to vector<1x512xf32>
    %cst_12 = arith.constant 4.000000e+00 : f32
    %17 = vector.broadcast %cst_12 : f32 to vector<1x512xf32>
    %18 = arith.divf %16, %17 : vector<1x512xf32>
    %19 = vector.broadcast %11 : vector<1x512xf32> to vector<4x512xf32>
    %20 = arith.subf %5, %19 : vector<4x512xf32>
    %cst_13 = arith.constant 9.99999974E-6 : f32
    %21 = vector.broadcast %cst_13 : f32 to vector<1x512xf32>
    %22 = arith.addf %18, %21 : vector<1x512xf32>
    %23 = math.rsqrt %22 : vector<1x512xf32>
    %24 = vector.broadcast %23 : vector<1x512xf32> to vector<4x512xf32>
    %25 = arith.mulf %20, %24 : vector<4x512xf32>
    %26 = vector.broadcast %6 : vector<1x512xf32> to vector<4x512xf32>
    %27 = arith.mulf %25, %26 : vector<4x512xf32>
    %28 = vector.broadcast %7 : vector<1x512xf32> to vector<4x512xf32>
    %29 = arith.addf %27, %28 : vector<4x512xf32>
    %cst_14 = arith.constant 0.000000e+00 : f32
    %30 = vector.broadcast %cst_14 : f32 to vector<4x512xf32>
    %31 = arith.maximumf %29, %30 : vector<4x512xf32>
    %c0_15 = arith.constant 0 : index
    %c0_16 = arith.constant 0 : index
    %32 = vector.load %arg6[%c0_15, %c0_16] : memref<512x256xf32, #tpu.memory_space<vmem>>, vector<512x256xf32>
    %cst_17 = arith.constant dense<0.000000e+00> : vector<4x256xf32>
    %33 = tpu.matmul %31, %32, %cst_17 {dimension_numbers = #tpu.dot_dimension_numbers<[1], [0], [0], [1], [0, 0, 1, 1], [], []>} : vector<4x512xf32>, vector<512x256xf32>, vector<4x256xf32> -> vector<4x256xf32>
    %c0_18 = arith.constant 0 : index
    %c0_19 = arith.constant 0 : index
    %34 = vector.load %arg7[%c0_18, %c0_19] : memref<1x256xf32, #tpu.memory_space<vmem>>, vector<1x256xf32>
    %35 = vector.broadcast %34 : vector<1x256xf32> to vector<4x256xf32>
    %36 = arith.addf %33, %35 : vector<4x256xf32>
    %c0_20 = arith.constant 0 : index
    %c0_21 = arith.constant 0 : index
    %37 = vector.load %arg8[%c0_20, %c0_21] : memref<1x256xf32, #tpu.memory_space<vmem>>, vector<1x256xf32>
    %c0_22 = arith.constant 0 : index
    %c0_23 = arith.constant 0 : index
    %38 = vector.load %arg9[%c0_22, %c0_23] : memref<1x256xf32, #tpu.memory_space<vmem>>, vector<1x256xf32>
    %cst_24 = arith.constant dense<0.000000e+00> : vector<256xf32>
    %39 = vector.multi_reduction <add>, %36, %cst_24 [0] : vector<4x256xf32> to vector<256xf32>
    %40 = vector.shape_cast %39 : vector<256xf32> to vector<1x256xf32>
    %cst_25 = arith.constant 4.000000e+00 : f32
    %41 = vector.broadcast %cst_25 : f32 to vector<1x256xf32>
    %42 = arith.divf %40, %41 : vector<1x256xf32>
    %43 = vector.broadcast %42 : vector<1x256xf32> to vector<4x256xf32>
    %44 = arith.subf %36, %43 : vector<4x256xf32>
    %45 = arith.mulf %44, %44 : vector<4x256xf32>
    %cst_26 = arith.constant dense<0.000000e+00> : vector<256xf32>
    %46 = vector.multi_reduction <add>, %45, %cst_26 [0] : vector<4x256xf32> to vector<256xf32>
    %47 = vector.shape_cast %46 : vector<256xf32> to vector<1x256xf32>
    %cst_27 = arith.constant 4.000000e+00 : f32
    %48 = vector.broadcast %cst_27 : f32 to vector<1x256xf32>
    %49 = arith.divf %47, %48 : vector<1x256xf32>
    %50 = vector.broadcast %42 : vector<1x256xf32> to vector<4x256xf32>
    %51 = arith.subf %36, %50 : vector<4x256xf32>
    %cst_28 = arith.constant 9.99999974E-6 : f32
    %52 = vector.broadcast %cst_28 : f32 to vector<1x256xf32>
    %53 = arith.addf %49, %52 : vector<1x256xf32>
    %54 = math.rsqrt %53 : vector<1x256xf32>
    %55 = vector.broadcast %54 : vector<1x256xf32> to vector<4x256xf32>
    %56 = arith.mulf %51, %55 : vector<4x256xf32>
    %57 = vector.broadcast %37 : vector<1x256xf32> to vector<4x256xf32>
    %58 = arith.mulf %56, %57 : vector<4x256xf32>
    %59 = vector.broadcast %38 : vector<1x256xf32> to vector<4x256xf32>
    %60 = arith.addf %58, %59 : vector<4x256xf32>
    %cst_29 = arith.constant 0.000000e+00 : f32
    %61 = vector.broadcast %cst_29 : f32 to vector<4x256xf32>
    %62 = arith.maximumf %60, %61 : vector<4x256xf32>
    %c0_30 = arith.constant 0 : index
    %c0_31 = arith.constant 0 : index
    %63 = vector.load %arg10[%c0_30, %c0_31] : memref<256x128xf32, #tpu.memory_space<vmem>>, vector<256x128xf32>
    %cst_32 = arith.constant dense<0.000000e+00> : vector<4x128xf32>
    %64 = tpu.matmul %62, %63, %cst_32 {dimension_numbers = #tpu.dot_dimension_numbers<[1], [0], [0], [1], [0, 0, 1, 1], [], []>} : vector<4x256xf32>, vector<256x128xf32>, vector<4x128xf32> -> vector<4x128xf32>
    %c0_33 = arith.constant 0 : index
    %c0_34 = arith.constant 0 : index
    %65 = vector.load %arg11[%c0_33, %c0_34] : memref<1x128xf32, #tpu.memory_space<vmem>>, vector<1x128xf32>
    %66 = vector.broadcast %65 : vector<1x128xf32> to vector<4x128xf32>
    %67 = arith.addf %64, %66 : vector<4x128xf32>
    %c0_35 = arith.constant 0 : index
    %c0_36 = arith.constant 0 : index
    %68 = vector.load %arg12[%c0_35, %c0_36] : memref<4x128xf32, #tpu.memory_space<vmem>>, vector<4x128xf32>
    tpu.vector_store %arg12[%c0_35, %c0_36], %67 {strides = array<i32>} : memref<4x128xf32, #tpu.memory_space<vmem>>, vector<4x128xf32>,
    return
  }
  func.func @transform_0(%arg0: i32) -> (i32, i32) {
    %c0_i32 = arith.constant 0 : i32
    %c0_i32_0 = arith.constant 0 : i32
    %c0_i32_1 = arith.constant 0 : i32
    return %c0_i32, %c0_i32_0 : i32, i32
  }
  func.func @transform_1(%arg0: i32) -> (i32, i32) {
    %c0_i32 = arith.constant 0 : i32
    %c0_i32_0 = arith.constant 0 : i32
    %c0_i32_1 = arith.constant 0 : i32
    return %c0_i32, %c0_i32_0 : i32, i32
  }
  func.func @transform_2(%arg0: i32) -> (i32, i32) {
    %c0_i32 = arith.constant 0 : i32
    %c0_i32_0 = arith.constant 0 : i32
    %c0_i32_1 = arith.constant 0 : i32
    return %c0_i32, %c0_i32_0 : i32, i32
  }
  func.func @transform_3(%arg0: i32) -> (i32, i32) {
    %c0_i32 = arith.constant 0 : i32
    %c0_i32_0 = arith.constant 0 : i32
    %c0_i32_1 = arith.constant 0 : i32
    return %c0_i32, %c0_i32_0 : i32, i32
  }
  func.func @transform_4(%arg0: i32) -> (i32, i32) {
    %c0_i32 = arith.constant 0 : i32
    %c0_i32_0 = arith.constant 0 : i32
    %c0_i32_1 = arith.constant 0 : i32
    return %c0_i32, %c0_i32_0 : i32, i32
  }
  func.func @transform_5(%arg0: i32) -> (i32, i32) {
    %c0_i32 = arith.constant 0 : i32
    %c0_i32_0 = arith.constant 0 : i32
    %c0_i32_1 = arith.constant 0 : i32
    return %c0_i32, %c0_i32_0 : i32, i32
  }
  func.func @transform_6(%arg0: i32) -> (i32, i32) {
    %c0_i32 = arith.constant 0 : i32
    %c0_i32_0 = arith.constant 0 : i32
    %c0_i32_1 = arith.constant 0 : i32
    return %c0_i32, %c0_i32_0 : i32, i32
  }
  func.func @transform_7(%arg0: i32) -> (i32, i32) {
    %c0_i32 = arith.constant 0 : i32
    %c0_i32_0 = arith.constant 0 : i32
    %c0_i32_1 = arith.constant 0 : i32
    return %c0_i32, %c0_i32_0 : i32, i32
  }
  func.func @transform_8(%arg0: i32) -> (i32, i32) {
    %c0_i32 = arith.constant 0 : i32
    %c0_i32_0 = arith.constant 0 : i32
    %c0_i32_1 = arith.constant 0 : i32
    return %c0_i32, %c0_i32_0 : i32, i32
  }
  func.func @transform_9(%arg0: i32) -> (i32, i32) {
    %c0_i32 = arith.constant 0 : i32
    %c0_i32_0 = arith.constant 0 : i32
    %c0_i32_1 = arith.constant 0 : i32
    return %c0_i32, %c0_i32_0 : i32, i32
  }
  func.func @transform_10(%arg0: i32) -> (i32, i32) {
    %c0_i32 = arith.constant 0 : i32
    %c0_i32_0 = arith.constant 0 : i32
    %c0_i32_1 = arith.constant 0 : i32
    return %c0_i32, %c0_i32_0 : i32, i32
  }
  func.func @transform_11(%arg0: i32) -> (i32, i32) {
    %c0_i32 = arith.constant 0 : i32
    %c0_i32_0 = arith.constant 0 : i32
    %c0_i32_1 = arith.constant 0 : i32
    return %c0_i32, %c0_i32_0 : i32, i32
  }
}

module attributes {stable_mosaic.version = 11 : i64} {
  func.func @_layer1_kernel(%arg0: i32, %arg1: i32, %arg2: memref<4x4096xf32, #tpu.memory_space<vmem>>, %arg3: memref<4096x512xbf16, #tpu.memory_space<vmem>>, %arg4: memref<1x512xf32, #tpu.memory_space<vmem>>, %arg5: memref<1x512xf32, #tpu.memory_space<vmem>>, %arg6: memref<1x512xf32, #tpu.memory_space<vmem>>, %arg7: memref<4x512xf32, #tpu.memory_space<vmem>>) attributes {dimension_semantics = [#tpu.dimension_semantics<parallel>, #tpu.dimension_semantics<arbitrary>], iteration_bounds = array<i64: 2, 12>, scalar_prefetch = 0 : i64, scratch_operands = 0 : i64, tpu.core_type = #tpu.core_type<tc>, window_params = [{transform_indices = @transform_0, window_bounds = array<i64: 4, 4096>}, {transform_indices = @transform_1, window_bounds = array<i64: 4096, 512>}, {transform_indices = @transform_2, window_bounds = array<i64: 1, 512>}, {transform_indices = @transform_3, window_bounds = array<i64: 1, 512>}, {transform_indices = @transform_4, window_bounds = array<i64: 1, 512>}, {transform_indices = @transform_5, window_bounds = array<i64: 4, 512>}]} {
    %c0_i32 = arith.constant 0 : i32
    %0 = arith.cmpi eq, %arg1, %c0_i32 : i32
    %1 = arith.extui %0 : i1 to i32
    %c0_i32_0 = arith.constant 0 : i32
    %2 = arith.cmpi ne, %1, %c0_i32_0 : i32
    scf.if %2 {
      %cst_9 = arith.constant 0.000000e+00 : f32
      %13 = vector.broadcast %cst_9 : f32 to vector<4x512xf32>
      %c0_10 = arith.constant 0 : index
      %c0_11 = arith.constant 0 : index
      %14 = vector.load %arg7[%c0_10, %c0_11] : memref<4x512xf32, #tpu.memory_space<vmem>>, vector<4x512xf32>
      tpu.vector_store %arg7[%c0_10, %c0_11], %13 {strides = array<i32>} : memref<4x512xf32, #tpu.memory_space<vmem>>, vector<4x512xf32>,
    } else {
    }
    %c0 = arith.constant 0 : index
    %c0_1 = arith.constant 0 : index
    %3 = vector.load %arg7[%c0, %c0_1] : memref<4x512xf32, #tpu.memory_space<vmem>>, vector<4x512xf32>
    %c0_2 = arith.constant 0 : index
    %c0_3 = arith.constant 0 : index
    %4 = vector.load %arg2[%c0_2, %c0_3] : memref<4x4096xf32, #tpu.memory_space<vmem>>, vector<4x4096xf32>
    %5 = arith.truncf %4 : vector<4x4096xf32> to vector<4x4096xbf16>
    %c0_4 = arith.constant 0 : index
    %c0_5 = arith.constant 0 : index
    %6 = vector.load %arg3[%c0_4, %c0_5] : memref<4096x512xbf16, #tpu.memory_space<vmem>>, vector<4096x512xbf16>
    %cst = arith.constant dense<0.000000e+00> : vector<4x512xf32>
    %7 = tpu.matmul %5, %6, %cst {dimension_numbers = #tpu.dot_dimension_numbers<[1], [0], [0], [1], [0, 0, 1, 1], [], []>} : vector<4x4096xbf16>, vector<4096x512xbf16>, vector<4x512xf32> -> vector<4x512xf32>
    %8 = arith.addf %3, %7 : vector<4x512xf32>
    %c0_6 = arith.constant 0 : index
    %c0_7 = arith.constant 0 : index
    %9 = vector.load %arg7[%c0_6, %c0_7] : memref<4x512xf32, #tpu.memory_space<vmem>>, vector<4x512xf32>
    tpu.vector_store %arg7[%c0_6, %c0_7], %8 {strides = array<i32>} : memref<4x512xf32, #tpu.memory_space<vmem>>, vector<4x512xf32>,
    %c11_i32 = arith.constant 11 : i32
    %10 = arith.cmpi eq, %arg1, %c11_i32 : i32
    %11 = arith.extui %10 : i1 to i32
    %c0_i32_8 = arith.constant 0 : i32
    %12 = arith.cmpi ne, %11, %c0_i32_8 : i32
    scf.if %12 {
      %c0_9 = arith.constant 0 : index
      %c0_10 = arith.constant 0 : index
      %13 = vector.load %arg7[%c0_9, %c0_10] : memref<4x512xf32, #tpu.memory_space<vmem>>, vector<4x512xf32>
      %c0_11 = arith.constant 0 : index
      %c0_12 = arith.constant 0 : index
      %14 = vector.load %arg4[%c0_11, %c0_12] : memref<1x512xf32, #tpu.memory_space<vmem>>, vector<1x512xf32>
      %15 = vector.broadcast %14 : vector<1x512xf32> to vector<4x512xf32>
      %16 = arith.addf %13, %15 : vector<4x512xf32>
      %c0_13 = arith.constant 0 : index
      %c0_14 = arith.constant 0 : index
      %17 = vector.load %arg5[%c0_13, %c0_14] : memref<1x512xf32, #tpu.memory_space<vmem>>, vector<1x512xf32>
      %c0_15 = arith.constant 0 : index
      %c0_16 = arith.constant 0 : index
      %18 = vector.load %arg6[%c0_15, %c0_16] : memref<1x512xf32, #tpu.memory_space<vmem>>, vector<1x512xf32>
      %cst_17 = arith.constant dense<0.000000e+00> : vector<512xf32>
      %19 = vector.multi_reduction <add>, %16, %cst_17 [0] : vector<4x512xf32> to vector<512xf32>
      %20 = vector.shape_cast %19 : vector<512xf32> to vector<1x512xf32>
      %cst_18 = arith.constant 4.000000e+00 : f32
      %21 = vector.broadcast %cst_18 : f32 to vector<1x512xf32>
      %22 = arith.divf %20, %21 : vector<1x512xf32>
      %23 = vector.broadcast %22 : vector<1x512xf32> to vector<4x512xf32>
      %24 = arith.subf %16, %23 : vector<4x512xf32>
      %25 = arith.mulf %24, %24 : vector<4x512xf32>
      %cst_19 = arith.constant dense<0.000000e+00> : vector<512xf32>
      %26 = vector.multi_reduction <add>, %25, %cst_19 [0] : vector<4x512xf32> to vector<512xf32>
      %27 = vector.shape_cast %26 : vector<512xf32> to vector<1x512xf32>
      %cst_20 = arith.constant 4.000000e+00 : f32
      %28 = vector.broadcast %cst_20 : f32 to vector<1x512xf32>
      %29 = arith.divf %27, %28 : vector<1x512xf32>
      %30 = vector.broadcast %22 : vector<1x512xf32> to vector<4x512xf32>
      %31 = arith.subf %16, %30 : vector<4x512xf32>
      %cst_21 = arith.constant 9.99999974E-6 : f32
      %32 = vector.broadcast %cst_21 : f32 to vector<1x512xf32>
      %33 = arith.addf %29, %32 : vector<1x512xf32>
      %34 = math.rsqrt %33 : vector<1x512xf32>
      %35 = vector.broadcast %34 : vector<1x512xf32> to vector<4x512xf32>
      %36 = arith.mulf %31, %35 : vector<4x512xf32>
      %37 = vector.broadcast %17 : vector<1x512xf32> to vector<4x512xf32>
      %38 = arith.mulf %36, %37 : vector<4x512xf32>
      %39 = vector.broadcast %18 : vector<1x512xf32> to vector<4x512xf32>
      %40 = arith.addf %38, %39 : vector<4x512xf32>
      %cst_22 = arith.constant 0.000000e+00 : f32
      %41 = vector.broadcast %cst_22 : f32 to vector<4x512xf32>
      %42 = arith.maximumf %40, %41 : vector<4x512xf32>
      %c0_23 = arith.constant 0 : index
      %c0_24 = arith.constant 0 : index
      %43 = vector.load %arg7[%c0_23, %c0_24] : memref<4x512xf32, #tpu.memory_space<vmem>>, vector<4x512xf32>
      tpu.vector_store %arg7[%c0_23, %c0_24], %42 {strides = array<i32>} : memref<4x512xf32, #tpu.memory_space<vmem>>, vector<4x512xf32>,
    } else {
    }
    return
  }
  func.func @transform_0(%arg0: i32, %arg1: i32) -> (i32, i32) {
    %c0_i32 = arith.constant 0 : i32
    %c0_i32_0 = arith.constant 0 : i32
    return %c0_i32, %arg1 : i32, i32
  }
  func.func @transform_1(%arg0: i32, %arg1: i32) -> (i32, i32) {
    %c0_i32 = arith.constant 0 : i32
    return %arg1, %arg0 : i32, i32
  }
  func.func @transform_2(%arg0: i32, %arg1: i32) -> (i32, i32) {
    %c0_i32 = arith.constant 0 : i32
    %c0_i32_0 = arith.constant 0 : i32
    return %c0_i32, %arg0 : i32, i32
  }
  func.func @transform_3(%arg0: i32, %arg1: i32) -> (i32, i32) {
    %c0_i32 = arith.constant 0 : i32
    %c0_i32_0 = arith.constant 0 : i32
    return %c0_i32, %arg0 : i32, i32
  }
  func.func @transform_4(%arg0: i32, %arg1: i32) -> (i32, i32) {
    %c0_i32 = arith.constant 0 : i32
    %c0_i32_0 = arith.constant 0 : i32
    return %c0_i32, %arg0 : i32, i32
  }
  func.func @transform_5(%arg0: i32, %arg1: i32) -> (i32, i32) {
    %c0_i32 = arith.constant 0 : i32
    %c0_i32_0 = arith.constant 0 : i32
    return %c0_i32, %arg0 : i32, i32
  }
}

</mosaic_0001>

<bundles_post_ra>
// kernel: reconstructor_forward.3
= control target key start
LH: loop header
LB: loop body
LE: loop exit
PB: predicated region body
PF: predicated region fallthrough
CT: control target
= control target key end

     0   :  { %16 = vsyncpa [#allocation3], 0  ;;  %s2614_s0 = inlined_call_operand.vmem [shape: f32[4,1024], index: 0, kind: input, shape index: {}]   ;;  %s2615_s1 = inlined_call_operand.hbm [shape: f32[1024,512], index: 1, kind: input, shape index: {}]   ;;  %s2616_s2 = inlined_call_operand.hbm [shape: f32[1,512], index: 2, kind: input, shape index: {}]   ;;  %s2617_s3 = inlined_call_operand.hbm [shape: f32[1,512], index: 3, kind: input, shape index: {}]   ;;  %s2618_s4 = inlined_call_operand.hbm [shape: f32[1,512], index: 4, kind: input, shape index: {}]   ;;  %s2619_s5 = inlined_call_operand.hbm [shape: f32[512,256], index: 5, kind: input, shape index: {}]   ;;  %s2620_s6 = inlined_call_operand.hbm [shape: f32[1,256], index: 6, kind: input, shape index: {}]   ;;  %s2621_s7 = inlined_call_operand.hbm [shape: f32[1,256], index: 7, kind: input, shape index: {}]   ;;  %s2622_s8 = inlined_call_operand.hbm [shape: f32[1,256], index: 8, kind: input, shape index: {}]   ;;  %s2623_s9 = inlined_call_operand.hbm [shape: f32[256,128], index: 9, kind: input, shape index: {}]   ;;  %s2624_s10 = inlined_call_operand.hbm [shape: f32[1,128], index: 10, kind: input, shape index: {}]   ;;  %s2625_s11 = inlined_call_operand.hbm [shape: f32[4,128], index: 11, kind: output, shape index: {}]  }
   0x1   :  { %17 = vsyncpa [#allocation6], 0 }
   0x2   :  { %18 = vsyncpa [#allocation9], 0 }
   0x3   :  { %19 = vsyncpa [#allocation12], 0 }
   0x4   :  { %20 = vsyncpa [#allocation15], 0 }
   0x5   :  { %21 = vsyncpa [#allocation18], 0  ;;  %s43_s19 = sshll.u32 %s2616_s2, 4  ;;  %s44_s19 = int_to_ptr.hbm [resolvable:$true] %s43_s19 }
   0x6   :  { %22 = vsyncpa [#allocation4], 0  ;;  %s2325_s20 = smov [#allocation5]   ;;  %s65_s24 = sshll.u32 %s2618_s4, 4  ;;  %s66_s24 = int_to_ptr.hbm [resolvable:$true] %s65_s24 }
   0x7   :  { %s45_s21 = sshll.u32 %s2325_s20, 4  ;;  %s2326_s25 = smov [#allocation8]   ;;  %s46_s21 = int_to_ptr.vmem [resolvable:$true] %s45_s21 }
   0x8   :  { %48 = dma.hbm_to_vmem [thread:$0]  %s44_s19, 64, %s46_s21, [#allocation6]  }
   0x9   :  { %s67_s26 = sshll.u32 %s2326_s25, 4  ;;  %s89_s29 = sshll.u32 %s2620_s6, 4  ;;  %s68_s26 = int_to_ptr.vmem [resolvable:$true] %s67_s26  ;;  %s90_s29 = int_to_ptr.hbm [resolvable:$true] %s89_s29 }
   0xa   :  { %70 = dma.hbm_to_vmem [thread:$0]  %s66_s24, 64, %s68_s26, [#allocation9]  }
   0xb   :  { %s111_s12 = sshll.u32 %s2622_s8, 4  ;;  %s2327_s13 = smov [#allocation11]   ;;  %s112_s12 = int_to_ptr.hbm [resolvable:$true] %s111_s12 }
   0xc   :  { %s91_s14 = sshll.u32 %s2327_s13, 4  ;;  %s2328_s4 = smov [#allocation14]   ;;  %s92_s14 = int_to_ptr.vmem [resolvable:$true] %s91_s14 }
   0xd   :  { %94 = dma.hbm_to_vmem [thread:$0]  %s90_s29, 32, %s92_s14, [#allocation12]  }
   0xe   :  { %s113_s15 = sshll.u32 %s2328_s4, 4  ;;  %s29_s18 = sshll.u32 %s2615_s1, 4  ;;  %s114_s15 = int_to_ptr.vmem [resolvable:$true] %s113_s15  ;;  %s30_s18 = int_to_ptr.hbm [resolvable:$true] %s29_s18 }
   0xf   :  { %116 = dma.hbm_to_vmem [thread:$0]  %s112_s12, 32, %s114_s15, [#allocation15]  }
  0x10   :  { %s2329_s6 = smov [#allocation2]   ;;  %s54_s8 = sshll.u32 %s2617_s3, 4  ;;  %s55_s8 = int_to_ptr.hbm [resolvable:$true] %s54_s8 }
  0x11   :  { %s31_s19 = sshll.u32 %s2329_s6, 4  ;;  %s2330_s22 = smov 512   ;;  %s32_s19 = int_to_ptr.vmem [resolvable:$true] %s31_s19 }
  0x12   :  { %s2331_s23 = smov 32   ;;  %s2332_s24 = smov [#allocation7]  }
  0x13   :  { %37 = dma.hbm_to_vmem [thread:$0]  %s30_s18, 65536, %s32_s19, [#allocation3], %s2330_s22, %s2330_s22, %s2331_s23  }
  0x14   :  { %s56_s25 = sshll.u32 %s2332_s24, 4  ;;  %s75_s1 = sshll.u32 %s2619_s5, 4  ;;  %s57_s25 = int_to_ptr.vmem [resolvable:$true] %s56_s25  ;;  %s76_s1 = int_to_ptr.hbm [resolvable:$true] %s75_s1 }
  0x15   :  { %59 = dma.hbm_to_vmem [thread:$0]  %s55_s8, 64, %s57_s25, [#allocation6]  }
  0x16   :  { %s2333_s28 = smov [#allocation10]   ;;  %s100_s3 = sshll.u32 %s2621_s7, 4  ;;  %s101_s3 = int_to_ptr.hbm [resolvable:$true] %s100_s3 }
  0x17   :  { %s77_s29 = sshll.u32 %s2333_s28, 4  ;;  %s2334_s12 = smov 256   ;;  %s78_s29 = int_to_ptr.vmem [resolvable:$true] %s77_s29 }
  0x18   :  { %s2335_s13 = smov 16   ;;  %s2336_s14 = smov [#allocation13]  }
  0x19   :  { %83 = dma.hbm_to_vmem [thread:$0]  %s76_s1, 16384, %s78_s29, [#allocation9], %s2334_s12, %s2334_s12, %s2335_s13  }
  0x1a   :  { %s102_s4 = sshll.u32 %s2336_s14, 4  ;;  %s121_s5 = sshll.u32 %s2623_s9, 4  ;;  %s103_s4 = int_to_ptr.vmem [resolvable:$true] %s102_s4  ;;  %s122_s5 = int_to_ptr.hbm [resolvable:$true] %s121_s5 }
  0x1b   :  { %105 = dma.hbm_to_vmem [thread:$0]  %s101_s3, 32, %s103_s4, [#allocation12]  }
  0x1c   :  { %s2337_s17 = smov [#allocation16]   ;;  %s135_s7 = sshll.u32 %s2624_s10, 4  ;;  %s136_s7 = int_to_ptr.hbm [resolvable:$true] %s135_s7 }
  0x1d   :  { %s123_s18 = sshll.u32 %s2337_s17, 4  ;;  %s2338_s20 = smov 128   ;;  %s124_s18 = int_to_ptr.vmem [resolvable:$true] %s123_s18 }
  0x1e   :  { %s2339_s21 = smov 8   ;;  %s2340_s8 = smov [#allocation17]  }
  0x1f   :  { %129 = dma.hbm_to_vmem [thread:$0]  %s122_s5, 4096, %s124_s18, [#allocation15], %s2338_s20, %s2338_s20, %s2339_s21  }
  0x20   :  { %s137_s22 = sshll.u32 %s2340_s8, 4  ;;  %s138_s22 = int_to_ptr.vmem [resolvable:$true] %s137_s22 }
  0x21   :  { %140 = dma.hbm_to_vmem [thread:$0]  %s136_s7, 16, %s138_s22, [#allocation18]  }
  0x22   :  { %2311 = dma.done.wait [#allocation3], 65536  }
  0x23   :  { %2312 = vsyncadd [#allocation3], 4294901760 }
  0x24   :  { %2313 = dma.done.wait [#allocation6], 128  }
  0x25   :  { %2314 = vsyncadd [#allocation6], 4294967168 }
  0x26   :  { %2315 = dma.done.wait [#allocation9], 16448  }
  0x27   :  { %2316 = vsyncadd [#allocation9], 4294950848 }
  0x28   :  { %2317 = dma.done.wait [#allocation12], 64  }
  0x29   :  { %2318 = vsyncadd [#allocation12], 4294967232 }
  0x2a   :  { %2319 = dma.done.wait [#allocation15], 4128  }
  0x2b   :  { %2320 = vsyncadd [#allocation15], 4294963168 }
  0x2c   :  { %2321 = dma.done.wait [#allocation18], 16  }
  0x2d   :  { %2322 = vsyncadd [#allocation18], 4294967280  ;;  %v245_v0 = vld [vmem:[#allocation2 + $0x1e0] sm:$0xff]  ;;  %vm1376_vm0 = vcmask 1043456   ;;  %s1990_s30 = sshll.u32 %s2625_s11, 4  ;;  %s1991_s30 = int_to_ptr.hbm [resolvable:$true] %s1990_s30 }
  0x2e   :  { %v373_v1 = vld [vmem:[#allocation2 + $0x5e0] sm:$0xff]  ;;  %734 = vmatpush.msra.mxu0 %v245_v0 }
  0x2f   :  { %v241_v2 = vld [vmem:[#allocation2 + $0x1c0] sm:$0xff]  ;;  %774 = vmatpush.msra.mxu2 %v373_v1 }
  0x30   :  { %v369_v3 = vld [vmem:[#allocation2 + $0x5c0] sm:$0xff]  ;;  %735 = vmatpush.msra.mxu0 %v241_v2 }
  0x31   :  { %v437_v4 = vld [vmem:[#allocation2 + $0x7e0] sm:$0xff]  ;;  %775 = vmatpush.msra.mxu2 %v369_v3 }
  0x32   :  { %v237_v5 = vld [vmem:[#allocation2 + $0x1a0] sm:$0xff]  ;;  %794 = vmatpush.msra.mxu3 %v437_v4 }
  0x33   :  { %v309_v6 = vld [vmem:[#allocation2 + $0x3e0] sm:$0xff]  ;;  %736 = vmatpush.msra.mxu0 %v237_v5 }
  0x34   :  { %v365_v7 = vld [vmem:[#allocation2 + $0x5a0] sm:$0xff]  ;;  %754 = vmatpush.msra.mxu1 %v309_v6 }
  0x35   :  { %v433_v8 = vld [vmem:[#allocation2 + $0x7c0] sm:$0xff]  ;;  %776 = vmatpush.msra.mxu2 %v365_v7 }
  0x36   :  { %v305_v9 = vld [vmem:[#allocation2 + $0x3c0] sm:$0xff]  ;;  %795 = vmatpush.msra.mxu3 %v433_v8 }
  0x37   :  { %v233_v10 = vld [vmem:[#allocation2 + $0x180] sm:$0xff]  ;;  %755 = vmatpush.msra.mxu1 %v305_v9 }
  0x38   :  { %v361_v11 = vld [vmem:[#allocation2 + $0x580] sm:$0xff]  ;;  %737 = vmatpush.msra.mxu0 %v233_v10 }
  0x39   :  { %v429_v12 = vld [vmem:[#allocation2 + $0x7a0] sm:$0xff]  ;;  %777 = vmatpush.msra.mxu2 %v361_v11 }
  0x3a   :  { %v301_v13 = vld [vmem:[#allocation2 + $0x3a0] sm:$0xff]  ;;  %796 = vmatpush.msra.mxu3 %v429_v12 }
  0x3b   :  { %v425_v14 = vld [vmem:[#allocation2 + $0x780] sm:$0xff]  ;;  %756 = vmatpush.msra.mxu1 %v301_v13 }
  0x3c   :  { %v229_v15 = vld [vmem:[#allocation2 + $0x160] sm:$0xff]  ;;  %797 = vmatpush.msra.mxu3 %v425_v14 }
  0x3d   :  { %v357_v16 = vld [vmem:[#allocation2 + $0x560] sm:$0xff]  ;;  %738 = vmatpush.msra.mxu0 %v229_v15 }
  0x3e   :  { %v297_v17 = vld [vmem:[#allocation2 + $0x380] sm:$0xff]  ;;  %778 = vmatpush.msra.mxu2 %v357_v16 }
  0x3f   :  { %v421_v18 = vld [vmem:[#allocation2 + $0x760] sm:$0xff]  ;;  %757 = vmatpush.msra.mxu1 %v297_v17 }
  0x40   :  { %v225_v19 = vld [vmem:[#allocation2 + $0x140] sm:$0xff]  ;;  %798 = vmatpush.msra.mxu3 %v421_v18  ;;  %v181_v18 = vld [vmem:[%s2614_s0] sm:$0xff] }
  0x41   :  { %v353_v20 = vld [vmem:[#allocation2 + $0x540] sm:$0xff]  ;;  %739 = vmatpush.msra.mxu0 %v225_v19  ;;  %711 = vst [vmem:[#allocation1] ss:$2 sm:$0xff] %v181_v18  ;;  %v366_v18 = vld [vmem:[#allocation2 + $0x5a8] sm:$0xff] }
  0x42   :  { %v293_v21 = vld [vmem:[#allocation2 + $0x360] sm:$0xff]  ;;  %779 = vmatpush.msra.mxu2 %v353_v20 }
  0x43   :  { %v417_v22 = vld [vmem:[#allocation2 + $0x740] sm:$0xff]  ;;  %758 = vmatpush.msra.mxu1 %v293_v21 }
  0x44   :  { %v221_v23 = vld [vmem:[#allocation2 + $0x120] sm:$0xff]  ;;  %799 = vmatpush.msra.mxu3 %v417_v22 }
  0x45   :  { %v349_v24 = vld [vmem:[#allocation2 + $0x520] sm:$0xff]  ;;  %740 = vmatpush.msra.mxu0 %v221_v23 }
  0x46   :  { %v289_v25 = vld [vmem:[#allocation2 + $0x340] sm:$0xff]  ;;  %780 = vmatpush.msra.mxu2 %v349_v24 }
  0x47   :  { %v413_v26 = vld [vmem:[#allocation2 + $0x720] sm:$0xff]  ;;  %759 = vmatpush.msra.mxu1 %v289_v25 }
  0x48   :  { %v217_v27 = vld [vmem:[#allocation2 + $0x100] sm:$0xff]  ;;  %800 = vmatpush.msra.mxu3 %v413_v26 }
  0x49   :  { %v345_v28 = vld [vmem:[#allocation2 + $0x500] sm:$0xff]  ;;  %741 = vmatpush.msra.mxu0 %v217_v27  ;;  %v184_v27 = vld [vmem:[%s2614_s0 + $0x18] sm:$0xff] }
  0x4a   :  { %v285_v29 = vld [vmem:[#allocation2 + $0x320] sm:$0xff]  ;;  %781 = vmatpush.msra.mxu2 %v345_v28  ;;  %717 = vst [vmem:[#allocation1 + $0x30] ss:$2 sm:$0xff] %v184_v27  ;;  %v302_v27 = vld [vmem:[#allocation2 + $0x3a8] sm:$0xff] }
  0x4b   :  { %v409_v30 = vld [vmem:[#allocation2 + $0x700] sm:$0xff]  ;;  %760 = vmatpush.msra.mxu1 %v285_v29 }
  0x4c   :  { %v213_v31 = vld [vmem:[#allocation2 + $0xe0] sm:$0xff]  ;;  %801 = vmatpush.msra.mxu3 %v409_v30 }
  0x4d   :  { %v341_v32 = vld [vmem:[#allocation2 + $0x4e0] sm:$0xff]  ;;  %742 = vmatpush.msra.mxu0 %v213_v31 }
  0x4e   :  { %v281_v33 = vld [vmem:[#allocation2 + $0x300] sm:$0xff]  ;;  %782 = vmatpush.msra.mxu2 %v341_v32 }
  0x4f   :  { %v405_v34 = vld [vmem:[#allocation2 + $0x6e0] sm:$0xff]  ;;  %761 = vmatpush.msra.mxu1 %v281_v33 }
  0x50   :  { %v209_v35 = vld [vmem:[#allocation2 + $0xc0] sm:$0xff]  ;;  %802 = vmatpush.msra.mxu3 %v405_v34  ;;  %v183_v34 = vld [vmem:[%s2614_s0 + $0x10] sm:$0xff] }
  0x51   :  { %v337_v36 = vld [vmem:[#allocation2 + $0x4c0] sm:$0xff]  ;;  %743 = vmatpush.msra.mxu0 %v209_v35  ;;  %715 = vst [vmem:[#allocation1 + $0x20] ss:$2 sm:$0xff] %v183_v34  ;;  %v350_v34 = vld [vmem:[#allocation2 + $0x528] sm:$0xff] }
  0x52   :  { %v277_v37 = vld [vmem:[#allocation2 + $0x2e0] sm:$0xff]  ;;  %783 = vmatpush.msra.mxu2 %v337_v36 }
  0x53   :  { %v401_v38 = vld [vmem:[#allocation2 + $0x6c0] sm:$0xff]  ;;  %762 = vmatpush.msra.mxu1 %v277_v37 }
  0x54   :  { %v205_v39 = vld [vmem:[#allocation2 + $0xa0] sm:$0xff]  ;;  %803 = vmatpush.msra.mxu3 %v401_v38 }
  0x55   :  { %v333_v40 = vld [vmem:[#allocation2 + $0x4a0] sm:$0xff]  ;;  %744 = vmatpush.msra.mxu0 %v205_v39 }
  0x56   :  { %v273_v41 = vld [vmem:[#allocation2 + $0x2c0] sm:$0xff]  ;;  %784 = vmatpush.msra.mxu2 %v333_v40 }
  0x57   :  { %v397_v42 = vld [vmem:[#allocation2 + $0x6a0] sm:$0xff]  ;;  %763 = vmatpush.msra.mxu1 %v273_v41 }
  0x58   :  { %v201_v43 = vld [vmem:[#allocation2 + $0x80] sm:$0xff]  ;;  %804 = vmatpush.msra.mxu3 %v397_v42 }
  0x59   :  { %v329_v44 = vld [vmem:[#allocation2 + $0x480] sm:$0xff]  ;;  %745 = vmatpush.msra.mxu0 %v201_v43 }
  0x5a   :  { %v269_v45 = vld [vmem:[#allocation2 + $0x2a0] sm:$0xff]  ;;  %785 = vmatpush.msra.mxu2 %v329_v44 }
  0x5b   :  { %v393_v46 = vld [vmem:[#allocation2 + $0x680] sm:$0xff]  ;;  %764 = vmatpush.msra.mxu1 %v269_v45 }
  0x5c   :  { %v197_v47 = vld [vmem:[#allocation2 + $0x60] sm:$0xff]  ;;  %805 = vmatpush.msra.mxu3 %v393_v46 }
  0x5d   :  { %v325_v48 = vld [vmem:[#allocation2 + $0x460] sm:$0xff]  ;;  %746 = vmatpush.msra.mxu0 %v197_v47 }
  0x5e   :  { %v265_v49 = vld [vmem:[#allocation2 + $0x280] sm:$0xff]  ;;  %786 = vmatpush.msra.mxu2 %v325_v48 }
  0x5f   :  { %v389_v50 = vld [vmem:[#allocation2 + $0x660] sm:$0xff]  ;;  %765 = vmatpush.msra.mxu1 %v265_v49 }
  0x60   :  { %v193_v51 = vld [vmem:[#allocation2 + $0x40] sm:$0xff]  ;;  %806 = vmatpush.msra.mxu3 %v389_v50 }
  0x61   :  { %v321_v52 = vld [vmem:[#allocation2 + $0x440] sm:$0xff]  ;;  %747 = vmatpush.msra.mxu0 %v193_v51 }
  0x62   :  { %v261_v53 = vld [vmem:[#allocation2 + $0x260] sm:$0xff]  ;;  %787 = vmatpush.msra.mxu2 %v321_v52 }
  0x63   :  { %v385_v54 = vld [vmem:[#allocation2 + $0x640] sm:$0xff]  ;;  %766 = vmatpush.msra.mxu1 %v261_v53 }
  0x64   :  { %v189_v55 = vld [vmem:[#allocation2 + $0x20] sm:$0xff]  ;;  %807 = vmatpush.msra.mxu3 %v385_v54  ;;  %v2447_v54 = vld.sshfl [vmem:[#allocation1] sm:$0xff pattern:$0x75316420] }
  0x65   :  { %v317_v56 = vld [vmem:[#allocation2 + $0x420] sm:$0xff]  ;;  %748 = vmatpush.msra.mxu0 %v189_v55 }
  0x66   :  { %v257_v57 = vld [vmem:[#allocation2 + $0x240] sm:$0xff]  ;;  %788 = vmatpush.msra.mxu2 %v317_v56 }
  0x67   :  { %v381_v58 = vld [vmem:[#allocation2 + $0x620] sm:$0xff]  ;;  %767 = vmatpush.msra.mxu1 %v257_v57 }
  0x68   :  { %v185_v59 = vld [vmem:[#allocation2] sm:$0xff]  ;;  %808 = vmatpush.msra.mxu3 %v381_v58 }
  0x69   :  { %v313_v60 = vld [vmem:[#allocation2 + $0x400] sm:$0xff]  ;;  %749 = vmatpush.msra.mxu0 %v185_v59 }
  0x6a   :  { %v501_v61 = vld [vmem:[#allocation2 + $0x9e0] sm:$0xff]  ;;  %789 = vmatpush.msra.mxu2 %v313_v60  ;;  %750 = vmatmul.f32.vlgmr.msra.gmra.mxu0 %v2447_v54 }
  0x6b   :  { %v629_v62 = vld [vmem:[#allocation2 + $0xde0] sm:$0xff]  ;;  %814 = vmatpush.msrb.mxu0 %v501_v61 }
  0x6c   :  { %v253_v63 = vld [vmem:[#allocation2 + $0x220] sm:$0xff]  ;;  %854 = vmatpush.msrb.mxu2 %v629_v62 }
  0x6d   :  { %v377_v0 = vld [vmem:[#allocation2 + $0x600] sm:$0xff]  ;;  %768 = vmatpush.msra.mxu1 %v253_v63 }
  0x6e   :  { %v497_v1 = vld [vmem:[#allocation2 + $0x9c0] sm:$0xff]  ;;  %809 = vmatpush.msra.mxu3 %v377_v0 }
  0x6f   :  { %v625_v2 = vld [vmem:[#allocation2 + $0xdc0] sm:$0xff]  ;;  %815 = vmatpush.msrb.mxu0 %v497_v1 }
  0x70   :  { %v693_v3 = vld [vmem:[#allocation2 + $0xfe0] sm:$0xff]  ;;  %855 = vmatpush.msrb.mxu2 %v625_v2 }
  0x71   :  { %v249_v4 = vld [vmem:[#allocation2 + $0x200] sm:$0xff]  ;;  %874 = vmatpush.msrb.mxu3 %v693_v3 }
  0x72   :  { %v493_v5 = vld [vmem:[#allocation2 + $0x9a0] sm:$0xff]  ;;  %769 = vmatpush.msra.mxu1 %v249_v4 }
  0x73   :  { %v565_v6 = vld [vmem:[#allocation2 + $0xbe0] sm:$0xff]  ;;  %816 = vmatpush.msrb.mxu0 %v493_v5  ;;  %v2457_v5 = vld.sshfl [vmem:[#allocation1 + $0x30] sm:$0xff pattern:$0x75316420] }
  0x74   :  { %v621_v7 = vld [vmem:[#allocation2 + $0xda0] sm:$0xff]  ;;  %834 = vmatpush.msrb.mxu1 %v565_v6  ;;  %v246_v6 = vld [vmem:[#allocation2 + $0x1e8] sm:$0xff] }
  0x75   :  { %v689_v8 = vld [vmem:[#allocation2 + $0xfc0] sm:$0xff]  ;;  %856 = vmatpush.msrb.mxu2 %v621_v7  ;;  %v374_v7 = vld [vmem:[#allocation2 + $0x5e8] sm:$0xff] }
  0x76   :  { %v489_v9 = vld [vmem:[#allocation2 + $0x980] sm:$0xff]  ;;  %875 = vmatpush.msrb.mxu3 %v689_v8 }
  0x77   :  { %v561_v10 = vld [vmem:[#allocation2 + $0xbc0] sm:$0xff]  ;;  %817 = vmatpush.msrb.mxu0 %v489_v9 }
  0x78   :  { %v617_v11 = vld [vmem:[#allocation2 + $0xd80] sm:$0xff]  ;;  %835 = vmatpush.msrb.mxu1 %v561_v10  ;;  %v2459_v10 = vld.sshfl [vmem:[#allocation1 + $0x20] sm:$0xff pattern:$0x75316420] }
  0x79   :  { %v685_v12 = vld [vmem:[#allocation2 + $0xfa0] sm:$0xff]  ;;  %857 = vmatpush.msrb.mxu2 %v617_v11  ;;  %v2462_v11 = vld.sshfl [vmem:[#allocation1 + $0x38] sm:$0xff pattern:$0x75316420] }
  0x7a   :  { %v182_v13 = vld [vmem:[%s2614_s0 + $0x8] sm:$0xff]  ;;  %876 = vmatpush.msrb.mxu3 %v685_v12  ;;  %v242_v12 = vld [vmem:[#allocation2 + $0x1c8] sm:$0xff]  ;;  %s2342_s0 = smov [#allocation19]  }
  0x7b   :  { %v485_v14 = vld [vmem:[#allocation2 + $0x960] sm:$0xff]  ;;  %713 = vst [vmem:[#allocation1 + $0x10] ss:$2 sm:$0xff] %v182_v13  ;;  %v370_v13 = vld [vmem:[#allocation2 + $0x5c8] sm:$0xff]  ;;  %s1988_s28 = sshll.u32 %s2342_s0, 4  ;;  %s1989_s28 = int_to_ptr.vmem [resolvable:$true] %s1988_s28 }
  0x7c   :  { %v557_v15 = vld [vmem:[#allocation2 + $0xba0] sm:$0xff]  ;;  %818 = vmatpush.msrb.mxu0 %v485_v14  ;;  %v438_v14 = vld [vmem:[#allocation2 + $0x7e8] sm:$0xff] }
  0x7d   :  { %v613_v16 = vld [vmem:[#allocation2 + $0xd60] sm:$0xff]  ;;  %836 = vmatpush.msrb.mxu1 %v557_v15 }
  0x7e   :  { %v681_v17 = vld [vmem:[#allocation2 + $0xf80] sm:$0xff]  ;;  %858 = vmatpush.msrb.mxu2 %v613_v16  ;;  %v238_v16 = vld [vmem:[#allocation2 + $0x1a8] sm:$0xff] }
  0x7f   :  { %v481_v19 = vld [vmem:[#allocation2 + $0x940] sm:$0xff]  ;;  %877 = vmatpush.msrb.mxu3 %v681_v17 }
  0x80   :  { %v553_v20 = vld [vmem:[#allocation2 + $0xb80] sm:$0xff]  ;;  %819 = vmatpush.msrb.mxu0 %v481_v19  ;;  %v310_v19 = vld [vmem:[#allocation2 + $0x3e8] sm:$0xff] }
  0x81   :  { %v609_v21 = vld [vmem:[#allocation2 + $0xd40] sm:$0xff]  ;;  %837 = vmatpush.msrb.mxu1 %v553_v20  ;;  %v434_v20 = vld [vmem:[#allocation2 + $0x7c8] sm:$0xff] }
  0x82   :  { %v677_v22 = vld [vmem:[#allocation2 + $0xf60] sm:$0xff]  ;;  %859 = vmatpush.msrb.mxu2 %v609_v21  ;;  %v2445_v49 = vld.sshfl [vmem:[#allocation1 + $0x10] sm:$0xff pattern:$0x75316420] }
  0x83   :  { %v477_v23 = vld [vmem:[#allocation2 + $0x920] sm:$0xff]  ;;  %878 = vmatpush.msrb.mxu3 %v677_v22  ;;  %790 = vmatmul.f32.vlgmr.msra.gmra.mxu2 %v2445_v49  ;;  %v2450_v55 = vld.sshfl [vmem:[#allocation1 + $0x18] sm:$0xff pattern:$0x75316420]  ;;  %v234_v21 = vld [vmem:[#allocation2 + $0x188] sm:$0xff] }
  0x84   :  { %v549_v24 = vld [vmem:[#allocation2 + $0xb60] sm:$0xff]  ;;  %820 = vmatpush.msrb.mxu0 %v477_v23  ;;  %810 = vmatmul.f32.vlgmr.msra.gmra.mxu3 %v2450_v55  ;;  %v362_v22 = vld [vmem:[#allocation2 + $0x588] sm:$0xff] }
  0x85   :  { %v605_v25 = vld [vmem:[#allocation2 + $0xd20] sm:$0xff]  ;;  %838 = vmatpush.msrb.mxu1 %v549_v24  ;;  %v306_v23 = vld [vmem:[#allocation2 + $0x3c8] sm:$0xff] }
  0x86   :  { %v673_v26 = vld [vmem:[#allocation2 + $0xf40] sm:$0xff]  ;;  %860 = vmatpush.msrb.mxu2 %v605_v25  ;;  %v430_v24 = vld [vmem:[#allocation2 + $0x7a8] sm:$0xff] }
  0x87   :  { %v473_v28 = vld [vmem:[#allocation2 + $0x900] sm:$0xff]  ;;  %879 = vmatpush.msrb.mxu3 %v673_v26  ;;  %v230_v25 = vld [vmem:[#allocation2 + $0x168] sm:$0xff] }
  0x88   :  { %v545_v29 = vld [vmem:[#allocation2 + $0xb40] sm:$0xff]  ;;  %821 = vmatpush.msrb.mxu0 %v473_v28  ;;  %v358_v26 = vld [vmem:[#allocation2 + $0x568] sm:$0xff] }
  0x89   :  { %v601_v30 = vld [vmem:[#allocation2 + $0xd00] sm:$0xff]  ;;  %839 = vmatpush.msrb.mxu1 %v545_v29  ;;  %v426_v28 = vld [vmem:[#allocation2 + $0x788] sm:$0xff] }
  0x8a   :  { %v669_v31 = vld [vmem:[#allocation2 + $0xf20] sm:$0xff]  ;;  %861 = vmatpush.msrb.mxu2 %v601_v30  ;;  %v226_v29 = vld [vmem:[#allocation2 + $0x148] sm:$0xff] }
  0x8b   :  { %v469_v32 = vld [vmem:[#allocation2 + $0x8e0] sm:$0xff]  ;;  %880 = vmatpush.msrb.mxu3 %v669_v31  ;;  %v354_v30 = vld [vmem:[#allocation2 + $0x548] sm:$0xff] }
  0x8c   :  { %v541_v33 = vld [vmem:[#allocation2 + $0xb20] sm:$0xff]  ;;  %822 = vmatpush.msrb.mxu0 %v469_v32  ;;  %v298_v31 = vld [vmem:[#allocation2 + $0x388] sm:$0xff] }
  0x8d   :  { %v597_v35 = vld [vmem:[#allocation2 + $0xce0] sm:$0xff]  ;;  %840 = vmatpush.msrb.mxu1 %v541_v33  ;;  %v422_v32 = vld [vmem:[#allocation2 + $0x768] sm:$0xff] }
  0x8e   :  { %v665_v36 = vld [vmem:[#allocation2 + $0xf00] sm:$0xff]  ;;  %862 = vmatpush.msrb.mxu2 %v597_v35  ;;  %v222_v33 = vld [vmem:[#allocation2 + $0x128] sm:$0xff] }
  0x8f   :  { %v465_v37 = vld [vmem:[#allocation2 + $0x8c0] sm:$0xff]  ;;  %881 = vmatpush.msrb.mxu3 %v665_v36  ;;  %v294_v35 = vld [vmem:[#allocation2 + $0x368] sm:$0xff] }
  0x90   :  { %v537_v38 = vld [vmem:[#allocation2 + $0xb00] sm:$0xff]  ;;  %823 = vmatpush.msrb.mxu0 %v465_v37  ;;  %v418_v36 = vld [vmem:[#allocation2 + $0x748] sm:$0xff] }
  0x91   :  { %v593_v39 = vld [vmem:[#allocation2 + $0xcc0] sm:$0xff]  ;;  %841 = vmatpush.msrb.mxu1 %v537_v38  ;;  %v218_v37 = vld [vmem:[#allocation2 + $0x108] sm:$0xff] }
  0x92   :  { %v661_v40 = vld [vmem:[#allocation2 + $0xee0] sm:$0xff]  ;;  %863 = vmatpush.msrb.mxu2 %v593_v39  ;;  %v346_v38 = vld [vmem:[#allocation2 + $0x508] sm:$0xff] }
  0x93   :  { %v461_v41 = vld [vmem:[#allocation2 + $0x8a0] sm:$0xff]  ;;  %882 = vmatpush.msrb.mxu3 %v661_v40  ;;  %v290_v39 = vld [vmem:[#allocation2 + $0x348] sm:$0xff] }
  0x94   :  { %v533_v42 = vld [vmem:[#allocation2 + $0xae0] sm:$0xff]  ;;  %824 = vmatpush.msrb.mxu0 %v461_v41  ;;  %v414_v40 = vld [vmem:[#allocation2 + $0x728] sm:$0xff] }
  0x95   :  { %v589_v43 = vld [vmem:[#allocation2 + $0xca0] sm:$0xff]  ;;  %842 = vmatpush.msrb.mxu1 %v533_v42  ;;  %v214_v41 = vld [vmem:[#allocation2 + $0xe8] sm:$0xff] }
  0x96   :  { %v657_v44 = vld [vmem:[#allocation2 + $0xec0] sm:$0xff]  ;;  %864 = vmatpush.msrb.mxu2 %v589_v43  ;;  %v342_v42 = vld [vmem:[#allocation2 + $0x4e8] sm:$0xff] }
  0x97   :  { %v457_v45 = vld [vmem:[#allocation2 + $0x880] sm:$0xff]  ;;  %883 = vmatpush.msrb.mxu3 %v657_v44  ;;  %v286_v43 = vld [vmem:[#allocation2 + $0x328] sm:$0xff] }
  0x98   :  { %v529_v46 = vld [vmem:[#allocation2 + $0xac0] sm:$0xff]  ;;  %825 = vmatpush.msrb.mxu0 %v457_v45  ;;  %v410_v44 = vld [vmem:[#allocation2 + $0x708] sm:$0xff] }
  0x99   :  { %v585_v47 = vld [vmem:[#allocation2 + $0xc80] sm:$0xff]  ;;  %843 = vmatpush.msrb.mxu1 %v529_v46  ;;  %v210_v45 = vld [vmem:[#allocation2 + $0xc8] sm:$0xff] }
  0x9a   :  { %v653_v48 = vld [vmem:[#allocation2 + $0xea0] sm:$0xff]  ;;  %865 = vmatpush.msrb.mxu2 %v585_v47  ;;  %v338_v46 = vld [vmem:[#allocation2 + $0x4c8] sm:$0xff] }
  0x9b   :  { %v453_v50 = vld [vmem:[#allocation2 + $0x860] sm:$0xff]  ;;  %884 = vmatpush.msrb.mxu3 %v653_v48  ;;  %v282_v47 = vld [vmem:[#allocation2 + $0x308] sm:$0xff] }
  0x9c   :  { %v525_v51 = vld [vmem:[#allocation2 + $0xaa0] sm:$0xff]  ;;  %826 = vmatpush.msrb.mxu0 %v453_v50  ;;  %v406_v48 = vld [vmem:[#allocation2 + $0x6e8] sm:$0xff] }
  0x9d   :  { %v581_v52 = vld [vmem:[#allocation2 + $0xc60] sm:$0xff]  ;;  %844 = vmatpush.msrb.mxu1 %v525_v51  ;;  %v206_v50 = vld [vmem:[#allocation2 + $0xa8] sm:$0xff] }
  0x9e   :  { %v649_v53 = vld [vmem:[#allocation2 + $0xe80] sm:$0xff]  ;;  %866 = vmatpush.msrb.mxu2 %v581_v52  ;;  %v334_v51 = vld [vmem:[#allocation2 + $0x4a8] sm:$0xff] }
  0x9f   :  { %v449_v56 = vld [vmem:[#allocation2 + $0x840] sm:$0xff]  ;;  %885 = vmatpush.msrb.mxu3 %v649_v53  ;;  %v278_v52 = vld [vmem:[#allocation2 + $0x2e8] sm:$0xff] }
  0xa0   :  { %v521_v57 = vld [vmem:[#allocation2 + $0xa80] sm:$0xff]  ;;  %827 = vmatpush.msrb.mxu0 %v449_v56  ;;  %v402_v53 = vld [vmem:[#allocation2 + $0x6c8] sm:$0xff] }
  0xa1   :  { %v577_v58 = vld [vmem:[#allocation2 + $0xc40] sm:$0xff]  ;;  %845 = vmatpush.msrb.mxu1 %v521_v57  ;;  %v202_v56 = vld [vmem:[#allocation2 + $0x88] sm:$0xff] }
  0xa2   :  { %v645_v59 = vld [vmem:[#allocation2 + $0xe60] sm:$0xff]  ;;  %867 = vmatpush.msrb.mxu2 %v577_v58  ;;  %v330_v57 = vld [vmem:[#allocation2 + $0x488] sm:$0xff] }
  0xa3   :  { %v2453_v60 = vld.sshfl [vmem:[#allocation1 + $0x8] sm:$0xff pattern:$0x75316420]  ;;  %886 = vmatpush.msrb.mxu3 %v645_v59  ;;  %v274_v58 = vld [vmem:[#allocation2 + $0x2c8] sm:$0xff] }
  0xa4   :  { %v445_v61 = vld [vmem:[#allocation2 + $0x820] sm:$0xff]  ;;  %770 = vmatmul.f32.vlgmr.msra.gmra.mxu1 %v2453_v60  ;;  %v398_v59 = vld [vmem:[#allocation2 + $0x6a8] sm:$0xff] }
  0xa5   :  { %v517_v62 = vld [vmem:[#allocation2 + $0xa60] sm:$0xff]  ;;  %828 = vmatpush.msrb.mxu0 %v445_v61  ;;  %v198_v61 = vld [vmem:[#allocation2 + $0x68] sm:$0xff] }
  0xa6   :  { %v573_v63 = vld [vmem:[#allocation2 + $0xc20] sm:$0xff]  ;;  %846 = vmatpush.msrb.mxu1 %v517_v62  ;;  %v326_v62 = vld [vmem:[#allocation2 + $0x468] sm:$0xff] }
  0xa7   :  { %v641_v0 = vld [vmem:[#allocation2 + $0xe40] sm:$0xff]  ;;  %868 = vmatpush.msrb.mxu2 %v573_v63  ;;  %v270_v63 = vld [vmem:[#allocation2 + $0x2a8] sm:$0xff] }
  0xa8   :  { %v441_v1 = vld [vmem:[#allocation2 + $0x800] sm:$0xff]  ;;  %887 = vmatpush.msrb.mxu3 %v641_v0  ;;  %v394_v0 = vld [vmem:[#allocation2 + $0x688] sm:$0xff] }
  0xa9   :  { %v513_v2 = vld [vmem:[#allocation2 + $0xa40] sm:$0xff]  ;;  %829 = vmatpush.msrb.mxu0 %v441_v1  ;;  %v194_v1 = vld [vmem:[#allocation2 + $0x48] sm:$0xff] }
  0xaa   :  { %v569_v3 = vld [vmem:[#allocation2 + $0xc00] sm:$0xff]  ;;  %847 = vmatpush.msrb.mxu1 %v513_v2  ;;  %830 = vmatmul.f32.vlgmr.msrb.gmra.mxu0 %v2459_v10  ;;  %v322_v2 = vld [vmem:[#allocation2 + $0x448] sm:$0xff] }
  0xab   :  { %v637_v4 = vld [vmem:[#allocation2 + $0xe20] sm:$0xff]  ;;  %869 = vmatpush.msrb.mxu2 %v569_v3  ;;  %894 = vmatpush.msra.mxu0 %v246_v6  ;;  %v266_v3 = vld [vmem:[#allocation2 + $0x288] sm:$0xff] }
  0xac   :  { %v509_v8 = vld [vmem:[#allocation2 + $0xa20] sm:$0xff]  ;;  %888 = vmatpush.msrb.mxu3 %v637_v4  ;;  %870 = vmatmul.f32.vlgmr.msrb.gmra.mxu2 %v2457_v5  ;;  %v390_v4 = vld [vmem:[#allocation2 + $0x668] sm:$0xff] }
  0xad   :  { %v633_v9 = vld [vmem:[#allocation2 + $0xe00] sm:$0xff]  ;;  %934 = vmatpush.msra.mxu2 %v374_v7  ;;  %848 = vmatpush.msrb.mxu1 %v509_v8  ;;  %v190_v6 = vld [vmem:[#allocation2 + $0x28] sm:$0xff] }
  0xae   :  { %889 = vmatpush.msrb.mxu3 %v633_v9  ;;  %v505_v15 = vld [vmem:[#allocation2 + $0xa00] sm:$0xff]  ;;  %895 = vmatpush.msra.mxu0 %v242_v12  ;;  %v318_v7 = vld [vmem:[#allocation2 + $0x428] sm:$0xff] }
  0xaf   :  { %890 = vmatmul.f32.vlgmr.msrb.gmra.mxu3 %v2462_v11  ;;  %v2466_v17 = vld.sshfl [vmem:[#allocation1 + $0x28] sm:$0xff pattern:$0x75316420]  ;;  %935 = vmatpush.msra.mxu2 %v370_v13  ;;  %v262_v8 = vld [vmem:[#allocation2 + $0x268] sm:$0xff] }
  0xb0   :  { %954 = vmatpush.msra.mxu3 %v438_v14  ;;  %849 = vmatpush.msrb.mxu1 %v505_v15  ;;  %v386_v9 = vld [vmem:[#allocation2 + $0x648] sm:$0xff] }
  0xb1   :  { %896 = vmatpush.msra.mxu0 %v238_v16  ;;  %850 = vmatmul.f32.vlgmr.msrb.gmra.mxu1 %v2466_v17  ;;  %v186_v12 = vld [vmem:[#allocation2 + $0x8] sm:$0xff] }
  0xb2   :  { %936 = vmatpush.msra.mxu2 %v366_v18  ;;  %914 = vmatpush.msra.mxu1 %v310_v19  ;;  %v314_v13 = vld [vmem:[#allocation2 + $0x408] sm:$0xff] }
  0xb3   :  { %955 = vmatpush.msra.mxu3 %v434_v20  ;;  %897 = vmatpush.msra.mxu0 %v234_v21  ;;  %v258_v14 = vld [vmem:[#allocation2 + $0x248] sm:$0xff] }
  0xb4   :  { %937 = vmatpush.msra.mxu2 %v362_v22  ;;  %915 = vmatpush.msra.mxu1 %v306_v23  ;;  %v382_v15 = vld [vmem:[#allocation2 + $0x628] sm:$0xff] }
  0xb5   :  { %956 = vmatpush.msra.mxu3 %v430_v24  ;;  %898 = vmatpush.msra.mxu0 %v230_v25  ;;  %v502_v16 = vld [vmem:[#allocation2 + $0x9e8] sm:$0xff] }
  0xb6   :  { %938 = vmatpush.msra.mxu2 %v358_v26  ;;  %916 = vmatpush.msra.mxu1 %v302_v27  ;;  %v630_v18 = vld [vmem:[#allocation2 + $0xde8] sm:$0xff] }
  0xb7   :  { %957 = vmatpush.msra.mxu3 %v426_v28  ;;  %899 = vmatpush.msra.mxu0 %v226_v29  ;;  %v254_v19 = vld [vmem:[#allocation2 + $0x228] sm:$0xff] }
  0xb8   :  { %939 = vmatpush.msra.mxu2 %v354_v30  ;;  %917 = vmatpush.msra.mxu1 %v298_v31  ;;  %v378_v20 = vld [vmem:[#allocation2 + $0x608] sm:$0xff] }
  0xb9   :  { %958 = vmatpush.msra.mxu3 %v422_v32  ;;  %900 = vmatpush.msra.mxu0 %v222_v33  ;;  %v498_v21 = vld [vmem:[#allocation2 + $0x9c8] sm:$0xff] }
  0xba   :  { %940 = vmatpush.msra.mxu2 %v350_v34  ;;  %918 = vmatpush.msra.mxu1 %v294_v35  ;;  %v626_v22 = vld [vmem:[#allocation2 + $0xdc8] sm:$0xff] }
  0xbb   :  { %959 = vmatpush.msra.mxu3 %v418_v36  ;;  %901 = vmatpush.msra.mxu0 %v218_v37  ;;  %v694_v23 = vld [vmem:[#allocation2 + $0xfe8] sm:$0xff] }
  0xbc   :  { %941 = vmatpush.msra.mxu2 %v346_v38  ;;  %919 = vmatpush.msra.mxu1 %v290_v39  ;;  %v250_v24 = vld [vmem:[#allocation2 + $0x208] sm:$0xff] }
  0xbd   :  { %960 = vmatpush.msra.mxu3 %v414_v40  ;;  %902 = vmatpush.msra.mxu0 %v214_v41  ;;  %v494_v25 = vld [vmem:[#allocation2 + $0x9a8] sm:$0xff] }
  0xbe   :  { %942 = vmatpush.msra.mxu2 %v342_v42  ;;  %920 = vmatpush.msra.mxu1 %v286_v43  ;;  %v566_v26 = vld [vmem:[#allocation2 + $0xbe8] sm:$0xff] }
  0xbf   :  { %961 = vmatpush.msra.mxu3 %v410_v44  ;;  %903 = vmatpush.msra.mxu0 %v210_v45  ;;  %v622_v27 = vld [vmem:[#allocation2 + $0xda8] sm:$0xff] }
  0xc0   :  { %943 = vmatpush.msra.mxu2 %v338_v46  ;;  %921 = vmatpush.msra.mxu1 %v282_v47  ;;  %v690_v28 = vld [vmem:[#allocation2 + $0xfc8] sm:$0xff] }
  0xc1   :  { %962 = vmatpush.msra.mxu3 %v406_v48  ;;  %904 = vmatpush.msra.mxu0 %v206_v50  ;;  %v490_v29 = vld [vmem:[#allocation2 + $0x988] sm:$0xff] }
  0xc2   :  { %944 = vmatpush.msra.mxu2 %v334_v51  ;;  %922 = vmatpush.msra.mxu1 %v278_v52  ;;  %v562_v30 = vld [vmem:[#allocation2 + $0xbc8] sm:$0xff] }
  0xc3   :  { %963 = vmatpush.msra.mxu3 %v402_v53  ;;  %905 = vmatpush.msra.mxu0 %v202_v56  ;;  %v618_v31 = vld [vmem:[#allocation2 + $0xd88] sm:$0xff] }
  0xc4   :  { %945 = vmatpush.msra.mxu2 %v330_v57  ;;  %923 = vmatpush.msra.mxu1 %v274_v58  ;;  %v686_v32 = vld [vmem:[#allocation2 + $0xfa8] sm:$0xff] }
  0xc5   :  { %964 = vmatpush.msra.mxu3 %v398_v59  ;;  %906 = vmatpush.msra.mxu0 %v198_v61  ;;  %v486_v33 = vld [vmem:[#allocation2 + $0x968] sm:$0xff] }
  0xc6   :  { %946 = vmatpush.msra.mxu2 %v326_v62  ;;  %924 = vmatpush.msra.mxu1 %v270_v63  ;;  %v558_v34 = vld [vmem:[#allocation2 + $0xba8] sm:$0xff] }
  0xc7   :  { %965 = vmatpush.msra.mxu3 %v394_v0  ;;  %907 = vmatpush.msra.mxu0 %v194_v1  ;;  %v614_v35 = vld [vmem:[#allocation2 + $0xd68] sm:$0xff] }
  0xc8   :  { %947 = vmatpush.msra.mxu2 %v322_v2  ;;  %925 = vmatpush.msra.mxu1 %v266_v3  ;;  %v682_v36 = vld [vmem:[#allocation2 + $0xf88] sm:$0xff] }
  0xc9   :  { %966 = vmatpush.msra.mxu3 %v390_v4  ;;  %908 = vmatpush.msra.mxu0 %v190_v6  ;;  %v482_v37 = vld [vmem:[#allocation2 + $0x948] sm:$0xff] }
  0xca   :  { %948 = vmatpush.msra.mxu2 %v318_v7  ;;  %926 = vmatpush.msra.mxu1 %v262_v8  ;;  %v554_v38 = vld [vmem:[#allocation2 + $0xb88] sm:$0xff] }
  0xcb   :  { %967 = vmatpush.msra.mxu3 %v386_v9  ;;  %909 = vmatpush.msra.mxu0 %v186_v12  ;;  %v610_v39 = vld [vmem:[#allocation2 + $0xd48] sm:$0xff] }
  0xcc   :  { %949 = vmatpush.msra.mxu2 %v314_v13  ;;  %927 = vmatpush.msra.mxu1 %v258_v14  ;;  %v678_v40 = vld [vmem:[#allocation2 + $0xf68] sm:$0xff] }
  0xcd   :  { %968 = vmatpush.msra.mxu3 %v382_v15  ;;  %974 = vmatpush.msrb.mxu0 %v502_v16  ;;  %v478_v41 = vld [vmem:[#allocation2 + $0x928] sm:$0xff] }
  0xce   :  { %1014 = vmatpush.msrb.mxu2 %v630_v18  ;;  %928 = vmatpush.msra.mxu1 %v254_v19  ;;  %v550_v42 = vld [vmem:[#allocation2 + $0xb68] sm:$0xff] }
  0xcf   :  { %969 = vmatpush.msra.mxu3 %v378_v20  ;;  %975 = vmatpush.msrb.mxu0 %v498_v21  ;;  %v606_v43 = vld [vmem:[#allocation2 + $0xd28] sm:$0xff] }
  0xd0   :  { %1015 = vmatpush.msrb.mxu2 %v626_v22  ;;  %929 = vmatpush.msra.mxu1 %v250_v24  ;;  %v674_v44 = vld [vmem:[#allocation2 + $0xf48] sm:$0xff] }
  0xd1   :  { %1034 = vmatpush.msrb.mxu3 %v694_v23  ;;  %976 = vmatpush.msrb.mxu0 %v494_v25  ;;  %v474_v45 = vld [vmem:[#allocation2 + $0x908] sm:$0xff] }
  0xd2   :  { %994 = vmatpush.msrb.mxu1 %v566_v26  ;;  %1016 = vmatpush.msrb.mxu2 %v622_v27  ;;  %v546_v46 = vld [vmem:[#allocation2 + $0xb48] sm:$0xff]  ;;  %v371_v26 = vld [vmem:[#allocation2 + $0x5d0] sm:$0xff] }
  0xd3   :  { %1035 = vmatpush.msrb.mxu3 %v690_v28  ;;  %977 = vmatpush.msrb.mxu0 %v490_v29  ;;  %v602_v47 = vld [vmem:[#allocation2 + $0xd08] sm:$0xff]  ;;  %v439_v27 = vld [vmem:[#allocation2 + $0x7f0] sm:$0xff] }
  0xd4   :  { %995 = vmatpush.msrb.mxu1 %v562_v30  ;;  %1017 = vmatpush.msrb.mxu2 %v618_v31  ;;  %v670_v48 = vld [vmem:[#allocation2 + $0xf28] sm:$0xff]  ;;  %v239_v29 = vld [vmem:[#allocation2 + $0x1b0] sm:$0xff] }
  0xd5   :  { %1036 = vmatpush.msrb.mxu3 %v686_v32  ;;  %978 = vmatpush.msrb.mxu0 %v486_v33  ;;  %v470_v50 = vld [vmem:[#allocation2 + $0x8e8] sm:$0xff]  ;;  %v367_v30 = vld [vmem:[#allocation2 + $0x5b0] sm:$0xff] }
  0xd6   :  { %996 = vmatpush.msrb.mxu1 %v558_v34  ;;  %1018 = vmatpush.msrb.mxu2 %v614_v35  ;;  %v542_v51 = vld [vmem:[#allocation2 + $0xb28] sm:$0xff]  ;;  %v311_v31 = vld [vmem:[#allocation2 + $0x3f0] sm:$0xff] }
  0xd7   :  { %1037 = vmatpush.msrb.mxu3 %v682_v36  ;;  %979 = vmatpush.msrb.mxu0 %v482_v37  ;;  %v598_v52 = vld [vmem:[#allocation2 + $0xce8] sm:$0xff]  ;;  %v435_v32 = vld [vmem:[#allocation2 + $0x7d0] sm:$0xff] }
  0xd8   :  { %997 = vmatpush.msrb.mxu1 %v554_v38  ;;  %1019 = vmatpush.msrb.mxu2 %v610_v39  ;;  %v666_v53 = vld [vmem:[#allocation2 + $0xf08] sm:$0xff]  ;;  %v363_v33 = vld [vmem:[#allocation2 + $0x590] sm:$0xff] }
  0xd9   :  { %1038 = vmatpush.msrb.mxu3 %v678_v40  ;;  %980 = vmatpush.msrb.mxu0 %v478_v41  ;;  %v466_v56 = vld [vmem:[#allocation2 + $0x8c8] sm:$0xff]  ;;  %v307_v34 = vld [vmem:[#allocation2 + $0x3d0] sm:$0xff] }
  0xda   :  { %998 = vmatpush.msrb.mxu1 %v550_v42  ;;  %1020 = vmatpush.msrb.mxu2 %v606_v43  ;;  %v538_v57 = vld [vmem:[#allocation2 + $0xb08] sm:$0xff]  ;;  %v431_v35 = vld [vmem:[#allocation2 + $0x7b0] sm:$0xff] }
  0xdb   :  { %1039 = vmatpush.msrb.mxu3 %v674_v44  ;;  %981 = vmatpush.msrb.mxu0 %v474_v45  ;;  %v594_v58 = vld [vmem:[#allocation2 + $0xcc8] sm:$0xff]  ;;  %v359_v36 = vld [vmem:[#allocation2 + $0x570] sm:$0xff] }
  0xdc   :  { %999 = vmatpush.msrb.mxu1 %v546_v46  ;;  %1021 = vmatpush.msrb.mxu2 %v602_v47  ;;  %v662_v59 = vld [vmem:[#allocation2 + $0xee8] sm:$0xff]  ;;  %v427_v37 = vld [vmem:[#allocation2 + $0x790] sm:$0xff] }
  0xdd   :  { %1040 = vmatpush.msrb.mxu3 %v670_v48  ;;  %982 = vmatpush.msrb.mxu0 %v470_v50  ;;  %v462_v61 = vld [vmem:[#allocation2 + $0x8a8] sm:$0xff]  ;;  %v227_v38 = vld [vmem:[#allocation2 + $0x150] sm:$0xff] }
  0xde   :  { %1000 = vmatpush.msrb.mxu1 %v542_v51  ;;  %1022 = vmatpush.msrb.mxu2 %v598_v52  ;;  %v534_v62 = vld [vmem:[#allocation2 + $0xae8] sm:$0xff]  ;;  %v355_v39 = vld [vmem:[#allocation2 + $0x550] sm:$0xff] }
  0xdf   :  { %1041 = vmatpush.msrb.mxu3 %v666_v53  ;;  %983 = vmatpush.msrb.mxu0 %v466_v56  ;;  %v590_v63 = vld [vmem:[#allocation2 + $0xca8] sm:$0xff]  ;;  %v299_v40 = vld [vmem:[#allocation2 + $0x390] sm:$0xff] }
  0xe0   :  { %1001 = vmatpush.msrb.mxu1 %v538_v57  ;;  %v658_v0 = vld [vmem:[#allocation2 + $0xec8] sm:$0xff]  ;;  %1023 = vmatpush.msrb.mxu2 %v594_v58  ;;  %v423_v41 = vld [vmem:[#allocation2 + $0x770] sm:$0xff] }
  0xe1   :  { %1042 = vmatpush.msrb.mxu3 %v662_v59  ;;  %v458_v1 = vld [vmem:[#allocation2 + $0x888] sm:$0xff]  ;;  %984 = vmatpush.msrb.mxu0 %v462_v61  ;;  %v351_v42 = vld [vmem:[#allocation2 + $0x530] sm:$0xff] }
  0xe2   :  { %v530_v2 = vld [vmem:[#allocation2 + $0xac8] sm:$0xff]  ;;  %1002 = vmatpush.msrb.mxu1 %v534_v62  ;;  %1024 = vmatpush.msrb.mxu2 %v590_v63  ;;  %v295_v43 = vld [vmem:[#allocation2 + $0x370] sm:$0xff] }
  0xe3   :  { %v586_v3 = vld [vmem:[#allocation2 + $0xc88] sm:$0xff]  ;;  %1043 = vmatpush.msrb.mxu3 %v658_v0  ;;  %985 = vmatpush.msrb.mxu0 %v458_v1  ;;  %v419_v44 = vld [vmem:[#allocation2 + $0x750] sm:$0xff] }
  0xe4   :  { %v654_v4 = vld [vmem:[#allocation2 + $0xea8] sm:$0xff]  ;;  %1003 = vmatpush.msrb.mxu1 %v530_v2  ;;  %1025 = vmatpush.msrb.mxu2 %v586_v3  ;;  %v219_v45 = vld [vmem:[#allocation2 + $0x110] sm:$0xff] }
  0xe5   :  { %v454_v6 = vld [vmem:[#allocation2 + $0x868] sm:$0xff]  ;;  %1044 = vmatpush.msrb.mxu3 %v654_v4  ;;  %950 = vmatmul.f32.vlgmr.msra.gmra.mxu2 %v2445_v49  ;;  %v347_v46 = vld [vmem:[#allocation2 + $0x510] sm:$0xff] }
  0xe6   :  { %v526_v7 = vld [vmem:[#allocation2 + $0xaa8] sm:$0xff]  ;;  %986 = vmatpush.msrb.mxu0 %v454_v6  ;;  %970 = vmatmul.f32.vlgmr.msra.gmra.mxu3 %v2450_v55  ;;  %v375_v55 = vld [vmem:[#allocation2 + $0x5f0] sm:$0xff] }
  0xe7   :  { %v582_v8 = vld [vmem:[#allocation2 + $0xc68] sm:$0xff]  ;;  %1004 = vmatpush.msrb.mxu1 %v526_v7  ;;  %910 = vmatmul.f32.vlgmr.msra.gmra.mxu0 %v2447_v54  ;;  %v247_v54 = vld [vmem:[#allocation2 + $0x1f0] sm:$0xff] }
  0xe8   :  { %v650_v9 = vld [vmem:[#allocation2 + $0xe88] sm:$0xff]  ;;  %1026 = vmatpush.msrb.mxu2 %v582_v8  ;;  %930 = vmatmul.f32.vlgmr.msra.gmra.mxu1 %v2453_v60  ;;  %v243_v60 = vld [vmem:[#allocation2 + $0x1d0] sm:$0xff] }
  0xe9   :  { %v450_v12 = vld [vmem:[#allocation2 + $0x848] sm:$0xff]  ;;  %1045 = vmatpush.msrb.mxu3 %v650_v9  ;;  %v291_v47 = vld [vmem:[#allocation2 + $0x350] sm:$0xff] }
  0xea   :  { %v522_v13 = vld [vmem:[#allocation2 + $0xa88] sm:$0xff]  ;;  %987 = vmatpush.msrb.mxu0 %v450_v12  ;;  %v415_v48 = vld [vmem:[#allocation2 + $0x730] sm:$0xff] }
  0xeb   :  { %v578_v14 = vld [vmem:[#allocation2 + $0xc48] sm:$0xff]  ;;  %1005 = vmatpush.msrb.mxu1 %v522_v13  ;;  %v215_v50 = vld [vmem:[#allocation2 + $0xf0] sm:$0xff] }
  0xec   :  { %v646_v15 = vld [vmem:[#allocation2 + $0xe68] sm:$0xff]  ;;  %1027 = vmatpush.msrb.mxu2 %v578_v14  ;;  %v343_v51 = vld [vmem:[#allocation2 + $0x4f0] sm:$0xff] }
  0xed   :  { %v446_v16 = vld [vmem:[#allocation2 + $0x828] sm:$0xff]  ;;  %1046 = vmatpush.msrb.mxu3 %v646_v15  ;;  %v287_v52 = vld [vmem:[#allocation2 + $0x330] sm:$0xff] }
  0xee   :  { %v518_v18 = vld [vmem:[#allocation2 + $0xa68] sm:$0xff]  ;;  %988 = vmatpush.msrb.mxu0 %v446_v16  ;;  %v411_v53 = vld [vmem:[#allocation2 + $0x710] sm:$0xff] }
  0xef   :  { %v574_v19 = vld [vmem:[#allocation2 + $0xc28] sm:$0xff]  ;;  %1006 = vmatpush.msrb.mxu1 %v518_v18  ;;  %v211_v56 = vld [vmem:[#allocation2 + $0xd0] sm:$0xff] }
  0xf0   :  { %v642_v20 = vld [vmem:[#allocation2 + $0xe48] sm:$0xff]  ;;  %1028 = vmatpush.msrb.mxu2 %v574_v19  ;;  %v339_v57 = vld [vmem:[#allocation2 + $0x4d0] sm:$0xff] }
  0xf1   :  { %v442_v49 = vld [vmem:[#allocation2 + $0x808] sm:$0xff]  ;;  %1047 = vmatpush.msrb.mxu3 %v642_v20  ;;  %v283_v58 = vld [vmem:[#allocation2 + $0x310] sm:$0xff] }
  0xf2   :  { %v514_v21 = vld [vmem:[#allocation2 + $0xa48] sm:$0xff]  ;;  %989 = vmatpush.msrb.mxu0 %v442_v49  ;;  %v407_v59 = vld [vmem:[#allocation2 + $0x6f0] sm:$0xff] }
  0xf3   :  { %v570_v22 = vld [vmem:[#allocation2 + $0xc08] sm:$0xff]  ;;  %1007 = vmatpush.msrb.mxu1 %v514_v21  ;;  %990 = vmatmul.f32.vlgmr.msrb.gmra.mxu0 %v2459_v10  ;;  %v231_v10 = vld [vmem:[#allocation2 + $0x170] sm:$0xff] }
  0xf4   :  { %v638_v23 = vld [vmem:[#allocation2 + $0xe28] sm:$0xff]  ;;  %1029 = vmatpush.msrb.mxu2 %v570_v22  ;;  %1054 = vmatpush.msra.mxu0 %v247_v54  ;;  %v207_v61 = vld [vmem:[#allocation2 + $0xb0] sm:$0xff] }
  0xf5   :  { %v510_v24 = vld [vmem:[#allocation2 + $0xa28] sm:$0xff]  ;;  %1048 = vmatpush.msrb.mxu3 %v638_v23  ;;  %1030 = vmatmul.f32.vlgmr.msrb.gmra.mxu2 %v2457_v5  ;;  %v235_v5 = vld [vmem:[#allocation2 + $0x190] sm:$0xff] }
  0xf6   :  { %v634_v25 = vld [vmem:[#allocation2 + $0xe08] sm:$0xff]  ;;  %1094 = vmatpush.msra.mxu2 %v375_v55  ;;  %1008 = vmatpush.msrb.mxu1 %v510_v24  ;;  %v335_v62 = vld [vmem:[#allocation2 + $0x4b0] sm:$0xff] }
  0xf7   :  { %1049 = vmatpush.msrb.mxu3 %v634_v25  ;;  %v506_v28 = vld [vmem:[#allocation2 + $0xa08] sm:$0xff]  ;;  %1055 = vmatpush.msra.mxu0 %v243_v60  ;;  %v279_v63 = vld [vmem:[#allocation2 + $0x2f0] sm:$0xff] }
  0xf8   :  { %1050 = vmatmul.f32.vlgmr.msrb.gmra.mxu3 %v2462_v11  ;;  %1095 = vmatpush.msra.mxu2 %v371_v26  ;;  %v303_v11 = vld [vmem:[#allocation2 + $0x3b0] sm:$0xff] }
  0xf9   :  { %1114 = vmatpush.msra.mxu3 %v439_v27  ;;  %1009 = vmatpush.msrb.mxu1 %v506_v28  ;;  %v403_v0 = vld [vmem:[#allocation2 + $0x6d0] sm:$0xff] }
  0xfa   :  { %1056 = vmatpush.msra.mxu0 %v239_v29  ;;  %1010 = vmatmul.f32.vlgmr.msrb.gmra.mxu1 %v2466_v17  ;;  %v223_v17 = vld [vmem:[#allocation2 + $0x130] sm:$0xff] }
  0xfb   :  { %1096 = vmatpush.msra.mxu2 %v367_v30  ;;  %1074 = vmatpush.msra.mxu1 %v311_v31  ;;  %v203_v1 = vld [vmem:[#allocation2 + $0x90] sm:$0xff] }
  0xfc   :  { %1115 = vmatpush.msra.mxu3 %v435_v32  ;;  %1057 = vmatpush.msra.mxu0 %v235_v5  ;;  %v331_v2 = vld [vmem:[#allocation2 + $0x490] sm:$0xff] }
  0xfd   :  { %1097 = vmatpush.msra.mxu2 %v363_v33  ;;  %1075 = vmatpush.msra.mxu1 %v307_v34  ;;  %v275_v3 = vld [vmem:[#allocation2 + $0x2d0] sm:$0xff] }
  0xfe   :  { %1116 = vmatpush.msra.mxu3 %v431_v35  ;;  %1058 = vmatpush.msra.mxu0 %v231_v10  ;;  %v399_v4 = vld [vmem:[#allocation2 + $0x6b0] sm:$0xff] }
  0xff   :  { %1098 = vmatpush.msra.mxu2 %v359_v36  ;;  %1076 = vmatpush.msra.mxu1 %v303_v11  ;;  %v199_v6 = vld [vmem:[#allocation2 + $0x70] sm:$0xff] }
 0x100   :  { %1117 = vmatpush.msra.mxu3 %v427_v37  ;;  %1059 = vmatpush.msra.mxu0 %v227_v38  ;;  %v327_v7 = vld [vmem:[#allocation2 + $0x470] sm:$0xff] }
 0x101   :  { %1099 = vmatpush.msra.mxu2 %v355_v39  ;;  %1077 = vmatpush.msra.mxu1 %v299_v40  ;;  %v271_v8 = vld [vmem:[#allocation2 + $0x2b0] sm:$0xff] }
 0x102   :  { %1118 = vmatpush.msra.mxu3 %v423_v41  ;;  %1060 = vmatpush.msra.mxu0 %v223_v17  ;;  %v395_v9 = vld [vmem:[#allocation2 + $0x690] sm:$0xff] }
 0x103   :  { %1100 = vmatpush.msra.mxu2 %v351_v42  ;;  %1078 = vmatpush.msra.mxu1 %v295_v43  ;;  %v195_v12 = vld [vmem:[#allocation2 + $0x50] sm:$0xff]  ;;  %v2477_v43 = vld [vmem:[#allocation5] sm:$0xf] }
 0x104   :  { %1119 = vmatpush.msra.mxu3 %v419_v44  ;;  %1061 = vmatpush.msra.mxu0 %v219_v45  ;;  %v323_v13 = vld [vmem:[#allocation2 + $0x450] sm:$0xff] }
 0x105   :  { %1101 = vmatpush.msra.mxu2 %v347_v46  ;;  %1079 = vmatpush.msra.mxu1 %v291_v47  ;;  %v267_v14 = vld [vmem:[#allocation2 + $0x290] sm:$0xff] }
 0x106   :  { %1120 = vmatpush.msra.mxu3 %v415_v48  ;;  %1062 = vmatpush.msra.mxu0 %v215_v50  ;;  %v391_v15 = vld [vmem:[#allocation2 + $0x670] sm:$0xff] }
 0x107   :  { %1102 = vmatpush.msra.mxu2 %v343_v51  ;;  %1080 = vmatpush.msra.mxu1 %v287_v52  ;;  %v191_v16 = vld [vmem:[#allocation2 + $0x30] sm:$0xff]  ;;  %v699_v51 = vperm.slane %v2477_v43, 0 }
 0x108   :  { %1121 = vmatpush.msra.mxu3 %v411_v53  ;;  %1063 = vmatpush.msra.mxu0 %v211_v56  ;;  %v319_v18 = vld [vmem:[#allocation2 + $0x430] sm:$0xff] }
 0x109   :  { %1103 = vmatpush.msra.mxu2 %v339_v57  ;;  %1081 = vmatpush.msra.mxu1 %v283_v58  ;;  %v263_v19 = vld [vmem:[#allocation2 + $0x270] sm:$0xff] }
 0x10a   :  { %1122 = vmatpush.msra.mxu3 %v407_v59  ;;  %1064 = vmatpush.msra.mxu0 %v207_v61  ;;  %v387_v20 = vld [vmem:[#allocation2 + $0x650] sm:$0xff]  ;;  %v751_v61 = vpop.f32.mrf.mxu0 }
 0x10b   :  { %1104 = vmatpush.msra.mxu2 %v335_v62  ;;  %1082 = vmatpush.msra.mxu1 %v279_v63  ;;  %v187_v49 = vld [vmem:[#allocation2 + $0x10] sm:$0xff] }
 0x10c   :  { %1123 = vmatpush.msra.mxu3 %v403_v0  ;;  %1065 = vmatpush.msra.mxu0 %v203_v1  ;;  %v315_v21 = vld [vmem:[#allocation2 + $0x410] sm:$0xff]  ;;  %v752_v0 = vadd.f32 %v751_v61, %v699_v51  ;;  %v372_v51 = vld [vmem:[#allocation2 + $0x5d8] sm:$0xff] }
 0x10d   :  { %1105 = vmatpush.msra.mxu2 %v331_v2  ;;  %1083 = vmatpush.msra.mxu1 %v275_v3  ;;  %v259_v22 = vld [vmem:[#allocation2 + $0x250] sm:$0xff]  ;;  %v368_v61 = vld [vmem:[#allocation2 + $0x5b8] sm:$0xff] }
 0x10e   :  { %1124 = vmatpush.msra.mxu3 %v399_v4  ;;  %1066 = vmatpush.msra.mxu0 %v199_v6  ;;  %v383_v23 = vld [vmem:[#allocation2 + $0x630] sm:$0xff] }
 0x10f   :  { %1106 = vmatpush.msra.mxu2 %v327_v7  ;;  %1084 = vmatpush.msra.mxu1 %v271_v8  ;;  %v503_v54 = vld [vmem:[#allocation2 + $0x9f0] sm:$0xff] }
 0x110   :  { %1125 = vmatpush.msra.mxu3 %v395_v9  ;;  %1067 = vmatpush.msra.mxu0 %v195_v12  ;;  %v631_v55 = vld [vmem:[#allocation2 + $0xdf0] sm:$0xff]  ;;  %v791_v12 = vpop.f32.mrf.mxu2 }
 0x111   :  { %1107 = vmatpush.msra.mxu2 %v323_v13  ;;  %1085 = vmatpush.msra.mxu1 %v267_v14  ;;  %v255_v24 = vld [vmem:[#allocation2 + $0x230] sm:$0xff] }
 0x112   :  { %1126 = vmatpush.msra.mxu3 %v391_v15  ;;  %1068 = vmatpush.msra.mxu0 %v191_v16  ;;  %v379_v25 = vld [vmem:[#allocation2 + $0x610] sm:$0xff] }
 0x113   :  { %1108 = vmatpush.msra.mxu2 %v319_v18  ;;  %1086 = vmatpush.msra.mxu1 %v263_v19  ;;  %v499_v60 = vld [vmem:[#allocation2 + $0x9d0] sm:$0xff]  ;;  %v2341_v18 = vmov 4.0  }
 0x114   :  { %1127 = vmatpush.msra.mxu3 %v387_v20  ;;  %1069 = vmatpush.msra.mxu0 %v187_v49  ;;  %v627_v26 = vld [vmem:[#allocation2 + $0xdd0] sm:$0xff]  ;;  %2024 = vrcp.f32 %v2341_v18  ;;  %v811_v49 = vpop.f32.mrf.mxu3 }
 0x115   :  { %1109 = vmatpush.msra.mxu2 %v315_v21  ;;  %1087 = vmatpush.msra.mxu1 %v259_v22  ;;  %v695_v27 = vld [vmem:[#allocation2 + $0xff0] sm:$0xff] }
 0x116   :  { %1128 = vmatpush.msra.mxu3 %v383_v23  ;;  %1134 = vmatpush.msrb.mxu0 %v503_v54  ;;  %v251_v28 = vld [vmem:[#allocation2 + $0x210] sm:$0xff]  ;;  %v2480_v23 = vld.sshfl [vmem:[#allocation1 + $0x10] sm:$0xff pattern:$0x75316420] }
 0x117   :  { %1174 = vmatpush.msrb.mxu2 %v631_v55  ;;  %1088 = vmatpush.msra.mxu1 %v255_v24  ;;  %v495_v29 = vld [vmem:[#allocation2 + $0x9b0] sm:$0xff] }
 0x118   :  { %1129 = vmatpush.msra.mxu3 %v379_v25  ;;  %v567_v30 = vld [vmem:[#allocation2 + $0xbf0] sm:$0xff]  ;;  %1135 = vmatpush.msrb.mxu0 %v499_v60  ;;  %v2483_v60 = vld.sshfl [vmem:[#allocation1] sm:$0xff pattern:$0x75316420] }
 0x119   :  { %1175 = vmatpush.msrb.mxu2 %v627_v26  ;;  %v623_v31 = vld [vmem:[#allocation2 + $0xdb0] sm:$0xff]  ;;  %1089 = vmatpush.msra.mxu1 %v251_v28 }
 0x11a   :  { %v691_v32 = vld [vmem:[#allocation2 + $0xfd0] sm:$0xff]  ;;  %1194 = vmatpush.msrb.mxu3 %v695_v27  ;;  %1136 = vmatpush.msrb.mxu0 %v495_v29  ;;  %v2486_v28 = vpop.eup %2024 }
 0x11b   :  { %v491_v5 = vld [vmem:[#allocation2 + $0x990] sm:$0xff]  ;;  %1154 = vmatpush.msrb.mxu1 %v567_v30  ;;  %1176 = vmatpush.msrb.mxu2 %v623_v31  ;;  %vm1410_vm1 = vweird.f32 %v2486_v28 }
 0x11c   :  { %v563_v33 = vld [vmem:[#allocation2 + $0xbd0] sm:$0xff]  ;;  %1195 = vmatpush.msrb.mxu3 %v691_v32  ;;  %1137 = vmatpush.msrb.mxu0 %v491_v5 }
 0x11d   :  { %v619_v34 = vld [vmem:[#allocation2 + $0xd90] sm:$0xff]  ;;  %1155 = vmatpush.msrb.mxu1 %v563_v33  ;;  %1110 = vmatmul.f32.vlgmr.msra.gmra.mxu2 %v2480_v23  ;;  %v2491_v33 = vld.sshfl [vmem:[#allocation1 + $0x8] sm:$0xff pattern:$0x75316420] }
 0x11e   :  { %v687_v35 = vld [vmem:[#allocation2 + $0xfb0] sm:$0xff]  ;;  %1177 = vmatpush.msrb.mxu2 %v619_v34  ;;  %1070 = vmatmul.f32.vlgmr.msra.gmra.mxu0 %v2483_v60 }
 0x11f   :  { %v487_v10 = vld [vmem:[#allocation2 + $0x970] sm:$0xff]  ;;  %1196 = vmatpush.msrb.mxu3 %v687_v35  ;;  %1090 = vmatmul.f32.vlgmr.msra.gmra.mxu1 %v2491_v33 }
 0x120   :  { %v559_v36 = vld [vmem:[#allocation2 + $0xbb0] sm:$0xff]  ;;  %1138 = vmatpush.msrb.mxu0 %v487_v10 }
 0x121   :  { %v615_v11 = vld [vmem:[#allocation2 + $0xd70] sm:$0xff]  ;;  %1156 = vmatpush.msrb.mxu1 %v559_v36  ;;  %v771_v6 = vpop.f32.mrf.mxu1 }
 0x122   :  { %v683_v37 = vld [vmem:[#allocation2 + $0xf90] sm:$0xff]  ;;  %1178 = vmatpush.msrb.mxu2 %v615_v11  ;;  %v772_v9 = vadd.f32 %v771_v6, %v752_v0  ;;  %v436_v0 = vld [vmem:[#allocation2 + $0x7d8] sm:$0xff]  ;;  %v2509_v6 = vld.sshfl [vmem:[#allocation1 + $0x28] sm:$0xff pattern:$0x75316420] }
 0x123   :  { %v483_v38 = vld [vmem:[#allocation2 + $0x950] sm:$0xff]  ;;  %1197 = vmatpush.msrb.mxu3 %v683_v37 }
 0x124   :  { %v555_v39 = vld [vmem:[#allocation2 + $0xb90] sm:$0xff]  ;;  %1139 = vmatpush.msrb.mxu0 %v483_v38  ;;  %v792_v16 = vadd.f32 %v791_v12, %v772_v9  ;;  %v232_v9 = vld [vmem:[#allocation2 + $0x178] sm:$0xff] }
 0x125   :  { %v611_v40 = vld [vmem:[#allocation2 + $0xd50] sm:$0xff]  ;;  %1157 = vmatpush.msrb.mxu1 %v555_v39  ;;  %v1406_v39 = vmul.f32 4.0, %v2486_v28  ;;  %v360_v12 = vld [vmem:[#allocation2 + $0x578] sm:$0xff] }
 0x126   :  { %v679_v41 = vld [vmem:[#allocation2 + $0xf70] sm:$0xff]  ;;  %1179 = vmatpush.msrb.mxu2 %v611_v40  ;;  %v812_v22 = vadd.f32 %v811_v49, %v792_v16  ;;  %v248_v40 = vld [vmem:[#allocation2 + $0x1f8] sm:$0xff] }
 0x127   :  { %v479_v17 = vld [vmem:[#allocation2 + $0x930] sm:$0xff]  ;;  %1198 = vmatpush.msrb.mxu3 %v679_v41  ;;  %v831_v25 = vpop.f32.mrf.mxu0  ;;  %v376_v41 = vld [vmem:[#allocation2 + $0x5f8] sm:$0xff] }
 0x128   :  { %v551_v42 = vld [vmem:[#allocation2 + $0xb70] sm:$0xff]  ;;  %1140 = vmatpush.msrb.mxu0 %v479_v17  ;;  %v832_v27 = vadd.f32 %v831_v25, %v812_v22  ;;  %v300_v49 = vld [vmem:[#allocation2 + $0x398] sm:$0xff] }
 0x129   :  { %v607_v44 = vld [vmem:[#allocation2 + $0xd30] sm:$0xff]  ;;  %1158 = vmatpush.msrb.mxu1 %v551_v42  ;;  %v296_v25 = vld [vmem:[#allocation2 + $0x378] sm:$0xff] }
 0x12a   :  { %v675_v45 = vld [vmem:[#allocation2 + $0xf50] sm:$0xff]  ;;  %1180 = vmatpush.msrb.mxu2 %v607_v44 }
 0x12b   :  { %v475_v46 = vld [vmem:[#allocation2 + $0x910] sm:$0xff]  ;;  %1199 = vmatpush.msrb.mxu3 %v675_v45 }
 0x12c   :  { %v547_v47 = vld [vmem:[#allocation2 + $0xb50] sm:$0xff]  ;;  %1141 = vmatpush.msrb.mxu0 %v475_v46  ;;  %v2495_v46 = vld.sshfl [vmem:[#allocation1 + $0x30] sm:$0xff pattern:$0x75316420] }
 0x12d   :  { %v603_v48 = vld [vmem:[#allocation2 + $0xd10] sm:$0xff]  ;;  %1159 = vmatpush.msrb.mxu1 %v547_v47  ;;  %v244_v47 = vld [vmem:[#allocation2 + $0x1d8] sm:$0xff] }
 0x12e   :  { %v671_v50 = vld [vmem:[#allocation2 + $0xf30] sm:$0xff]  ;;  %1181 = vmatpush.msrb.mxu2 %v603_v48  ;;  %v851_v10 = vpop.f32.mrf.mxu1 }
 0x12f   :  { %v471_v52 = vld [vmem:[#allocation2 + $0x8f0] sm:$0xff]  ;;  %1200 = vmatpush.msrb.mxu3 %v671_v50  ;;  %v871_v36 = vpop.f32.mrf.mxu2  ;;  %v852_v38 = vadd.f32 %v851_v10, %v832_v27  ;;  %v1407_v50 = vsub.f32 1.0, %v1406_v39  ;;  %v288_v10 = vld [vmem:[#allocation2 + $0x338] sm:$0xff] }
 0x130   :  { %v543_v53 = vld [vmem:[#allocation2 + $0xb30] sm:$0xff]  ;;  %1142 = vmatpush.msrb.mxu0 %v471_v52  ;;  %v440_v52 = vld [vmem:[#allocation2 + $0x7f8] sm:$0xff] }
 0x131   :  { %v599_v56 = vld [vmem:[#allocation2 + $0xcf0] sm:$0xff]  ;;  %1160 = vmatpush.msrb.mxu1 %v543_v53  ;;  %v872_v42 = vadd.f32 %v871_v36, %v852_v38  ;;  %v2500_v53 = vld.sshfl [vmem:[#allocation1 + $0x20] sm:$0xff pattern:$0x75316420] }
 0x132   :  { %v667_v57 = vld [vmem:[#allocation2 + $0xf10] sm:$0xff]  ;;  %1182 = vmatpush.msrb.mxu2 %v599_v56  ;;  %v891_v44 = vpop.f32.mrf.mxu3  ;;  %v412_v36 = vld [vmem:[#allocation2 + $0x718] sm:$0xff] }
 0x133   :  { %v467_v58 = vld [vmem:[#allocation2 + $0x8d0] sm:$0xff]  ;;  %1201 = vmatpush.msrb.mxu3 %v667_v57  ;;  %v2498_v48 = vadd.f32 %v891_v44, %v872_v42  ;;  %v240_v57 = vld [vmem:[#allocation2 + $0x1b8] sm:$0xff] }
 0x134   :  { %v539_v59 = vld [vmem:[#allocation2 + $0xb10] sm:$0xff]  ;;  %1143 = vmatpush.msrb.mxu0 %v467_v58  ;;  %v340_v38 = vld [vmem:[#allocation2 + $0x4d8] sm:$0xff] }
 0x135   :  { %v595_v62 = vld [vmem:[#allocation2 + $0xcd0] sm:$0xff]  ;;  %1161 = vmatpush.msrb.mxu1 %v539_v59  ;;  %v1377_v58 = vsel %vm1376_vm0, %v2498_v48, 0.0  ;;  %v284_v39 = vld [vmem:[#allocation2 + $0x318] sm:$0xff] }
 0x136   :  { %v663_v63 = vld [vmem:[#allocation2 + $0xef0] sm:$0xff]  ;;  %1183 = vmatpush.msrb.mxu2 %v595_v62  ;;  %v1378_v62 = vrot.slane %v1377_v58, 4  ;;  %v336_v42 = vld [vmem:[#allocation2 + $0x4b8] sm:$0xff] }
 0x137   :  { %v463_v1 = vld [vmem:[#allocation2 + $0x8b0] sm:$0xff]  ;;  %1202 = vmatpush.msrb.mxu3 %v663_v63  ;;  %v312_v63 = vld [vmem:[#allocation2 + $0x3f8] sm:$0xff] }
 0x138   :  { %v535_v2 = vld [vmem:[#allocation2 + $0xaf0] sm:$0xff]  ;;  %1144 = vmatpush.msrb.mxu0 %v463_v1  ;;  %v1408_v1 = vmul.f32 %v2486_v28, %v1407_v50  ;;  %v280_v44 = vld [vmem:[#allocation2 + $0x2f8] sm:$0xff] }
 0x139   :  { %v591_v3 = vld [vmem:[#allocation2 + $0xcb0] sm:$0xff]  ;;  %1162 = vmatpush.msrb.mxu1 %v535_v2  ;;  %v236_v2 = vld [vmem:[#allocation2 + $0x198] sm:$0xff] }
 0x13a   :  { %v659_v4 = vld [vmem:[#allocation2 + $0xed0] sm:$0xff]  ;;  %1184 = vmatpush.msrb.mxu2 %v591_v3  ;;  %v364_v3 = vld [vmem:[#allocation2 + $0x598] sm:$0xff]  ;;  %v1409_v16 = vadd.f32 %v2486_v28, %v1408_v1 }
 0x13b   :  { %v459_v7 = vld [vmem:[#allocation2 + $0x890] sm:$0xff]  ;;  %1203 = vmatpush.msrb.mxu3 %v659_v4  ;;  %v1379_v4 = vadd.f32 %v1378_v62, %v1377_v58  ;;  %v332_v50 = vld [vmem:[#allocation2 + $0x498] sm:$0xff] }
 0x13c   :  { %v531_v8 = vld [vmem:[#allocation2 + $0xad0] sm:$0xff]  ;;  %1145 = vmatpush.msrb.mxu0 %v459_v7  ;;  %v308_v7 = vld [vmem:[#allocation2 + $0x3d8] sm:$0xff] }
 0x13d   :  { %v587_v13 = vld [vmem:[#allocation2 + $0xc90] sm:$0xff]  ;;  %1163 = vmatpush.msrb.mxu1 %v531_v8  ;;  %v432_v8 = vld [vmem:[#allocation2 + $0x7b8] sm:$0xff] }
 0x13e   :  { %v655_v14 = vld [vmem:[#allocation2 + $0xeb0] sm:$0xff]  ;;  %1185 = vmatpush.msrb.mxu2 %v587_v13  ;;  %v1380_v13 = vrot.slane %v1379_v4, 2  ;;  %v328_v58 = vld [vmem:[#allocation2 + $0x478] sm:$0xff] }
 0x13f   :  { %v455_v15 = vld [vmem:[#allocation2 + $0x870] sm:$0xff]  ;;  %1204 = vmatpush.msrb.mxu3 %v655_v14  ;;  %v304_v14 = vld [vmem:[#allocation2 + $0x3b8] sm:$0xff] }
 0x140   :  { %v527_v19 = vld [vmem:[#allocation2 + $0xab0] sm:$0xff]  ;;  %1146 = vmatpush.msrb.mxu0 %v455_v15  ;;  %v428_v15 = vld [vmem:[#allocation2 + $0x798] sm:$0xff]  ;;  %v1381_v18 = vadd.f32 %v1380_v13, %v1379_v4 }
 0x141   :  { %v583_v20 = vld [vmem:[#allocation2 + $0xc70] sm:$0xff]  ;;  %1164 = vmatpush.msrb.mxu1 %v527_v19  ;;  %v228_v19 = vld [vmem:[#allocation2 + $0x158] sm:$0xff] }
 0x142   :  { %v651_v21 = vld [vmem:[#allocation2 + $0xe90] sm:$0xff]  ;;  %1186 = vmatpush.msrb.mxu2 %v583_v20  ;;  %v356_v20 = vld [vmem:[#allocation2 + $0x558] sm:$0xff]  ;;  %v1382_v22 = vrot.slane %v1381_v18, 1 }
 0x143   :  { %v451_v54 = vld [vmem:[#allocation2 + $0x850] sm:$0xff]  ;;  %1205 = vmatpush.msrb.mxu3 %v651_v21  ;;  %v424_v21 = vld [vmem:[#allocation2 + $0x778] sm:$0xff] }
 0x144   :  { %v523_v55 = vld [vmem:[#allocation2 + $0xa90] sm:$0xff]  ;;  %1147 = vmatpush.msrb.mxu0 %v451_v54  ;;  %v224_v54 = vld [vmem:[#allocation2 + $0x138] sm:$0xff]  ;;  %v1383_v27 = vadd.f32 %v1382_v22, %v1381_v18 }
 0x145   :  { %v579_v24 = vld [vmem:[#allocation2 + $0xc50] sm:$0xff]  ;;  %1165 = vmatpush.msrb.mxu1 %v523_v55  ;;  %v352_v55 = vld [vmem:[#allocation2 + $0x538] sm:$0xff] }
 0x146   :  { %v647_v26 = vld [vmem:[#allocation2 + $0xe70] sm:$0xff]  ;;  %1187 = vmatpush.msrb.mxu2 %v579_v24  ;;  %v2515_v24 = vsel %vm1410_vm1, %v2486_v28, %v1409_v16  ;;  %v344_v28 = vld [vmem:[#allocation2 + $0x4f8] sm:$0xff] }
 0x147   :  { %v2488_v29 = vld.sshfl [vmem:[#allocation1 + $0x18] sm:$0xff pattern:$0x75316420]  ;;  %1206 = vmatpush.msrb.mxu3 %v647_v26  ;;  %v420_v26 = vld [vmem:[#allocation2 + $0x758] sm:$0xff] }
 0x148   :  { %1130 = vmatmul.f32.vlgmr.msra.gmra.mxu3 %v2488_v29  ;;  %v447_v30 = vld [vmem:[#allocation2 + $0x830] sm:$0xff]  ;;  %v396_v62 = vld [vmem:[#allocation2 + $0x698] sm:$0xff] }
 0x149   :  { %v519_v31 = vld [vmem:[#allocation2 + $0xa70] sm:$0xff]  ;;  %1148 = vmatpush.msrb.mxu0 %v447_v30  ;;  %v220_v30 = vld [vmem:[#allocation2 + $0x118] sm:$0xff] }
 0x14a   :  { %v575_v32 = vld [vmem:[#allocation2 + $0xc30] sm:$0xff]  ;;  %1166 = vmatpush.msrb.mxu1 %v519_v31  ;;  %v348_v31 = vld [vmem:[#allocation2 + $0x518] sm:$0xff] }
 0x14b   :  { %v643_v5 = vld [vmem:[#allocation2 + $0xe50] sm:$0xff]  ;;  %1188 = vmatpush.msrb.mxu2 %v575_v32  ;;  %v292_v32 = vld [vmem:[#allocation2 + $0x358] sm:$0xff] }
 0x14c   :  { %v443_v34 = vld [vmem:[#allocation2 + $0x810] sm:$0xff]  ;;  %1207 = vmatpush.msrb.mxu3 %v643_v5  ;;  %v416_v5 = vld [vmem:[#allocation2 + $0x738] sm:$0xff] }
 0x14d   :  { %v515_v35 = vld [vmem:[#allocation2 + $0xa50] sm:$0xff]  ;;  %1149 = vmatpush.msrb.mxu0 %v443_v34  ;;  %v1412_v34 = vmul.f32 %v2515_v24, %v1383_v27  ;;  %v192_v4 = vld [vmem:[#allocation2 + $0x38] sm:$0xff] }
 0x14e   :  { %v571_v11 = vld [vmem:[#allocation2 + $0xc10] sm:$0xff]  ;;  %1167 = vmatpush.msrb.mxu1 %v515_v35  ;;  %1150 = vmatmul.f32.vlgmr.msrb.gmra.mxu0 %v2500_v53  ;;  %v216_v35 = vld [vmem:[#allocation2 + $0xf8] sm:$0xff] }
 0x14f   :  { %v639_v37 = vld [vmem:[#allocation2 + $0xe30] sm:$0xff]  ;;  %1189 = vmatpush.msrb.mxu2 %v571_v11  ;;  %1214 = vmatpush.msra.mxu0 %v248_v40  ;;  %v2519_v11 = vsub.f32 %v2498_v48, %v1412_v34  ;;  %v408_v40 = vld [vmem:[#allocation2 + $0x6f8] sm:$0xff] }
 0x150   :  { %v511_v17 = vld [vmem:[#allocation2 + $0xa30] sm:$0xff]  ;;  %1208 = vmatpush.msrb.mxu3 %v639_v37  ;;  %1190 = vmatmul.f32.vlgmr.msrb.gmra.mxu2 %v2495_v46  ;;  %v212_v37 = vld [vmem:[#allocation2 + $0xd8] sm:$0xff] }
 0x151   :  { %v635_v45 = vld [vmem:[#allocation2 + $0xe10] sm:$0xff]  ;;  %1254 = vmatpush.msra.mxu2 %v376_v41  ;;  %1168 = vmatpush.msrb.mxu1 %v511_v17  ;;  %v1420_v41 = vmul.f32 %v2519_v11, %v2519_v11  ;;  %v208_v17 = vld [vmem:[#allocation2 + $0xb8] sm:$0xff] }
 0x152   :  { %1209 = vmatpush.msrb.mxu3 %v635_v45  ;;  %v507_v56 = vld [vmem:[#allocation2 + $0xa10] sm:$0xff]  ;;  %1215 = vmatpush.msra.mxu0 %v244_v47  ;;  %v404_v45 = vld [vmem:[#allocation2 + $0x6d8] sm:$0xff] }
 0x153   :  { %v2505_v59 = vld.sshfl [vmem:[#allocation1 + $0x38] sm:$0xff pattern:$0x75316420]  ;;  %1255 = vmatpush.msra.mxu2 %v372_v51  ;;  %1169 = vmatpush.msrb.mxu1 %v507_v56  ;;  %v1424_v47 = vsel %vm1376_vm0, %v1420_v41, 0.0  ;;  %v204_v48 = vld [vmem:[#allocation2 + $0x98] sm:$0xff] }
 0x154   :  { %1210 = vmatmul.f32.vlgmr.msrb.gmra.mxu3 %v2505_v59  ;;  %1216 = vmatpush.msra.mxu0 %v240_v57  ;;  %v1425_v51 = vrot.slane %v1424_v47, 4  ;;  %v400_v56 = vld [vmem:[#allocation2 + $0x6b8] sm:$0xff] }
 0x155   :  { %1274 = vmatpush.msra.mxu3 %v440_v52  ;;  %1170 = vmatmul.f32.vlgmr.msrb.gmra.mxu1 %v2509_v6  ;;  %v276_v52 = vld [vmem:[#allocation2 + $0x2d8] sm:$0xff] }
 0x156   :  { %1256 = vmatpush.msra.mxu2 %v368_v61  ;;  %1234 = vmatpush.msra.mxu1 %v312_v63  ;;  %v200_v57 = vld [vmem:[#allocation2 + $0x78] sm:$0xff]  ;;  %v1426_v1 = vadd.f32 %v1425_v51, %v1424_v47 }
 0x157   :  { %1275 = vmatpush.msra.mxu3 %v436_v0  ;;  %1217 = vmatpush.msra.mxu0 %v236_v2  ;;  %v272_v61 = vld [vmem:[#allocation2 + $0x2b8] sm:$0xff] }
 0x158   :  { %1257 = vmatpush.msra.mxu2 %v364_v3  ;;  %1235 = vmatpush.msra.mxu1 %v308_v7  ;;  %v196_v63 = vld [vmem:[#allocation2 + $0x58] sm:$0xff] }
 0x159   :  { %1276 = vmatpush.msra.mxu3 %v432_v8  ;;  %1218 = vmatpush.msra.mxu0 %v232_v9  ;;  %v324_v0 = vld [vmem:[#allocation2 + $0x458] sm:$0xff] }
 0x15a   :  { %1258 = vmatpush.msra.mxu2 %v360_v12  ;;  %1236 = vmatpush.msra.mxu1 %v304_v14  ;;  %v268_v2 = vld [vmem:[#allocation2 + $0x298] sm:$0xff]  ;;  %v1427_v14 = vrot.slane %v1426_v1, 2 }
 0x15b   :  { %1277 = vmatpush.msra.mxu3 %v428_v15  ;;  %1219 = vmatpush.msra.mxu0 %v228_v19  ;;  %v392_v3 = vld [vmem:[#allocation2 + $0x678] sm:$0xff] }
 0x15c   :  { %1259 = vmatpush.msra.mxu2 %v356_v20  ;;  %1237 = vmatpush.msra.mxu1 %v300_v49  ;;  %v320_v7 = vld [vmem:[#allocation2 + $0x438] sm:$0xff] }
 0x15d   :  { %1278 = vmatpush.msra.mxu3 %v424_v21  ;;  %1220 = vmatpush.msra.mxu0 %v224_v54  ;;  %v264_v8 = vld [vmem:[#allocation2 + $0x278] sm:$0xff]  ;;  %v1428_v54 = vadd.f32 %v1427_v14, %v1426_v1 }
 0x15e   :  { %1260 = vmatpush.msra.mxu2 %v352_v55  ;;  %1238 = vmatpush.msra.mxu1 %v296_v25  ;;  %v388_v9 = vld [vmem:[#allocation2 + $0x658] sm:$0xff] }
 0x15f   :  { %1279 = vmatpush.msra.mxu3 %v420_v26  ;;  %1221 = vmatpush.msra.mxu0 %v220_v30  ;;  %v188_v12 = vld [vmem:[#allocation2 + $0x18] sm:$0xff]  ;;  %v1429_v34 = vrot.slane %v1428_v54, 1 }
 0x160   :  { %1261 = vmatpush.msra.mxu2 %v348_v31  ;;  %1239 = vmatpush.msra.mxu1 %v292_v32  ;;  %v316_v13 = vld [vmem:[#allocation2 + $0x418] sm:$0xff] }
 0x161   :  { %1280 = vmatpush.msra.mxu3 %v416_v5  ;;  %1222 = vmatpush.msra.mxu0 %v216_v35  ;;  %v260_v15 = vld [vmem:[#allocation2 + $0x258] sm:$0xff]  ;;  %v1430_v41 = vadd.f32 %v1429_v34, %v1428_v54 }
 0x162   :  { %1262 = vmatpush.msra.mxu2 %v344_v28  ;;  %1240 = vmatpush.msra.mxu1 %v288_v10  ;;  %v384_v16 = vld [vmem:[#allocation2 + $0x638] sm:$0xff] }
 0x163   :  { %1281 = vmatpush.msra.mxu3 %v412_v36  ;;  %1223 = vmatpush.msra.mxu0 %v212_v37  ;;  %v504_v18 = vld [vmem:[#allocation2 + $0x9f8] sm:$0xff] }
 0x164   :  { %1263 = vmatpush.msra.mxu2 %v340_v38  ;;  %1241 = vmatpush.msra.mxu1 %v284_v39  ;;  %v632_v19 = vld [vmem:[#allocation2 + $0xdf8] sm:$0xff] }
 0x165   :  { %1282 = vmatpush.msra.mxu3 %v408_v40  ;;  %1224 = vmatpush.msra.mxu0 %v208_v17  ;;  %v256_v20 = vld [vmem:[#allocation2 + $0x238] sm:$0xff] }
 0x166   :  { %1264 = vmatpush.msra.mxu2 %v336_v42  ;;  %1242 = vmatpush.msra.mxu1 %v280_v44  ;;  %v380_v49 = vld [vmem:[#allocation2 + $0x618] sm:$0xff] }
 0x167   :  { %1283 = vmatpush.msra.mxu3 %v404_v45  ;;  %1225 = vmatpush.msra.mxu0 %v204_v48  ;;  %v500_v21 = vld [vmem:[#allocation2 + $0x9d8] sm:$0xff] }
 0x168   :  { %1265 = vmatpush.msra.mxu2 %v332_v50  ;;  %1243 = vmatpush.msra.mxu1 %v276_v52  ;;  %v628_v22 = vld [vmem:[#allocation2 + $0xdd8] sm:$0xff]  ;;  %v1452_v52 = vmul.f32 %v1430_v41, %v2515_v24 }
 0x169   :  { %1284 = vmatpush.msra.mxu3 %v400_v56  ;;  %1226 = vmatpush.msra.mxu0 %v200_v57  ;;  %v696_v55 = vld [vmem:[#allocation2 + $0xff8] sm:$0xff] }
 0x16a   :  { %1266 = vmatpush.msra.mxu2 %v328_v58  ;;  %1244 = vmatpush.msra.mxu1 %v272_v61  ;;  %v252_v25 = vld [vmem:[#allocation2 + $0x218] sm:$0xff]  ;;  %v700_v58 = vperm.slane %v2477_v43, 1 }
 0x16b   :  { %1285 = vmatpush.msra.mxu3 %v396_v62  ;;  %1227 = vmatpush.msra.mxu0 %v196_v63  ;;  %v496_v26 = vld [vmem:[#allocation2 + $0x9b8] sm:$0xff] }
 0x16c   :  { %1267 = vmatpush.msra.mxu2 %v324_v0  ;;  %1245 = vmatpush.msra.mxu1 %v268_v2  ;;  %v568_v27 = vld [vmem:[#allocation2 + $0xbf8] sm:$0xff] }
 0x16d   :  { %1286 = vmatpush.msra.mxu3 %v392_v3  ;;  %1228 = vmatpush.msra.mxu0 %v192_v4  ;;  %v624_v30 = vld [vmem:[#allocation2 + $0xdb8] sm:$0xff]  ;;  %v911_v3 = vpop.f32.mrf.mxu0  ;;  %v2526_v4 = vadd.f32 1e-05, %v1452_v52  ;;  %v1562_v52 = vld [vmem:[#allocation10 + $0xe0] sm:$0xff] }
 0x16e   :  { %1268 = vmatpush.msra.mxu2 %v320_v7  ;;  %1246 = vmatpush.msra.mxu1 %v264_v8  ;;  %v692_v31 = vld [vmem:[#allocation2 + $0xfd8] sm:$0xff]  ;;  %v912_v43 = vadd.f32 %v911_v3, %v700_v58 }
 0x16f   :  { %1287 = vmatpush.msra.mxu3 %v388_v9  ;;  %1229 = vmatpush.msra.mxu0 %v188_v12  ;;  %v492_v32 = vld [vmem:[#allocation2 + $0x998] sm:$0xff]  ;;  %2026 = vrsqrt.f32 %v2526_v4  ;;  %vm1466_vm3 = vweird.f32 %v2526_v4 }
 0x170   :  { %1269 = vmatpush.msra.mxu2 %v316_v13  ;;  %1247 = vmatpush.msra.mxu1 %v260_v15  ;;  %v564_v5 = vld [vmem:[#allocation2 + $0xbd8] sm:$0xff]  ;;  %v931_v15 = vpop.f32.mrf.mxu1 }
 0x171   :  { %1288 = vmatpush.msra.mxu3 %v384_v16  ;;  %1294 = vmatpush.msrb.mxu0 %v504_v18  ;;  %v620_v35 = vld [vmem:[#allocation2 + $0xd98] sm:$0xff] }
 0x172   :  { %1334 = vmatpush.msrb.mxu2 %v632_v19  ;;  %1248 = vmatpush.msra.mxu1 %v256_v20  ;;  %v688_v28 = vld [vmem:[#allocation2 + $0xfb8] sm:$0xff]  ;;  %v932_v19 = vadd.f32 %v931_v15, %v912_v43  ;;  %v951_v20 = vpop.f32.mrf.mxu2  ;;  %v1590_v43 = vld [vmem:[#allocation10 + $0x1c0] sm:$0xff] }
 0x173   :  { %1289 = vmatpush.msra.mxu3 %v380_v49  ;;  %1295 = vmatpush.msrb.mxu0 %v500_v21  ;;  %v488_v10 = vld [vmem:[#allocation2 + $0x978] sm:$0xff]  ;;  %v1550_v15 = vld [vmem:[#allocation10 + $0x80] sm:$0xff] }
 0x174   :  { %1335 = vmatpush.msrb.mxu2 %v628_v22  ;;  %1249 = vmatpush.msra.mxu1 %v252_v25  ;;  %v560_v36 = vld [vmem:[#allocation2 + $0xbb8] sm:$0xff]  ;;  %v952_v54 = vadd.f32 %v951_v20, %v932_v19 }
 0x175   :  { %1354 = vmatpush.msrb.mxu3 %v696_v55  ;;  %1296 = vmatpush.msrb.mxu0 %v496_v26  ;;  %v616_v37 = vld [vmem:[#allocation2 + $0xd78] sm:$0xff]  ;;  %v971_v26 = vpop.f32.mrf.mxu3  ;;  %v991_v34 = vpop.f32.mrf.mxu0 }
 0x176   :  { %1314 = vmatpush.msrb.mxu1 %v568_v27  ;;  %1336 = vmatpush.msrb.mxu2 %v624_v30  ;;  %v684_v38 = vld [vmem:[#allocation2 + $0xf98] sm:$0xff]  ;;  %v972_v30 = vadd.f32 %v971_v26, %v952_v54  ;;  %v1546_v54 = vld [vmem:[#allocation10 + $0x60] sm:$0xff] }
 0x177   :  { %1355 = vmatpush.msrb.mxu3 %v692_v31  ;;  %1297 = vmatpush.msrb.mxu0 %v492_v32  ;;  %v484_v39 = vld [vmem:[#allocation2 + $0x958] sm:$0xff] }
 0x178   :  { %1315 = vmatpush.msrb.mxu1 %v564_v5  ;;  %1337 = vmatpush.msrb.mxu2 %v620_v35  ;;  %v556_v40 = vld [vmem:[#allocation2 + $0xb98] sm:$0xff]  ;;  %v2530_v35 = vpop.eup %2026 }
 0x179   :  { %1356 = vmatpush.msrb.mxu3 %v688_v28  ;;  %1298 = vmatpush.msrb.mxu0 %v488_v10  ;;  %v612_v17 = vld [vmem:[#allocation2 + $0xd58] sm:$0xff]  ;;  %v992_v10 = vadd.f32 %v991_v34, %v972_v30  ;;  %vm1467_vm2 = vweird.f32 %v2530_v35  ;;  %v1578_v34 = vld [vmem:[#allocation10 + $0x160] sm:$0xff] }
 0x17a   :  { %1316 = vmatpush.msrb.mxu1 %v560_v36  ;;  %v680_v42 = vld [vmem:[#allocation2 + $0xf78] sm:$0xff]  ;;  %1338 = vmatpush.msrb.mxu2 %v616_v37  ;;  %vm1468_vm4 = vmor %vm1466_vm3, %vm1467_vm2 }
 0x17b   :  { %1357 = vmatpush.msrb.mxu3 %v684_v38  ;;  %v480_v44 = vld [vmem:[#allocation2 + $0x938] sm:$0xff]  ;;  %1299 = vmatpush.msrb.mxu0 %v484_v39  ;;  %v1461_v39 = vmul.f32 %v2530_v35, %v2526_v4 }
 0x17c   :  { %v552_v45 = vld [vmem:[#allocation2 + $0xb78] sm:$0xff]  ;;  %1317 = vmatpush.msrb.mxu1 %v556_v40  ;;  %1339 = vmatpush.msrb.mxu2 %v612_v17  ;;  %v1031_v17 = vpop.f32.mrf.mxu2 }
 0x17d   :  { %v608_v47 = vld [vmem:[#allocation2 + $0xd38] sm:$0xff]  ;;  %1358 = vmatpush.msrb.mxu3 %v680_v42  ;;  %1300 = vmatpush.msrb.mxu0 %v480_v44 }
 0x17e   :  { %v676_v48 = vld [vmem:[#allocation2 + $0xf58] sm:$0xff]  ;;  %1318 = vmatpush.msrb.mxu1 %v552_v45  ;;  %1340 = vmatpush.msrb.mxu2 %v608_v47 }
 0x17f   :  { %v476_v50 = vld [vmem:[#allocation2 + $0x918] sm:$0xff]  ;;  %1359 = vmatpush.msrb.mxu3 %v676_v48  ;;  %1270 = vmatmul.f32.vlgmr.msra.gmra.mxu2 %v2480_v23 }
 0x180   :  { %v548_v51 = vld [vmem:[#allocation2 + $0xb58] sm:$0xff]  ;;  %1301 = vmatpush.msrb.mxu0 %v476_v50  ;;  %1290 = vmatmul.f32.vlgmr.msra.gmra.mxu3 %v2488_v29 }
 0x181   :  { %v604_v56 = vld [vmem:[#allocation2 + $0xd18] sm:$0xff]  ;;  %1319 = vmatpush.msrb.mxu1 %v548_v51  ;;  %1230 = vmatmul.f32.vlgmr.msra.gmra.mxu0 %v2483_v60  ;;  %v1011_v60 = vpop.f32.mrf.mxu1  ;;  %v1051_v51 = vpop.f32.mrf.mxu3 }
 0x182   :  { %v672_v57 = vld [vmem:[#allocation2 + $0xf38] sm:$0xff]  ;;  %1341 = vmatpush.msrb.mxu2 %v604_v56  ;;  %1250 = vmatmul.f32.vlgmr.msra.gmra.mxu1 %v2491_v33  ;;  %v1012_v44 = vadd.f32 %v1011_v60, %v992_v10  ;;  %v1462_v33 = vmul.f32 %v2530_v35, %v1461_v39  ;;  %v1574_v39 = vld [vmem:[#allocation10 + $0x140] sm:$0xff] }
 0x183   :  { %v472_v61 = vld [vmem:[#allocation2 + $0x8f8] sm:$0xff]  ;;  %1360 = vmatpush.msrb.mxu3 %v672_v57 }
 0x184   :  { %v544_v62 = vld [vmem:[#allocation2 + $0xb38] sm:$0xff]  ;;  %1302 = vmatpush.msrb.mxu0 %v472_v61  ;;  %v1032_v50 = vadd.f32 %v1031_v17, %v1012_v44  ;;  %v1570_v44 = vld [vmem:[#allocation10 + $0x120] sm:$0xff] }
 0x185   :  { %v600_v63 = vld [vmem:[#allocation2 + $0xcf8] sm:$0xff]  ;;  %1320 = vmatpush.msrb.mxu1 %v544_v62 }
 0x186   :  { %v668_v0 = vld [vmem:[#allocation2 + $0xf18] sm:$0xff]  ;;  %1342 = vmatpush.msrb.mxu2 %v600_v63  ;;  %v1052_v57 = vadd.f32 %v1051_v51, %v1032_v50  ;;  %v1463_v63 = vmul.f32 0.5, %v1462_v33 }
 0x187   :  { %v468_v1 = vld [vmem:[#allocation2 + $0x8d8] sm:$0xff]  ;;  %1361 = vmatpush.msrb.mxu3 %v668_v0 }
 0x188   :  { %v540_v2 = vld [vmem:[#allocation2 + $0xb18] sm:$0xff]  ;;  %1303 = vmatpush.msrb.mxu0 %v468_v1  ;;  %v1384_v61 = vsel %vm1376_vm0, %v1052_v57, 0.0  ;;  %v1594_v1 = vld [vmem:[#allocation10 + $0x1e0] sm:$0xff] }
 0x189   :  { %v596_v7 = vld [vmem:[#allocation2 + $0xcd8] sm:$0xff]  ;;  %1321 = vmatpush.msrb.mxu1 %v540_v2  ;;  %v1385_v0 = vrot.slane %v1384_v61, 4 }
 0x18a   :  { %v664_v8 = vld [vmem:[#allocation2 + $0xef8] sm:$0xff]  ;;  %1343 = vmatpush.msrb.mxu2 %v596_v7 }
 0x18b   :  { %v464_v9 = vld [vmem:[#allocation2 + $0x8b8] sm:$0xff]  ;;  %1362 = vmatpush.msrb.mxu3 %v664_v8  ;;  %v1386_v2 = vadd.f32 %v1385_v0, %v1384_v61  ;;  %v1554_v8 = vld [vmem:[#allocation10 + $0xa0] sm:$0xff]  ;;  %v1593_v0 = vld [vmem:[#allocation10 + $0x1d8] sm:$0xff] }
 0x18c   :  { %v536_v12 = vld [vmem:[#allocation2 + $0xaf8] sm:$0xff]  ;;  %1304 = vmatpush.msrb.mxu0 %v464_v9 }
 0x18d   :  { %v592_v13 = vld [vmem:[#allocation2 + $0xcb8] sm:$0xff]  ;;  %1322 = vmatpush.msrb.mxu1 %v536_v12 }
 0x18e   :  { %v660_v14 = vld [vmem:[#allocation2 + $0xed8] sm:$0xff]  ;;  %1344 = vmatpush.msrb.mxu2 %v592_v13 }
 0x18f   :  { %v460_v16 = vld [vmem:[#allocation2 + $0x898] sm:$0xff]  ;;  %1363 = vmatpush.msrb.mxu3 %v660_v14 }
 0x190   :  { %v532_v18 = vld [vmem:[#allocation2 + $0xad8] sm:$0xff]  ;;  %1305 = vmatpush.msrb.mxu0 %v460_v16  ;;  %v1586_v16 = vld [vmem:[#allocation10 + $0x1a0] sm:$0xff] }
 0x191   :  { %v588_v49 = vld [vmem:[#allocation2 + $0xc98] sm:$0xff]  ;;  %1323 = vmatpush.msrb.mxu1 %v532_v18 }
 0x192   :  { %v656_v21 = vld [vmem:[#allocation2 + $0xeb8] sm:$0xff]  ;;  %1345 = vmatpush.msrb.mxu2 %v588_v49  ;;  %v2546_v49 = vld [vmem:[#allocation7] sm:$0xf] }
 0x193   :  { %v456_v22 = vld [vmem:[#allocation2 + $0x878] sm:$0xff]  ;;  %1364 = vmatpush.msrb.mxu3 %v656_v21  ;;  %v1505_v26 = vperm.slane %v2546_v49, 0 }
 0x194   :  { %v528_v55 = vld [vmem:[#allocation2 + $0xab8] sm:$0xff]  ;;  %1306 = vmatpush.msrb.mxu0 %v456_v22 }
 0x195   :  { %v584_v25 = vld [vmem:[#allocation2 + $0xc78] sm:$0xff]  ;;  %1324 = vmatpush.msrb.mxu1 %v528_v55  ;;  %v1582_v55 = vld [vmem:[#allocation10 + $0x180] sm:$0xff] }
 0x196   :  { %v652_v27 = vld [vmem:[#allocation2 + $0xe98] sm:$0xff]  ;;  %1346 = vmatpush.msrb.mxu2 %v584_v25 }
 0x197   :  { %v452_v31 = vld [vmem:[#allocation2 + $0x858] sm:$0xff]  ;;  %1365 = vmatpush.msrb.mxu3 %v652_v27 }
 0x198   :  { %v524_v32 = vld [vmem:[#allocation2 + $0xa98] sm:$0xff]  ;;  %1307 = vmatpush.msrb.mxu0 %v452_v31 }
 0x199   :  { %v580_v5 = vld [vmem:[#allocation2 + $0xc58] sm:$0xff]  ;;  %1325 = vmatpush.msrb.mxu1 %v524_v32  ;;  %v2556_v32 = vld [vmem:[#allocation8] sm:$0xf] }
 0x19a   :  { %v648_v28 = vld [vmem:[#allocation2 + $0xe78] sm:$0xff]  ;;  %1347 = vmatpush.msrb.mxu2 %v580_v5  ;;  %v1542_v5 = vld [vmem:[#allocation10 + $0x40] sm:$0xff] }
 0x19b   :  { %v448_v36 = vld [vmem:[#allocation2 + $0x838] sm:$0xff]  ;;  %1366 = vmatpush.msrb.mxu3 %v648_v28 }
 0x19c   :  { %v520_v37 = vld [vmem:[#allocation2 + $0xa78] sm:$0xff]  ;;  %1308 = vmatpush.msrb.mxu0 %v448_v36  ;;  %v1518_v36 = vperm.slane %v2556_v32, 0 }
 0x19d   :  { %v576_v23 = vld [vmem:[#allocation2 + $0xc38] sm:$0xff]  ;;  %1326 = vmatpush.msrb.mxu1 %v520_v37 }
 0x19e   :  { %v644_v38 = vld [vmem:[#allocation2 + $0xe58] sm:$0xff]  ;;  %1348 = vmatpush.msrb.mxu2 %v576_v23 }
 0x19f   :  { %v444_v40 = vld [vmem:[#allocation2 + $0x818] sm:$0xff]  ;;  %1367 = vmatpush.msrb.mxu3 %v644_v38  ;;  %v1538_v38 = vld [vmem:[#allocation10 + $0x20] sm:$0xff] }
 0x1a0   :  { %v516_v41 = vld [vmem:[#allocation2 + $0xa58] sm:$0xff]  ;;  %1309 = vmatpush.msrb.mxu0 %v444_v40 }
 0x1a1   :  { %v572_v29 = vld [vmem:[#allocation2 + $0xc18] sm:$0xff]  ;;  %1327 = vmatpush.msrb.mxu1 %v516_v41  ;;  %1310 = vmatmul.f32.vlgmr.msrb.gmra.mxu0 %v2500_v53  ;;  %v1464_v53 = vsub.f32 1.5, %v1463_v63 }
 0x1a2   :  { %v640_v42 = vld [vmem:[#allocation2 + $0xe38] sm:$0xff]  ;;  %1349 = vmatpush.msrb.mxu2 %v572_v29 }
 0x1a3   :  { %v1564_v45 = vld [vmem:[#allocation10 + $0xf0] sm:$0xff]  ;;  %1368 = vmatpush.msrb.mxu3 %v640_v42  ;;  %1350 = vmatmul.f32.vlgmr.msrb.gmra.mxu2 %v2495_v46  ;;  %v1558_v46 = vld [vmem:[#allocation10 + $0xc0] sm:$0xff]  ;;  %v1563_v33 = vld [vmem:[#allocation10 + $0xe8] sm:$0xff] }
 0x1a4   :  { %v512_v47 = vld [vmem:[#allocation2 + $0xa38] sm:$0xff]  ;;  %1668 = vmatpush.msra.mxu0 %v1564_v45  ;;  %v1534_v42 = vld [vmem:[#allocation10] sm:$0xff] }
 0x1a5   :  { %v636_v48 = vld [vmem:[#allocation2 + $0xe18] sm:$0xff]  ;;  %1328 = vmatpush.msrb.mxu1 %v512_v47 }
 0x1a6   :  { %v508_v56 = vld [vmem:[#allocation2 + $0xa18] sm:$0xff]  ;;  %1369 = vmatpush.msrb.mxu3 %v636_v48  ;;  %1669 = vmatpush.msra.mxu0 %v1562_v52  ;;  %v1565_v48 = vld [vmem:[#allocation10 + $0xf8] sm:$0xff]  ;;  %v1566_v52 = vld [vmem:[#allocation10 + $0x100] sm:$0xff] }
 0x1a7   :  { %1370 = vmatmul.f32.vlgmr.msrb.gmra.mxu3 %v2505_v59  ;;  %v1560_v58 = vld [vmem:[#allocation10 + $0xd0] sm:$0xff]  ;;  %1329 = vmatpush.msrb.mxu1 %v508_v56  ;;  %v1387_v59 = vrot.slane %v1386_v2, 2  ;;  %v1597_v56 = vld [vmem:[#allocation10 + $0x1f8] sm:$0xff]  ;;  %v1595_v61 = vld [vmem:[#allocation10 + $0x1e8] sm:$0xff] }
 0x1a8   :  { %v1596_v62 = vld [vmem:[#allocation10 + $0x1f0] sm:$0xff]  ;;  %1330 = vmatmul.f32.vlgmr.msrb.gmra.mxu1 %v2509_v6  ;;  %1670 = vmatpush.msra.mxu0 %v1560_v58  ;;  %v1465_v6 = vmul.f32 %v2530_v35, %v1464_v53  ;;  %v1561_v58 = vld [vmem:[#allocation10 + $0xd8] sm:$0xff]  ;;  %v1559_v63 = vld [vmem:[#allocation10 + $0xc8] sm:$0xff] }
 0x1a9   :  { %1688 = vmatpush.msra.mxu1 %v1596_v62  ;;  %v1556_v3 = vld [vmem:[#allocation10 + $0xb0] sm:$0xff]  ;;  %v1388_v9 = vadd.f32 %v1387_v59, %v1386_v2  ;;  %v1555_v2 = vld [vmem:[#allocation10 + $0xa8] sm:$0xff] }
 0x1aa   :  { %v1592_v7 = vld [vmem:[#allocation10 + $0x1d0] sm:$0xff]  ;;  %1671 = vmatpush.msra.mxu0 %v1558_v46  ;;  %v1469_v21 = vsel %vm1468_vm4, %v2530_v35, %v1465_v6  ;;  %v1557_v46 = vld [vmem:[#allocation10 + $0xb8] sm:$0xff]  ;;  %v1587_v53 = vld [vmem:[#allocation10 + $0x1a8] sm:$0xff] }
 0x1ab   :  { %1689 = vmatpush.msra.mxu1 %v1594_v1  ;;  %v1552_v12 = vld [vmem:[#allocation10 + $0x90] sm:$0xff]  ;;  %v1389_v14 = vrot.slane %v1388_v9, 1  ;;  %v1500_v4 = vmul.f32 %v1469_v21, %v2519_v11  ;;  %v1591_v1 = vld [vmem:[#allocation10 + $0x1c8] sm:$0xff]  ;;  %v1545_v21 = vld [vmem:[#allocation10 + $0x58] sm:$0xff] }
 0x1ac   :  { %1672 = vmatpush.msra.mxu0 %v1556_v3  ;;  %v1588_v13 = vld [vmem:[#allocation10 + $0x1b0] sm:$0xff]  ;;  %v1589_v3 = vld [vmem:[#allocation10 + $0x1b8] sm:$0xff] }
 0x1ad   :  { %1690 = vmatpush.msra.mxu1 %v1592_v7  ;;  %v1390_v18 = vadd.f32 %v1389_v14, %v1388_v9  ;;  %v1548_v19 = vld [vmem:[#allocation10 + $0x70] sm:$0xff]  ;;  %v1513_v28 = vmul.f32 %v1505_v26, %v1500_v4  ;;  %v1553_v7 = vld [vmem:[#allocation10 + $0x98] sm:$0xff]  ;;  %v1543_v26 = vld [vmem:[#allocation10 + $0x48] sm:$0xff] }
 0x1ae   :  { %1673 = vmatpush.msra.mxu0 %v1554_v8  ;;  %v1584_v20 = vld [vmem:[#allocation10 + $0x190] sm:$0xff]  ;;  %v1551_v8 = vld [vmem:[#allocation10 + $0x88] sm:$0xff]  ;;  %v1585_v9 = vld [vmem:[#allocation10 + $0x198] sm:$0xff] }
 0x1af   :  { %1691 = vmatpush.msra.mxu1 %v1590_v43  ;;  %v1413_v22 = vmul.f32 %v2515_v24, %v1390_v18  ;;  %v1544_v27 = vld [vmem:[#allocation10 + $0x50] sm:$0xff]  ;;  %v2560_v60 = vadd.f32 %v1518_v36, %v1513_v28  ;;  %v1506_v28 = vperm.slane %v2546_v49, 1 }
 0x1b0   :  { %1674 = vmatpush.msra.mxu0 %v1552_v12  ;;  %v1580_v30 = vld [vmem:[#allocation10 + $0x170] sm:$0xff]  ;;  %v1549_v12 = vld [vmem:[#allocation10 + $0x78] sm:$0xff] }
 0x1b1   :  { %1692 = vmatpush.msra.mxu1 %v1588_v13  ;;  %v2550_v25 = vsub.f32 %v1052_v57, %v1413_v22  ;;  %v1540_v11 = vld [vmem:[#allocation10 + $0x30] sm:$0xff]  ;;  %v1530_v47 = vmax.f32 %v2560_v60, 0.0 }
 0x1b2   :  { %1675 = vmatpush.msra.mxu0 %v1550_v15  ;;  %v1576_v37 = vld [vmem:[#allocation10 + $0x150] sm:$0xff]  ;;  %v1583_v15 = vld [vmem:[#allocation10 + $0x188] sm:$0xff] }
 0x1b3   :  { %1693 = vmatpush.msra.mxu1 %v1586_v16  ;;  %v1421_v31 = vmul.f32 %v2550_v25, %v2550_v25  ;;  %v1536_v41 = vld [vmem:[#allocation10 + $0x10] sm:$0xff]  ;;  %v1547_v16 = vld [vmem:[#allocation10 + $0x68] sm:$0xff] }
 0x1b4   :  { %1676 = vmatpush.msra.mxu0 %v1548_v19  ;;  %v1572_v17 = vld [vmem:[#allocation10 + $0x130] sm:$0xff]  ;;  %v1071_v19 = vpop.f32.mrf.mxu0 }
 0x1b5   :  { %1694 = vmatpush.msra.mxu1 %v1584_v20  ;;  %v1431_v35 = vsel %vm1376_vm0, %v1421_v31, 0.0  ;;  %v1568_v50 = vld [vmem:[#allocation10 + $0x110] sm:$0xff]  ;;  %v1581_v20 = vld [vmem:[#allocation10 + $0x178] sm:$0xff] }
 0x1b6   :  { %1677 = vmatpush.msra.mxu0 %v1546_v54  ;;  %v1432_v10 = vrot.slane %v1431_v35, 4  ;;  %v2566_v13 = vld [vmem:[#allocation5] sm:$0xf] }
 0x1b7   :  { %1695 = vmatpush.msra.mxu1 %v1582_v55  ;;  %v701_v6 = vperm.slane %v2566_v13, 2  ;;  %v1579_v55 = vld [vmem:[#allocation10 + $0x168] sm:$0xff]  ;;  %v1628_v4 = vld [vmem:[#allocation10 + $0x2f0] sm:$0xff] }
 0x1b8   :  { %1678 = vmatpush.msra.mxu0 %v1544_v27  ;;  %v1433_v23 = vadd.f32 %v1432_v10, %v1431_v35  ;;  %v1091_v27 = vpop.f32.mrf.mxu1  ;;  %1708 = vmatpush.msra.mxu2 %v1628_v4  ;;  %v1626_v35 = vld [vmem:[#allocation10 + $0x2e0] sm:$0xff]  ;;  %v1541_v10 = vld [vmem:[#allocation10 + $0x38] sm:$0xff]  ;;  %v1608_v60 = vld [vmem:[#allocation10 + $0x250] sm:$0xff] }
 0x1b9   :  { %1696 = vmatpush.msra.mxu1 %v1580_v30  ;;  %v1072_v22 = vadd.f32 %v1071_v19, %v701_v6  ;;  %v1604_v6 = vld [vmem:[#allocation10 + $0x230] sm:$0xff]  ;;  %v1625_v4 = vld [vmem:[#allocation10 + $0x2d8] sm:$0xff] }
 0x1ba   :  { %1679 = vmatpush.msra.mxu0 %v1542_v5  ;;  %v1434_v40 = vrot.slane %v1433_v23, 2  ;;  %v1111_v5 = vpop.f32.mrf.mxu2  ;;  %1709 = vmatpush.msra.mxu2 %v1626_v35  ;;  %v1619_v35 = vld [vmem:[#allocation10 + $0x2a8] sm:$0xff] }
 0x1bb   :  { %1697 = vmatpush.msra.mxu1 %v1578_v34  ;;  %v1092_v31 = vadd.f32 %v1091_v27, %v1072_v22  ;;  %v1577_v34 = vld [vmem:[#allocation10 + $0x158] sm:$0xff]  ;;  %v1623_v27 = vld [vmem:[#allocation10 + $0x2c8] sm:$0xff] }
 0x1bc   :  { %1680 = vmatpush.msra.mxu0 %v1540_v11  ;;  %v1435_v29 = vadd.f32 %v1434_v40, %v1433_v23  ;;  %v1624_v23 = vld [vmem:[#allocation10 + $0x2d0] sm:$0xff] }
 0x1bd   :  { %1698 = vmatpush.msra.mxu1 %v1576_v37  ;;  %v1112_v36 = vadd.f32 %v1111_v5, %v1092_v31  ;;  %v1575_v37 = vld [vmem:[#allocation10 + $0x148] sm:$0xff]  ;;  %1710 = vmatpush.msra.mxu2 %v1624_v23  ;;  %v1621_v5 = vld [vmem:[#allocation10 + $0x2b8] sm:$0xff] }
 0x1be   :  { %1681 = vmatpush.msra.mxu0 %v1538_v38  ;;  %v1436_v45 = vrot.slane %v1435_v29, 1  ;;  %v1613_v23 = vld [vmem:[#allocation10 + $0x278] sm:$0xff] }
 0x1bf   :  { %1699 = vmatpush.msra.mxu1 %v1574_v39  ;;  %v1539_v39 = vld [vmem:[#allocation10 + $0x28] sm:$0xff] }
 0x1c0   :  { %1682 = vmatpush.msra.mxu0 %v1536_v41  ;;  %v1437_v51 = vadd.f32 %v1436_v45, %v1435_v29  ;;  %v1519_v41 = vperm.slane %v2556_v32, 1  ;;  %v1573_v29 = vld [vmem:[#allocation10 + $0x138] sm:$0xff] }
 0x1c1   :  { %1700 = vmatpush.msra.mxu1 %v1572_v17  ;;  %v1537_v45 = vld [vmem:[#allocation10 + $0x18] sm:$0xff] }
 0x1c2   :  { %1683 = vmatpush.msra.mxu0 %v1534_v42  ;;  %v1453_v57 = vmul.f32 %v1437_v51, %v2515_v24  ;;  %v1622_v42 = vld [vmem:[#allocation10 + $0x2c0] sm:$0xff]  ;;  %v1620_v51 = vld [vmem:[#allocation10 + $0x2b0] sm:$0xff] }
 0x1c3   :  { %1701 = vmatpush.msra.mxu1 %v1570_v44  ;;  %1684 = vmatmul.f32.vlgmr.msra.gmra.mxu0 %v1530_v47 }
 0x1c4   :  { %1748 = vmatpush.msrb.mxu0 %v1565_v48  ;;  %v1457_v62 = vadd.f32 1e-05, %v1453_v57  ;;  %1711 = vmatpush.msra.mxu2 %v1622_v42  ;;  %v1605_v42 = vld [vmem:[#allocation10 + $0x238] sm:$0xff] }
 0x1c5   :  { %1702 = vmatpush.msra.mxu1 %v1568_v50  ;;  %v1571_v50 = vld [vmem:[#allocation10 + $0x128] sm:$0xff] }
 0x1c6   :  { %1749 = vmatpush.msrb.mxu0 %v1563_v33  ;;  %2028 = vrsqrt.f32 %v1457_v62  ;;  %vm1476_vm6 = vweird.f32 %v1457_v62  ;;  %v1535_v33 = vld [vmem:[#allocation10 + $0x8] sm:$0xff]  ;;  %1712 = vmatpush.msra.mxu2 %v1620_v51 }
 0x1c7   :  { %1703 = vmatpush.msra.mxu1 %v1566_v52 }
 0x1c8   :  { %1750 = vmatpush.msrb.mxu0 %v1561_v58  ;;  %v1569_v58 = vld [vmem:[#allocation10 + $0x118] sm:$0xff] }
 0x1c9   :  { %1768 = vmatpush.msrb.mxu1 %v1597_v56  ;;  %v1618_v56 = vld [vmem:[#allocation10 + $0x2a0] sm:$0xff] }
 0x1ca   :  { %1751 = vmatpush.msrb.mxu0 %v1559_v63  ;;  %1713 = vmatpush.msra.mxu2 %v1618_v56  ;;  %v1616_v63 = vld [vmem:[#allocation10 + $0x290] sm:$0xff]  ;;  %v1658_v56 = vld [vmem:[#allocation10 + $0x3e0] sm:$0xff] }
 0x1cb   :  { %1769 = vmatpush.msrb.mxu1 %v1595_v61  ;;  %v1131_v40 = vpop.f32.mrf.mxu3  ;;  %v1151_v48 = vpop.f32.mrf.mxu0 }
 0x1cc   :  { %1752 = vmatpush.msrb.mxu0 %v1557_v46  ;;  %v2029_v59 = vpop.eup %2028  ;;  %v1132_v17 = vadd.f32 %v1131_v40, %v1112_v36  ;;  %v1567_v46 = vld [vmem:[#allocation10 + $0x108] sm:$0xff]  ;;  %1714 = vmatpush.msra.mxu2 %v1616_v63 }
 0x1cd   :  { %1770 = vmatpush.msrb.mxu1 %v1593_v0  ;;  %v1471_v43 = vmul.f32 %v2029_v59, %v1457_v62  ;;  %vm1477_vm5 = vweird.f32 %v2029_v59  ;;  %v1615_v36 = vld [vmem:[#allocation10 + $0x288] sm:$0xff] }
 0x1ce   :  { %1753 = vmatpush.msrb.mxu0 %v1555_v2  ;;  %vm1478_vm7 = vmor %vm1476_vm6, %vm1477_vm5 }
 0x1cf   :  { %1771 = vmatpush.msrb.mxu1 %v1591_v1  ;;  %v1472_v14 = vmul.f32 %v2029_v59, %v1471_v43  ;;  %v1614_v1 = vld [vmem:[#allocation10 + $0x280] sm:$0xff] }
 0x1d0   :  { %1754 = vmatpush.msrb.mxu0 %v1553_v7  ;;  %1715 = vmatpush.msra.mxu2 %v1614_v1  ;;  %v1612_v7 = vld [vmem:[#allocation10 + $0x270] sm:$0xff] }
 0x1d1   :  { %1772 = vmatpush.msrb.mxu1 %v1589_v3  ;;  %v1473_v18 = vmul.f32 0.5, %v1472_v14 }
 0x1d2   :  { %1755 = vmatpush.msrb.mxu0 %v1551_v8  ;;  %v1171_v61 = vpop.f32.mrf.mxu1  ;;  %1716 = vmatpush.msra.mxu2 %v1612_v7  ;;  %v1507_v7 = vperm.slane %v2546_v49, 2 }
 0x1d3   :  { %1773 = vmatpush.msrb.mxu1 %v1587_v53  ;;  %v1474_v54 = vsub.f32 1.5, %v1473_v18  ;;  %v1191_v62 = vpop.f32.mrf.mxu2  ;;  %v1600_v18 = vld [vmem:[#allocation10 + $0x210] sm:$0xff] }
 0x1d4   :  { %1756 = vmatpush.msrb.mxu0 %v1549_v12 }
 0x1d5   :  { %1774 = vmatpush.msrb.mxu1 %v1585_v9  ;;  %v1475_v30 = vmul.f32 %v2029_v59, %v1474_v54  ;;  %v1606_v9 = vld [vmem:[#allocation10 + $0x240] sm:$0xff]  ;;  %v1627_v54 = vld [vmem:[#allocation10 + $0x2e8] sm:$0xff] }
 0x1d6   :  { %1757 = vmatpush.msrb.mxu0 %v1547_v16 }
 0x1d7   :  { %1775 = vmatpush.msrb.mxu1 %v1583_v15  ;;  %v1479_v11 = vsel %vm1478_vm7, %v2029_v59, %v1475_v30  ;;  %v1211_v3 = vpop.f32.mrf.mxu3  ;;  %v1610_v59 = vld [vmem:[#allocation10 + $0x260] sm:$0xff] }
 0x1d8   :  { %1758 = vmatpush.msrb.mxu0 %v1545_v21  ;;  %v1501_v38 = vmul.f32 %v1479_v11, %v2550_v25  ;;  %v1152_v25 = vadd.f32 %v1151_v48, %v1132_v17  ;;  %1717 = vmatpush.msra.mxu2 %v1610_v59  ;;  %v1602_v15 = vld [vmem:[#allocation10 + $0x220] sm:$0xff]  ;;  %v1629_v21 = vld [vmem:[#allocation10 + $0x2f8] sm:$0xff] }
 0x1d9   :  { %1776 = vmatpush.msrb.mxu1 %v1581_v20  ;;  %v1598_v20 = vld [vmem:[#allocation10 + $0x200] sm:$0xff] }
 0x1da   :  { %1759 = vmatpush.msrb.mxu0 %v1543_v26  ;;  %v1514_v44 = vmul.f32 %v1506_v28, %v1501_v38  ;;  %v1172_v0 = vadd.f32 %v1171_v61, %v1152_v25  ;;  %1718 = vmatpush.msra.mxu2 %v1608_v60  ;;  %v702_v25 = vperm.slane %v2566_v13, 3  ;;  %v1656_v61 = vld [vmem:[#allocation10 + $0x3d0] sm:$0xff] }
 0x1db   :  { %1777 = vmatpush.msrb.mxu1 %v1579_v55  ;;  %v1652_v13 = vld [vmem:[#allocation10 + $0x3b0] sm:$0xff] }
 0x1dc   :  { %1760 = vmatpush.msrb.mxu0 %v1541_v10  ;;  %v1527_v52 = vadd.f32 %v1519_v41, %v1514_v44  ;;  %v1192_v2 = vadd.f32 %v1191_v62, %v1172_v0  ;;  %1719 = vmatpush.msra.mxu2 %v1606_v9  ;;  %v1617_v10 = vld [vmem:[#allocation10 + $0x298] sm:$0xff]  ;;  %v1603_v44 = vld [vmem:[#allocation10 + $0x228] sm:$0xff]  ;;  %v1654_v0 = vld [vmem:[#allocation10 + $0x3c0] sm:$0xff] }
 0x1dd   :  { %1778 = vmatpush.msrb.mxu1 %v1577_v34  ;;  %v1609_v41 = vld [vmem:[#allocation10 + $0x258] sm:$0xff] }
 0x1de   :  { %1761 = vmatpush.msrb.mxu0 %v1539_v39  ;;  %v1531_v57 = vmax.f32 %v1527_v52, 0.0  ;;  %v1212_v53 = vadd.f32 %v1211_v3, %v1192_v2  ;;  %1720 = vmatpush.msra.mxu2 %v1604_v6  ;;  %v1611_v39 = vld [vmem:[#allocation10 + $0x268] sm:$0xff] }
 0x1df   :  { %1779 = vmatpush.msrb.mxu1 %v1575_v37 }
 0x1e0   :  { %1762 = vmatpush.msrb.mxu0 %v1537_v45  ;;  %1704 = vmatmul.f32.vlgmr.msra.gmra.mxu1 %v1531_v57  ;;  %v1391_v8 = vsel %vm1376_vm0, %v1212_v53, 0.0  ;;  %v1601_v45 = vld [vmem:[#allocation10 + $0x218] sm:$0xff] }
 0x1e1   :  { %1780 = vmatpush.msrb.mxu1 %v1573_v29  ;;  %v1392_v43 = vrot.slane %v1391_v8, 4  ;;  %1721 = vmatpush.msra.mxu2 %v1602_v15  ;;  %v1607_v29 = vld [vmem:[#allocation10 + $0x248] sm:$0xff]  ;;  %v1646_v15 = vld [vmem:[#allocation10 + $0x380] sm:$0xff] }
 0x1e2   :  { %1763 = vmatpush.msrb.mxu0 %v1535_v33  ;;  %v1660_v33 = vld [vmem:[#allocation10 + $0x3f0] sm:$0xff] }
 0x1e3   :  { %1781 = vmatpush.msrb.mxu1 %v1571_v50  ;;  %1764 = vmatmul.f32.vlgmr.msrb.gmra.mxu0 %v1530_v47  ;;  %v1393_v47 = vadd.f32 %v1392_v43, %v1391_v8  ;;  %v1599_v50 = vld [vmem:[#allocation10 + $0x208] sm:$0xff]  ;;  %v1650_v8 = vld [vmem:[#allocation10 + $0x3a0] sm:$0xff] }
 0x1e4   :  { %1722 = vmatpush.msra.mxu2 %v1600_v18  ;;  %1728 = vmatpush.msra.mxu3 %v1660_v33 }
 0x1e5   :  { %1782 = vmatpush.msrb.mxu1 %v1569_v58  ;;  %v1394_v12 = vrot.slane %v1393_v47, 2 }
 0x1e6   :  { %1723 = vmatpush.msra.mxu2 %v1598_v20  ;;  %1729 = vmatpush.msra.mxu3 %v1658_v56  ;;  %v1644_v20 = vld [vmem:[#allocation10 + $0x370] sm:$0xff]  ;;  %v1647_v56 = vld [vmem:[#allocation10 + $0x388] sm:$0xff] }
 0x1e7   :  { %1783 = vmatpush.msrb.mxu1 %v1567_v46  ;;  %v1395_v14 = vadd.f32 %v1394_v12, %v1393_v47  ;;  %v1520_v47 = vperm.slane %v2556_v32, 2  ;;  %v1648_v12 = vld [vmem:[#allocation10 + $0x390] sm:$0xff] }
 0x1e8   :  { %1784 = vmatmul.f32.vlgmr.msrb.gmra.mxu1 %v1531_v57  ;;  %1788 = vmatpush.msrb.mxu2 %v1629_v21 }
 0x1e9   :  { %v1396_v16 = vrot.slane %v1395_v14, 1  ;;  %1730 = vmatpush.msra.mxu3 %v1656_v61  ;;  %v1643_v61 = vld [vmem:[#allocation10 + $0x368] sm:$0xff] }
 0x1ea   :  { %1789 = vmatpush.msrb.mxu2 %v1627_v54 }
 0x1eb   :  { %v1397_v19 = vadd.f32 %v1396_v16, %v1395_v14  ;;  %1731 = vmatpush.msra.mxu3 %v1654_v0 }
 0x1ec   :  { %1790 = vmatpush.msrb.mxu2 %v1625_v4 }
 0x1ed   :  { %v1414_v22 = vmul.f32 %v2515_v24, %v1397_v19  ;;  %1732 = vmatpush.msra.mxu3 %v1652_v13  ;;  %v1635_v13 = vld [vmem:[#allocation10 + $0x328] sm:$0xff] }
 0x1ee   :  { %1791 = vmatpush.msrb.mxu2 %v1623_v27  ;;  %v1640_v27 = vld [vmem:[#allocation10 + $0x350] sm:$0xff] }
 0x1ef   :  { %v2577_v55 = vsub.f32 %v1212_v53, %v1414_v22  ;;  %1733 = vmatpush.msra.mxu3 %v1650_v8 }
 0x1f0   :  { %1792 = vmatpush.msrb.mxu2 %v1621_v5 }
 0x1f1   :  { %v1422_v26 = vmul.f32 %v2577_v55, %v2577_v55  ;;  %1734 = vmatpush.msra.mxu3 %v1648_v12 }
 0x1f2   :  { %1793 = vmatpush.msrb.mxu2 %v1619_v35  ;;  %v1636_v35 = vld [vmem:[#allocation10 + $0x330] sm:$0xff] }
 0x1f3   :  { %v1438_v30 = vsel %vm1376_vm0, %v1422_v26, 0.0  ;;  %1735 = vmatpush.msra.mxu3 %v1646_v15 }
 0x1f4   :  { %v1439_v31 = vrot.slane %v1438_v30, 4  ;;  %1794 = vmatpush.msrb.mxu2 %v1617_v10  ;;  %v1634_v10 = vld [vmem:[#allocation10 + $0x320] sm:$0xff] }
 0x1f5   :  { %1736 = vmatpush.msra.mxu3 %v1644_v20 }
 0x1f6   :  { %v1440_v34 = vadd.f32 %v1439_v31, %v1438_v30  ;;  %1795 = vmatpush.msrb.mxu2 %v1615_v36  ;;  %v1638_v31 = vld [vmem:[#allocation10 + $0x340] sm:$0xff]  ;;  %v1632_v36 = vld [vmem:[#allocation10 + $0x310] sm:$0xff] }
 0x1f8   :  { %v1441_v28 = vrot.slane %v1440_v34, 2  ;;  %1796 = vmatpush.msrb.mxu2 %v1613_v23  ;;  %v1630_v23 = vld [vmem:[#allocation10 + $0x300] sm:$0xff] }
 0x1fa   :  { %v1442_v11 = vadd.f32 %v1441_v28, %v1440_v34  ;;  %1797 = vmatpush.msrb.mxu2 %v1611_v39 }
 0x1fc   :  { %v1443_v37 = vrot.slane %v1442_v11, 1  ;;  %1798 = vmatpush.msrb.mxu2 %v1609_v41 }
 0x1fe   :  { %v1444_v38 = vadd.f32 %v1443_v37, %v1442_v11  ;;  %1799 = vmatpush.msrb.mxu2 %v1607_v29  ;;  %v1231_v58 = vpop.f32.mrf.mxu0 }
 0x1ff   :  { %v1232_v62 = vadd.f32 %v1231_v58, %v702_v25  ;;  %v1251_v46 = vpop.f32.mrf.mxu1  ;;  %v1649_v25 = vld [vmem:[#allocation10 + $0x398] sm:$0xff] }
 0x200   :  { %v1454_v40 = vmul.f32 %v1444_v38, %v2515_v24  ;;  %1800 = vmatpush.msrb.mxu2 %v1605_v42  ;;  %v1661_v38 = vld [vmem:[#allocation10 + $0x3f8] sm:$0xff]  ;;  %v1655_v42 = vld [vmem:[#allocation10 + $0x3c8] sm:$0xff] }
 0x201   :  { %v1252_v2 = vadd.f32 %v1251_v46, %v1232_v62  ;;  %v1645_v58 = vld [vmem:[#allocation10 + $0x378] sm:$0xff]  ;;  %v1639_v46 = vld [vmem:[#allocation10 + $0x348] sm:$0xff] }
 0x202   :  { %v1458_v17 = vadd.f32 1e-05, %v1454_v40  ;;  %1801 = vmatpush.msrb.mxu2 %v1603_v44  ;;  %v1271_v3 = vpop.f32.mrf.mxu2  ;;  %v1659_v40 = vld [vmem:[#allocation10 + $0x3e8] sm:$0xff] }
 0x203   :  { %v1272_v59 = vadd.f32 %v1271_v3, %v1252_v2  ;;  %v1291_v60 = vpop.f32.mrf.mxu3  ;;  %v1637_v2 = vld [vmem:[#allocation10 + $0x338] sm:$0xff] }
 0x204   :  { %2030 = vrsqrt.f32 %v1458_v17  ;;  %1802 = vmatpush.msrb.mxu2 %v1601_v45  ;;  %vm1486_vm9 = vweird.f32 %v1458_v17  ;;  %v1653_v45 = vld [vmem:[#allocation10 + $0x3b8] sm:$0xff] }
 0x205   :  { %v1292_v9 = vadd.f32 %v1291_v60, %v1272_v59  ;;  %v1631_v59 = vld [vmem:[#allocation10 + $0x308] sm:$0xff] }
 0x206   :  { %1803 = vmatpush.msrb.mxu2 %v1599_v50  ;;  %v1651_v50 = vld [vmem:[#allocation10 + $0x3a8] sm:$0xff] }
 0x20a   :  { %v2031_v48 = vpop.eup %2030 }
 0x20b   :  { %v1481_v51 = vmul.f32 %v2031_v48, %v1458_v17  ;;  %vm1487_vm8 = vweird.f32 %v2031_v48  ;;  %v1657_v17 = vld [vmem:[#allocation10 + $0x3d8] sm:$0xff] }
 0x20c   :  { %vm1488_vm10 = vmor %vm1486_vm9, %vm1487_vm8 }
 0x20d   :  { %v1482_v52 = vmul.f32 %v2031_v48, %v1481_v51 }
 0x20f   :  { %v1483_v57 = vmul.f32 0.5, %v1482_v52 }
 0x211   :  { %v1484_v63 = vsub.f32 1.5, %v1483_v57 }
 0x213   :  { %v1485_v1 = vmul.f32 %v2031_v48, %v1484_v63  ;;  %v1641_v63 = vld [vmem:[#allocation10 + $0x358] sm:$0xff] }
 0x215   :  { %v1489_v53 = vsel %vm1488_vm10, %v2031_v48, %v1485_v1 }
 0x216   :  { %v1502_v43 = vmul.f32 %v1489_v53, %v2577_v55  ;;  %v1642_v55 = vld [vmem:[#allocation10 + $0x360] sm:$0xff]  ;;  %v1633_v53 = vld [vmem:[#allocation10 + $0x318] sm:$0xff] }
 0x217   :  { %1737 = vmatpush.msra.mxu3 %v1642_v55 }
 0x218   :  { %v1515_v6 = vmul.f32 %v1507_v7, %v1502_v43 }
 0x219   :  { %1738 = vmatpush.msra.mxu3 %v1640_v27 }
 0x21a   :  { %v1528_v18 = vadd.f32 %v1520_v47, %v1515_v6  ;;  %v1508_v6 = vperm.slane %v2546_v49, 3 }
 0x21b   :  { %1739 = vmatpush.msra.mxu3 %v1638_v31 }
 0x21c   :  { %v1532_v22 = vmax.f32 %v1528_v18, 0.0 }
 0x21d   :  { %1740 = vmatpush.msra.mxu3 %v1636_v35 }
 0x21e   :  { %v1311_v14 = vpop.f32.mrf.mxu0  ;;  %1724 = vmatmul.f32.vlgmr.msra.gmra.mxu2 %v1532_v22 }
 0x21f   :  { %v1312_v16 = vadd.f32 %v1311_v14, %v1292_v9  ;;  %1741 = vmatpush.msra.mxu3 %v1634_v10  ;;  %v1921_v10 = vld [vmem:[#allocation16 + $0x78] sm:$0xff] }
 0x220   :  { %1942 = vmatpush.msra.mxu0 %v1921_v10 }
 0x221   :  { %1742 = vmatpush.msra.mxu3 %v1632_v36 }
 0x223   :  { %1743 = vmatpush.msra.mxu3 %v1630_v23  ;;  %v1920_v23 = vld [vmem:[#allocation16 + $0x70] sm:$0xff] }
 0x224   :  { %1943 = vmatpush.msra.mxu0 %v1920_v23 }
 0x225   :  { %v1331_v19 = vpop.f32.mrf.mxu1  ;;  %1808 = vmatpush.msrb.mxu3 %v1661_v38 }
 0x226   :  { %v1332_v21 = vadd.f32 %v1331_v19, %v1312_v16  ;;  %v1351_v54 = vpop.f32.mrf.mxu2  ;;  %1804 = vmatmul.f32.vlgmr.msrb.gmra.mxu2 %v1532_v22  ;;  %v1521_v16 = vperm.slane %v2556_v32, 3 }
 0x227   :  { %1809 = vmatpush.msrb.mxu3 %v1659_v40  ;;  %v1919_v40 = vld [vmem:[#allocation16 + $0x68] sm:$0xff] }
 0x228   :  { %v1352_v4 = vadd.f32 %v1351_v54, %v1332_v21  ;;  %v1662_v21 = vld [vmem:[#allocation11] sm:$0x3]  ;;  %1944 = vmatpush.msra.mxu0 %v1919_v40  ;;  %v1922_v40 = vld [vmem:[#allocation16 + $0x80] sm:$0xff] }
 0x229   :  { %1810 = vmatpush.msrb.mxu3 %v1657_v17  ;;  %v1664_v22 = vperm.slane %v1662_v21, 0 }
 0x22a   :  { %v1371_v26 = vpop.f32.mrf.mxu3 }
 0x22b   :  { %v1372_v30 = vadd.f32 %v1371_v26, %v1352_v4  ;;  %1811 = vmatpush.msrb.mxu3 %v1655_v42  ;;  %v1918_v42 = vld [vmem:[#allocation16 + $0x60] sm:$0xff] }
 0x22c   :  { %1945 = vmatpush.msra.mxu0 %v1918_v42 }
 0x22d   :  { %v1398_v5 = vsel %vm1376_vm0, %v1372_v30, 0.0  ;;  %1812 = vmatpush.msrb.mxu3 %v1653_v45 }
 0x22e   :  { %v1399_v34 = vrot.slane %v1398_v5, 4 }
 0x22f   :  { %1813 = vmatpush.msrb.mxu3 %v1651_v50  ;;  %v1937_v50 = vld [vmem:[#allocation16 + $0xf8] sm:$0xff] }
 0x230   :  { %v1400_v28 = vadd.f32 %v1399_v34, %v1398_v5  ;;  %1962 = vmatpush.msra.mxu1 %v1937_v50  ;;  %v1828_v50 = vld [vmem:[#allocation13] sm:$0x3] }
 0x231   :  { %1814 = vmatpush.msrb.mxu3 %v1649_v25  ;;  %v1916_v25 = vld [vmem:[#allocation16 + $0x50] sm:$0xff] }
 0x232   :  { %v1401_v11 = vrot.slane %v1400_v28, 2 }
 0x233   :  { %1815 = vmatpush.msrb.mxu3 %v1647_v56 }
 0x234   :  { %v1402_v37 = vadd.f32 %v1401_v11, %v1400_v28 }
 0x235   :  { %1816 = vmatpush.msrb.mxu3 %v1645_v58  ;;  %v1915_v58 = vld [vmem:[#allocation16 + $0x48] sm:$0xff] }
 0x236   :  { %v1403_v39 = vrot.slane %v1402_v37, 1 }
 0x237   :  { %1817 = vmatpush.msrb.mxu3 %v1643_v61  ;;  %v1935_v61 = vld [vmem:[#allocation16 + $0xe8] sm:$0xff] }
 0x238   :  { %v1404_v41 = vadd.f32 %v1403_v39, %v1402_v37 }
 0x239   :  { %1818 = vmatpush.msrb.mxu3 %v1641_v63 }
 0x23a   :  { %v1415_v29 = vmul.f32 %v2515_v24, %v1404_v41 }
 0x23b   :  { %1819 = vmatpush.msrb.mxu3 %v1639_v46  ;;  %v1934_v46 = vld [vmem:[#allocation16 + $0xe0] sm:$0xff] }
 0x23c   :  { %v1419_v44 = vsub.f32 %v1372_v30, %v1415_v29  ;;  %v1665_v30 = vperm.slane %v1662_v21, 1  ;;  %v1929_v21 = vld [vmem:[#allocation16 + $0xb8] sm:$0xff] }
 0x23d   :  { %1820 = vmatpush.msrb.mxu3 %v1637_v2 }
 0x23e   :  { %v1423_v48 = vmul.f32 %v1419_v44, %v1419_v44 }
 0x23f   :  { %1821 = vmatpush.msrb.mxu3 %v1635_v13  ;;  %v1933_v13 = vld [vmem:[#allocation16 + $0xd8] sm:$0xff] }
 0x240   :  { %v1445_v51 = vsel %vm1376_vm0, %v1423_v48, 0.0  ;;  %v1685_v54 = vpop.f32.mrf.mxu0  ;;  %v1917_v48 = vld [vmem:[#allocation16 + $0x58] sm:$0xff] }
 0x241   :  { %v1446_v33 = vrot.slane %v1445_v51, 4  ;;  %1822 = vmatpush.msrb.mxu3 %v1633_v53  ;;  %v1686_v26 = vadd.f32 %v1685_v54, %v1664_v22  ;;  %1946 = vmatpush.msra.mxu0 %v1917_v48 }
 0x243   :  { %v1447_v52 = vadd.f32 %v1446_v33, %v1445_v51  ;;  %1823 = vmatpush.msrb.mxu3 %v1631_v59  ;;  %1947 = vmatpush.msra.mxu0 %v1916_v25  ;;  %v1912_v59 = vld [vmem:[#allocation16 + $0x30] sm:$0xff] }
 0x245   :  { %v1448_v57 = vrot.slane %v1447_v52, 2  ;;  %1948 = vmatpush.msra.mxu0 %v1915_v58 }
 0x247   :  { %v1449_v62 = vadd.f32 %v1448_v57, %v1447_v52  ;;  %v1936_v52 = vld [vmem:[#allocation16 + $0xf0] sm:$0xff] }
 0x248   :  { %1963 = vmatpush.msra.mxu1 %v1936_v52 }
 0x249   :  { %v1450_v0 = vrot.slane %v1449_v62, 1 }
 0x24a   :  { %1964 = vmatpush.msra.mxu1 %v1935_v61 }
 0x24b   :  { %v1451_v1 = vadd.f32 %v1450_v0, %v1449_v62  ;;  %v1914_v0 = vld [vmem:[#allocation16 + $0x40] sm:$0xff] }
 0x24c   :  { %1949 = vmatpush.msra.mxu0 %v1914_v0  ;;  %1965 = vmatpush.msra.mxu1 %v1934_v46 }
 0x24d   :  { %v1455_v3 = vmul.f32 %v1451_v1, %v2515_v24 }
 0x24e   :  { %1966 = vmatpush.msra.mxu1 %v1933_v13  ;;  %v1892_v13 = vperm.slane %v1828_v50, 1 }
 0x24f   :  { %v1459_v7 = vadd.f32 1e-05, %v1455_v3  ;;  %v1913_v3 = vld [vmem:[#allocation16 + $0x38] sm:$0xff] }
 0x250   :  { %1950 = vmatpush.msra.mxu0 %v1913_v3 }
 0x251   :  { %2032 = vrsqrt.f32 %v1459_v7  ;;  %vm1496_vm12 = vweird.f32 %v1459_v7 }
 0x252   :  { %1951 = vmatpush.msra.mxu0 %v1912_v59 }
 0x257   :  { %v2033_v8 = vpop.eup %2032 }
 0x258   :  { %v1491_v43 = vmul.f32 %v2033_v8, %v1459_v7  ;;  %vm1497_vm11 = vweird.f32 %v2033_v8 }
 0x259   :  { %vm1498_vm13 = vmor %vm1496_vm12, %vm1497_vm11 }
 0x25a   :  { %v1492_v60 = vmul.f32 %v2033_v8, %v1491_v43 }
 0x25c   :  { %v1493_v47 = vmul.f32 0.5, %v1492_v60 }
 0x25d   :  { %v1705_v55 = vpop.f32.mrf.mxu1 }
 0x25e   :  { %v1494_v9 = vsub.f32 1.5, %v1493_v47  ;;  %v1706_v27 = vadd.f32 %v1705_v55, %v1686_v26  ;;  %v1908_v55 = vld [vmem:[#allocation16 + $0x10] sm:$0xff] }
 0x260   :  { %v1495_v12 = vmul.f32 %v2033_v8, %v1494_v9  ;;  %v1765_v5 = vpop.f32.mrf.mxu0  ;;  %v1911_v9 = vld [vmem:[#allocation16 + $0x28] sm:$0xff] }
 0x261   :  { %v1766_v28 = vadd.f32 %v1765_v5, %v1665_v30  ;;  %1952 = vmatpush.msra.mxu0 %v1911_v9  ;;  %v1927_v5 = vld [vmem:[#allocation16 + $0xa8] sm:$0xff] }
 0x262   :  { %v1499_v14 = vsel %vm1498_vm13, %v2033_v8, %v1495_v12  ;;  %v1932_v8 = vld [vmem:[#allocation16 + $0xd0] sm:$0xff]  ;;  %v1931_v12 = vld [vmem:[#allocation16 + $0xc8] sm:$0xff] }
 0x263   :  { %v1503_v15 = vmul.f32 %v1499_v14, %v1419_v44  ;;  %1967 = vmatpush.msra.mxu1 %v1932_v8 }
 0x265   :  { %v1516_v18 = vmul.f32 %v1508_v6, %v1503_v15  ;;  %v1785_v35 = vpop.f32.mrf.mxu1  ;;  %1968 = vmatpush.msra.mxu1 %v1931_v12  ;;  %v1910_v15 = vld [vmem:[#allocation16 + $0x20] sm:$0xff] }
 0x266   :  { %v1786_v37 = vadd.f32 %v1785_v35, %v1766_v28  ;;  %1953 = vmatpush.msra.mxu0 %v1910_v15  ;;  %v1906_v35 = vld [vmem:[#allocation16] sm:$0xff] }
 0x267   :  { %v1529_v19 = vadd.f32 %v1521_v16, %v1516_v18  ;;  %v1930_v16 = vld [vmem:[#allocation16 + $0xc0] sm:$0xff] }
 0x268   :  { %1969 = vmatpush.msra.mxu1 %v1930_v16  ;;  %v1926_v28 = vld [vmem:[#allocation16 + $0xa0] sm:$0xff] }
 0x269   :  { %v1533_v20 = vmax.f32 %v1529_v19, 0.0 }
 0x26a   :  { %1970 = vmatpush.msra.mxu1 %v1929_v21 }
 0x26b   :  { %1744 = vmatmul.f32.vlgmr.msra.gmra.mxu3 %v1533_v20 }
 0x273   :  { %1824 = vmatmul.f32.vlgmr.msrb.gmra.mxu3 %v1533_v20  ;;  %v1909_v20 = vld [vmem:[#allocation16 + $0x18] sm:$0xff] }
 0x274   :  { %1954 = vmatpush.msra.mxu0 %v1909_v20 }
 0x276   :  { %1955 = vmatpush.msra.mxu0 %v1908_v55 }
 0x2a1   :  { %v1725_v4 = vpop.f32.mrf.mxu2 }
 0x2a2   :  { %v1726_v31 = vadd.f32 %v1725_v4, %v1706_v27  ;;  %v1928_v4 = vld [vmem:[#allocation16 + $0xb0] sm:$0xff] }
 0x2a3   :  { %1971 = vmatpush.msra.mxu1 %v1928_v4 }
 0x2a5   :  { %1972 = vmatpush.msra.mxu1 %v1927_v5 }
 0x2a7   :  { %1973 = vmatpush.msra.mxu1 %v1926_v28 }
 0x2a9   :  { %v1805_v11 = vpop.f32.mrf.mxu2 }
 0x2aa   :  { %v1806_v39 = vadd.f32 %v1805_v11, %v1786_v37  ;;  %v1925_v11 = vld [vmem:[#allocation16 + $0x98] sm:$0xff] }
 0x2ab   :  { %1974 = vmatpush.msra.mxu1 %v1925_v11 }
 0x2ee   :  { %v1745_v49 = vpop.f32.mrf.mxu3 }
 0x2ef   :  { %v1746_v34 = vadd.f32 %v1745_v49, %v1726_v31  ;;  %v1907_v31 = vld [vmem:[#allocation16 + $0x8] sm:$0xff] }
 0x2f0   :  { %1956 = vmatpush.msra.mxu0 %v1907_v31 }
 0x2f1   :  { %v1830_v32 = vsel %vm1376_vm0, %v1746_v34, 0.0 }
 0x2f2   :  { %v1831_v36 = vrot.slane %v1830_v32, 4  ;;  %1957 = vmatpush.msra.mxu0 %v1906_v35 }
 0x2f4   :  { %v1832_v38 = vadd.f32 %v1831_v36, %v1830_v32  ;;  %v1924_v36 = vld [vmem:[#allocation16 + $0x90] sm:$0xff] }
 0x2f5   :  { %1975 = vmatpush.msra.mxu1 %v1924_v36 }
 0x2f6   :  { %v1833_v41 = vrot.slane %v1832_v38, 2  ;;  %v1825_v17 = vpop.f32.mrf.mxu3 }
 0x2f7   :  { %v1826_v29 = vadd.f32 %v1825_v17, %v1806_v39 }
 0x2f8   :  { %v1834_v44 = vadd.f32 %v1833_v41, %v1832_v38  ;;  %v1923_v38 = vld [vmem:[#allocation16 + $0x88] sm:$0xff] }
 0x2f9   :  { %v1837_v45 = vsel %vm1376_vm0, %v1826_v29, 0.0  ;;  %1976 = vmatpush.msra.mxu1 %v1923_v38 }
 0x2fa   :  { %v1835_v51 = vrot.slane %v1834_v44, 1  ;;  %v1838_v33 = vrot.slane %v1837_v45, 4 }
 0x2fb   :  { %1977 = vmatpush.msra.mxu1 %v1922_v40 }
 0x2fc   :  { %v1836_v56 = vadd.f32 %v1835_v51, %v1834_v44  ;;  %v1839_v57 = vadd.f32 %v1838_v33, %v1837_v45 }
 0x2fe   :  { %v1844_v62 = vmul.f32 %v1836_v56, %v2515_v24  ;;  %v1840_v63 = vrot.slane %v1839_v57, 2  ;;  %v1829_v56 = vld [vmem:[#allocation14] sm:$0x3] }
 0x2ff   :  { %v1899_v8 = vperm.slane %v1829_v56, 1 }
 0x300   :  { %v2596_v1 = vsub.f32 %v1746_v34, %v1844_v62  ;;  %v1841_v2 = vadd.f32 %v1840_v63, %v1839_v57  ;;  %v1891_v57 = vperm.slane %v1828_v50, 0  ;;  %v1898_v62 = vperm.slane %v1829_v56, 0 }
 0x302   :  { %v1848_v7 = vmul.f32 %v2596_v1, %v2596_v1  ;;  %v1842_v53 = vrot.slane %v1841_v2, 1 }
 0x304   :  { %v1850_v43 = vsel %vm1376_vm0, %v1848_v7, 0.0  ;;  %v1843_v60 = vadd.f32 %v1842_v53, %v1841_v2 }
 0x305   :  { %v1851_v47 = vrot.slane %v1850_v43, 4 }
 0x306   :  { %v1845_v6 = vmul.f32 %v1843_v60, %v2515_v24 }
 0x307   :  { %v1852_v14 = vadd.f32 %v1851_v47, %v1850_v43 }
 0x308   :  { %v2602_v18 = vsub.f32 %v1826_v29, %v1845_v6 }
 0x309   :  { %v1853_v19 = vrot.slane %v1852_v14, 2 }
 0x30a   :  { %v1849_v22 = vmul.f32 %v2602_v18, %v2602_v18 }
 0x30b   :  { %v1854_v54 = vadd.f32 %v1853_v19, %v1852_v14 }
 0x30c   :  { %v1857_v26 = vsel %vm1376_vm0, %v1849_v22, 0.0 }
 0x30d   :  { %v1855_v27 = vrot.slane %v1854_v54, 1  ;;  %v1858_v30 = vrot.slane %v1857_v26, 4 }
 0x30f   :  { %v1856_v49 = vadd.f32 %v1855_v27, %v1854_v54  ;;  %v1859_v34 = vadd.f32 %v1858_v30, %v1857_v26 }
 0x311   :  { %v1864_v32 = vmul.f32 %v1856_v49, %v2515_v24  ;;  %v1860_v10 = vrot.slane %v1859_v34, 2 }
 0x313   :  { %v1866_v37 = vadd.f32 1e-05, %v1864_v32  ;;  %v1861_v23 = vadd.f32 %v1860_v10, %v1859_v34 }
 0x315   :  { %2034 = vrsqrt.f32 %v1866_v37  ;;  %v1862_v39 = vrot.slane %v1861_v23, 1  ;;  %vm1874_vm15 = vweird.f32 %v1866_v37 }
 0x317   :  { %v1863_v41 = vadd.f32 %v1862_v39, %v1861_v23 }
 0x319   :  { %v1865_v17 = vmul.f32 %v1863_v41, %v2515_v24 }
 0x31b   :  { %v2035_v29 = vpop.eup %2034  ;;  %v1867_v42 = vadd.f32 1e-05, %v1865_v17 }
 0x31c   :  { %v1869_v44 = vmul.f32 %v2035_v29, %v1866_v37  ;;  %vm1875_vm14 = vweird.f32 %v2035_v29 }
 0x31d   :  { %2036 = vrsqrt.f32 %v1867_v42  ;;  %vm1876_vm0 = vmor %vm1874_vm15, %vm1875_vm14  ;;  %vm1884_vm2 = vweird.f32 %v1867_v42 }
 0x31e   :  { %v1870_v45 = vmul.f32 %v2035_v29, %v1869_v44 }
 0x320   :  { %v1871_v48 = vmul.f32 0.5, %v1870_v45 }
 0x322   :  { %v1872_v51 = vsub.f32 1.5, %v1871_v48 }
 0x323   :  { %v2037_v33 = vpop.eup %2036 }
 0x324   :  { %v1873_v25 = vmul.f32 %v2035_v29, %v1872_v51  ;;  %v1879_v52 = vmul.f32 %v2037_v33, %v1867_v42  ;;  %vm1885_vm1 = vweird.f32 %v2037_v33 }
 0x325   :  { %vm1886_vm3 = vmor %vm1884_vm2, %vm1885_vm1 }
 0x326   :  { %v1877_v58 = vsel %vm1876_vm0, %v2035_v29, %v1873_v25  ;;  %v1880_v61 = vmul.f32 %v2037_v33, %v1879_v52 }
 0x327   :  { %v1888_v24 = vmul.f32 %v1877_v58, %v2596_v1  ;;  %v2023_v1 = vld [vmem:[#allocation17] ss:$0 sm:$0xff] }
 0x328   :  { %v1881_v63 = vmul.f32 0.5, %v1880_v61 }
 0x329   :  { %v1895_v0 = vmul.f32 %v1891_v57, %v1888_v24 }
 0x32a   :  { %v1882_v46 = vsub.f32 1.5, %v1881_v63 }
 0x32b   :  { %v1902_v2 = vadd.f32 %v1898_v62, %v1895_v0 }
 0x32c   :  { %v1883_v3 = vmul.f32 %v2037_v33, %v1882_v46 }
 0x32d   :  { %v1904_v7 = vmax.f32 %v1902_v2, 0.0 }
 0x32e   :  { %v1887_v53 = vsel %vm1886_vm3, %v2037_v33, %v1883_v3 }
 0x32f   :  { %v1889_v59 = vmul.f32 %v1887_v53, %v2602_v18  ;;  %1958 = vmatmul.f32.vlgmr.msra.gmra.mxu0 %v1904_v7 }
 0x331   :  { %v1896_v43 = vmul.f32 %v1892_v13, %v1889_v59 }
 0x333   :  { %v1903_v60 = vadd.f32 %v1899_v8, %v1896_v43 }
 0x335   :  { %v1905_v47 = vmax.f32 %v1903_v60, 0.0 }
 0x337   :  { %1978 = vmatmul.f32.vlgmr.msra.gmra.mxu1 %v1905_v47 }
 0x3ac   :  { %v1959_v9 = vpop.f32.mrf.mxu0 }
 0x3ad   :  { %v1960_v12 = vadd.f32 %v2023_v1, %v1959_v9 }
 0x3b4   :  { %v1979_v6 = vpop.f32.mrf.mxu1 }
 0x3b5   :  { %v1980_v14 = vadd.f32 %v1979_v6, %v1960_v12 }
 0x3b7   :  { %1982 = vst [vmem:[#allocation19] sm:$0xf] %v1980_v14 }
 0x3b8   :  { %1993 = dma.vmem_to_hbm [thread:$0]  %s1989_s28, 64, %s1991_s30, [#allocation4]  }
 0x3b9   :  { %2323 = dma.done.wait [#allocation4], 64  }
 0x3ba   :  { %2324 = vsyncadd [#allocation4], 4294967232 }
 0x3bb   :  { %1998 = vsyncpa [#allocation3], 1 }
 0x3bc   :  { %1999 = vsyncpa [#allocation6], 1 }
 0x3bd   :  { %2000 = vsyncpa [#allocation9], 1 }
 0x3be   :  { %2001 = vsyncpa [#allocation12], 1 }
 0x3bf   :  { %2002 = vsyncpa [#allocation15], 1 }
 0x3c0   :  { %2003 = vsyncpa [#allocation18], 1 }
 0x3c1   :  { %2004 = vsyncpa [#allocation4], 1 }

// kernel: reconstructor_forward.2
= control target key start
LH: loop header
LB: loop body
LE: loop exit
PB: predicated region body
PF: predicated region fallthrough
CT: control target
= control target key end

     0   :  { %s17000_s0 = inlined_call_operand.vmem [shape: f32[4,49152], index: 0, kind: input, shape index: {}]   ;;  %s17001_s1 = inlined_call_operand.hbm [shape: bf16[49152,1024], index: 1, kind: input, shape index: {}]   ;;  %s17002_s2 = inlined_call_operand.hbm [shape: f32[1,1024], index: 2, kind: input, shape index: {}]   ;;  %s17003_s3 = inlined_call_operand.hbm [shape: f32[1,1024], index: 3, kind: input, shape index: {}]   ;;  %s17004_s4 = inlined_call_operand.hbm [shape: f32[1,1024], index: 4, kind: input, shape index: {}]   ;;  %s17005_s5 = inlined_call_operand.vmem [shape: f32[4,1024], index: 5, kind: output, shape index: {}]  }
   0x1   :  { %17016 = sst [smem:[#allocation23_spill]] %s17000_s0 }
   0x2   :  { %17017 = sst [smem:[#allocation24_spill]] %s17001_s1 }
   0x3   :  { %17018 = sst [smem:[#allocation25_spill]] %s17002_s2 }
   0x4   :  { %17019 = sst [smem:[#allocation26_spill]] %s17005_s5 }
   0x5   :  { %10 = vsyncpa [#allocation3], 0 }
   0x6   :  { %12 = vsyncpa [#allocation3 + $0x1], 0 }
   0x7   :  { %13 = vsyncpa [#allocation5], 0 }
   0x8   :  { %15 = vsyncpa [#allocation5 + $0x1], 0 }
   0x9   :  { %16 = vsyncpa [#allocation8], 0 }
   0xa   :  { %18 = vsyncpa [#allocation8 + $0x1], 0  ;;  %s14292_s18 = smov 0   ;;  %s14294_s19 = smov 0  }
   0xb   :  { %s14296_s20 = smov 0   ;;  %s14298_s21 = smov 0  }
   0xc   :  { %s14300_s22 = smov 0   ;;  %s14302_s23 = smov 0  }
   0xd   :  { %s14304_s24 = smov 0   ;;  %s14306_s25 = smov 0  }
   0xe   :  { %s14308_s26 = smov 0   ;;  %s14310_s27 = smov 0  }
   0xf   :  { %s14312_s28 = smov 0  }
  0x10 LB: > { %17020 = sst [smem:[#allocation12_spill]] %s14235_s23  ;;  %s17006_s29 = sadd.s32 4294967295, %s14255_s28   ;;  %s14255_s28 = sphi %s14312_s28, %s24_s28   ;;  %s14251_s27 = sphi %s14310_s27, %s17056_s27   ;;  %s14247_s26 = sphi %s14308_s26, %s17055_s26   ;;  %s14243_s25 = sphi %s14306_s25, %s17054_s25   ;;  %s14239_s24 = sphi %s14304_s24, %s17062_s24   ;;  %s14235_s23 = sphi %s14302_s23, %s17052_s23   ;;  %s14231_s22 = sphi %s14300_s22, %s17061_s22   ;;  %s14227_s21 = sphi %s14298_s21, %s17060_s21   ;;  %s14223_s20 = sphi %s14296_s20, %s17059_s20   ;;  %s14219_s19 = sphi %s14294_s19, %s17058_s19   ;;  %s14215_s18 = sphi %s14292_s18, %s17057_s18  }
  0x11   : > { %17021 = sst [smem:[#allocation13_spill]] %s14239_s24  ;;  %s33_s30 = sadd.s32 1, %s14247_s26 }
  0x12   : > { %17022 = sst [smem:[#allocation14_spill]] %s14243_s25  ;;  %p34_p0 = scmp.ge.s32.totalorder %s33_s30, 12 }
  0x13   : > { %17023 = sst [smem:[#allocation15_spill]] %s14247_s26  ;;  %s36_s6 = sadd.s32 1, %s14251_s27 }
  0x14   : > { %17024 = sst [smem:[#allocation16_spill]] %s14251_s27  ;;  %s71_s7 = sadd.s32 1, %s14235_s23 }
  0x15   : > { %p78_p1 = scmp.ne.s32.totalorder %s14235_s23, %s14231_s22  ;;  %s17064_s30 = smov (%p34_p0, %s33_s30), 0 }
  0x16   : > { %17025 = sst [smem:[#allocation17_spill]] %s17064_s30  ;;  %s17066_s6 = smov (!%p34_p0, %s36_s6), %s14251_s27 }
  0x17   : > { %s66_s8 = ssub.s32 %s14247_s26, %s17064_s30  ;;  %p79_p2 = scmp.eq.s32.totalorder %s14255_s28, 0 }
  0x18   : > { %p38_p3 = scmp.ge.s32.totalorder %s17066_s6, 2  ;;  %p84_p4 = scmp.ne.s32.totalorder %s14231_s22, %s14227_s21 }
  0x19   : > { %p14360_p5 = por %p79_p2, %p78_p1  ;;  %p14366_p6 = scmp.eq.s32.totalorder %s17006_s29, 0 }
  0x1a   : > { %s17068_s6 = smov (%p38_p3, %s17066_s6), 0  ;;  %s97_s12 = sadd.s32 1, %s14223_s20 }
  0x1b   : > { %17028 = sst [smem:[#allocation18_spill]] %s17068_s6  ;;  %p14374_p7 = por %p14366_p6, %p84_p4 }
  0x1c   : > { %s67_s13 = ssub.s32 %s14251_s27, %s17068_s6  ;;  %p104_p8 = scmp.ne.s32.totalorder %s14223_s20, %s14219_s19 }
  0x1d   : > { %s68_s14 = sor.u32 %s67_s13, %s66_s8  ;;  %p95_p9 = scmp.eq.s32.totalorder %s67_s13, 0 }
  0x1e   : > { %p69_p10 = scmp.eq.s32.totalorder %s68_s14, 0  ;;  %p14385_p11 = por %p104_p8, %p79_p2 }
  0x1f   : > { %s14390_s16 = scalar_select %p95_p9, %s14223_s20, %s97_s12  }
  0x20   : > { %s14393_s17 = scalar_select %p69_p10, %s14235_s23, %s71_s7  }
  0x21   : > { %17031 = sst [smem:[#allocation19_spill]] %s14390_s16  ;;  %p110_p12 = scmp.ne.s32.totalorder %s14219_s19, %s14215_s18 }
  0x22   : > { %17032 = sst [smem:[#allocation20_spill]] %s14393_s17  ;;  %p13933_p13 = scmp.lt.s32.totalorder %s14255_s28, 24 }
  0x23   : > { %s14399_s21 = sshll.u32 %s14251_s27, 2  ;;  %p14403_p0 = por %p110_p12, %p14366_p6 }
  0x24   : > { %s12887_s13 = sshll.u32 %s14247_s26, 12  ;;  %p14413_p1 = pnand %p13933_p13, %p14360_p5 }
  0x25   : > { %s231_s12 = sadd.s32 %s12887_s13, %s14399_s21  ;;  %s246_s14 = sand.u32 1, %s14255_s28  }
  0x26   : > { %s8771_s7 = sshll.u32 %s231_s12, 2  ;;  %s17011_s10 = sand.u32 1, %s14223_s20  }
  0x27   : > { %s17035_s2 = sld [smem:[#allocation25_spill]]  ;;  %s14425_s27 = sshll.u32 %s17011_s10, 2 }
  0x28   : > { %s250_s9 = scalar_lea.vmem [#allocation4], %s14425_s27  ;;  %p14432_p2 = pnand %p13933_p13, %p14385_p11 }
  0x29   : > { %s258_s13 = sshll.u32 %s250_s9, 4  ;;  %p8778_p3 = scmp.ge.s32.totalorder %s14255_s28, 1  ;;  %s259_s13 = int_to_ptr.vmem [resolvable:$true] %s258_s13 }
  0x2a   : > { %p301_p4 = scmp.lt.s32.totalorder %s14255_s28, 25  ;;  %s247_s29 = scalar_lea.sflag [#allocation5], %s246_s14 }
  0x2b   : > { %s221_s6 = sand.u32 1, %s14235_s23   ;;  %s17038_s1 = sld [smem:[#allocation24_spill]] }
  0x2c   : > { %p14440_p5 = pnand %p8778_p3, %p301_p4  ;;  %s8767_s15 = sshll.u32 %s221_s6, 13 }
  0x2d   : > { %s254_s30 = scalar_lea.hbm %s17035_s2, %s14399_s21  ;;  %s225_s16 = scalar_lea.vmem [#allocation2], %s8767_s15 }
  0x2e   : > { %s256_s26 = sshll.u32 %s254_s30, 4  ;;  %s236_s5 = sshll.u32 %s225_s16, 4  ;;  %s257_s26 = int_to_ptr.hbm [resolvable:$true] %s256_s26  ;;  %s237_s5 = int_to_ptr.vmem [resolvable:$true] %s236_s5 }
  0x2f   : > { %13926 = dma.hbm_to_vmem [thread:$0]  (!%p14432_p2), %s257_s26, 64, %s259_s13, %s247_s29  }
  0x30   : > { %s222_s26 = scalar_lea.sflag [#allocation3], %s221_s6  ;;  %s14257_s14 = smov 512  }
  0x31   : > { %s233_s10 = scalar_lea.hbm %s17038_s1, %s8771_s7  ;;  %s14258_s13 = smov 256  }
  0x32   : > { %s234_s2 = sshll.u32 %s233_s10, 4  ;;  %s14259_s0 = smov 16   ;;  %s235_s2 = int_to_ptr.hbm [resolvable:$true] %s234_s2 }
  0x33   : > { %13923 = dma.hbm_to_vmem [thread:$0]  (!%p14413_p1), %s235_s2, 131072, %s237_s5, %s222_s26, %s14257_s14, %s14258_s13, %s14259_s0  }
  0x34   : > { %s273_s7 = scalar_lea.hbm %s17003_s3, %s14399_s21  ;;  %s269_s10 = scalar_lea.vmem [#allocation6], %s14425_s27 }
  0x35   : > { %s277_s12 = sshll.u32 %s269_s10, 4  ;;  %s275_s15 = sshll.u32 %s273_s7, 4  ;;  %s278_s12 = int_to_ptr.vmem [resolvable:$true] %s277_s12  ;;  %s276_s15 = int_to_ptr.hbm [resolvable:$true] %s275_s15 }
  0x36   : > { %13929 = dma.hbm_to_vmem [thread:$0]  (!%p14432_p2), %s276_s15, 64, %s278_s12, %s247_s29  }
  0x37   : > { %s292_s9 = scalar_lea.hbm %s17004_s4, %s14399_s21  ;;  %s288_s24 = scalar_lea.vmem [#allocation7], %s14425_s27 }
  0x38   : > { %s294_s1 = sshll.u32 %s292_s9, 4  ;;  %s296_s18 = sshll.u32 %s288_s24, 4  ;;  %s295_s1 = int_to_ptr.hbm [resolvable:$true] %s294_s1  ;;  %s297_s18 = int_to_ptr.vmem [resolvable:$true] %s296_s18 }
  0x39   : > { %s17039_s0 = sand.u32 1, %s14223_s20   ;;  %305 = sbr.rel (%p14440_p5) target bundleno = 1371 (0x55b), region = 40 }
  0x3a   : > { %s285_s2 = scalar_lea.sflag [#allocation8], %s17039_s0 }
  0x3b   : > { %13932 = dma.hbm_to_vmem [thread:$0]  (!%p14432_p2), %s295_s1, 64, %s297_s18, %s285_s2  }
  0x3e   : > { %s307_s5 = sand.u32 1, %s14231_s22  }
  0x3f   : > { %s8779_s23 = sshll.u32 %s307_s5, 13  ;;  %s308_s25 = scalar_lea.sflag [#allocation3], %s307_s5 }
  0x40   : > { %s14469_s29 = scalar_lea.vmem [#allocation2], %s8779_s23 }
  0x41   : > { %14202 = dma.done.wait (%p14374_p7), %s308_s25, 131072  }
  0x42   : > { %14204 = vsyncadd (%p14374_p7), %s308_s25, 4294836224  ;;  %s17040_s24 = sadd.s32 4294967295, %s14255_s28   ;;  %s319_s27 = sand.u32 1, %s14219_s19  }
  0x43   : > { %s317_s1 = sand.u32 1, %s17040_s24   ;;  %s14478_s17 = sshll.u32 %s319_s27, 2 }
  0x44   : > { %s318_s21 = scalar_lea.sflag [#allocation5], %s317_s1  ;;  %s321_s30 = scalar_lea.vmem [#allocation4], %s14478_s17 }
  0x45   : > { %14206 = dma.done.wait (%p14403_p0), %s318_s21, 128  }
  0x46   : > { %14208 = vsyncadd (%p14403_p0), %s318_s21, 4294967168  ;;  %s331_s11 = scalar_lea.vmem [#allocation6], %s14478_s17  ;;  %s338_s26 = scalar_lea.sflag [#allocation8], %s319_s27 }
  0x47   : > { %s341_s14 = scalar_lea.vmem [#allocation7], %s14478_s17 }
  0x48   : > { %14210 = dma.done.wait (%p14403_p0), %s338_s26, 64  }
  0x49   : > { %14212 = vsyncadd (%p14403_p0), %s338_s26, 4294967232  ;;  %s17041_s13 = sld [smem:[#allocation13_spill]] }
  0x4a   : > { %s17042_s7 = sld [smem:[#allocation14_spill]] }
  0x4b   : > { %s17043_s9 = sld [smem:[#allocation23_spill]] }
  0x4c   : > { %s17044_s23 = sld [smem:[#allocation26_spill]] }
  0x4f   : > { %s8783_s10 = sshll.u32 %s17041_s13, 5  ;;  %p8787_p8 = scmp.ne.s32.totalorder %s17041_s13, 0 }
  0x50   : > { %s8785_s12 = sshll.u32 %s17042_s7, 2  ;;  %p390_p6 = scmp.lt.s32.totalorder %s8783_s10, 383 }
  0x51   : > { %p401_p7 = scmp.lt.s32.totalorder %s8785_s12, 7  ;;  %409 = sbr.rel (%p8787_p8) target bundleno = 89 (0x59), region = 60 }
  0x52   : > { %s17070_s10 = smov (!%p390_p6, %s8783_s10), 383 }
  0x53   : > { %s17072_s12 = smov (!%p401_p7, %s8785_s12), 7  ;;  %s8784_s15 = sshll.u32 %s17070_s10, 2 }
  0x54   : > { %s14496_s18 = scalar_lea.vmem %s17043_s9, %s8784_s15  ;;  %s8786_s0 = sshll.u32 %s17072_s12, 2 }
  0x55   : > { %s14501_s8 = scalar_lea.vmem %s17044_s23, %s8786_s0 }
  0x56   : > { %v14260_v0 = vmov 0.0  }
  0x57   : > { %410 = vst [vmem:[%s14501_s8] sm:$0xff] %v14260_v0 }
  0x58   : > { %411 = vst [vmem:[%s14501_s8 + $0x8] sm:$0xff] %v14260_v0 }
  0x59 PF: > { %v8902_v1 = vld [vmem:[%s14469_s29 + $0xe0] sm:$0xf]  ;;  %v12918_v2 = vld [vmem:[%s14469_s29 + $0xec] sm:$0xf0]  ;;  %vm8375_vm0 = vcmask 1043456   ;;  %s17049_s25 = sld [smem:[#allocation13_spill]] }
  0x5a   : > { %v9030_v3 = vld [vmem:[%s14469_s29 + $0x1e0] sm:$0xf]  ;;  %v8903_v4 = vor.u32 %v12918_v2, %v8902_v1  ;;  %v12950_v5 = vld [vmem:[%s14469_s29 + $0x1ec] sm:$0xf0] }
  0x5b   : > { %v9158_v6 = vld [vmem:[%s14469_s29 + $0x2e0] sm:$0xf]  ;;  %v12982_v7 = vld [vmem:[%s14469_s29 + $0x2ec] sm:$0xf0]  ;;  %v9031_v8 = vor.u32 %v12950_v5, %v9030_v3 }
  0x5c   : > { %v9159_v9 = vor.u32 %v12982_v7, %v9158_v6  ;;  %v9286_v10 = vld [vmem:[%s14469_s29 + $0x3e0] sm:$0xf]  ;;  %v13014_v11 = vld [vmem:[%s14469_s29 + $0x3ec] sm:$0xf0]  ;;  %6705 = vmatpush.bf16.msra.mxu0 %v8903_v4 }
  0x5d   : > { %v8886_v12 = vld [vmem:[%s14469_s29 + $0xc0] sm:$0xf]  ;;  %v9287_v13 = vor.u32 %v13014_v11, %v9286_v10  ;;  %v12914_v14 = vld [vmem:[%s14469_s29 + $0xcc] sm:$0xf0]  ;;  %6718 = vmatpush.bf16.msra.mxu1 %v9031_v8 }
  0x5e   : > { %v9014_v15 = vld [vmem:[%s14469_s29 + $0x1c0] sm:$0xf]  ;;  %v12946_v16 = vld [vmem:[%s14469_s29 + $0x1cc] sm:$0xf0]  ;;  %6731 = vmatpush.bf16.msra.mxu2 %v9159_v9  ;;  %v8887_v17 = vor.u32 %v12914_v14, %v8886_v12 }
  0x5f   : > { %v9015_v18 = vor.u32 %v12946_v16, %v9014_v15  ;;  %v9142_v19 = vld [vmem:[%s14469_s29 + $0x2c0] sm:$0xf]  ;;  %v12978_v20 = vld [vmem:[%s14469_s29 + $0x2cc] sm:$0xf0]  ;;  %6744 = vmatpush.bf16.msra.mxu3 %v9287_v13  ;;  %p12884_p9 = scmp.ne.s32.totalorder %s17049_s25, 11 }
  0x60   : > { %v9270_v21 = vld [vmem:[%s14469_s29 + $0x3c0] sm:$0xf]  ;;  %v9143_v22 = vor.u32 %v12978_v20, %v9142_v19  ;;  %v13010_v23 = vld [vmem:[%s14469_s29 + $0x3cc] sm:$0xf0]  ;;  %6706 = vmatpush.bf16.msra.mxu0 %v8887_v17 }
  0x61   : > { %v8870_v24 = vld [vmem:[%s14469_s29 + $0xa0] sm:$0xf]  ;;  %v12910_v25 = vld [vmem:[%s14469_s29 + $0xac] sm:$0xf0]  ;;  %v9271_v26 = vor.u32 %v13010_v23, %v9270_v21  ;;  %6719 = vmatpush.bf16.msra.mxu1 %v9015_v18 }
  0x62   : > { %v8998_v27 = vld [vmem:[%s14469_s29 + $0x1a0] sm:$0xf]  ;;  %v12942_v28 = vld [vmem:[%s14469_s29 + $0x1ac] sm:$0xf0]  ;;  %v8871_v30 = vor.u32 %v12910_v25, %v8870_v24  ;;  %6732 = vmatpush.bf16.msra.mxu2 %v9143_v22 }
  0x63   : > { %v9126_v29 = vld [vmem:[%s14469_s29 + $0x2a0] sm:$0xf]  ;;  %v12974_v31 = vld [vmem:[%s14469_s29 + $0x2ac] sm:$0xf0]  ;;  %v8999_v34 = vor.u32 %v12942_v28, %v8998_v27  ;;  %6745 = vmatpush.bf16.msra.mxu3 %v9271_v26 }
  0x64   : > { %v9254_v32 = vld [vmem:[%s14469_s29 + $0x3a0] sm:$0xf]  ;;  %v13006_v33 = vld [vmem:[%s14469_s29 + $0x3ac] sm:$0xf0]  ;;  %v9127_v35 = vor.u32 %v12974_v31, %v9126_v29  ;;  %6707 = vmatpush.bf16.msra.mxu0 %v8871_v30 }
  0x65   : > { %v8854_v36 = vld [vmem:[%s14469_s29 + $0x80] sm:$0xf]  ;;  %v12906_v37 = vld [vmem:[%s14469_s29 + $0x8c] sm:$0xf0]  ;;  %v9255_v39 = vor.u32 %v13006_v33, %v9254_v32  ;;  %6720 = vmatpush.bf16.msra.mxu1 %v8999_v34 }
  0x66   : > { %v8982_v38 = vld [vmem:[%s14469_s29 + $0x180] sm:$0xf]  ;;  %v12938_v40 = vld [vmem:[%s14469_s29 + $0x18c] sm:$0xf0]  ;;  %v8855_v45 = vor.u32 %v12906_v37, %v8854_v36  ;;  %6733 = vmatpush.bf16.msra.mxu2 %v9127_v35 }
  0x67   : > { %v9110_v41 = vld [vmem:[%s14469_s29 + $0x280] sm:$0xf]  ;;  %v12970_v42 = vld [vmem:[%s14469_s29 + $0x28c] sm:$0xf0]  ;;  %v8983_v46 = vor.u32 %v12938_v40, %v8982_v38  ;;  %6746 = vmatpush.bf16.msra.mxu3 %v9255_v39 }
  0x68   : > { %v9238_v43 = vld [vmem:[%s14469_s29 + $0x380] sm:$0xf]  ;;  %v13002_v44 = vld [vmem:[%s14469_s29 + $0x38c] sm:$0xf0]  ;;  %v9111_v47 = vor.u32 %v12970_v42, %v9110_v41  ;;  %6708 = vmatpush.bf16.msra.mxu0 %v8855_v45 }
  0x69   : > { %v8838_v48 = vld [vmem:[%s14469_s29 + $0x60] sm:$0xf]  ;;  %v12902_v49 = vld [vmem:[%s14469_s29 + $0x6c] sm:$0xf0]  ;;  %v9239_v51 = vor.u32 %v13002_v44, %v9238_v43  ;;  %6721 = vmatpush.bf16.msra.mxu1 %v8983_v46 }
  0x6a   : > { %v8966_v50 = vld [vmem:[%s14469_s29 + $0x160] sm:$0xf]  ;;  %v12934_v52 = vld [vmem:[%s14469_s29 + $0x16c] sm:$0xf0]  ;;  %v8839_v57 = vor.u32 %v12902_v49, %v8838_v48  ;;  %6734 = vmatpush.bf16.msra.mxu2 %v9111_v47 }
  0x6b   : > { %v9094_v53 = vld [vmem:[%s14469_s29 + $0x260] sm:$0xf]  ;;  %v12966_v54 = vld [vmem:[%s14469_s29 + $0x26c] sm:$0xf0]  ;;  %v8967_v58 = vor.u32 %v12934_v52, %v8966_v50  ;;  %6747 = vmatpush.bf16.msra.mxu3 %v9239_v51 }
  0x6c   : > { %v9222_v55 = vld [vmem:[%s14469_s29 + $0x360] sm:$0xf]  ;;  %v12998_v56 = vld [vmem:[%s14469_s29 + $0x36c] sm:$0xf0]  ;;  %v9095_v59 = vor.u32 %v12966_v54, %v9094_v53  ;;  %6709 = vmatpush.bf16.msra.mxu0 %v8839_v57 }
  0x6d   : > { %v8822_v60 = vld [vmem:[%s14469_s29 + $0x40] sm:$0xf]  ;;  %v12898_v61 = vld [vmem:[%s14469_s29 + $0x4c] sm:$0xf0]  ;;  %v9223_v63 = vor.u32 %v12998_v56, %v9222_v55  ;;  %6722 = vmatpush.bf16.msra.mxu1 %v8967_v58 }
  0x6e   : > { %v8950_v62 = vld [vmem:[%s14469_s29 + $0x140] sm:$0xf]  ;;  %v12930_v0 = vld [vmem:[%s14469_s29 + $0x14c] sm:$0xf0]  ;;  %v8823_v5 = vor.u32 %v12898_v61, %v8822_v60  ;;  %6735 = vmatpush.bf16.msra.mxu2 %v9095_v59 }
  0x6f   : > { %v9078_v1 = vld [vmem:[%s14469_s29 + $0x240] sm:$0xf]  ;;  %v12962_v2 = vld [vmem:[%s14469_s29 + $0x24c] sm:$0xf0]  ;;  %v8951_v6 = vor.u32 %v12930_v0, %v8950_v62  ;;  %6748 = vmatpush.bf16.msra.mxu3 %v9223_v63 }
  0x70   : > { %v9206_v3 = vld [vmem:[%s14469_s29 + $0x340] sm:$0xf]  ;;  %v12994_v4 = vld [vmem:[%s14469_s29 + $0x34c] sm:$0xf0]  ;;  %v9079_v7 = vor.u32 %v12962_v2, %v9078_v1  ;;  %6710 = vmatpush.bf16.msra.mxu0 %v8823_v5 }
  0x71   : > { %v8806_v8 = vld [vmem:[%s14469_s29 + $0x20] sm:$0xf]  ;;  %v12894_v9 = vld [vmem:[%s14469_s29 + $0x2c] sm:$0xf0]  ;;  %v9207_v11 = vor.u32 %v12994_v4, %v9206_v3  ;;  %6723 = vmatpush.bf16.msra.mxu1 %v8951_v6 }
  0x72   : > { %v8934_v10 = vld [vmem:[%s14469_s29 + $0x120] sm:$0xf]  ;;  %v12926_v12 = vld [vmem:[%s14469_s29 + $0x12c] sm:$0xf0]  ;;  %v8807_v17 = vor.u32 %v12894_v9, %v8806_v8  ;;  %6736 = vmatpush.bf16.msra.mxu2 %v9079_v7 }
  0x73   : > { %v9062_v13 = vld [vmem:[%s14469_s29 + $0x220] sm:$0xf]  ;;  %v12958_v14 = vld [vmem:[%s14469_s29 + $0x22c] sm:$0xf0]  ;;  %v8935_v20 = vor.u32 %v12926_v12, %v8934_v10  ;;  %6749 = vmatpush.bf16.msra.mxu3 %v9207_v11  ;;  %v414_v11 = vld [vmem:[%s14496_s18] sm:$0xff] }
  0x74   : > { %v9190_v15 = vld [vmem:[%s14469_s29 + $0x320] sm:$0xf]  ;;  %v12990_v16 = vld [vmem:[%s14469_s29 + $0x32c] sm:$0xf0]  ;;  %v9063_v21 = vor.u32 %v12958_v14, %v9062_v13  ;;  %6711 = vmatpush.bf16.msra.mxu0 %v8807_v17  ;;  %446 = vst [vmem:[#allocation1] ss:$2 sm:$0xff] %v414_v11 }
  0x75   : > { %v8790_v18 = vld [vmem:[%s14469_s29] sm:$0xf]  ;;  %v12890_v19 = vld [vmem:[%s14469_s29 + $0xc] sm:$0xf0]  ;;  %v9191_v25 = vor.u32 %v12990_v16, %v9190_v15  ;;  %6724 = vmatpush.bf16.msra.mxu1 %v8935_v20 }
  0x76   : > { %v8918_v22 = vld [vmem:[%s14469_s29 + $0x100] sm:$0xf]  ;;  %v12922_v23 = vld [vmem:[%s14469_s29 + $0x10c] sm:$0xf0]  ;;  %v8791_v32 = vor.u32 %v12890_v19, %v8790_v18  ;;  %6737 = vmatpush.bf16.msra.mxu2 %v9063_v21 }
  0x77   : > { %v9046_v24 = vld [vmem:[%s14469_s29 + $0x200] sm:$0xf]  ;;  %v12954_v26 = vld [vmem:[%s14469_s29 + $0x20c] sm:$0xf0]  ;;  %v8919_v36 = vor.u32 %v12922_v23, %v8918_v22  ;;  %6750 = vmatpush.bf16.msra.mxu3 %v9191_v25 }
  0x78   : > { %v9174_v27 = vld [vmem:[%s14469_s29 + $0x300] sm:$0xf]  ;;  %v12986_v28 = vld [vmem:[%s14469_s29 + $0x30c] sm:$0xf0]  ;;  %v9047_v37 = vor.u32 %v12954_v26, %v9046_v24  ;;  %6712 = vmatpush.bf16.msra.mxu0 %v8791_v32 }
  0x79   : > { %v9414_v29 = vld [vmem:[%s14469_s29 + $0x4e0] sm:$0xf]  ;;  %v13046_v30 = vld [vmem:[%s14469_s29 + $0x4ec] sm:$0xf0]  ;;  %v9175_v40 = vor.u32 %v12986_v28, %v9174_v27  ;;  %6725 = vmatpush.bf16.msra.mxu1 %v8919_v36 }
  0x7a   : > { %v9542_v31 = vld [vmem:[%s14469_s29 + $0x5e0] sm:$0xf]  ;;  %v13078_v33 = vld [vmem:[%s14469_s29 + $0x5ec] sm:$0xf0]  ;;  %v9415_v41 = vor.u32 %v13046_v30, %v9414_v29  ;;  %6738 = vmatpush.bf16.msra.mxu2 %v9047_v37 }
  0x7b   : > { %v9670_v34 = vld [vmem:[%s14469_s29 + $0x6e0] sm:$0xf]  ;;  %v13110_v35 = vld [vmem:[%s14469_s29 + $0x6ec] sm:$0xf0]  ;;  %v9543_v42 = vor.u32 %v13078_v33, %v9542_v31  ;;  %6751 = vmatpush.bf16.msra.mxu3 %v9175_v40  ;;  %v418_v33 = vld [vmem:[%s14496_s18 + $0x20] sm:$0xff] }
  0x7c   : > { %v9798_v38 = vld [vmem:[%s14469_s29 + $0x7e0] sm:$0xf]  ;;  %v13142_v39 = vld [vmem:[%s14469_s29 + $0x7ec] sm:$0xf0]  ;;  %v9671_v43 = vor.u32 %v13110_v35, %v9670_v34  ;;  %6757 = vmatpush.bf16.msrb.mxu0 %v9415_v41 }
  0x7d   : > { %v9398_v44 = vld [vmem:[%s14469_s29 + $0x4c0] sm:$0xf]  ;;  %v13042_v45 = vld [vmem:[%s14469_s29 + $0x4cc] sm:$0xf0]  ;;  %v9799_v47 = vor.u32 %v13142_v39, %v9798_v38  ;;  %6770 = vmatpush.bf16.msrb.mxu1 %v9543_v42 }
  0x7e   : > { %v9526_v46 = vld [vmem:[%s14469_s29 + $0x5c0] sm:$0xf]  ;;  %v13074_v48 = vld [vmem:[%s14469_s29 + $0x5cc] sm:$0xf0]  ;;  %v9399_v53 = vor.u32 %v13042_v45, %v9398_v44  ;;  %6783 = vmatpush.bf16.msrb.mxu2 %v9671_v43 }
  0x7f   : > { %v9654_v49 = vld [vmem:[%s14469_s29 + $0x6c0] sm:$0xf]  ;;  %v13106_v50 = vld [vmem:[%s14469_s29 + $0x6cc] sm:$0xf0]  ;;  %v9527_v56 = vor.u32 %v13074_v48, %v9526_v46  ;;  %6796 = vmatpush.bf16.msrb.mxu3 %v9799_v47 }
  0x80   : > { %v9782_v51 = vld [vmem:[%s14469_s29 + $0x7c0] sm:$0xf]  ;;  %v13138_v52 = vld [vmem:[%s14469_s29 + $0x7cc] sm:$0xf0]  ;;  %v9655_v57 = vor.u32 %v13106_v50, %v9654_v49  ;;  %6758 = vmatpush.bf16.msrb.mxu0 %v9399_v53 }
  0x81   : > { %v9382_v54 = vld [vmem:[%s14469_s29 + $0x4a0] sm:$0xf]  ;;  %v13038_v55 = vld [vmem:[%s14469_s29 + $0x4ac] sm:$0xf0]  ;;  %v9783_v61 = vor.u32 %v13138_v52, %v9782_v51  ;;  %6771 = vmatpush.bf16.msrb.mxu1 %v9527_v56 }
  0x82   : > { %v9510_v58 = vld [vmem:[%s14469_s29 + $0x5a0] sm:$0xf]  ;;  %v13070_v59 = vld [vmem:[%s14469_s29 + $0x5ac] sm:$0xf0]  ;;  %v9383_v3 = vor.u32 %v13038_v55, %v9382_v54  ;;  %6784 = vmatpush.bf16.msrb.mxu2 %v9655_v57 }
  0x83   : > { %v415_v60 = vld [vmem:[%s14496_s18 + $0x8] sm:$0xff]  ;;  %v13102_v63 = vld [vmem:[%s14469_s29 + $0x6ac] sm:$0xf0]  ;;  %v9511_v7 = vor.u32 %v13070_v59, %v9510_v58  ;;  %6797 = vmatpush.bf16.msrb.mxu3 %v9783_v61  ;;  %v453_v40 = vld.sshfl [vmem:[#allocation1] sm:$0xff pattern:$0x75316420] }
  0x84   : > { %v9638_v62 = vld [vmem:[%s14469_s29 + $0x6a0] sm:$0xf]  ;;  %448 = vst [vmem:[#allocation1 + $0x10] ss:$2 sm:$0xff] %v415_v60  ;;  %v13134_v1 = vld [vmem:[%s14469_s29 + $0x7ac] sm:$0xf0]  ;;  %6759 = vmatpush.bf16.msrb.mxu0 %v9383_v3  ;;  %v14625_v45 = vpack.c.bf16 %v453_v40, %v453_v40 }
  0x85   : > { %v9766_v0 = vld [vmem:[%s14469_s29 + $0x7a0] sm:$0xf]  ;;  %v13034_v4 = vld [vmem:[%s14469_s29 + $0x48c] sm:$0xf0]  ;;  %v9639_v8 = vor.u32 %v13102_v63, %v9638_v62  ;;  %6772 = vmatpush.bf16.msrb.mxu1 %v9511_v7 }
  0x86   : > { %v9366_v2 = vld [vmem:[%s14469_s29 + $0x480] sm:$0xf]  ;;  %v13066_v6 = vld [vmem:[%s14469_s29 + $0x58c] sm:$0xf0]  ;;  %v9767_v12 = vor.u32 %v13134_v1, %v9766_v0  ;;  %6713 = vmatmul.bf16.vlgmr.msra.gmra.mxu0 %v14625_v45 }
  0x87   : > { %v9494_v5 = vld [vmem:[%s14469_s29 + $0x580] sm:$0xf]  ;;  %v13098_v10 = vld [vmem:[%s14469_s29 + $0x68c] sm:$0xf0]  ;;  %v9367_v18 = vor.u32 %v13034_v4, %v9366_v2  ;;  %6785 = vmatpush.bf16.msrb.mxu2 %v9639_v8  ;;  %v416_v4 = vld [vmem:[%s14496_s18 + $0x10] sm:$0xff] }
  0x88   : > { %v9622_v9 = vld [vmem:[%s14469_s29 + $0x680] sm:$0xf]  ;;  %v13130_v14 = vld [vmem:[%s14469_s29 + $0x78c] sm:$0xf0]  ;;  %v9495_v22 = vor.u32 %v13066_v6, %v9494_v5  ;;  %6798 = vmatpush.bf16.msrb.mxu3 %v9767_v12  ;;  %450 = vst [vmem:[#allocation1 + $0x20] ss:$2 sm:$0xff] %v416_v4 }
  0x89   : > { %v9750_v13 = vld [vmem:[%s14469_s29 + $0x780] sm:$0xf]  ;;  %v13030_v16 = vld [vmem:[%s14469_s29 + $0x46c] sm:$0xf0]  ;;  %v9623_v23 = vor.u32 %v13098_v10, %v9622_v9  ;;  %6760 = vmatpush.bf16.msrb.mxu0 %v9367_v18 }
  0x8a   : > { %v9350_v15 = vld [vmem:[%s14469_s29 + $0x460] sm:$0xf]  ;;  %v13062_v20 = vld [vmem:[%s14469_s29 + $0x56c] sm:$0xf0]  ;;  %v9751_v26 = vor.u32 %v13130_v14, %v9750_v13  ;;  %6773 = vmatpush.bf16.msrb.mxu1 %v9495_v22 }
  0x8b   : > { %v419_v17 = vld [vmem:[%s14496_s18 + $0x28] sm:$0xff]  ;;  %v455_v24 = vld.sshfl [vmem:[#allocation1 + $0x10] sm:$0xff pattern:$0x75316420]  ;;  %v13094_v27 = vld [vmem:[%s14469_s29 + $0x66c] sm:$0xf0]  ;;  %v9351_v34 = vor.u32 %v13030_v16, %v9350_v15  ;;  %6786 = vmatpush.bf16.msrb.mxu2 %v9623_v23 }
  0x8c   : > { %v9478_v19 = vld [vmem:[%s14469_s29 + $0x560] sm:$0xf]  ;;  %v456_v25 = vld.sshfl [vmem:[#allocation1 + $0x18] sm:$0xff pattern:$0x75316420]  ;;  %v14612_v29 = vpack.c.bf16 %v455_v24, %v455_v24  ;;  %6799 = vmatpush.bf16.msrb.mxu3 %v9751_v26 }
  0x8d   : > { %v9606_v21 = vld [vmem:[%s14469_s29 + $0x660] sm:$0xf]  ;;  %462 = vst [vmem:[#allocation1 + $0x10] ss:$2 sm:$0xff] %v419_v17  ;;  %v13126_v30 = vld [vmem:[%s14469_s29 + $0x76c] sm:$0xf0]  ;;  %v14616_v32 = vpack.c.bf16 %v456_v25, %v456_v25  ;;  %v9479_v38 = vor.u32 %v13062_v20, %v9478_v19  ;;  %6761 = vmatpush.bf16.msrb.mxu0 %v9351_v34 }
  0x8e   : > { %v9734_v28 = vld [vmem:[%s14469_s29 + $0x760] sm:$0xf]  ;;  %6739 = vmatmul.bf16.vlgmr.msra.gmra.mxu2 %v14612_v29  ;;  %v13026_v35 = vld [vmem:[%s14469_s29 + $0x44c] sm:$0xf0]  ;;  %v9607_v39 = vor.u32 %v13094_v27, %v9606_v21 }
  0x8f   : > { %v9334_v31 = vld [vmem:[%s14469_s29 + $0x440] sm:$0xf]  ;;  %v13058_v37 = vld [vmem:[%s14469_s29 + $0x54c] sm:$0xf0]  ;;  %v9735_v42 = vor.u32 %v13126_v30, %v9734_v28  ;;  %6752 = vmatmul.bf16.vlgmr.msra.gmra.mxu3 %v14616_v32  ;;  %6774 = vmatpush.bf16.msrb.mxu1 %v9479_v38 }
  0x90   : > { %v9462_v36 = vld [vmem:[%s14469_s29 + $0x540] sm:$0xf]  ;;  %v13090_v44 = vld [vmem:[%s14469_s29 + $0x64c] sm:$0xf0]  ;;  %v9335_v49 = vor.u32 %v13026_v35, %v9334_v31  ;;  %6787 = vmatpush.bf16.msrb.mxu2 %v9607_v39 }
  0x91   : > { %v454_v41 = vld.sshfl [vmem:[#allocation1 + $0x8] sm:$0xff pattern:$0x75316420]  ;;  %v13122_v48 = vld [vmem:[%s14469_s29 + $0x74c] sm:$0xf0]  ;;  %v9463_v52 = vor.u32 %v13058_v37, %v9462_v36  ;;  %6800 = vmatpush.bf16.msrb.mxu3 %v9735_v42 }
  0x92   : > { %v9590_v43 = vld [vmem:[%s14469_s29 + $0x640] sm:$0xf]  ;;  %461 = vst [vmem:[#allocation1] ss:$2 sm:$0xff] %v418_v33  ;;  %v14627_v46 = vpack.c.bf16 %v454_v41, %v454_v41  ;;  %v13022_v51 = vld [vmem:[%s14469_s29 + $0x42c] sm:$0xf0]  ;;  %6762 = vmatpush.bf16.msrb.mxu0 %v9335_v49 }
  0x93   : > { %v9718_v47 = vld [vmem:[%s14469_s29 + $0x740] sm:$0xf]  ;;  %v9591_v53 = vor.u32 %v13090_v44, %v9590_v43  ;;  %v13054_v55 = vld [vmem:[%s14469_s29 + $0x52c] sm:$0xf0]  ;;  %6775 = vmatpush.bf16.msrb.mxu1 %v9463_v52  ;;  %v420_v33 = vld [vmem:[%s14496_s18 + $0x30] sm:$0xff] }
  0x94   : > { %6726 = vmatmul.bf16.vlgmr.msra.gmra.mxu1 %v14627_v46  ;;  %v9318_v50 = vld [vmem:[%s14469_s29 + $0x420] sm:$0xf]  ;;  %v9719_v57 = vor.u32 %v13122_v48, %v9718_v47  ;;  %v13086_v58 = vld [vmem:[%s14469_s29 + $0x62c] sm:$0xf0] }
  0x95   : > { %v9446_v54 = vld [vmem:[%s14469_s29 + $0x520] sm:$0xf]  ;;  %v13118_v60 = vld [vmem:[%s14469_s29 + $0x72c] sm:$0xf0]  ;;  %v9319_v0 = vor.u32 %v13022_v51, %v9318_v50  ;;  %6788 = vmatpush.bf16.msrb.mxu2 %v9591_v53 }
  0x96   : > { %v9574_v56 = vld [vmem:[%s14469_s29 + $0x620] sm:$0xf]  ;;  %v13018_v62 = vld [vmem:[%s14469_s29 + $0x40c] sm:$0xf0]  ;;  %v9447_v5 = vor.u32 %v13054_v55, %v9446_v54  ;;  %6801 = vmatpush.bf16.msrb.mxu3 %v9719_v57 }
  0x97   : > { %v9702_v59 = vld [vmem:[%s14469_s29 + $0x720] sm:$0xf]  ;;  %v417_v63 = vld [vmem:[%s14496_s18 + $0x18] sm:$0xff]  ;;  %v9575_v6 = vor.u32 %v13086_v58, %v9574_v56  ;;  %6763 = vmatpush.bf16.msrb.mxu0 %v9319_v0  ;;  %v457_v42 = vld.sshfl [vmem:[#allocation1 + $0x20] sm:$0xff pattern:$0x75316420] }
  0x98   : > { %v9302_v61 = vld [vmem:[%s14469_s29 + $0x400] sm:$0xf]  ;;  %v13050_v2 = vld [vmem:[%s14469_s29 + $0x50c] sm:$0xf0]  ;;  %452 = vst [vmem:[#allocation1 + $0x30] ss:$2 sm:$0xff] %v417_v63  ;;  %v9703_v9 = vor.u32 %v13118_v60, %v9702_v59  ;;  %6776 = vmatpush.bf16.msrb.mxu1 %v9447_v5  ;;  %v14680_v55 = vpack.c.bf16 %v457_v42, %v457_v42 }
  0x99   : > { %v9430_v1 = vld [vmem:[%s14469_s29 + $0x500] sm:$0xf]  ;;  %v13082_v7 = vld [vmem:[%s14469_s29 + $0x60c] sm:$0xf0]  ;;  %v9303_v16 = vor.u32 %v13018_v62, %v9302_v61  ;;  %6789 = vmatpush.bf16.msrb.mxu2 %v9575_v6 }
  0x9a   : > { %v9558_v3 = vld [vmem:[%s14469_s29 + $0x600] sm:$0xf]  ;;  %v13114_v10 = vld [vmem:[%s14469_s29 + $0x70c] sm:$0xf0]  ;;  %v9431_v20 = vor.u32 %v13050_v2, %v9430_v1  ;;  %6802 = vmatpush.bf16.msrb.mxu3 %v9703_v9 }
  0x9b   : > { %v9686_v8 = vld [vmem:[%s14469_s29 + $0x700] sm:$0xf]  ;;  %v13174_v12 = vld [vmem:[%s14469_s29 + $0x8ec] sm:$0xf0]  ;;  %v9559_v21 = vor.u32 %v13082_v7, %v9558_v3  ;;  %6764 = vmatpush.bf16.msrb.mxu0 %v9303_v16 }
  0x9c   : > { %v9926_v11 = vld [vmem:[%s14469_s29 + $0x8e0] sm:$0xf]  ;;  %v13206_v14 = vld [vmem:[%s14469_s29 + $0x9ec] sm:$0xf0]  ;;  %v9687_v25 = vor.u32 %v13114_v10, %v9686_v8  ;;  %6777 = vmatpush.bf16.msrb.mxu1 %v9431_v20 }
  0x9d   : > { %v10054_v13 = vld [vmem:[%s14469_s29 + $0x9e0] sm:$0xf]  ;;  %v13238_v17 = vld [vmem:[%s14469_s29 + $0xaec] sm:$0xf0]  ;;  %v9927_v26 = vor.u32 %v13174_v12, %v9926_v11  ;;  %6790 = vmatpush.bf16.msrb.mxu2 %v9559_v21 }
  0x9e   : > { %v10182_v15 = vld [vmem:[%s14469_s29 + $0xae0] sm:$0xf]  ;;  %v13270_v19 = vld [vmem:[%s14469_s29 + $0xbec] sm:$0xf0]  ;;  %v10055_v34 = vor.u32 %v13206_v14, %v10054_v13  ;;  %6803 = vmatpush.bf16.msrb.mxu3 %v9687_v25  ;;  %6765 = vmatmul.bf16.vlgmr.msrb.gmra.mxu0 %v14680_v55 }
  0x9f   : > { %v10310_v18 = vld [vmem:[%s14469_s29 + $0xbe0] sm:$0xf]  ;;  %v13170_v23 = vld [vmem:[%s14469_s29 + $0x8cc] sm:$0xf0]  ;;  %v10183_v35 = vor.u32 %v13238_v17, %v10182_v15  ;;  %6809 = vmatpush.bf16.msra.mxu0 %v9927_v26 }
  0xa0   : > { %v9910_v22 = vld [vmem:[%s14469_s29 + $0x8c0] sm:$0xf]  ;;  %v421_v24 = vld [vmem:[%s14496_s18 + $0x38] sm:$0xff]  ;;  %v459_v36 = vld.sshfl [vmem:[#allocation1 + $0x30] sm:$0xff pattern:$0x75316420]  ;;  %v10311_v38 = vor.u32 %v13270_v19, %v10310_v18  ;;  %6822 = vmatpush.bf16.msra.mxu1 %v10055_v34 }
  0xa1   : > { %v10038_v27 = vld [vmem:[%s14469_s29 + $0x9c0] sm:$0xf]  ;;  %v13202_v28 = vld [vmem:[%s14469_s29 + $0x9cc] sm:$0xf0]  ;;  %v14670_v41 = vpack.c.bf16 %v459_v36, %v459_v36  ;;  %v9911_v47 = vor.u32 %v13170_v23, %v9910_v22  ;;  %6835 = vmatpush.bf16.msra.mxu2 %v10183_v35 }
  0xa2   : > { %v10166_v30 = vld [vmem:[%s14469_s29 + $0xac0] sm:$0xf]  ;;  %v13234_v31 = vld [vmem:[%s14469_s29 + $0xacc] sm:$0xf0]  ;;  %v10039_v49 = vor.u32 %v13202_v28, %v10038_v27  ;;  %6848 = vmatpush.bf16.msra.mxu3 %v10311_v38 }
  0xa3   : > { %v460_v37 = vld.sshfl [vmem:[#allocation1 + $0x38] sm:$0xff pattern:$0x75316420]  ;;  %v10294_v39 = vld [vmem:[%s14469_s29 + $0xbc0] sm:$0xf]  ;;  %v10167_v50 = vor.u32 %v13234_v31, %v10166_v30  ;;  %6791 = vmatmul.bf16.vlgmr.msrb.gmra.mxu2 %v14670_v41  ;;  %6810 = vmatpush.bf16.msra.mxu0 %v9911_v47 }
  0xa4   : > { %v13266_v40 = vld [vmem:[%s14469_s29 + $0xbcc] sm:$0xf0]  ;;  %464 = vst [vmem:[#allocation1 + $0x30] ss:$2 sm:$0xff] %v421_v24  ;;  %v14672_v43 = vpack.c.bf16 %v460_v37, %v460_v37  ;;  %v9894_v51 = vld [vmem:[%s14469_s29 + $0x8a0] sm:$0xf]  ;;  %6823 = vmatpush.bf16.msra.mxu1 %v10039_v49 }
  0xa5   : > { %v458_v44 = vld.sshfl [vmem:[#allocation1 + $0x28] sm:$0xff pattern:$0x75316420]  ;;  %v13166_v52 = vld [vmem:[%s14469_s29 + $0x8ac] sm:$0xf0]  ;;  %v10295_v54 = vor.u32 %v13266_v40, %v10294_v39  ;;  %6836 = vmatpush.bf16.msra.mxu2 %v10167_v50  ;;  %v422_v37 = vld [vmem:[%s14496_s18 + $0x40] sm:$0xff] }
  0xa6   : > { %463 = vst [vmem:[#allocation1 + $0x20] ss:$2 sm:$0xff] %v420_v33  ;;  %v14674_v48 = vpack.c.bf16 %v458_v44, %v458_v44  ;;  %v10022_v53 = vld [vmem:[%s14469_s29 + $0x9a0] sm:$0xf]  ;;  %v13198_v56 = vld [vmem:[%s14469_s29 + $0x9ac] sm:$0xf0]  ;;  %6804 = vmatmul.bf16.vlgmr.msrb.gmra.mxu3 %v14672_v43  ;;  %v9895_v61 = vor.u32 %v13166_v52, %v9894_v51 }
  0xa7   : > { %v10150_v57 = vld [vmem:[%s14469_s29 + $0xaa0] sm:$0xf]  ;;  %v13230_v58 = vld [vmem:[%s14469_s29 + $0xaac] sm:$0xf0]  ;;  %v10023_v62 = vor.u32 %v13198_v56, %v10022_v53  ;;  %6849 = vmatpush.bf16.msra.mxu3 %v10295_v54 }
  0xa8   : > { %17045 = vst [vmem:[#allocation21_spill] sm:$0xff] %v14674_v48  ;;  %v10278_v59 = vld [vmem:[%s14469_s29 + $0xba0] sm:$0xf]  ;;  %v13262_v60 = vld [vmem:[%s14469_s29 + $0xbac] sm:$0xf0]  ;;  %6778 = vmatmul.bf16.vlgmr.msrb.gmra.mxu1 %v14674_v48  ;;  %v10151_v63 = vor.u32 %v13230_v58, %v10150_v57  ;;  %6811 = vmatpush.bf16.msra.mxu0 %v9895_v61 }
  0xa9   : > { %v9878_v0 = vld [vmem:[%s14469_s29 + $0x880] sm:$0xf]  ;;  %v13162_v1 = vld [vmem:[%s14469_s29 + $0x88c] sm:$0xf0]  ;;  %v10279_v3 = vor.u32 %v13262_v60, %v10278_v59  ;;  %6824 = vmatpush.bf16.msra.mxu1 %v10023_v62 }
  0xaa   : > { %v10006_v2 = vld [vmem:[%s14469_s29 + $0x980] sm:$0xf]  ;;  %v13194_v4 = vld [vmem:[%s14469_s29 + $0x98c] sm:$0xf0]  ;;  %v9879_v9 = vor.u32 %v13162_v1, %v9878_v0  ;;  %6837 = vmatpush.bf16.msra.mxu2 %v10151_v63 }
  0xab   : > { %v10134_v5 = vld [vmem:[%s14469_s29 + $0xa80] sm:$0xf]  ;;  %v13226_v6 = vld [vmem:[%s14469_s29 + $0xa8c] sm:$0xf0]  ;;  %v10007_v11 = vor.u32 %v13194_v4, %v10006_v2  ;;  %6850 = vmatpush.bf16.msra.mxu3 %v10279_v3 }
  0xac   : > { %v10262_v7 = vld [vmem:[%s14469_s29 + $0xb80] sm:$0xf]  ;;  %v13258_v8 = vld [vmem:[%s14469_s29 + $0xb8c] sm:$0xf0]  ;;  %v10135_v12 = vor.u32 %v13226_v6, %v10134_v5  ;;  %6812 = vmatpush.bf16.msra.mxu0 %v9879_v9 }
  0xad   : > { %v9862_v10 = vld [vmem:[%s14469_s29 + $0x860] sm:$0xf]  ;;  %v13158_v13 = vld [vmem:[%s14469_s29 + $0x86c] sm:$0xf0]  ;;  %v10263_v16 = vor.u32 %v13258_v8, %v10262_v7  ;;  %6825 = vmatpush.bf16.msra.mxu1 %v10007_v11 }
  0xae   : > { %v9990_v14 = vld [vmem:[%s14469_s29 + $0x960] sm:$0xf]  ;;  %v13190_v15 = vld [vmem:[%s14469_s29 + $0x96c] sm:$0xf0]  ;;  %v9863_v23 = vor.u32 %v13158_v13, %v9862_v10  ;;  %6838 = vmatpush.bf16.msra.mxu2 %v10135_v12 }
  0xaf   : > { %v10118_v17 = vld [vmem:[%s14469_s29 + $0xa60] sm:$0xf]  ;;  %v13222_v18 = vld [vmem:[%s14469_s29 + $0xa6c] sm:$0xf0]  ;;  %v9991_v28 = vor.u32 %v13190_v15, %v9990_v14  ;;  %6851 = vmatpush.bf16.msra.mxu3 %v10263_v16 }
  0xb0   : > { %v10246_v19 = vld [vmem:[%s14469_s29 + $0xb60] sm:$0xf]  ;;  %v13254_v20 = vld [vmem:[%s14469_s29 + $0xb6c] sm:$0xf0]  ;;  %v10119_v30 = vor.u32 %v13222_v18, %v10118_v17  ;;  %6813 = vmatpush.bf16.msra.mxu0 %v9863_v23 }
  0xb1   : > { %v9846_v21 = vld [vmem:[%s14469_s29 + $0x840] sm:$0xf]  ;;  %v13154_v22 = vld [vmem:[%s14469_s29 + $0x84c] sm:$0xf0]  ;;  %v10247_v36 = vor.u32 %v13254_v20, %v10246_v19  ;;  %6826 = vmatpush.bf16.msra.mxu1 %v9991_v28 }
  0xb2   : > { %v9974_v24 = vld [vmem:[%s14469_s29 + $0x940] sm:$0xf]  ;;  %v13186_v25 = vld [vmem:[%s14469_s29 + $0x94c] sm:$0xf0]  ;;  %v9847_v42 = vor.u32 %v13154_v22, %v9846_v21  ;;  %6839 = vmatpush.bf16.msra.mxu2 %v10119_v30 }
  0xb3   : > { %v10102_v26 = vld [vmem:[%s14469_s29 + $0xa40] sm:$0xf]  ;;  %v13218_v27 = vld [vmem:[%s14469_s29 + $0xa4c] sm:$0xf0]  ;;  %v9975_v44 = vor.u32 %v13186_v25, %v9974_v24  ;;  %6852 = vmatpush.bf16.msra.mxu3 %v10247_v36 }
  0xb4   : > { %v10230_v31 = vld [vmem:[%s14469_s29 + $0xb40] sm:$0xf]  ;;  %v13250_v33 = vld [vmem:[%s14469_s29 + $0xb4c] sm:$0xf0]  ;;  %v10103_v47 = vor.u32 %v13218_v27, %v10102_v26  ;;  %6814 = vmatpush.bf16.msra.mxu0 %v9847_v42 }
  0xb5   : > { %v14714_v34 = vld.sshfl [vmem:[#allocation1] sm:$0xff pattern:$0x75316420]  ;;  %v14716_v35 = vld.sshfl [vmem:[#allocation1 + $0x10] sm:$0xff pattern:$0x75316420]  ;;  %v10231_v52 = vor.u32 %v13250_v33, %v10230_v31  ;;  %6827 = vmatpush.bf16.msra.mxu1 %v9975_v44 }
  0xb6   : > { %v14719_v38 = vld.sshfl [vmem:[#allocation1 + $0x8] sm:$0xff pattern:$0x75316420]  ;;  %v14722_v40 = vld.sshfl [vmem:[#allocation1 + $0x18] sm:$0xff pattern:$0x75316420]  ;;  %6840 = vmatpush.bf16.msra.mxu2 %v10103_v47  ;;  %v14753_v26 = vpack.c.bf16 %v14714_v34, %v14714_v34  ;;  %v14760_v31 = vpack.c.bf16 %v14716_v35, %v14716_v35 }
  0xb7   : > { %v423_v39 = vld [vmem:[%s14496_s18 + $0x48] sm:$0xff]  ;;  %473 = vst [vmem:[#allocation1] ss:$2 sm:$0xff] %v422_v37  ;;  %v13150_v50 = vld [vmem:[%s14469_s29 + $0x82c] sm:$0xf0]  ;;  %6853 = vmatpush.bf16.msra.mxu3 %v10231_v52  ;;  %v14764_v33 = vpack.c.bf16 %v14719_v38, %v14719_v38  ;;  %v14770_v37 = vpack.c.bf16 %v14722_v40, %v14722_v40 }
  0xb8   : > { %474 = vst [vmem:[#allocation1 + $0x10] ss:$2 sm:$0xff] %v423_v39  ;;  %v9830_v49 = vld [vmem:[%s14469_s29 + $0x820] sm:$0xf]  ;;  %v13182_v53 = vld [vmem:[%s14469_s29 + $0x92c] sm:$0xf0] }
  0xb9   : > { %v9958_v51 = vld [vmem:[%s14469_s29 + $0x920] sm:$0xf]  ;;  %v13214_v56 = vld [vmem:[%s14469_s29 + $0xa2c] sm:$0xf0]  ;;  %v9831_v59 = vor.u32 %v13150_v50, %v9830_v49  ;;  %17046 = vst [vmem:[#allocation22_spill] sm:$0xff] %v14770_v37 }
  0xba   : > { %v10086_v54 = vld [vmem:[%s14469_s29 + $0xa20] sm:$0xf]  ;;  %v13246_v58 = vld [vmem:[%s14469_s29 + $0xb2c] sm:$0xf0]  ;;  %v9959_v62 = vor.u32 %v13182_v53, %v9958_v51 }
  0xbb   : > { %v10214_v57 = vld [vmem:[%s14469_s29 + $0xb20] sm:$0xf]  ;;  %v13146_v61 = vld [vmem:[%s14469_s29 + $0x80c] sm:$0xf0]  ;;  %v10087_v63 = vor.u32 %v13214_v56, %v10086_v54  ;;  %6815 = vmatpush.bf16.msra.mxu0 %v9831_v59 }
  0xbc   : > { %v9814_v60 = vld [vmem:[%s14469_s29 + $0x800] sm:$0xf]  ;;  %v13178_v1 = vld [vmem:[%s14469_s29 + $0x90c] sm:$0xf0]  ;;  %v10215_v3 = vor.u32 %v13246_v58, %v10214_v57  ;;  %6828 = vmatpush.bf16.msra.mxu1 %v9959_v62 }
  0xbd   : > { %v9942_v0 = vld [vmem:[%s14469_s29 + $0x900] sm:$0xf]  ;;  %v13210_v4 = vld [vmem:[%s14469_s29 + $0xa0c] sm:$0xf0]  ;;  %v9815_v10 = vor.u32 %v13146_v61, %v9814_v60  ;;  %6841 = vmatpush.bf16.msra.mxu2 %v10087_v63 }
  0xbe   : > { %v10070_v2 = vld [vmem:[%s14469_s29 + $0xa00] sm:$0xf]  ;;  %v13242_v6 = vld [vmem:[%s14469_s29 + $0xb0c] sm:$0xf0]  ;;  %v9943_v14 = vor.u32 %v13178_v1, %v9942_v0  ;;  %6854 = vmatpush.bf16.msra.mxu3 %v10215_v3 }
  0xbf   : > { %v10198_v5 = vld [vmem:[%s14469_s29 + $0xb00] sm:$0xf]  ;;  %v13302_v8 = vld [vmem:[%s14469_s29 + $0xcec] sm:$0xf0]  ;;  %v10071_v15 = vor.u32 %v13210_v4, %v10070_v2  ;;  %6816 = vmatpush.bf16.msra.mxu0 %v9815_v10 }
  0xc0   : > { %v10438_v7 = vld [vmem:[%s14469_s29 + $0xce0] sm:$0xf]  ;;  %v13334_v11 = vld [vmem:[%s14469_s29 + $0xdec] sm:$0xf0]  ;;  %v10199_v18 = vor.u32 %v13242_v6, %v10198_v5  ;;  %6829 = vmatpush.bf16.msra.mxu1 %v9943_v14  ;;  %v424_v5 = vld [vmem:[%s14496_s18 + $0x50] sm:$0xff] }
  0xc1   : > { %v10566_v9 = vld [vmem:[%s14469_s29 + $0xde0] sm:$0xf]  ;;  %v13366_v13 = vld [vmem:[%s14469_s29 + $0xeec] sm:$0xf0]  ;;  %v10439_v19 = vor.u32 %v13302_v8, %v10438_v7  ;;  %6842 = vmatpush.bf16.msra.mxu2 %v10071_v15 }
  0xc2   : > { %v10694_v12 = vld [vmem:[%s14469_s29 + $0xee0] sm:$0xf]  ;;  %v13398_v17 = vld [vmem:[%s14469_s29 + $0xfec] sm:$0xf0]  ;;  %v10567_v20 = vor.u32 %v13334_v11, %v10566_v9  ;;  %6855 = vmatpush.bf16.msra.mxu3 %v10199_v18  ;;  %6817 = vmatmul.bf16.vlgmr.msra.gmra.mxu0 %v14753_v26 }
  0xc3   : > { %v10822_v16 = vld [vmem:[%s14469_s29 + $0xfe0] sm:$0xf]  ;;  %v10695_v21 = vor.u32 %v13366_v13, %v10694_v12  ;;  %v13298_v23 = vld [vmem:[%s14469_s29 + $0xccc] sm:$0xf0]  ;;  %6861 = vmatpush.bf16.msrb.mxu0 %v10439_v19  ;;  %6830 = vmatmul.bf16.vlgmr.msra.gmra.mxu1 %v14764_v33 }
  0xc4   : > { %v10422_v22 = vld [vmem:[%s14469_s29 + $0xcc0] sm:$0xf]  ;;  %v10823_v25 = vor.u32 %v13398_v17, %v10822_v16  ;;  %v13330_v27 = vld [vmem:[%s14469_s29 + $0xdcc] sm:$0xf0]  ;;  %6874 = vmatpush.bf16.msrb.mxu1 %v10567_v20  ;;  %6843 = vmatmul.bf16.vlgmr.msra.gmra.mxu2 %v14760_v31 }
  0xc5   : > { %v10550_v24 = vld [vmem:[%s14469_s29 + $0xdc0] sm:$0xf]  ;;  %v13362_v30 = vld [vmem:[%s14469_s29 + $0xecc] sm:$0xf0]  ;;  %v10423_v39 = vor.u32 %v13298_v23, %v10422_v22  ;;  %6887 = vmatpush.bf16.msrb.mxu2 %v10695_v21  ;;  %6856 = vmatmul.bf16.vlgmr.msra.gmra.mxu3 %v14770_v37 }
  0xc6   : > { %v10678_v28 = vld [vmem:[%s14469_s29 + $0xec0] sm:$0xf]  ;;  %v13394_v34 = vld [vmem:[%s14469_s29 + $0xfcc] sm:$0xf0]  ;;  %v10551_v35 = vor.u32 %v13330_v27, %v10550_v24  ;;  %6900 = vmatpush.bf16.msrb.mxu3 %v10823_v25 }
  0xc7   : > { %v10806_v36 = vld [vmem:[%s14469_s29 + $0xfc0] sm:$0xf]  ;;  %v10679_v42 = vor.u32 %v13362_v30, %v10678_v28  ;;  %v13294_v44 = vld [vmem:[%s14469_s29 + $0xcac] sm:$0xf0]  ;;  %6862 = vmatpush.bf16.msrb.mxu0 %v10423_v39 }
  0xc8   : > { %v10406_v38 = vld [vmem:[%s14469_s29 + $0xca0] sm:$0xf]  ;;  %v10807_v49 = vor.u32 %v13394_v34, %v10806_v36  ;;  %v13326_v50 = vld [vmem:[%s14469_s29 + $0xdac] sm:$0xf0]  ;;  %6875 = vmatpush.bf16.msrb.mxu1 %v10551_v35 }
  0xc9   : > { %v10534_v47 = vld [vmem:[%s14469_s29 + $0xda0] sm:$0xf]  ;;  %v13358_v51 = vld [vmem:[%s14469_s29 + $0xeac] sm:$0xf0]  ;;  %v10407_v54 = vor.u32 %v13294_v44, %v10406_v38  ;;  %6888 = vmatpush.bf16.msrb.mxu2 %v10679_v42 }
  0xca   : > { %v10662_v40 = vld [vmem:[%s14469_s29 + $0xea0] sm:$0xf]  ;;  %v13390_v53 = vld [vmem:[%s14469_s29 + $0xfac] sm:$0xf0]  ;;  %v10535_v58 = vor.u32 %v13326_v50, %v10534_v47  ;;  %6901 = vmatpush.bf16.msrb.mxu3 %v10807_v49 }
  0xcb   : > { %v10790_v52 = vld [vmem:[%s14469_s29 + $0xfa0] sm:$0xf]  ;;  %v13290_v57 = vld [vmem:[%s14469_s29 + $0xc8c] sm:$0xf0]  ;;  %v10663_v59 = vor.u32 %v13358_v51, %v10662_v40  ;;  %6863 = vmatpush.bf16.msrb.mxu0 %v10407_v54 }
  0xcc   : > { %v10390_v56 = vld [vmem:[%s14469_s29 + $0xc80] sm:$0xf]  ;;  %v13322_v61 = vld [vmem:[%s14469_s29 + $0xd8c] sm:$0xf0]  ;;  %v10791_v63 = vor.u32 %v13390_v53, %v10790_v52  ;;  %6876 = vmatpush.bf16.msrb.mxu1 %v10535_v58 }
  0xcd   : > { %v10518_v60 = vld [vmem:[%s14469_s29 + $0xd80] sm:$0xf]  ;;  %v13354_v0 = vld [vmem:[%s14469_s29 + $0xe8c] sm:$0xf0]  ;;  %v10391_v6 = vor.u32 %v13290_v57, %v10390_v56  ;;  %6889 = vmatpush.bf16.msrb.mxu2 %v10663_v59 }
  0xce   : > { %v10646_v62 = vld [vmem:[%s14469_s29 + $0xe80] sm:$0xf]  ;;  %v13386_v2 = vld [vmem:[%s14469_s29 + $0xf8c] sm:$0xf0]  ;;  %v10519_v12 = vor.u32 %v13322_v61, %v10518_v60  ;;  %6902 = vmatpush.bf16.msrb.mxu3 %v10791_v63 }
  0xcf   : > { %v10774_v1 = vld [vmem:[%s14469_s29 + $0xf80] sm:$0xf]  ;;  %v13286_v4 = vld [vmem:[%s14469_s29 + $0xc6c] sm:$0xf0]  ;;  %v10647_v13 = vor.u32 %v13354_v0, %v10646_v62  ;;  %6864 = vmatpush.bf16.msrb.mxu0 %v10391_v6 }
  0xd0   : > { %v10374_v3 = vld [vmem:[%s14469_s29 + $0xc60] sm:$0xf]  ;;  %v13318_v8 = vld [vmem:[%s14469_s29 + $0xd6c] sm:$0xf0]  ;;  %v10775_v17 = vor.u32 %v13386_v2, %v10774_v1  ;;  %6877 = vmatpush.bf16.msrb.mxu1 %v10519_v12 }
  0xd1   : > { %v10502_v7 = vld [vmem:[%s14469_s29 + $0xd60] sm:$0xf]  ;;  %v14798_v10 = vld.sshfl [vmem:[#allocation1 + $0x20] sm:$0xff pattern:$0x75316420]  ;;  %v425_v16 = vld [vmem:[%s14496_s18 + $0x58] sm:$0xff]  ;;  %v10375_v21 = vor.u32 %v13286_v4, %v10374_v3  ;;  %6890 = vmatpush.bf16.msrb.mxu2 %v10647_v13 }
  0xd2   : > { %v10630_v9 = vld [vmem:[%s14469_s29 + $0xe60] sm:$0xf]  ;;  %v14800_v11 = vld.sshfl [vmem:[#allocation1 + $0x30] sm:$0xff pattern:$0x75316420]  ;;  %v10503_v22 = vor.u32 %v13318_v8, %v10502_v7  ;;  %6903 = vmatpush.bf16.msrb.mxu3 %v10775_v17 }
  0xd3   : > { %v13350_v14 = vld [vmem:[%s14469_s29 + $0xe6c] sm:$0xf0]  ;;  %v14803_v15 = vld.sshfl [vmem:[#allocation1 + $0x28] sm:$0xff pattern:$0x75316420]  ;;  %6865 = vmatpush.bf16.msrb.mxu0 %v10375_v21 }
  0xd4   : > { %475 = vst [vmem:[#allocation1 + $0x20] ss:$2 sm:$0xff] %v424_v5  ;;  %v14806_v18 = vld.sshfl [vmem:[#allocation1 + $0x38] sm:$0xff pattern:$0x75316420]  ;;  %v10631_v23 = vor.u32 %v13350_v14, %v10630_v9  ;;  %6878 = vmatpush.bf16.msrb.mxu1 %v10503_v22 }
  0xd5   : > { %v10758_v19 = vld [vmem:[%s14469_s29 + $0xf60] sm:$0xf]  ;;  %v13382_v20 = vld [vmem:[%s14469_s29 + $0xf6c] sm:$0xf0]  ;;  %476 = vst [vmem:[#allocation1 + $0x30] ss:$2 sm:$0xff] %v425_v16 }
  0xd6   : > { %v10358_v24 = vld [vmem:[%s14469_s29 + $0xc40] sm:$0xf]  ;;  %v13282_v25 = vld [vmem:[%s14469_s29 + $0xc4c] sm:$0xf0]  ;;  %v10759_v28 = vor.u32 %v13382_v20, %v10758_v19  ;;  %6891 = vmatpush.bf16.msrb.mxu2 %v10631_v23 }
  0xd7   : > { %v10486_v27 = vld [vmem:[%s14469_s29 + $0xd40] sm:$0xf]  ;;  %v13314_v30 = vld [vmem:[%s14469_s29 + $0xd4c] sm:$0xf0]  ;;  %v10359_v42 = vor.u32 %v13282_v25, %v10358_v24 }
  0xd8   : > { %v10614_v36 = vld [vmem:[%s14469_s29 + $0xe40] sm:$0xf]  ;;  %v13346_v34 = vld [vmem:[%s14469_s29 + $0xe4c] sm:$0xf0]  ;;  %v10487_v38 = vor.u32 %v13314_v30, %v10486_v27  ;;  %6904 = vmatpush.bf16.msrb.mxu3 %v10759_v28  ;;  %v14847_v30 = vpack.c.bf16 %v14798_v10, %v14798_v10 }
  0xd9   : > { %v10742_v39 = vld [vmem:[%s14469_s29 + $0xf40] sm:$0xf]  ;;  %v13378_v35 = vld [vmem:[%s14469_s29 + $0xf4c] sm:$0xf0]  ;;  %v10615_v44 = vor.u32 %v13346_v34, %v10614_v36  ;;  %6866 = vmatpush.bf16.msrb.mxu0 %v10359_v42  ;;  %v14858_v42 = vpack.c.bf16 %v14803_v15, %v14803_v15 }
  0xda   : > { %v10342_v47 = vld [vmem:[%s14469_s29 + $0xc20] sm:$0xf]  ;;  %v13278_v49 = vld [vmem:[%s14469_s29 + $0xc2c] sm:$0xf0]  ;;  %v10743_v40 = vor.u32 %v13378_v35, %v10742_v39  ;;  %6879 = vmatpush.bf16.msrb.mxu1 %v10487_v38  ;;  %v14854_v35 = vpack.c.bf16 %v14800_v11, %v14800_v11 }
  0xdb   : > { %v10470_v50 = vld [vmem:[%s14469_s29 + $0xd20] sm:$0xf]  ;;  %v13310_v51 = vld [vmem:[%s14469_s29 + $0xd2c] sm:$0xf0]  ;;  %v10343_v57 = vor.u32 %v13278_v49, %v10342_v47  ;;  %6892 = vmatpush.bf16.msrb.mxu2 %v10615_v44  ;;  %v14865_v47 = vpack.c.bf16 %v14806_v18, %v14806_v18 }
  0xdc   : > { %v10598_v52 = vld [vmem:[%s14469_s29 + $0xe20] sm:$0xf]  ;;  %v13342_v53 = vld [vmem:[%s14469_s29 + $0xe2c] sm:$0xf0]  ;;  %v10471_v60 = vor.u32 %v13310_v51, %v10470_v50  ;;  %6905 = vmatpush.bf16.msrb.mxu3 %v10743_v40 }
  0xdd   : > { %v10726_v54 = vld [vmem:[%s14469_s29 + $0xf20] sm:$0xf]  ;;  %v13374_v56 = vld [vmem:[%s14469_s29 + $0xf2c] sm:$0xf0]  ;;  %v10599_v61 = vor.u32 %v13342_v53, %v10598_v52  ;;  %6867 = vmatpush.bf16.msrb.mxu0 %v10343_v57 }
  0xde   : > { %v10326_v58 = vld [vmem:[%s14469_s29 + $0xc00] sm:$0xf]  ;;  %v13274_v59 = vld [vmem:[%s14469_s29 + $0xc0c] sm:$0xf0]  ;;  %v10727_v1 = vor.u32 %v13374_v56, %v10726_v54  ;;  %6880 = vmatpush.bf16.msrb.mxu1 %v10471_v60 }
  0xdf   : > { %v10454_v62 = vld [vmem:[%s14469_s29 + $0xd00] sm:$0xf]  ;;  %v13306_v63 = vld [vmem:[%s14469_s29 + $0xd0c] sm:$0xf0]  ;;  %v10327_v8 = vor.u32 %v13274_v59, %v10326_v58  ;;  %6893 = vmatpush.bf16.msrb.mxu2 %v10599_v61  ;;  %v426_v58 = vld [vmem:[%s14496_s18 + $0x60] sm:$0xff] }
  0xe0   : > { %v10582_v0 = vld [vmem:[%s14469_s29 + $0xe00] sm:$0xf]  ;;  %v13338_v2 = vld [vmem:[%s14469_s29 + $0xe0c] sm:$0xf0]  ;;  %v10455_v14 = vor.u32 %v13306_v63, %v10454_v62  ;;  %6906 = vmatpush.bf16.msrb.mxu3 %v10727_v1 }
  0xe1   : > { %v10710_v3 = vld [vmem:[%s14469_s29 + $0xf00] sm:$0xf]  ;;  %v13370_v4 = vld [vmem:[%s14469_s29 + $0xf0c] sm:$0xf0]  ;;  %v10583_v16 = vor.u32 %v13338_v2, %v10582_v0  ;;  %6868 = vmatpush.bf16.msrb.mxu0 %v10327_v8 }
  0xe2   : > { %v10950_v5 = vld [vmem:[%s14469_s29 + $0x10e0] sm:$0xf]  ;;  %v13430_v6 = vld [vmem:[%s14469_s29 + $0x10ec] sm:$0xf0]  ;;  %v10711_v20 = vor.u32 %v13370_v4, %v10710_v3  ;;  %6881 = vmatpush.bf16.msrb.mxu1 %v10455_v14 }
  0xe3   : > { %v11078_v7 = vld [vmem:[%s14469_s29 + $0x11e0] sm:$0xf]  ;;  %v13462_v9 = vld [vmem:[%s14469_s29 + $0x11ec] sm:$0xf0]  ;;  %v10951_v21 = vor.u32 %v13430_v6, %v10950_v5  ;;  %6894 = vmatpush.bf16.msrb.mxu2 %v10583_v16 }
  0xe4   : > { %v11206_v12 = vld [vmem:[%s14469_s29 + $0x12e0] sm:$0xf]  ;;  %v13494_v13 = vld [vmem:[%s14469_s29 + $0x12ec] sm:$0xf0]  ;;  %v11079_v22 = vor.u32 %v13462_v9, %v11078_v7  ;;  %6907 = vmatpush.bf16.msrb.mxu3 %v10711_v20  ;;  %6869 = vmatmul.bf16.vlgmr.msrb.gmra.mxu0 %v14847_v30 }
  0xe5   : > { %v11334_v17 = vld [vmem:[%s14469_s29 + $0x13e0] sm:$0xf]  ;;  %v13526_v19 = vld [vmem:[%s14469_s29 + $0x13ec] sm:$0xf0]  ;;  %v11207_v23 = vor.u32 %v13494_v13, %v11206_v12  ;;  %6913 = vmatpush.bf16.msra.mxu0 %v10951_v21  ;;  %6882 = vmatmul.bf16.vlgmr.msrb.gmra.mxu1 %v14858_v42 }
  0xe6   : > { %v10934_v24 = vld [vmem:[%s14469_s29 + $0x10c0] sm:$0xf]  ;;  %v13426_v25 = vld [vmem:[%s14469_s29 + $0x10cc] sm:$0xf0]  ;;  %v11335_v28 = vor.u32 %v13526_v19, %v11334_v17  ;;  %6926 = vmatpush.bf16.msra.mxu1 %v11079_v22  ;;  %6895 = vmatmul.bf16.vlgmr.msrb.gmra.mxu2 %v14854_v35 }
  0xe7   : > { %v11062_v27 = vld [vmem:[%s14469_s29 + $0x11c0] sm:$0xf]  ;;  %v13458_v36 = vld [vmem:[%s14469_s29 + $0x11cc] sm:$0xf0]  ;;  %v10935_v49 = vor.u32 %v13426_v25, %v10934_v24  ;;  %6939 = vmatpush.bf16.msra.mxu2 %v11207_v23  ;;  %6908 = vmatmul.bf16.vlgmr.msrb.gmra.mxu3 %v14865_v47 }
  0xe8   : > { %v11190_v34 = vld [vmem:[%s14469_s29 + $0x12c0] sm:$0xf]  ;;  %v13490_v39 = vld [vmem:[%s14469_s29 + $0x12cc] sm:$0xf0]  ;;  %v11063_v15 = vor.u32 %v13458_v36, %v11062_v27  ;;  %6952 = vmatpush.bf16.msra.mxu3 %v11335_v28 }
  0xe9   : > { %v11318_v38 = vld [vmem:[%s14469_s29 + $0x13c0] sm:$0xf]  ;;  %v13522_v10 = vld [vmem:[%s14469_s29 + $0x13cc] sm:$0xf0]  ;;  %v11191_v51 = vor.u32 %v13490_v39, %v11190_v34  ;;  %6914 = vmatpush.bf16.msra.mxu0 %v10935_v49 }
  0xea   : > { %v10918_v44 = vld [vmem:[%s14469_s29 + $0x10a0] sm:$0xf]  ;;  %v13422_v11 = vld [vmem:[%s14469_s29 + $0x10ac] sm:$0xf0]  ;;  %v11319_v56 = vor.u32 %v13522_v10, %v11318_v38  ;;  %6927 = vmatpush.bf16.msra.mxu1 %v11063_v15 }
  0xeb   : > { %v11046_v50 = vld [vmem:[%s14469_s29 + $0x11a0] sm:$0xf]  ;;  %v13454_v40 = vld [vmem:[%s14469_s29 + $0x11ac] sm:$0xf0]  ;;  %v10919_v62 = vor.u32 %v13422_v11, %v10918_v44  ;;  %6940 = vmatpush.bf16.msra.mxu2 %v11191_v51 }
  0xec   : > { %v11174_v52 = vld [vmem:[%s14469_s29 + $0x12a0] sm:$0xf]  ;;  %v13486_v53 = vld [vmem:[%s14469_s29 + $0x12ac] sm:$0xf0]  ;;  %v11047_v1 = vor.u32 %v13454_v40, %v11046_v50  ;;  %6953 = vmatpush.bf16.msra.mxu3 %v11319_v56 }
  0xed   : > { %v11302_v54 = vld [vmem:[%s14469_s29 + $0x13a0] sm:$0xf]  ;;  %v13518_v18 = vld [vmem:[%s14469_s29 + $0x13ac] sm:$0xf0]  ;;  %v11175_v2 = vor.u32 %v13486_v53, %v11174_v52  ;;  %6915 = vmatpush.bf16.msra.mxu0 %v10919_v62 }
  0xee   : > { %v14875_v57 = vld.sshfl [vmem:[#allocation1] sm:$0xff pattern:$0x75316420]  ;;  %v10902_v59 = vld [vmem:[%s14469_s29 + $0x1080] sm:$0xf]  ;;  %v11303_v5 = vor.u32 %v13518_v18, %v11302_v54  ;;  %6928 = vmatpush.bf16.msra.mxu1 %v11047_v1 }
  0xef   : > { %v14881_v60 = vld.sshfl [vmem:[#allocation1 + $0x10] sm:$0xff pattern:$0x75316420]  ;;  %v14883_v61 = vld.sshfl [vmem:[#allocation1 + $0x8] sm:$0xff pattern:$0x75316420]  ;;  %6941 = vmatpush.bf16.msra.mxu2 %v11175_v2 }
  0xf0   : > { %485 = vst [vmem:[#allocation1] ss:$2 sm:$0xff] %v426_v58  ;;  %v427_v63 = vld [vmem:[%s14496_s18 + $0x68] sm:$0xff]  ;;  %v14887_v0 = vld.sshfl [vmem:[#allocation1 + $0x18] sm:$0xff pattern:$0x75316420]  ;;  %6954 = vmatpush.bf16.msra.mxu3 %v11303_v5 }
  0xf1   : > { %v13418_v3 = vld [vmem:[%s14469_s29 + $0x108c] sm:$0xf0]  ;;  %v11030_v4 = vld [vmem:[%s14469_s29 + $0x1180] sm:$0xf]  ;;  %486 = vst [vmem:[#allocation1 + $0x10] ss:$2 sm:$0xff] %v427_v63 }
  0xf2   : > { %v13450_v6 = vld [vmem:[%s14469_s29 + $0x118c] sm:$0xf0]  ;;  %v11158_v7 = vld [vmem:[%s14469_s29 + $0x1280] sm:$0xf]  ;;  %v10903_v13 = vor.u32 %v13418_v3, %v10902_v59 }
  0xf3   : > { %v13482_v8 = vld [vmem:[%s14469_s29 + $0x128c] sm:$0xf0]  ;;  %v11286_v9 = vld [vmem:[%s14469_s29 + $0x1380] sm:$0xf]  ;;  %v11031_v14 = vor.u32 %v13450_v6, %v11030_v4 }
  0xf4   : > { %v13514_v12 = vld [vmem:[%s14469_s29 + $0x138c] sm:$0xf0]  ;;  %v11159_v16 = vor.u32 %v13482_v8, %v11158_v7  ;;  %v10886_v17 = vld [vmem:[%s14469_s29 + $0x1060] sm:$0xf]  ;;  %6916 = vmatpush.bf16.msra.mxu0 %v10903_v13 }
  0xf5   : > { %v13414_v19 = vld [vmem:[%s14469_s29 + $0x106c] sm:$0xf0]  ;;  %v11014_v20 = vld [vmem:[%s14469_s29 + $0x1160] sm:$0xf]  ;;  %v11287_v21 = vor.u32 %v13514_v12, %v11286_v9  ;;  %6929 = vmatpush.bf16.msra.mxu1 %v11031_v14 }
  0xf6   : > { %v13446_v22 = vld [vmem:[%s14469_s29 + $0x116c] sm:$0xf0]  ;;  %v11142_v23 = vld [vmem:[%s14469_s29 + $0x1260] sm:$0xf]  ;;  %v10887_v28 = vor.u32 %v13414_v19, %v10886_v17  ;;  %6942 = vmatpush.bf16.msra.mxu2 %v11159_v16 }
  0xf7   : > { %v13478_v24 = vld [vmem:[%s14469_s29 + $0x126c] sm:$0xf0]  ;;  %v11270_v25 = vld [vmem:[%s14469_s29 + $0x1360] sm:$0xf]  ;;  %v11015_v36 = vor.u32 %v13446_v22, %v11014_v20  ;;  %6955 = vmatpush.bf16.msra.mxu3 %v11287_v21 }
  0xf8   : > { %v13510_v27 = vld [vmem:[%s14469_s29 + $0x136c] sm:$0xf0]  ;;  %v11143_v34 = vor.u32 %v13478_v24, %v11142_v23  ;;  %v10870_v39 = vld [vmem:[%s14469_s29 + $0x1040] sm:$0xf]  ;;  %6917 = vmatpush.bf16.msra.mxu0 %v10887_v28 }
  0xf9   : > { %v13410_v38 = vld [vmem:[%s14469_s29 + $0x104c] sm:$0xf0]  ;;  %v10998_v10 = vld [vmem:[%s14469_s29 + $0x1140] sm:$0xf]  ;;  %v11271_v44 = vor.u32 %v13510_v27, %v11270_v25  ;;  %6930 = vmatpush.bf16.msra.mxu1 %v11015_v36 }
  0xfa   : > { %v13442_v49 = vld [vmem:[%s14469_s29 + $0x114c] sm:$0xf0]  ;;  %v11126_v11 = vld [vmem:[%s14469_s29 + $0x1240] sm:$0xf]  ;;  %v10871_v51 = vor.u32 %v13410_v38, %v10870_v39  ;;  %6943 = vmatpush.bf16.msra.mxu2 %v11143_v34 }
  0xfb   : > { %v13474_v50 = vld [vmem:[%s14469_s29 + $0x124c] sm:$0xf0]  ;;  %v11254_v40 = vld [vmem:[%s14469_s29 + $0x1340] sm:$0xf]  ;;  %v10999_v52 = vor.u32 %v13442_v49, %v10998_v10  ;;  %6956 = vmatpush.bf16.msra.mxu3 %v11271_v44 }
  0xfc   : > { %v13506_v15 = vld [vmem:[%s14469_s29 + $0x134c] sm:$0xf0]  ;;  %v11127_v53 = vor.u32 %v13474_v50, %v11126_v11  ;;  %v10854_v54 = vld [vmem:[%s14469_s29 + $0x1020] sm:$0xf]  ;;  %6918 = vmatpush.bf16.msra.mxu0 %v10871_v51  ;;  %v14942_v51 = vpack.c.bf16 %v14875_v57, %v14875_v57 }
  0xfd   : > { %v13406_v56 = vld [vmem:[%s14469_s29 + $0x102c] sm:$0xf0]  ;;  %v10982_v18 = vld [vmem:[%s14469_s29 + $0x1120] sm:$0xf]  ;;  %v11255_v58 = vor.u32 %v13506_v15, %v11254_v40  ;;  %6931 = vmatpush.bf16.msra.mxu1 %v10999_v52 }
  0xfe   : > { %v13438_v59 = vld [vmem:[%s14469_s29 + $0x112c] sm:$0xf0]  ;;  %v11110_v62 = vld [vmem:[%s14469_s29 + $0x1220] sm:$0xf]  ;;  %v10855_v3 = vor.u32 %v13406_v56, %v10854_v54  ;;  %6944 = vmatpush.bf16.msra.mxu2 %v11127_v53  ;;  %v14949_v56 = vpack.c.bf16 %v14881_v60, %v14881_v60 }
  0xff   : > { %v13470_v63 = vld [vmem:[%s14469_s29 + $0x122c] sm:$0xf0]  ;;  %v11238_v1 = vld [vmem:[%s14469_s29 + $0x1320] sm:$0xf]  ;;  %v10983_v6 = vor.u32 %v13438_v59, %v10982_v18  ;;  %6957 = vmatpush.bf16.msra.mxu3 %v11255_v58  ;;  %v14953_v18 = vpack.c.bf16 %v14883_v61, %v14883_v61 }
 0x100   : > { %v13502_v2 = vld [vmem:[%s14469_s29 + $0x132c] sm:$0xf0]  ;;  %v10838_v4 = vld [vmem:[%s14469_s29 + $0x1000] sm:$0xf]  ;;  %v11111_v7 = vor.u32 %v13470_v63, %v11110_v62  ;;  %6919 = vmatpush.bf16.msra.mxu0 %v10855_v3  ;;  %v14960_v62 = vpack.c.bf16 %v14887_v0, %v14887_v0 }
 0x101   : > { %v13402_v5 = vld [vmem:[%s14469_s29 + $0x100c] sm:$0xf0]  ;;  %v10966_v8 = vld [vmem:[%s14469_s29 + $0x1100] sm:$0xf]  ;;  %v11239_v13 = vor.u32 %v13502_v2, %v11238_v1  ;;  %6932 = vmatpush.bf16.msra.mxu1 %v10983_v6 }
 0x102   : > { %v13434_v9 = vld [vmem:[%s14469_s29 + $0x110c] sm:$0xf0]  ;;  %v11094_v12 = vld [vmem:[%s14469_s29 + $0x1200] sm:$0xf]  ;;  %v10839_v22 = vor.u32 %v13402_v5, %v10838_v4  ;;  %6945 = vmatpush.bf16.msra.mxu2 %v11111_v7  ;;  %v428_v7 = vld [vmem:[%s14496_s18 + $0x70] sm:$0xff] }
 0x103   : > { %v13466_v14 = vld [vmem:[%s14469_s29 + $0x120c] sm:$0xf0]  ;;  %v11222_v16 = vld [vmem:[%s14469_s29 + $0x1300] sm:$0xf]  ;;  %v10967_v27 = vor.u32 %v13434_v9, %v10966_v8  ;;  %6958 = vmatpush.bf16.msra.mxu3 %v11239_v13 }
 0x104   : > { %v13498_v17 = vld [vmem:[%s14469_s29 + $0x130c] sm:$0xf0]  ;;  %v11462_v19 = vld [vmem:[%s14469_s29 + $0x14e0] sm:$0xf]  ;;  %v11095_v28 = vor.u32 %v13466_v14, %v11094_v12  ;;  %6920 = vmatpush.bf16.msra.mxu0 %v10839_v22 }
 0x105   : > { %v13558_v20 = vld [vmem:[%s14469_s29 + $0x14ec] sm:$0xf0]  ;;  %v11590_v21 = vld [vmem:[%s14469_s29 + $0x15e0] sm:$0xf]  ;;  %v11223_v39 = vor.u32 %v13498_v17, %v11222_v16  ;;  %6933 = vmatpush.bf16.msra.mxu1 %v10967_v27 }
 0x106   : > { %v13590_v23 = vld [vmem:[%s14469_s29 + $0x15ec] sm:$0xf0]  ;;  %v11718_v24 = vld [vmem:[%s14469_s29 + $0x16e0] sm:$0xf]  ;;  %v11463_v38 = vor.u32 %v13558_v20, %v11462_v19  ;;  %6946 = vmatpush.bf16.msra.mxu2 %v11095_v28 }
 0x107   : > { %v13622_v25 = vld [vmem:[%s14469_s29 + $0x16ec] sm:$0xf0]  ;;  %v11846_v36 = vld [vmem:[%s14469_s29 + $0x17e0] sm:$0xf]  ;;  %v11591_v44 = vor.u32 %v13590_v23, %v11590_v21  ;;  %6959 = vmatpush.bf16.msra.mxu3 %v11223_v39  ;;  %6921 = vmatmul.bf16.vlgmr.msra.gmra.mxu0 %v14942_v51 }
 0x108   : > { %v13654_v34 = vld [vmem:[%s14469_s29 + $0x17ec] sm:$0xf0]  ;;  %v11446_v10 = vld [vmem:[%s14469_s29 + $0x14c0] sm:$0xf]  ;;  %v11719_v49 = vor.u32 %v13622_v25, %v11718_v24  ;;  %6965 = vmatpush.bf16.msrb.mxu0 %v11463_v38  ;;  %6934 = vmatmul.bf16.vlgmr.msra.gmra.mxu1 %v14953_v18 }
 0x109   : > { %v13554_v11 = vld [vmem:[%s14469_s29 + $0x14cc] sm:$0xf0]  ;;  %v11574_v50 = vld [vmem:[%s14469_s29 + $0x15c0] sm:$0xf]  ;;  %v11847_v15 = vor.u32 %v13654_v34, %v11846_v36  ;;  %6978 = vmatpush.bf16.msrb.mxu1 %v11591_v44  ;;  %6947 = vmatmul.bf16.vlgmr.msra.gmra.mxu2 %v14949_v56 }
 0x10a   : > { %v13586_v40 = vld [vmem:[%s14469_s29 + $0x15cc] sm:$0xf0]  ;;  %v11702_v52 = vld [vmem:[%s14469_s29 + $0x16c0] sm:$0xf]  ;;  %v11447_v63 = vor.u32 %v13554_v11, %v11446_v10  ;;  %6991 = vmatpush.bf16.msrb.mxu2 %v11719_v49  ;;  %6960 = vmatmul.bf16.vlgmr.msra.gmra.mxu3 %v14960_v62 }
 0x10b   : > { %v13618_v53 = vld [vmem:[%s14469_s29 + $0x16cc] sm:$0xf0]  ;;  %v11830_v54 = vld [vmem:[%s14469_s29 + $0x17c0] sm:$0xf]  ;;  %v11575_v5 = vor.u32 %v13586_v40, %v11574_v50  ;;  %7004 = vmatpush.bf16.msrb.mxu3 %v11847_v15 }
 0x10c   : > { %v13650_v58 = vld [vmem:[%s14469_s29 + $0x17cc] sm:$0xf0]  ;;  %v11430_v59 = vld [vmem:[%s14469_s29 + $0x14a0] sm:$0xf]  ;;  %v11703_v6 = vor.u32 %v13618_v53, %v11702_v52  ;;  %6966 = vmatpush.bf16.msrb.mxu0 %v11447_v63 }
 0x10d   : > { %v13550_v57 = vld [vmem:[%s14469_s29 + $0x14ac] sm:$0xf0]  ;;  %v11558_v1 = vld [vmem:[%s14469_s29 + $0x15a0] sm:$0xf]  ;;  %v11831_v9 = vor.u32 %v13650_v58, %v11830_v54  ;;  %6979 = vmatpush.bf16.msrb.mxu1 %v11575_v5 }
 0x10e   : > { %v13582_v2 = vld [vmem:[%s14469_s29 + $0x15ac] sm:$0xf0]  ;;  %v11686_v60 = vld [vmem:[%s14469_s29 + $0x16a0] sm:$0xf]  ;;  %v11431_v16 = vor.u32 %v13550_v57, %v11430_v59  ;;  %6992 = vmatpush.bf16.msrb.mxu2 %v11703_v6 }
 0x10f   : > { %v13614_v3 = vld [vmem:[%s14469_s29 + $0x16ac] sm:$0xf0]  ;;  %v14966_v4 = vld.sshfl [vmem:[#allocation1 + $0x20] sm:$0xff pattern:$0x75316420]  ;;  %v11559_v17 = vor.u32 %v13582_v2, %v11558_v1  ;;  %7005 = vmatpush.bf16.msrb.mxu3 %v11831_v9 }
 0x110   : > { %v14968_v61 = vld.sshfl [vmem:[#allocation1 + $0x30] sm:$0xff pattern:$0x75316420]  ;;  %v14971_v8 = vld.sshfl [vmem:[#allocation1 + $0x28] sm:$0xff pattern:$0x75316420]  ;;  %v11687_v19 = vor.u32 %v13614_v3, %v11686_v60  ;;  %6967 = vmatpush.bf16.msrb.mxu0 %v11431_v16 }
 0x111   : > { %v429_v0 = vld [vmem:[%s14496_s18 + $0x78] sm:$0xff]  ;;  %487 = vst [vmem:[#allocation1 + $0x20] ss:$2 sm:$0xff] %v428_v7  ;;  %v11814_v13 = vld [vmem:[%s14469_s29 + $0x17a0] sm:$0xf]  ;;  %6980 = vmatpush.bf16.msrb.mxu1 %v11559_v17 }
 0x112   : > { %v14975_v12 = vld.sshfl [vmem:[#allocation1 + $0x38] sm:$0xff pattern:$0x75316420]  ;;  %v11414_v20 = vld [vmem:[%s14469_s29 + $0x1480] sm:$0xf]  ;;  %6993 = vmatpush.bf16.msrb.mxu2 %v11687_v19 }
 0x113   : > { %v13646_v14 = vld [vmem:[%s14469_s29 + $0x17ac] sm:$0xf0]  ;;  %488 = vst [vmem:[#allocation1 + $0x30] ss:$2 sm:$0xff] %v429_v0  ;;  %v11542_v22 = vld [vmem:[%s14469_s29 + $0x1580] sm:$0xf] }
 0x114   : > { %v13546_v21 = vld [vmem:[%s14469_s29 + $0x148c] sm:$0xf0]  ;;  %v11815_v23 = vor.u32 %v13646_v14, %v11814_v13  ;;  %v11670_v25 = vld [vmem:[%s14469_s29 + $0x1680] sm:$0xf] }
 0x115   : > { %v13578_v24 = vld [vmem:[%s14469_s29 + $0x158c] sm:$0xf0]  ;;  %v11798_v28 = vld [vmem:[%s14469_s29 + $0x1780] sm:$0xf]  ;;  %v11415_v34 = vor.u32 %v13546_v21, %v11414_v20 }
 0x116   : > { %v13610_v27 = vld [vmem:[%s14469_s29 + $0x168c] sm:$0xf0]  ;;  %v11543_v39 = vor.u32 %v13578_v24, %v11542_v22  ;;  %v11398_v10 = vld [vmem:[%s14469_s29 + $0x1460] sm:$0xf]  ;;  %7006 = vmatpush.bf16.msrb.mxu3 %v11815_v23 }
 0x117   : > { %v13642_v36 = vld [vmem:[%s14469_s29 + $0x178c] sm:$0xf0]  ;;  %v11671_v38 = vor.u32 %v13610_v27, %v11670_v25  ;;  %v11526_v49 = vld [vmem:[%s14469_s29 + $0x1560] sm:$0xf]  ;;  %6968 = vmatpush.bf16.msrb.mxu0 %v11415_v34 }
 0x118   : > { %v13542_v44 = vld [vmem:[%s14469_s29 + $0x146c] sm:$0xf0]  ;;  %v11799_v11 = vor.u32 %v13642_v36, %v11798_v28  ;;  %v11654_v40 = vld [vmem:[%s14469_s29 + $0x1660] sm:$0xf]  ;;  %6981 = vmatpush.bf16.msrb.mxu1 %v11543_v39 }
 0x119   : > { %v13574_v50 = vld [vmem:[%s14469_s29 + $0x156c] sm:$0xf0]  ;;  %v11782_v52 = vld [vmem:[%s14469_s29 + $0x1760] sm:$0xf]  ;;  %v11399_v54 = vor.u32 %v13542_v44, %v11398_v10  ;;  %6994 = vmatpush.bf16.msrb.mxu2 %v11671_v38  ;;  %v6727_v44 = vpop.f32.mrf.mxu1 }
 0x11a   : > { %v13606_v15 = vld [vmem:[%s14469_s29 + $0x166c] sm:$0xf0]  ;;  %v11527_v58 = vor.u32 %v13574_v50, %v11526_v49  ;;  %v11382_v57 = vld [vmem:[%s14469_s29 + $0x1440] sm:$0xf]  ;;  %7007 = vmatpush.bf16.msrb.mxu3 %v11799_v11 }
 0x11b   : > { %v13638_v53 = vld [vmem:[%s14469_s29 + $0x176c] sm:$0xf0]  ;;  %v11655_v59 = vor.u32 %v13606_v15, %v11654_v40  ;;  %v11510_v1 = vld [vmem:[%s14469_s29 + $0x1540] sm:$0xf]  ;;  %6969 = vmatpush.bf16.msrb.mxu0 %v11399_v54  ;;  %v6714_v54 = vpop.f32.mrf.mxu0 }
 0x11c   : > { %v13538_v63 = vld [vmem:[%s14469_s29 + $0x144c] sm:$0xf0]  ;;  %v11783_v2 = vor.u32 %v13638_v53, %v11782_v52  ;;  %v11638_v3 = vld [vmem:[%s14469_s29 + $0x1640] sm:$0xf]  ;;  %6982 = vmatpush.bf16.msrb.mxu1 %v11527_v58  ;;  %v6740_v58 = vpop.f32.mrf.mxu2 }
 0x11d   : > { %v13570_v60 = vld [vmem:[%s14469_s29 + $0x154c] sm:$0xf0]  ;;  %v11766_v6 = vld [vmem:[%s14469_s29 + $0x1740] sm:$0xf]  ;;  %v11383_v0 = vor.u32 %v13538_v63, %v11382_v57  ;;  %6995 = vmatpush.bf16.msrb.mxu2 %v11655_v59 }
 0x11e   : > { %v13602_v5 = vld [vmem:[%s14469_s29 + $0x164c] sm:$0xf0]  ;;  %v11511_v9 = vor.u32 %v13570_v60, %v11510_v1  ;;  %v11366_v14 = vld [vmem:[%s14469_s29 + $0x1420] sm:$0xf]  ;;  %7008 = vmatpush.bf16.msrb.mxu3 %v11783_v2  ;;  %v6728_v2 = vadd.f32 %v6727_v44, %v6714_v54 }
 0x11f   : > { %v13634_v7 = vld [vmem:[%s14469_s29 + $0x174c] sm:$0xf0]  ;;  %v11639_v13 = vor.u32 %v13602_v5, %v11638_v3  ;;  %v11494_v17 = vld [vmem:[%s14469_s29 + $0x1520] sm:$0xf]  ;;  %6970 = vmatpush.bf16.msrb.mxu0 %v11383_v0 }
 0x120   : > { %v13534_v16 = vld [vmem:[%s14469_s29 + $0x142c] sm:$0xf0]  ;;  %v11767_v19 = vor.u32 %v13634_v7, %v11766_v6  ;;  %v11622_v21 = vld [vmem:[%s14469_s29 + $0x1620] sm:$0xf]  ;;  %6983 = vmatpush.bf16.msrb.mxu1 %v11511_v9  ;;  %v6741_v9 = vadd.f32 %v6740_v58, %v6728_v2 }
 0x121   : > { %v13566_v20 = vld [vmem:[%s14469_s29 + $0x152c] sm:$0xf0]  ;;  %v11750_v23 = vld [vmem:[%s14469_s29 + $0x1720] sm:$0xf]  ;;  %v11367_v25 = vor.u32 %v13534_v16, %v11366_v14  ;;  %6996 = vmatpush.bf16.msrb.mxu2 %v11639_v13  ;;  %v6753_v13 = vpop.f32.mrf.mxu3 }
 0x122   : > { %v13598_v22 = vld [vmem:[%s14469_s29 + $0x162c] sm:$0xf0]  ;;  %v11350_v27 = vld [vmem:[%s14469_s29 + $0x1400] sm:$0xf]  ;;  %v11495_v36 = vor.u32 %v13566_v20, %v11494_v17  ;;  %7009 = vmatpush.bf16.msrb.mxu3 %v11767_v19 }
 0x123   : > { %v13630_v24 = vld [vmem:[%s14469_s29 + $0x172c] sm:$0xf0]  ;;  %v11623_v34 = vor.u32 %v13598_v22, %v11622_v21  ;;  %v11478_v39 = vld [vmem:[%s14469_s29 + $0x1500] sm:$0xf]  ;;  %6971 = vmatpush.bf16.msrb.mxu0 %v11367_v25  ;;  %v15035_v22 = vpack.c.bf16 %v14966_v4, %v14966_v4 }
 0x124   : > { %v13530_v28 = vld [vmem:[%s14469_s29 + $0x140c] sm:$0xf0]  ;;  %v11606_v10 = vld [vmem:[%s14469_s29 + $0x1600] sm:$0xf]  ;;  %v11751_v49 = vor.u32 %v13630_v24, %v11750_v23  ;;  %6984 = vmatpush.bf16.msrb.mxu1 %v11495_v36  ;;  %v15048_v36 = vpack.c.bf16 %v14971_v8, %v14971_v8 }
 0x125   : > { %v13562_v38 = vld [vmem:[%s14469_s29 + $0x150c] sm:$0xf0]  ;;  %v11734_v50 = vld [vmem:[%s14469_s29 + $0x1700] sm:$0xf]  ;;  %v11351_v59 = vor.u32 %v13530_v28, %v11350_v27  ;;  %6997 = vmatpush.bf16.msrb.mxu2 %v11623_v34  ;;  %v15040_v27 = vadd.f32 %v6753_v13, %v6741_v9  ;;  %v15044_v28 = vpack.c.bf16 %v14968_v61, %v14968_v61 }
 0x126   : > { %v13594_v11 = vld [vmem:[%s14469_s29 + $0x160c] sm:$0xf0]  ;;  %v11974_v15 = vld [vmem:[%s14469_s29 + $0x18e0] sm:$0xf]  ;;  %v11479_v60 = vor.u32 %v13562_v38, %v11478_v39  ;;  %7010 = vmatpush.bf16.msrb.mxu3 %v11751_v49  ;;  %v6729_v39 = vpop.f32.mrf.mxu1  ;;  %v15054_v38 = vpack.c.bf16 %v14975_v12, %v14975_v12 }
 0x127   : > { %v13626_v40 = vld [vmem:[%s14469_s29 + $0x170c] sm:$0xf0]  ;;  %v12102_v53 = vld [vmem:[%s14469_s29 + $0x19e0] sm:$0xf]  ;;  %v11607_v3 = vor.u32 %v13594_v11, %v11606_v10  ;;  %6972 = vmatpush.bf16.msrb.mxu0 %v11351_v59 }
 0x128   : > { %v13686_v52 = vld [vmem:[%s14469_s29 + $0x18ec] sm:$0xf0]  ;;  %v12230_v63 = vld [vmem:[%s14469_s29 + $0x1ae0] sm:$0xf]  ;;  %v11735_v7 = vor.u32 %v13626_v40, %v11734_v50  ;;  %6985 = vmatpush.bf16.msrb.mxu1 %v11479_v60  ;;  %v6716_v50 = vpop.f32.mrf.mxu0  ;;  %v6742_v40 = vpop.f32.mrf.mxu2 }
 0x129   : > { %v13718_v57 = vld [vmem:[%s14469_s29 + $0x19ec] sm:$0xf0]  ;;  %v12358_v5 = vld [vmem:[%s14469_s29 + $0x1be0] sm:$0xf]  ;;  %v11975_v0 = vor.u32 %v13686_v52, %v11974_v15  ;;  %6998 = vmatpush.bf16.msrb.mxu2 %v11607_v3 }
 0x12a   : > { %v13750_v1 = vld [vmem:[%s14469_s29 + $0x1aec] sm:$0xf0]  ;;  %v12103_v14 = vor.u32 %v13718_v57, %v12102_v53  ;;  %v11958_v17 = vld [vmem:[%s14469_s29 + $0x18c0] sm:$0xf]  ;;  %7011 = vmatpush.bf16.msrb.mxu3 %v11735_v7  ;;  %6973 = vmatmul.bf16.vlgmr.msrb.gmra.mxu0 %v15035_v22  ;;  %v6755_v57 = vpop.f32.mrf.mxu3 }
 0x12b   : > { %v13782_v6 = vld [vmem:[%s14469_s29 + $0x1bec] sm:$0xf0]  ;;  %v12231_v16 = vor.u32 %v13750_v1, %v12230_v63  ;;  %v12086_v20 = vld [vmem:[%s14469_s29 + $0x19c0] sm:$0xf]  ;;  %7017 = vmatpush.bf16.msra.mxu0 %v11975_v0  ;;  %6986 = vmatmul.bf16.vlgmr.msrb.gmra.mxu1 %v15048_v36 }
 0x12c   : > { %v13682_v19 = vld [vmem:[%s14469_s29 + $0x18cc] sm:$0xf0]  ;;  %v12359_v21 = vor.u32 %v13782_v6, %v12358_v5  ;;  %v12214_v24 = vld [vmem:[%s14469_s29 + $0x1ac0] sm:$0xf]  ;;  %7030 = vmatpush.bf16.msra.mxu1 %v12103_v14  ;;  %6999 = vmatmul.bf16.vlgmr.msrb.gmra.mxu2 %v15044_v28 }
 0x12d   : > { %v13714_v23 = vld [vmem:[%s14469_s29 + $0x19cc] sm:$0xf0]  ;;  %v12342_v4 = vld [vmem:[%s14469_s29 + $0x1bc0] sm:$0xf]  ;;  %v11959_v10 = vor.u32 %v13682_v19, %v11958_v17  ;;  %7043 = vmatpush.bf16.msra.mxu2 %v12231_v16  ;;  %7012 = vmatmul.bf16.vlgmr.msrb.gmra.mxu3 %v15054_v38 }
 0x12e   : > { %v13746_v25 = vld [vmem:[%s14469_s29 + $0x1acc] sm:$0xf0]  ;;  %v12087_v61 = vor.u32 %v13714_v23, %v12086_v20  ;;  %v11942_v44 = vld [vmem:[%s14469_s29 + $0x18a0] sm:$0xf]  ;;  %7056 = vmatpush.bf16.msra.mxu3 %v12359_v21  ;;  %v6779_v16 = vpop.f32.mrf.mxu1 }
 0x12f   : > { %v13778_v34 = vld [vmem:[%s14469_s29 + $0x1bcc] sm:$0xf0]  ;;  %v12215_v8 = vor.u32 %v13746_v25, %v12214_v24  ;;  %v12070_v11 = vld [vmem:[%s14469_s29 + $0x19a0] sm:$0xf]  ;;  %7018 = vmatpush.bf16.msra.mxu0 %v11959_v10 }
 0x130   : > { %v13678_v49 = vld [vmem:[%s14469_s29 + $0x18ac] sm:$0xf0]  ;;  %v12343_v15 = vor.u32 %v13778_v34, %v12342_v4  ;;  %v12198_v52 = vld [vmem:[%s14469_s29 + $0x1aa0] sm:$0xf]  ;;  %7031 = vmatpush.bf16.msra.mxu1 %v12087_v61  ;;  %v6766_v61 = vpop.f32.mrf.mxu0 }
 0x131   : > { %v13710_v12 = vld [vmem:[%s14469_s29 + $0x19ac] sm:$0xf0]  ;;  %v12326_v54 = vld [vmem:[%s14469_s29 + $0x1ba0] sm:$0xf]  ;;  %v11943_v59 = vor.u32 %v13678_v49, %v11942_v44  ;;  %7044 = vmatpush.bf16.msra.mxu2 %v12215_v8  ;;  %v6767_v44 = vadd.f32 %v6766_v61, %v15040_v27 }
 0x132   : > { %v13742_v53 = vld [vmem:[%s14469_s29 + $0x1aac] sm:$0xf0]  ;;  %v12071_v63 = vor.u32 %v13710_v12, %v12070_v11  ;;  %v11926_v2 = vld [vmem:[%s14469_s29 + $0x1880] sm:$0xf]  ;;  %7057 = vmatpush.bf16.msra.mxu3 %v12343_v15  ;;  %v6792_v12 = vpop.f32.mrf.mxu2  ;;  %v6805_v27 = vpop.f32.mrf.mxu3 }
 0x133   : > { %v13774_v58 = vld [vmem:[%s14469_s29 + $0x1bac] sm:$0xf0]  ;;  %v12199_v1 = vor.u32 %v13742_v53, %v12198_v52  ;;  %v12054_v3 = vld [vmem:[%s14469_s29 + $0x1980] sm:$0xf]  ;;  %7019 = vmatpush.bf16.msra.mxu0 %v11943_v59  ;;  %v6780_v53 = vadd.f32 %v6779_v16, %v6767_v44 }
 0x134   : > { %v13674_v60 = vld [vmem:[%s14469_s29 + $0x188c] sm:$0xf0]  ;;  %v12327_v5 = vor.u32 %v13774_v58, %v12326_v54  ;;  %v12182_v7 = vld [vmem:[%s14469_s29 + $0x1a80] sm:$0xf]  ;;  %7032 = vmatpush.bf16.msra.mxu1 %v12071_v63 }
 0x135   : > { %v13706_v6 = vld [vmem:[%s14469_s29 + $0x198c] sm:$0xf0]  ;;  %v12310_v9 = vld [vmem:[%s14469_s29 + $0x1b80] sm:$0xf]  ;;  %v11927_v14 = vor.u32 %v13674_v60, %v11926_v2  ;;  %7045 = vmatpush.bf16.msra.mxu2 %v12199_v1  ;;  %v6793_v2 = vadd.f32 %v6792_v12, %v6780_v53 }
 0x136   : > { %v13738_v0 = vld [vmem:[%s14469_s29 + $0x1a8c] sm:$0xf0]  ;;  %v12055_v17 = vor.u32 %v13706_v6, %v12054_v3  ;;  %v11910_v20 = vld [vmem:[%s14469_s29 + $0x1860] sm:$0xf]  ;;  %7058 = vmatpush.bf16.msra.mxu3 %v12327_v5  ;;  %v6781_v60 = vpop.f32.mrf.mxu1 }
 0x137   : > { %v13770_v13 = vld [vmem:[%s14469_s29 + $0x1b8c] sm:$0xf0]  ;;  %v12183_v19 = vor.u32 %v13738_v0, %v12182_v7  ;;  %v12038_v23 = vld [vmem:[%s14469_s29 + $0x1960] sm:$0xf]  ;;  %7020 = vmatpush.bf16.msra.mxu0 %v11927_v14 }
 0x138   : > { %v13670_v21 = vld [vmem:[%s14469_s29 + $0x186c] sm:$0xf0]  ;;  %v12311_v24 = vor.u32 %v13770_v13, %v12310_v9  ;;  %v12166_v4 = vld [vmem:[%s14469_s29 + $0x1a60] sm:$0xf]  ;;  %7033 = vmatpush.bf16.msra.mxu1 %v12055_v17  ;;  %v15096_v13 = vadd.f32 %v6805_v27, %v6793_v2 }
 0x139   : > { %v13702_v25 = vld [vmem:[%s14469_s29 + $0x196c] sm:$0xf0]  ;;  %v12294_v39 = vld [vmem:[%s14469_s29 + $0x1b60] sm:$0xf]  ;;  %v11911_v8 = vor.u32 %v13670_v21, %v11910_v20  ;;  %7046 = vmatpush.bf16.msra.mxu2 %v12183_v19 }
 0x13a   : > { %v13734_v34 = vld [vmem:[%s14469_s29 + $0x1a6c] sm:$0xf0]  ;;  %v12039_v49 = vor.u32 %v13702_v25, %v12038_v23  ;;  %v11894_v50 = vld [vmem:[%s14469_s29 + $0x1840] sm:$0xf]  ;;  %7059 = vmatpush.bf16.msra.mxu3 %v12311_v24  ;;  %v6768_v23 = vpop.f32.mrf.mxu0  ;;  %v6807_v12 = vpop.f32.mrf.mxu3 }
 0x13b   : > { %v13766_v10 = vld [vmem:[%s14469_s29 + $0x1b6c] sm:$0xf0]  ;;  %v12167_v11 = vor.u32 %v13734_v34, %v12166_v4  ;;  %v12022_v15 = vld [vmem:[%s14469_s29 + $0x1940] sm:$0xf]  ;;  %7021 = vmatpush.bf16.msra.mxu0 %v11911_v8 }
 0x13c   : > { %v13666_v40 = vld [vmem:[%s14469_s29 + $0x184c] sm:$0xf0]  ;;  %v12295_v52 = vor.u32 %v13766_v10, %v12294_v39  ;;  %v12150_v58 = vld [vmem:[%s14469_s29 + $0x1a40] sm:$0xf]  ;;  %7034 = vmatpush.bf16.msra.mxu1 %v12039_v49  ;;  %v6794_v49 = vpop.f32.mrf.mxu2 }
 0x13d   : > { %v13698_v54 = vld [vmem:[%s14469_s29 + $0x194c] sm:$0xf0]  ;;  %v12278_v57 = vld [vmem:[%s14469_s29 + $0x1b40] sm:$0xf]  ;;  %v11895_v1 = vor.u32 %v13666_v40, %v11894_v50  ;;  %7047 = vmatpush.bf16.msra.mxu2 %v12167_v11 }
 0x13e   : > { %v13730_v59 = vld [vmem:[%s14469_s29 + $0x1a4c] sm:$0xf0]  ;;  %v12023_v3 = vor.u32 %v13698_v54, %v12022_v15  ;;  %v11878_v6 = vld [vmem:[%s14469_s29 + $0x1820] sm:$0xf]  ;;  %7060 = vmatpush.bf16.msra.mxu3 %v12295_v52 }
 0x13f   : > { %v13762_v63 = vld [vmem:[%s14469_s29 + $0x1b4c] sm:$0xf0]  ;;  %v12151_v5 = vor.u32 %v13730_v59, %v12150_v58  ;;  %v12006_v0 = vld [vmem:[%s14469_s29 + $0x1920] sm:$0xf]  ;;  %7022 = vmatpush.bf16.msra.mxu0 %v11895_v1 }
 0x140   : > { %v13662_v7 = vld [vmem:[%s14469_s29 + $0x182c] sm:$0xf0]  ;;  %v12279_v9 = vor.u32 %v13762_v63, %v12278_v57  ;;  %v12134_v16 = vld [vmem:[%s14469_s29 + $0x1a20] sm:$0xf]  ;;  %7035 = vmatpush.bf16.msra.mxu1 %v12023_v3 }
 0x141   : > { %v13694_v14 = vld [vmem:[%s14469_s29 + $0x192c] sm:$0xf0]  ;;  %v12262_v19 = vld [vmem:[%s14469_s29 + $0x1b20] sm:$0xf]  ;;  %v11879_v24 = vor.u32 %v13662_v7, %v11878_v6  ;;  %7048 = vmatpush.bf16.msra.mxu2 %v12151_v5 }
 0x142   : > { %v13726_v17 = vld [vmem:[%s14469_s29 + $0x1a2c] sm:$0xf0]  ;;  %v11862_v21 = vld [vmem:[%s14469_s29 + $0x1800] sm:$0xf]  ;;  %v12007_v39 = vor.u32 %v13694_v14, %v12006_v0  ;;  %7061 = vmatpush.bf16.msra.mxu3 %v12279_v9 }
 0x143   : > { %v13758_v20 = vld [vmem:[%s14469_s29 + $0x1b2c] sm:$0xf0]  ;;  %v11990_v4 = vld [vmem:[%s14469_s29 + $0x1900] sm:$0xf]  ;;  %v12135_v10 = vor.u32 %v13726_v17, %v12134_v16  ;;  %7023 = vmatpush.bf16.msra.mxu0 %v11879_v24 }
 0x144   : > { %v13658_v25 = vld [vmem:[%s14469_s29 + $0x180c] sm:$0xf0]  ;;  %v12118_v61 = vld [vmem:[%s14469_s29 + $0x1a00] sm:$0xf]  ;;  %v12263_v11 = vor.u32 %v13758_v20, %v12262_v19  ;;  %7036 = vmatpush.bf16.msra.mxu1 %v12007_v39 }
 0x145   : > { %v13690_v34 = vld [vmem:[%s14469_s29 + $0x190c] sm:$0xf0]  ;;  %v12246_v44 = vld [vmem:[%s14469_s29 + $0x1b00] sm:$0xf]  ;;  %v11863_v58 = vor.u32 %v13658_v25, %v11862_v21  ;;  %7049 = vmatpush.bf16.msra.mxu2 %v12135_v10 }
 0x146   : > { %v13722_v8 = vld [vmem:[%s14469_s29 + $0x1a0c] sm:$0xf0]  ;;  %v12486_v40 = vld [vmem:[%s14469_s29 + $0x1ce0] sm:$0xf]  ;;  %v11991_v63 = vor.u32 %v13690_v34, %v11990_v4  ;;  %7062 = vmatpush.bf16.msra.mxu3 %v12263_v11 }
 0x147   : > { %v13754_v50 = vld [vmem:[%s14469_s29 + $0x1b0c] sm:$0xf0]  ;;  %v12614_v52 = vld [vmem:[%s14469_s29 + $0x1de0] sm:$0xf]  ;;  %v12119_v1 = vor.u32 %v13722_v8, %v12118_v61  ;;  %7024 = vmatpush.bf16.msra.mxu0 %v11863_v58 }
 0x148   : > { %v13814_v15 = vld [vmem:[%s14469_s29 + $0x1cec] sm:$0xf0]  ;;  %v12742_v54 = vld [vmem:[%s14469_s29 + $0x1ee0] sm:$0xf]  ;;  %v12247_v3 = vor.u32 %v13754_v50, %v12246_v44  ;;  %7037 = vmatpush.bf16.msra.mxu1 %v11991_v63 }
 0x149   : > { %v13846_v53 = vld [vmem:[%s14469_s29 + $0x1dec] sm:$0xf0]  ;;  %v12870_v27 = vld [vmem:[%s14469_s29 + $0x1fe0] sm:$0xf]  ;;  %v12487_v5 = vor.u32 %v13814_v15, %v12486_v40  ;;  %7050 = vmatpush.bf16.msra.mxu2 %v12119_v1 }
 0x14a   : > { %v13878_v59 = vld [vmem:[%s14469_s29 + $0x1eec] sm:$0xf0]  ;;  %v489_v2 = vld.sshfl [vmem:[#allocation1] sm:$0xff pattern:$0x75316420]  ;;  %v12615_v0 = vor.u32 %v13846_v53, %v12614_v52  ;;  %7063 = vmatpush.bf16.msra.mxu3 %v12247_v3 }
 0x14b   : > { %v13910_v57 = vld [vmem:[%s14469_s29 + $0x1fec] sm:$0xf0]  ;;  %v491_v60 = vld.sshfl [vmem:[#allocation1 + $0x10] sm:$0xff pattern:$0x75316420]  ;;  %v12743_v9 = vor.u32 %v13878_v59, %v12742_v54  ;;  %v15122_v20 = vpack.c.bf16 %v489_v2, %v489_v2  ;;  %7069 = vmatpush.bf16.msrb.mxu0 %v12487_v5 }
 0x14c   : > { %v490_v6 = vld.sshfl [vmem:[#allocation1 + $0x8] sm:$0xff pattern:$0x75316420]  ;;  %v492_v7 = vld.sshfl [vmem:[#allocation1 + $0x18] sm:$0xff pattern:$0x75316420]  ;;  %v12871_v19 = vor.u32 %v13910_v57, %v12870_v27  ;;  %v15127_v25 = vpack.c.bf16 %v491_v60, %v491_v60  ;;  %7082 = vmatpush.bf16.msrb.mxu1 %v12615_v0 }
 0x14d   : > { %v12470_v14 = vld [vmem:[%s14469_s29 + $0x1cc0] sm:$0xf]  ;;  %v13810_v16 = vld [vmem:[%s14469_s29 + $0x1ccc] sm:$0xf0]  ;;  %v15129_v4 = vpack.c.bf16 %v490_v6, %v490_v6  ;;  %v15133_v10 = vpack.c.bf16 %v492_v7, %v492_v7  ;;  %7095 = vmatpush.bf16.msrb.mxu2 %v12743_v9  ;;  %7025 = vmatmul.bf16.vlgmr.msra.gmra.mxu0 %v15122_v20  ;;  %v6818_v6 = vpop.f32.mrf.mxu0 }
 0x14e   : > { %v12598_v17 = vld [vmem:[%s14469_s29 + $0x1dc0] sm:$0xf]  ;;  %v13842_v21 = vld [vmem:[%s14469_s29 + $0x1dcc] sm:$0xf0]  ;;  %v12471_v61 = vor.u32 %v13810_v16, %v12470_v14  ;;  %7108 = vmatpush.bf16.msrb.mxu3 %v12871_v19  ;;  %7051 = vmatmul.bf16.vlgmr.msra.gmra.mxu2 %v15127_v25  ;;  %v6819_v9 = vadd.f32 %v6818_v6, %v15096_v13  ;;  %v6831_v16 = vpop.f32.mrf.mxu1 }
 0x14f   : > { %v12726_v23 = vld [vmem:[%s14469_s29 + $0x1ec0] sm:$0xf]  ;;  %v13874_v24 = vld [vmem:[%s14469_s29 + $0x1ecc] sm:$0xf0]  ;;  %v12599_v8 = vor.u32 %v13842_v21, %v12598_v17  ;;  %7038 = vmatmul.bf16.vlgmr.msra.gmra.mxu1 %v15129_v4  ;;  %7064 = vmatmul.bf16.vlgmr.msra.gmra.mxu3 %v15133_v10 }
 0x150   : > { %v12854_v34 = vld [vmem:[%s14469_s29 + $0x1fc0] sm:$0xf]  ;;  %v13906_v39 = vld [vmem:[%s14469_s29 + $0x1fcc] sm:$0xf0]  ;;  %v12727_v44 = vor.u32 %v13874_v24, %v12726_v23  ;;  %7070 = vmatpush.bf16.msrb.mxu0 %v12471_v61 }
 0x151   : > { %v12454_v49 = vld [vmem:[%s14469_s29 + $0x1ca0] sm:$0xf]  ;;  %v13806_v11 = vld [vmem:[%s14469_s29 + $0x1cac] sm:$0xf0]  ;;  %v12855_v40 = vor.u32 %v13906_v39, %v12854_v34  ;;  %7083 = vmatpush.bf16.msrb.mxu1 %v12599_v8  ;;  %v6832_v39 = vadd.f32 %v6831_v16, %v6819_v9 }
 0x152   : > { %v12582_v50 = vld [vmem:[%s14469_s29 + $0x1da0] sm:$0xf]  ;;  %v13838_v15 = vld [vmem:[%s14469_s29 + $0x1dac] sm:$0xf0]  ;;  %v12455_v58 = vor.u32 %v13806_v11, %v12454_v49  ;;  %7096 = vmatpush.bf16.msrb.mxu2 %v12727_v44 }
 0x153   : > { %v12710_v12 = vld [vmem:[%s14469_s29 + $0x1ea0] sm:$0xf]  ;;  %v13870_v52 = vld [vmem:[%s14469_s29 + $0x1eac] sm:$0xf0]  ;;  %v12583_v59 = vor.u32 %v13838_v15, %v12582_v50  ;;  %7109 = vmatpush.bf16.msrb.mxu3 %v12855_v40 }
 0x154   : > { %v12838_v53 = vld [vmem:[%s14469_s29 + $0x1fa0] sm:$0xf]  ;;  %v13902_v54 = vld [vmem:[%s14469_s29 + $0x1fac] sm:$0xf0]  ;;  %v12711_v27 = vor.u32 %v13870_v52, %v12710_v12  ;;  %7071 = vmatpush.bf16.msrb.mxu0 %v12455_v58 }
 0x155   : > { %v12438_v57 = vld [vmem:[%s14469_s29 + $0x1c80] sm:$0xf]  ;;  %v13802_v63 = vld [vmem:[%s14469_s29 + $0x1c8c] sm:$0xf0]  ;;  %v12839_v2 = vor.u32 %v13902_v54, %v12838_v53  ;;  %7084 = vmatpush.bf16.msrb.mxu1 %v12583_v59  ;;  %v6844_v54 = vpop.f32.mrf.mxu2 }
 0x156   : > { %v12566_v1 = vld [vmem:[%s14469_s29 + $0x1d80] sm:$0xf]  ;;  %v13834_v60 = vld [vmem:[%s14469_s29 + $0x1d8c] sm:$0xf0]  ;;  %v12439_v14 = vor.u32 %v13802_v63, %v12438_v57  ;;  %7097 = vmatpush.bf16.msrb.mxu2 %v12711_v27  ;;  %v6845_v57 = vadd.f32 %v6844_v54, %v6832_v39  ;;  %v6857_v63 = vpop.f32.mrf.mxu3  ;;  %v8904_v54 = vld [vmem:[%s14469_s29 + $0xf0] sm:$0xf0] }
 0x157   : > { %v12694_v3 = vld [vmem:[%s14469_s29 + $0x1e80] sm:$0xf]  ;;  %v13866_v5 = vld [vmem:[%s14469_s29 + $0x1e8c] sm:$0xf0]  ;;  %v12567_v17 = vor.u32 %v13834_v60, %v12566_v1  ;;  %7110 = vmatpush.bf16.msrb.mxu3 %v12839_v2  ;;  %v6820_v60 = vpop.f32.mrf.mxu0 }
 0x158   : > { %v12822_v7 = vld [vmem:[%s14469_s29 + $0x1f80] sm:$0xf]  ;;  %v13898_v0 = vld [vmem:[%s14469_s29 + $0x1f8c] sm:$0xf0]  ;;  %v12695_v19 = vor.u32 %v13866_v5, %v12694_v3  ;;  %7072 = vmatpush.bf16.msrb.mxu0 %v12439_v14  ;;  %v6833_v5 = vpop.f32.mrf.mxu1  ;;  %v15172_v6 = vadd.f32 %v6857_v63, %v6845_v57  ;;  %v12980_v57 = vld [vmem:[%s14469_s29 + $0x2e4] sm:$0xf] }
 0x159   : > { %v12422_v21 = vld [vmem:[%s14469_s29 + $0x1c60] sm:$0xf]  ;;  %v13798_v23 = vld [vmem:[%s14469_s29 + $0x1c6c] sm:$0xf0]  ;;  %v12823_v34 = vor.u32 %v13898_v0, %v12822_v7  ;;  %7085 = vmatpush.bf16.msrb.mxu1 %v12567_v17  ;;  %v13012_v60 = vld [vmem:[%s14469_s29 + $0x3e4] sm:$0xf] }
 0x15a   : > { %v12550_v24 = vld [vmem:[%s14469_s29 + $0x1d60] sm:$0xf]  ;;  %v13830_v61 = vld [vmem:[%s14469_s29 + $0x1d6c] sm:$0xf0]  ;;  %v12423_v11 = vor.u32 %v13798_v23, %v12422_v21  ;;  %7098 = vmatpush.bf16.msrb.mxu2 %v12695_v19 }
 0x15b   : > { %v12678_v8 = vld [vmem:[%s14469_s29 + $0x1e60] sm:$0xf]  ;;  %v13862_v13 = vld [vmem:[%s14469_s29 + $0x1e6c] sm:$0xf0]  ;;  %v12551_v50 = vor.u32 %v13830_v61, %v12550_v24  ;;  %7111 = vmatpush.bf16.msrb.mxu3 %v12823_v34 }
 0x15c   : > { %v12806_v44 = vld [vmem:[%s14469_s29 + $0x1f60] sm:$0xf]  ;;  %v13894_v49 = vld [vmem:[%s14469_s29 + $0x1f6c] sm:$0xf0]  ;;  %v12679_v40 = vor.u32 %v13862_v13, %v12678_v8  ;;  %7073 = vmatpush.bf16.msrb.mxu0 %v12423_v11 }
 0x15d   : > { %v12406_v15 = vld [vmem:[%s14469_s29 + $0x1c40] sm:$0xf]  ;;  %v13794_v12 = vld [vmem:[%s14469_s29 + $0x1c4c] sm:$0xf0]  ;;  %v12807_v53 = vor.u32 %v13894_v49, %v12806_v44  ;;  %7086 = vmatpush.bf16.msrb.mxu1 %v12551_v50 }
 0x15e   : > { %v12534_v52 = vld [vmem:[%s14469_s29 + $0x1d40] sm:$0xf]  ;;  %v13826_v58 = vld [vmem:[%s14469_s29 + $0x1d4c] sm:$0xf0]  ;;  %v12407_v3 = vor.u32 %v13794_v12, %v12406_v15  ;;  %7099 = vmatpush.bf16.msrb.mxu2 %v12679_v40  ;;  %v6859_v63 = vpop.f32.mrf.mxu3 }
 0x15f   : > { %v12662_v59 = vld [vmem:[%s14469_s29 + $0x1e40] sm:$0xf]  ;;  %v13858_v27 = vld [vmem:[%s14469_s29 + $0x1e4c] sm:$0xf0]  ;;  %v12535_v7 = vor.u32 %v13826_v58, %v12534_v52  ;;  %7112 = vmatpush.bf16.msrb.mxu3 %v12807_v53  ;;  %v12916_v53 = vld [vmem:[%s14469_s29 + $0xe4] sm:$0xf]  ;;  %v6846_v58 = vpop.f32.mrf.mxu2 }
 0x160   : > { %v12790_v1 = vld [vmem:[%s14469_s29 + $0x1f40] sm:$0xf]  ;;  %v13890_v2 = vld [vmem:[%s14469_s29 + $0x1f4c] sm:$0xf0]  ;;  %v12663_v0 = vor.u32 %v13858_v27, %v12662_v59  ;;  %7074 = vmatpush.bf16.msrb.mxu0 %v12407_v3  ;;  %v12948_v59 = vld [vmem:[%s14469_s29 + $0x1e4] sm:$0xf] }
 0x161   : > { %v12390_v9 = vld [vmem:[%s14469_s29 + $0x1c20] sm:$0xf]  ;;  %v13790_v14 = vld [vmem:[%s14469_s29 + $0x1c2c] sm:$0xf0]  ;;  %v12791_v17 = vor.u32 %v13890_v2, %v12790_v1  ;;  %7087 = vmatpush.bf16.msrb.mxu1 %v12535_v7  ;;  %v9032_v27 = vld [vmem:[%s14469_s29 + $0x1f0] sm:$0xf0] }
 0x162   : > { %v12518_v16 = vld [vmem:[%s14469_s29 + $0x1d20] sm:$0xf]  ;;  %v13822_v19 = vld [vmem:[%s14469_s29 + $0x1d2c] sm:$0xf0]  ;;  %v12391_v61 = vor.u32 %v13790_v14, %v12390_v9  ;;  %7100 = vmatpush.bf16.msrb.mxu2 %v12663_v0  ;;  %v9160_v2 = vld [vmem:[%s14469_s29 + $0x2f0] sm:$0xf0] }
 0x163   : > { %v12646_v21 = vld [vmem:[%s14469_s29 + $0x1e20] sm:$0xf]  ;;  %v13854_v23 = vld [vmem:[%s14469_s29 + $0x1e2c] sm:$0xf0]  ;;  %v12519_v49 = vor.u32 %v13822_v19, %v12518_v16  ;;  %7113 = vmatpush.bf16.msrb.mxu3 %v12791_v17  ;;  %v9288_v3 = vld [vmem:[%s14469_s29 + $0x3f0] sm:$0xf0]  ;;  %v8907_v16 = vor.u32 %v12916_v53, %v8904_v54 }
 0x164   : > { %v12774_v24 = vld [vmem:[%s14469_s29 + $0x1f20] sm:$0xf]  ;;  %v13886_v34 = vld [vmem:[%s14469_s29 + $0x1f2c] sm:$0xf0]  ;;  %v12647_v11 = vor.u32 %v13854_v23, %v12646_v21  ;;  %7075 = vmatpush.bf16.msrb.mxu0 %v12391_v61  ;;  %v9035_v21 = vor.u32 %v12948_v59, %v9032_v27  ;;  %v9163_v23 = vor.u32 %v12980_v57, %v9160_v2  ;;  %v9291_v61 = vor.u32 %v13012_v60, %v9288_v3  ;;  %v12908_v58 = vld [vmem:[%s14469_s29 + $0xa4] sm:$0xf] }
 0x165   : > { %v12374_v39 = vld [vmem:[%s14469_s29 + $0x1c00] sm:$0xf]  ;;  %v13786_v8 = vld [vmem:[%s14469_s29 + $0x1c0c] sm:$0xf0]  ;;  %v12775_v12 = vor.u32 %v13886_v34, %v12774_v24  ;;  %7088 = vmatpush.bf16.msrb.mxu1 %v12519_v49  ;;  %v12912_v24 = vld [vmem:[%s14469_s29 + $0xc4] sm:$0xf] }
 0x166   : > { %v12502_v13 = vld [vmem:[%s14469_s29 + $0x1d00] sm:$0xf]  ;;  %v13818_v44 = vld [vmem:[%s14469_s29 + $0x1d0c] sm:$0xf0]  ;;  %v12375_v1 = vor.u32 %v13786_v8, %v12374_v39  ;;  %7101 = vmatpush.bf16.msrb.mxu2 %v12647_v11  ;;  %v8888_v34 = vld [vmem:[%s14469_s29 + $0xd0] sm:$0xf0] }
 0x167   : > { %v12630_v50 = vld [vmem:[%s14469_s29 + $0x1e00] sm:$0xf]  ;;  %v13850_v40 = vld [vmem:[%s14469_s29 + $0x1e0c] sm:$0xf0]  ;;  %v12503_v5 = vor.u32 %v13818_v44, %v12502_v13  ;;  %7114 = vmatpush.bf16.msrb.mxu3 %v12775_v12  ;;  %v12944_v39 = vld [vmem:[%s14469_s29 + $0x1c4] sm:$0xf] }
 0x168   : > { %v12758_v15 = vld [vmem:[%s14469_s29 + $0x1f00] sm:$0xf]  ;;  %v13882_v52 = vld [vmem:[%s14469_s29 + $0x1f0c] sm:$0xf0]  ;;  %v12631_v7 = vor.u32 %v13850_v40, %v12630_v50  ;;  %7076 = vmatpush.bf16.msrb.mxu0 %v12375_v1  ;;  %v9016_v13 = vld [vmem:[%s14469_s29 + $0x1d0] sm:$0xf0] }
 0x169   : > { %v493_v0 = vld.sshfl [vmem:[#allocation1 + $0x20] sm:$0xff pattern:$0x75316420]  ;;  %v495_v9 = vld.sshfl [vmem:[#allocation1 + $0x30] sm:$0xff pattern:$0x75316420]  ;;  %v12759_v14 = vor.u32 %v13882_v52, %v12758_v15  ;;  %7089 = vmatpush.bf16.msrb.mxu1 %v12503_v5  ;;  %v8891_v52 = vor.u32 %v12912_v24, %v8888_v34  ;;  %v9019_v53 = vor.u32 %v12944_v39, %v9016_v13  ;;  %v6870_v24 = vpop.f32.mrf.mxu0 }
 0x16a   : > { %v494_v17 = vld.sshfl [vmem:[#allocation1 + $0x28] sm:$0xff pattern:$0x75316420]  ;;  %v496_v19 = vld.sshfl [vmem:[#allocation1 + $0x38] sm:$0xff pattern:$0x75316420]  ;;  %v15201_v8 = vpack.c.bf16 %v493_v0, %v493_v0  ;;  %7102 = vmatpush.bf16.msrb.mxu2 %v12631_v7  ;;  %v15206_v11 = vpack.c.bf16 %v495_v9, %v495_v9 }
 0x16b   : > { %v12976_v44 = vld [vmem:[%s14469_s29 + $0x2c4] sm:$0xf]  ;;  %v9144_v49 = vld [vmem:[%s14469_s29 + $0x2d0] sm:$0xf0]  ;;  %v15208_v50 = vpack.c.bf16 %v494_v17, %v494_v17  ;;  %7115 = vmatpush.bf16.msrb.mxu3 %v12759_v14  ;;  %v15212_v12 = vpack.c.bf16 %v496_v19, %v496_v19 }
 0x16c   : > { %v13008_v40 = vld [vmem:[%s14469_s29 + $0x3c4] sm:$0xf]  ;;  %v9272_v15 = vld [vmem:[%s14469_s29 + $0x3d0] sm:$0xf0]  ;;  %7121 = vmatpush.bf16.msra.mxu0 %v8907_v16  ;;  %v9147_v54 = vor.u32 %v12976_v44, %v9144_v49  ;;  %v6883_v44 = vpop.f32.mrf.mxu1 }
 0x16d   : > { %7134 = vmatpush.bf16.msra.mxu1 %v9035_v21  ;;  %v8872_v59 = vld [vmem:[%s14469_s29 + $0xb0] sm:$0xf0]  ;;  %v12940_v27 = vld [vmem:[%s14469_s29 + $0x1a4] sm:$0xf]  ;;  %7077 = vmatmul.bf16.vlgmr.msrb.gmra.mxu0 %v15201_v8  ;;  %v9275_v57 = vor.u32 %v13008_v40, %v9272_v15 }
 0x16e   : > { %7147 = vmatpush.bf16.msra.mxu2 %v9163_v23  ;;  %v9000_v63 = vld [vmem:[%s14469_s29 + $0x1b0] sm:$0xf0]  ;;  %v12972_v1 = vld [vmem:[%s14469_s29 + $0x2a4] sm:$0xf]  ;;  %7090 = vmatmul.bf16.vlgmr.msrb.gmra.mxu1 %v15208_v50  ;;  %v8875_v5 = vor.u32 %v12908_v58, %v8872_v59 }
 0x16f   : > { %7160 = vmatpush.bf16.msra.mxu3 %v9291_v61  ;;  %v9128_v2 = vld [vmem:[%s14469_s29 + $0x2b0] sm:$0xf0]  ;;  %7103 = vmatmul.bf16.vlgmr.msrb.gmra.mxu2 %v15206_v11  ;;  %v13004_v60 = vld [vmem:[%s14469_s29 + $0x3a4] sm:$0xf]  ;;  %v9003_v7 = vor.u32 %v12940_v27, %v9000_v63  ;;  %v6871_v61 = vadd.f32 %v6870_v24, %v15172_v6 }
 0x170   : > { %v9256_v3 = vld [vmem:[%s14469_s29 + $0x3b0] sm:$0xf0]  ;;  %7116 = vmatmul.bf16.vlgmr.msrb.gmra.mxu3 %v15212_v12  ;;  %7122 = vmatpush.bf16.msra.mxu0 %v8891_v52  ;;  %v9131_v0 = vor.u32 %v12972_v1, %v9128_v2  ;;  %v12904_v9 = vld [vmem:[%s14469_s29 + $0x84] sm:$0xf] }
 0x171   : > { %7135 = vmatpush.bf16.msra.mxu1 %v9019_v53  ;;  %v8856_v14 = vld [vmem:[%s14469_s29 + $0x90] sm:$0xf0]  ;;  %v12936_v16 = vld [vmem:[%s14469_s29 + $0x184] sm:$0xf]  ;;  %v9259_v17 = vor.u32 %v13004_v60, %v9256_v3  ;;  %v6884_v58 = vadd.f32 %v6883_v44, %v6871_v61 }
 0x172   : > { %7148 = vmatpush.bf16.msra.mxu2 %v9147_v54  ;;  %v8984_v19 = vld [vmem:[%s14469_s29 + $0x190] sm:$0xf0]  ;;  %v12968_v21 = vld [vmem:[%s14469_s29 + $0x284] sm:$0xf]  ;;  %v8859_v13 = vor.u32 %v12904_v9, %v8856_v14  ;;  %v6896_v9 = vpop.f32.mrf.mxu2 }
 0x173   : > { %7161 = vmatpush.bf16.msra.mxu3 %v9275_v57  ;;  %v9112_v23 = vld [vmem:[%s14469_s29 + $0x290] sm:$0xf0]  ;;  %v13000_v34 = vld [vmem:[%s14469_s29 + $0x384] sm:$0xf]  ;;  %v8987_v49 = vor.u32 %v12936_v16, %v8984_v19  ;;  %v6897_v19 = vadd.f32 %v6896_v9, %v6884_v58 }
 0x174   : > { %v9240_v39 = vld [vmem:[%s14469_s29 + $0x390] sm:$0xf0]  ;;  %7123 = vmatpush.bf16.msra.mxu0 %v8875_v5  ;;  %v9115_v40 = vor.u32 %v12968_v21, %v9112_v23  ;;  %v12900_v15 = vld [vmem:[%s14469_s29 + $0x64] sm:$0xf]  ;;  %v6909_v21 = vpop.f32.mrf.mxu3  ;;  %v6885_v61 = vpop.f32.mrf.mxu1 }
 0x175   : > { %7136 = vmatpush.bf16.msra.mxu1 %v9003_v7  ;;  %v8840_v52 = vld [vmem:[%s14469_s29 + $0x70] sm:$0xf0]  ;;  %v12932_v53 = vld [vmem:[%s14469_s29 + $0x164] sm:$0xf]  ;;  %v9243_v54 = vor.u32 %v13000_v34, %v9240_v39  ;;  %v6872_v34 = vpop.f32.mrf.mxu0 }
 0x176   : > { %7149 = vmatpush.bf16.msra.mxu2 %v9131_v0  ;;  %v8968_v59 = vld [vmem:[%s14469_s29 + $0x170] sm:$0xf0]  ;;  %v12964_v27 = vld [vmem:[%s14469_s29 + $0x264] sm:$0xf]  ;;  %v8843_v1 = vor.u32 %v12900_v15, %v8840_v52 }
 0x177   : > { %7162 = vmatpush.bf16.msra.mxu3 %v9259_v17  ;;  %v9096_v6 = vld [vmem:[%s14469_s29 + $0x270] sm:$0xf0]  ;;  %v12996_v57 = vld [vmem:[%s14469_s29 + $0x364] sm:$0xf]  ;;  %v8971_v2 = vor.u32 %v12932_v53, %v8968_v59 }
 0x178   : > { %v9224_v63 = vld [vmem:[%s14469_s29 + $0x370] sm:$0xf0]  ;;  %7124 = vmatpush.bf16.msra.mxu0 %v8859_v13  ;;  %v9099_v60 = vor.u32 %v12964_v27, %v9096_v6  ;;  %v12896_v3 = vld [vmem:[%s14469_s29 + $0x44] sm:$0xf]  ;;  %v15251_v13 = vadd.f32 %v6909_v21, %v6897_v19 }
 0x179   : > { %7137 = vmatpush.bf16.msra.mxu1 %v8987_v49  ;;  %v8824_v5 = vld [vmem:[%s14469_s29 + $0x50] sm:$0xf0]  ;;  %v12928_v7 = vld [vmem:[%s14469_s29 + $0x144] sm:$0xf]  ;;  %v9227_v0 = vor.u32 %v12996_v57, %v9224_v63 }
 0x17a   : > { %7150 = vmatpush.bf16.msra.mxu2 %v9115_v40  ;;  %v8952_v14 = vld [vmem:[%s14469_s29 + $0x150] sm:$0xf0]  ;;  %v12960_v16 = vld [vmem:[%s14469_s29 + $0x244] sm:$0xf]  ;;  %v8827_v39 = vor.u32 %v12896_v3, %v8824_v5 }
 0x17b   : > { %7163 = vmatpush.bf16.msra.mxu3 %v9243_v54  ;;  %v9080_v17 = vld [vmem:[%s14469_s29 + $0x250] sm:$0xf0]  ;;  %v12992_v23 = vld [vmem:[%s14469_s29 + $0x344] sm:$0xf]  ;;  %v8955_v44 = vor.u32 %v12928_v7, %v8952_v14 }
 0x17c   : > { %v9208_v24 = vld [vmem:[%s14469_s29 + $0x350] sm:$0xf0]  ;;  %7125 = vmatpush.bf16.msra.mxu0 %v8843_v1  ;;  %v9083_v49 = vor.u32 %v12960_v16, %v9080_v17  ;;  %v12892_v40 = vld [vmem:[%s14469_s29 + $0x24] sm:$0xf]  ;;  %v6898_v17 = vpop.f32.mrf.mxu2 }
 0x17d   : > { %7138 = vmatpush.bf16.msra.mxu1 %v8971_v2  ;;  %v8808_v15 = vld [vmem:[%s14469_s29 + $0x30] sm:$0xf0]  ;;  %v12924_v52 = vld [vmem:[%s14469_s29 + $0x124] sm:$0xf]  ;;  %v9211_v53 = vor.u32 %v12992_v23, %v9208_v24  ;;  %v6911_v24 = vpop.f32.mrf.mxu3 }
 0x17e   : > { %7151 = vmatpush.bf16.msra.mxu2 %v9099_v60  ;;  %v8936_v54 = vld [vmem:[%s14469_s29 + $0x130] sm:$0xf0]  ;;  %v12956_v58 = vld [vmem:[%s14469_s29 + $0x224] sm:$0xf]  ;;  %v8811_v57 = vor.u32 %v12892_v40, %v8808_v15 }
 0x17f   : > { %7164 = vmatpush.bf16.msra.mxu3 %v9227_v0  ;;  %v9064_v59 = vld [vmem:[%s14469_s29 + $0x230] sm:$0xf0]  ;;  %v12988_v27 = vld [vmem:[%s14469_s29 + $0x324] sm:$0xf]  ;;  %v8939_v2 = vor.u32 %v12924_v52, %v8936_v54 }
 0x180   : > { %v9192_v6 = vld [vmem:[%s14469_s29 + $0x330] sm:$0xf0]  ;;  %7126 = vmatpush.bf16.msra.mxu0 %v8827_v39  ;;  %v12888_v63 = vld [vmem:[%s14469_s29 + $0x4] sm:$0xf]  ;;  %v9067_v60 = vor.u32 %v12956_v58, %v9064_v59 }
 0x181   : > { %v8792_v1 = vld [vmem:[%s14469_s29 + $0x10] sm:$0xf0]  ;;  %7139 = vmatpush.bf16.msra.mxu1 %v8955_v44  ;;  %v12920_v3 = vld [vmem:[%s14469_s29 + $0x104] sm:$0xf]  ;;  %v9195_v0 = vor.u32 %v12988_v27, %v9192_v6 }
 0x182   : > { %7152 = vmatpush.bf16.msra.mxu2 %v9083_v49  ;;  %v8920_v5 = vld [vmem:[%s14469_s29 + $0x110] sm:$0xf0]  ;;  %v12952_v7 = vld [vmem:[%s14469_s29 + $0x204] sm:$0xf]  ;;  %v8795_v34 = vor.u32 %v12888_v63, %v8792_v1 }
 0x183   : > { %7165 = vmatpush.bf16.msra.mxu3 %v9211_v53  ;;  %v9048_v9 = vld [vmem:[%s14469_s29 + $0x210] sm:$0xf0]  ;;  %v12984_v14 = vld [vmem:[%s14469_s29 + $0x304] sm:$0xf]  ;;  %v8923_v49 = vor.u32 %v12920_v3, %v8920_v5 }
 0x184   : > { %v9176_v16 = vld [vmem:[%s14469_s29 + $0x310] sm:$0xf0]  ;;  %v13044_v19 = vld [vmem:[%s14469_s29 + $0x4e4] sm:$0xf]  ;;  %7127 = vmatpush.bf16.msra.mxu0 %v8811_v57  ;;  %v9051_v40 = vor.u32 %v12952_v7, %v9048_v9 }
 0x185   : > { %v9416_v21 = vld [vmem:[%s14469_s29 + $0x4f0] sm:$0xf0]  ;;  %v13076_v23 = vld [vmem:[%s14469_s29 + $0x5e4] sm:$0xf]  ;;  %7140 = vmatpush.bf16.msra.mxu1 %v8939_v2  ;;  %v9179_v53 = vor.u32 %v12984_v14, %v9176_v16 }
 0x186   : > { %v9544_v39 = vld [vmem:[%s14469_s29 + $0x5f0] sm:$0xf0]  ;;  %v13108_v61 = vld [vmem:[%s14469_s29 + $0x6e4] sm:$0xf]  ;;  %7153 = vmatpush.bf16.msra.mxu2 %v9067_v60  ;;  %v9419_v54 = vor.u32 %v13044_v19, %v9416_v21 }
 0x187   : > { %v9672_v44 = vld [vmem:[%s14469_s29 + $0x6f0] sm:$0xf0]  ;;  %v13140_v15 = vld [vmem:[%s14469_s29 + $0x7e4] sm:$0xf]  ;;  %7166 = vmatpush.bf16.msra.mxu3 %v9195_v0  ;;  %v9547_v58 = vor.u32 %v13076_v23, %v9544_v39 }
 0x188   : > { %v9800_v52 = vld [vmem:[%s14469_s29 + $0x7f0] sm:$0xf0]  ;;  %v9675_v59 = vor.u32 %v13108_v61, %v9672_v44  ;;  %v13040_v27 = vld [vmem:[%s14469_s29 + $0x4c4] sm:$0xf]  ;;  %7128 = vmatpush.bf16.msra.mxu0 %v8795_v34 }
 0x189   : > { %v9400_v6 = vld [vmem:[%s14469_s29 + $0x4d0] sm:$0xf0]  ;;  %v13072_v57 = vld [vmem:[%s14469_s29 + $0x5c4] sm:$0xf]  ;;  %v9803_v63 = vor.u32 %v13140_v15, %v9800_v52  ;;  %7141 = vmatpush.bf16.msra.mxu1 %v8923_v49 }
 0x18a   : > { %v9528_v1 = vld [vmem:[%s14469_s29 + $0x5d0] sm:$0xf0]  ;;  %v13104_v2 = vld [vmem:[%s14469_s29 + $0x6c4] sm:$0xf]  ;;  %7154 = vmatpush.bf16.msra.mxu2 %v9051_v40  ;;  %v9403_v7 = vor.u32 %v13040_v27, %v9400_v6  ;;  %v6922_v27 = vpop.f32.mrf.mxu0 }
 0x18b   : > { %v9656_v60 = vld [vmem:[%s14469_s29 + $0x6d0] sm:$0xf0]  ;;  %v13136_v3 = vld [vmem:[%s14469_s29 + $0x7c4] sm:$0xf]  ;;  %7167 = vmatpush.bf16.msra.mxu3 %v9179_v53  ;;  %v9531_v0 = vor.u32 %v13072_v57, %v9528_v1  ;;  %7129 = vmatmul.bf16.vlgmr.msra.gmra.mxu0 %v14625_v45 }
 0x18c   : > { %v9784_v5 = vld [vmem:[%s14469_s29 + $0x7d0] sm:$0xf0]  ;;  %7173 = vmatpush.bf16.msrb.mxu0 %v9419_v54  ;;  %v9659_v9 = vor.u32 %v13104_v2, %v9656_v60  ;;  %v13036_v14 = vld [vmem:[%s14469_s29 + $0x4a4] sm:$0xf]  ;;  %7142 = vmatmul.bf16.vlgmr.msra.gmra.mxu1 %v14627_v46  ;;  %v6935_v2 = vpop.f32.mrf.mxu1 }
 0x18d   : > { %7186 = vmatpush.bf16.msrb.mxu1 %v9547_v58  ;;  %v9384_v16 = vld [vmem:[%s14469_s29 + $0x4b0] sm:$0xf0]  ;;  %v13068_v17 = vld [vmem:[%s14469_s29 + $0x5a4] sm:$0xf]  ;;  %v9787_v19 = vor.u32 %v13136_v3, %v9784_v5  ;;  %7155 = vmatmul.bf16.vlgmr.msra.gmra.mxu2 %v14612_v29 }
 0x18e   : > { %7199 = vmatpush.bf16.msrb.mxu2 %v9675_v59  ;;  %v9512_v21 = vld [vmem:[%s14469_s29 + $0x5b0] sm:$0xf0]  ;;  %v13100_v23 = vld [vmem:[%s14469_s29 + $0x6a4] sm:$0xf]  ;;  %7168 = vmatmul.bf16.vlgmr.msra.gmra.mxu3 %v14616_v32  ;;  %v9387_v61 = vor.u32 %v13036_v14, %v9384_v16 }
 0x18f   : > { %7212 = vmatpush.bf16.msrb.mxu3 %v9803_v63  ;;  %v9640_v24 = vld [vmem:[%s14469_s29 + $0x6b0] sm:$0xf0]  ;;  %v13132_v34 = vld [vmem:[%s14469_s29 + $0x7a4] sm:$0xf]  ;;  %v9515_v44 = vor.u32 %v13068_v17, %v9512_v21  ;;  %v6923_v63 = vadd.f32 %v6922_v27, %v15251_v13 }
 0x190   : > { %v9768_v39 = vld [vmem:[%s14469_s29 + $0x7b0] sm:$0xf0]  ;;  %7174 = vmatpush.bf16.msrb.mxu0 %v9403_v7  ;;  %v9643_v49 = vor.u32 %v13100_v23, %v9640_v24  ;;  %v13032_v40 = vld [vmem:[%s14469_s29 + $0x484] sm:$0xf] }
 0x191   : > { %7187 = vmatpush.bf16.msrb.mxu1 %v9531_v0  ;;  %v9368_v15 = vld [vmem:[%s14469_s29 + $0x490] sm:$0xf0]  ;;  %v13064_v52 = vld [vmem:[%s14469_s29 + $0x584] sm:$0xf]  ;;  %v9771_v53 = vor.u32 %v13132_v34, %v9768_v39  ;;  %v6936_v14 = vadd.f32 %v6935_v2, %v6923_v63 }
 0x192   : > { %7200 = vmatpush.bf16.msrb.mxu2 %v9659_v9  ;;  %v9496_v54 = vld [vmem:[%s14469_s29 + $0x590] sm:$0xf0]  ;;  %v13096_v58 = vld [vmem:[%s14469_s29 + $0x684] sm:$0xf]  ;;  %v9371_v1 = vor.u32 %v13032_v40, %v9368_v15  ;;  %v6948_v40 = vpop.f32.mrf.mxu2 }
 0x193   : > { %7213 = vmatpush.bf16.msrb.mxu3 %v9787_v19  ;;  %v9624_v59 = vld [vmem:[%s14469_s29 + $0x690] sm:$0xf0]  ;;  %v13128_v6 = vld [vmem:[%s14469_s29 + $0x784] sm:$0xf]  ;;  %v9499_v60 = vor.u32 %v13064_v52, %v9496_v54  ;;  %v6949_v54 = vadd.f32 %v6948_v40, %v6936_v14 }
 0x194   : > { %v9752_v57 = vld [vmem:[%s14469_s29 + $0x790] sm:$0xf0]  ;;  %7175 = vmatpush.bf16.msrb.mxu0 %v9387_v61  ;;  %v9627_v3 = vor.u32 %v13096_v58, %v9624_v59  ;;  %v13028_v5 = vld [vmem:[%s14469_s29 + $0x464] sm:$0xf]  ;;  %v6961_v58 = vpop.f32.mrf.mxu3  ;;  %v6937_v63 = vpop.f32.mrf.mxu1 }
 0x195   : > { %7188 = vmatpush.bf16.msrb.mxu1 %v9515_v44  ;;  %v9352_v7 = vld [vmem:[%s14469_s29 + $0x470] sm:$0xf0]  ;;  %v13060_v0 = vld [vmem:[%s14469_s29 + $0x564] sm:$0xf]  ;;  %v9755_v9 = vor.u32 %v13128_v6, %v9752_v57  ;;  %v6924_v6 = vpop.f32.mrf.mxu0 }
 0x196   : > { %7201 = vmatpush.bf16.msrb.mxu2 %v9643_v49  ;;  %v9480_v16 = vld [vmem:[%s14469_s29 + $0x570] sm:$0xf0]  ;;  %v13092_v17 = vld [vmem:[%s14469_s29 + $0x664] sm:$0xf]  ;;  %v9355_v23 = vor.u32 %v13028_v5, %v9352_v7 }
 0x197   : > { %7214 = vmatpush.bf16.msrb.mxu3 %v9771_v53  ;;  %v9608_v13 = vld [vmem:[%s14469_s29 + $0x670] sm:$0xf0]  ;;  %v13124_v19 = vld [vmem:[%s14469_s29 + $0x764] sm:$0xf]  ;;  %v9483_v24 = vor.u32 %v13060_v0, %v9480_v16 }
 0x198   : > { %v9736_v21 = vld [vmem:[%s14469_s29 + $0x770] sm:$0xf0]  ;;  %7176 = vmatpush.bf16.msrb.mxu0 %v9371_v1  ;;  %v9611_v34 = vor.u32 %v13092_v17, %v9608_v13  ;;  %v13024_v39 = vld [vmem:[%s14469_s29 + $0x444] sm:$0xf]  ;;  %v15322_v1 = vadd.f32 %v6961_v58, %v6949_v54 }
 0x199   : > { %7189 = vmatpush.bf16.msrb.mxu1 %v9499_v60  ;;  %v9336_v61 = vld [vmem:[%s14469_s29 + $0x450] sm:$0xf0]  ;;  %v13056_v44 = vld [vmem:[%s14469_s29 + $0x544] sm:$0xf]  ;;  %v9739_v49 = vor.u32 %v13124_v19, %v9736_v21 }
 0x19a   : > { %7202 = vmatpush.bf16.msrb.mxu2 %v9627_v3  ;;  %v9464_v15 = vld [vmem:[%s14469_s29 + $0x550] sm:$0xf0]  ;;  %v13088_v52 = vld [vmem:[%s14469_s29 + $0x644] sm:$0xf]  ;;  %v9339_v57 = vor.u32 %v13024_v39, %v9336_v61 }
 0x19b   : > { %7215 = vmatpush.bf16.msrb.mxu3 %v9755_v9  ;;  %v9592_v53 = vld [vmem:[%s14469_s29 + $0x650] sm:$0xf0]  ;;  %v13120_v59 = vld [vmem:[%s14469_s29 + $0x744] sm:$0xf]  ;;  %v9467_v2 = vor.u32 %v13056_v44, %v9464_v15 }
 0x19c   : > { %v9720_v27 = vld [vmem:[%s14469_s29 + $0x750] sm:$0xf0]  ;;  %7177 = vmatpush.bf16.msrb.mxu0 %v9355_v23  ;;  %v9595_v60 = vor.u32 %v13088_v52, %v9592_v53  ;;  %v13020_v3 = vld [vmem:[%s14469_s29 + $0x424] sm:$0xf]  ;;  %v6950_v53 = vpop.f32.mrf.mxu2 }
 0x19d   : > { %7190 = vmatpush.bf16.msrb.mxu1 %v9483_v24  ;;  %v9320_v5 = vld [vmem:[%s14469_s29 + $0x430] sm:$0xf0]  ;;  %v13052_v7 = vld [vmem:[%s14469_s29 + $0x524] sm:$0xf]  ;;  %v9723_v0 = vor.u32 %v13120_v59, %v9720_v27  ;;  %v6963_v27 = vpop.f32.mrf.mxu3 }
 0x19e   : > { %7203 = vmatpush.bf16.msrb.mxu2 %v9611_v34  ;;  %v9448_v9 = vld [vmem:[%s14469_s29 + $0x530] sm:$0xf0]  ;;  %v13084_v14 = vld [vmem:[%s14469_s29 + $0x624] sm:$0xf]  ;;  %v9323_v19 = vor.u32 %v13020_v3, %v9320_v5 }
 0x19f   : > { %7216 = vmatpush.bf16.msrb.mxu3 %v9739_v49  ;;  %v9576_v16 = vld [vmem:[%s14469_s29 + $0x630] sm:$0xf0]  ;;  %v13116_v17 = vld [vmem:[%s14469_s29 + $0x724] sm:$0xf]  ;;  %v9451_v24 = vor.u32 %v13052_v7, %v9448_v9 }
 0x1a0   : > { %v9704_v13 = vld [vmem:[%s14469_s29 + $0x730] sm:$0xf0]  ;;  %7178 = vmatpush.bf16.msrb.mxu0 %v9339_v57  ;;  %v13016_v21 = vld [vmem:[%s14469_s29 + $0x404] sm:$0xf]  ;;  %v9579_v34 = vor.u32 %v13084_v14, %v9576_v16 }
 0x1a1   : > { %v9304_v23 = vld [vmem:[%s14469_s29 + $0x410] sm:$0xf0]  ;;  %7191 = vmatpush.bf16.msrb.mxu1 %v9467_v2  ;;  %v13048_v39 = vld [vmem:[%s14469_s29 + $0x504] sm:$0xf]  ;;  %v9707_v49 = vor.u32 %v13116_v17, %v9704_v13 }
 0x1a2   : > { %7204 = vmatpush.bf16.msrb.mxu2 %v9595_v60  ;;  %v9432_v61 = vld [vmem:[%s14469_s29 + $0x510] sm:$0xf0]  ;;  %v13080_v44 = vld [vmem:[%s14469_s29 + $0x604] sm:$0xf]  ;;  %v9307_v6 = vor.u32 %v13016_v21, %v9304_v23 }
 0x1a3   : > { %7217 = vmatpush.bf16.msrb.mxu3 %v9723_v0  ;;  %v9560_v40 = vld [vmem:[%s14469_s29 + $0x610] sm:$0xf0]  ;;  %v13112_v15 = vld [vmem:[%s14469_s29 + $0x704] sm:$0xf]  ;;  %v9435_v60 = vor.u32 %v13048_v39, %v9432_v61 }
 0x1a4   : > { %v9688_v52 = vld [vmem:[%s14469_s29 + $0x710] sm:$0xf0]  ;;  %v13172_v54 = vld [vmem:[%s14469_s29 + $0x8e4] sm:$0xf]  ;;  %7179 = vmatpush.bf16.msrb.mxu0 %v9323_v19  ;;  %v9563_v3 = vor.u32 %v13080_v44, %v9560_v40 }
 0x1a5   : > { %v9928_v58 = vld [vmem:[%s14469_s29 + $0x8f0] sm:$0xf0]  ;;  %v13204_v59 = vld [vmem:[%s14469_s29 + $0x9e4] sm:$0xf]  ;;  %7192 = vmatpush.bf16.msrb.mxu1 %v9451_v24  ;;  %v9691_v0 = vor.u32 %v13112_v15, %v9688_v52 }
 0x1a6   : > { %v10056_v57 = vld [vmem:[%s14469_s29 + $0x9f0] sm:$0xf0]  ;;  %v13236_v63 = vld [vmem:[%s14469_s29 + $0xae4] sm:$0xf]  ;;  %7205 = vmatpush.bf16.msrb.mxu2 %v9579_v34  ;;  %v9931_v9 = vor.u32 %v13172_v54, %v9928_v58 }
 0x1a7   : > { %v10184_v2 = vld [vmem:[%s14469_s29 + $0xaf0] sm:$0xf0]  ;;  %v13268_v5 = vld [vmem:[%s14469_s29 + $0xbe4] sm:$0xf]  ;;  %7218 = vmatpush.bf16.msrb.mxu3 %v9707_v49  ;;  %v10059_v14 = vor.u32 %v13204_v59, %v10056_v57 }
 0x1a8   : > { %v10312_v7 = vld [vmem:[%s14469_s29 + $0xbf0] sm:$0xf0]  ;;  %v10187_v16 = vor.u32 %v13236_v63, %v10184_v2  ;;  %v13168_v17 = vld [vmem:[%s14469_s29 + $0x8c4] sm:$0xf]  ;;  %7180 = vmatpush.bf16.msrb.mxu0 %v9307_v6 }
 0x1a9   : > { %v9912_v13 = vld [vmem:[%s14469_s29 + $0x8d0] sm:$0xf0]  ;;  %v13200_v19 = vld [vmem:[%s14469_s29 + $0x9c4] sm:$0xf]  ;;  %v10315_v21 = vor.u32 %v13268_v5, %v10312_v7  ;;  %7193 = vmatpush.bf16.msrb.mxu1 %v9435_v60 }
 0x1aa   : > { %v10040_v23 = vld [vmem:[%s14469_s29 + $0x9d0] sm:$0xf0]  ;;  %v13232_v24 = vld [vmem:[%s14469_s29 + $0xac4] sm:$0xf]  ;;  %7206 = vmatpush.bf16.msrb.mxu2 %v9563_v3  ;;  %v9915_v44 = vor.u32 %v13168_v17, %v9912_v13  ;;  %v6974_v17 = vpop.f32.mrf.mxu0 }
 0x1ab   : > { %v10168_v34 = vld [vmem:[%s14469_s29 + $0xad0] sm:$0xf0]  ;;  %v13264_v39 = vld [vmem:[%s14469_s29 + $0xbc4] sm:$0xf]  ;;  %7219 = vmatpush.bf16.msrb.mxu3 %v9691_v0  ;;  %v10043_v49 = vor.u32 %v13200_v19, %v10040_v23  ;;  %7181 = vmatmul.bf16.vlgmr.msrb.gmra.mxu0 %v14680_v55 }
 0x1ac   : > { %v10296_v61 = vld [vmem:[%s14469_s29 + $0xbd0] sm:$0xf0]  ;;  %7225 = vmatpush.bf16.msra.mxu0 %v9931_v9  ;;  %v10171_v40 = vor.u32 %v13232_v24, %v10168_v34  ;;  %v13164_v15 = vld [vmem:[%s14469_s29 + $0x8a4] sm:$0xf]  ;;  %7194 = vmatmul.bf16.vlgmr.msrb.gmra.mxu1 %v14674_v48  ;;  %v6987_v24 = vpop.f32.mrf.mxu1 }
 0x1ad   : > { %7238 = vmatpush.bf16.msra.mxu1 %v10059_v14  ;;  %v9896_v52 = vld [vmem:[%s14469_s29 + $0x8b0] sm:$0xf0]  ;;  %v13196_v53 = vld [vmem:[%s14469_s29 + $0x9a4] sm:$0xf]  ;;  %v10299_v54 = vor.u32 %v13264_v39, %v10296_v61  ;;  %7207 = vmatmul.bf16.vlgmr.msrb.gmra.mxu2 %v14670_v41 }
 0x1ae   : > { %7251 = vmatpush.bf16.msra.mxu2 %v10187_v16  ;;  %v10024_v58 = vld [vmem:[%s14469_s29 + $0x9b0] sm:$0xf0]  ;;  %v13228_v59 = vld [vmem:[%s14469_s29 + $0xaa4] sm:$0xf]  ;;  %7220 = vmatmul.bf16.vlgmr.msrb.gmra.mxu3 %v14672_v43  ;;  %v9899_v63 = vor.u32 %v13164_v15, %v9896_v52 }
 0x1af   : > { %7264 = vmatpush.bf16.msra.mxu3 %v10315_v21  ;;  %v10152_v27 = vld [vmem:[%s14469_s29 + $0xab0] sm:$0xf0]  ;;  %v13260_v6 = vld [vmem:[%s14469_s29 + $0xba4] sm:$0xf]  ;;  %v10027_v2 = vor.u32 %v13196_v53, %v10024_v58  ;;  %v6975_v21 = vadd.f32 %v6974_v17, %v15322_v1 }
 0x1b0   : > { %v10280_v57 = vld [vmem:[%s14469_s29 + $0xbb0] sm:$0xf0]  ;;  %7226 = vmatpush.bf16.msra.mxu0 %v9915_v44  ;;  %v10155_v60 = vor.u32 %v13228_v59, %v10152_v27  ;;  %v13160_v3 = vld [vmem:[%s14469_s29 + $0x884] sm:$0xf] }
 0x1b1   : > { %7239 = vmatpush.bf16.msra.mxu1 %v10043_v49  ;;  %v9880_v5 = vld [vmem:[%s14469_s29 + $0x890] sm:$0xf0]  ;;  %v13192_v7 = vld [vmem:[%s14469_s29 + $0x984] sm:$0xf]  ;;  %v10283_v0 = vor.u32 %v13260_v6, %v10280_v57  ;;  %v6988_v15 = vadd.f32 %v6987_v24, %v6975_v21 }
 0x1b2   : > { %7252 = vmatpush.bf16.msra.mxu2 %v10171_v40  ;;  %v10008_v9 = vld [vmem:[%s14469_s29 + $0x990] sm:$0xf0]  ;;  %v13224_v14 = vld [vmem:[%s14469_s29 + $0xa84] sm:$0xf]  ;;  %v9883_v23 = vor.u32 %v13160_v3, %v9880_v5  ;;  %v7000_v3 = vpop.f32.mrf.mxu2 }
 0x1b3   : > { %7265 = vmatpush.bf16.msra.mxu3 %v10299_v54  ;;  %v10136_v16 = vld [vmem:[%s14469_s29 + $0xa90] sm:$0xf0]  ;;  %v13256_v13 = vld [vmem:[%s14469_s29 + $0xb84] sm:$0xf]  ;;  %v10011_v34 = vor.u32 %v13192_v7, %v10008_v9  ;;  %v7001_v9 = vadd.f32 %v7000_v3, %v6988_v15 }
 0x1b4   : > { %v10264_v19 = vld [vmem:[%s14469_s29 + $0xb90] sm:$0xf0]  ;;  %7227 = vmatpush.bf16.msra.mxu0 %v9899_v63  ;;  %v10139_v39 = vor.u32 %v13224_v14, %v10136_v16  ;;  %v13156_v61 = vld [vmem:[%s14469_s29 + $0x864] sm:$0xf]  ;;  %v7013_v14 = vpop.f32.mrf.mxu3  ;;  %v6989_v21 = vpop.f32.mrf.mxu1 }
 0x1b5   : > { %7240 = vmatpush.bf16.msra.mxu1 %v10027_v2  ;;  %v9864_v44 = vld [vmem:[%s14469_s29 + $0x870] sm:$0xf0]  ;;  %v13188_v49 = vld [vmem:[%s14469_s29 + $0x964] sm:$0xf]  ;;  %v10267_v40 = vor.u32 %v13256_v13, %v10264_v19  ;;  %v6976_v13 = vpop.f32.mrf.mxu0 }
 0x1b6   : > { %7253 = vmatpush.bf16.msra.mxu2 %v10155_v60  ;;  %v9992_v52 = vld [vmem:[%s14469_s29 + $0x970] sm:$0xf0]  ;;  %v13220_v53 = vld [vmem:[%s14469_s29 + $0xa64] sm:$0xf]  ;;  %v9867_v59 = vor.u32 %v13156_v61, %v9864_v44 }
 0x1b7   : > { %7266 = vmatpush.bf16.msra.mxu3 %v10283_v0  ;;  %v10120_v1 = vld [vmem:[%s14469_s29 + $0xa70] sm:$0xf0]  ;;  %v13252_v54 = vld [vmem:[%s14469_s29 + $0xb64] sm:$0xf]  ;;  %v9995_v27 = vor.u32 %v13188_v49, %v9992_v52 }
 0x1b8   : > { %v10248_v58 = vld [vmem:[%s14469_s29 + $0xb70] sm:$0xf0]  ;;  %7228 = vmatpush.bf16.msra.mxu0 %v9883_v23  ;;  %v10123_v6 = vor.u32 %v13220_v53, %v10120_v1  ;;  %v13152_v57 = vld [vmem:[%s14469_s29 + $0x844] sm:$0xf]  ;;  %v15393_v23 = vadd.f32 %v7013_v14, %v7001_v9 }
 0x1b9   : > { %7241 = vmatpush.bf16.msra.mxu1 %v10011_v34  ;;  %v9848_v63 = vld [vmem:[%s14469_s29 + $0x850] sm:$0xf0]  ;;  %v13184_v2 = vld [vmem:[%s14469_s29 + $0x944] sm:$0xf]  ;;  %v10251_v60 = vor.u32 %v13252_v54, %v10248_v58 }
 0x1ba   : > { %7254 = vmatpush.bf16.msra.mxu2 %v10139_v39  ;;  %v9976_v5 = vld [vmem:[%s14469_s29 + $0x950] sm:$0xf0]  ;;  %v13216_v7 = vld [vmem:[%s14469_s29 + $0xa44] sm:$0xf]  ;;  %v9851_v19 = vor.u32 %v13152_v57, %v9848_v63 }
 0x1bb   : > { %7267 = vmatpush.bf16.msra.mxu3 %v10267_v40  ;;  %v10104_v0 = vld [vmem:[%s14469_s29 + $0xa50] sm:$0xf0]  ;;  %v13248_v16 = vld [vmem:[%s14469_s29 + $0xb44] sm:$0xf]  ;;  %v9979_v24 = vor.u32 %v13184_v2, %v9976_v5 }
 0x1bc   : > { %v10232_v17 = vld [vmem:[%s14469_s29 + $0xb50] sm:$0xf0]  ;;  %7229 = vmatpush.bf16.msra.mxu0 %v9867_v59  ;;  %v10107_v34 = vor.u32 %v13216_v7, %v10104_v0  ;;  %v13148_v39 = vld [vmem:[%s14469_s29 + $0x824] sm:$0xf]  ;;  %v7002_v0 = vpop.f32.mrf.mxu2 }
 0x1bd   : > { %7242 = vmatpush.bf16.msra.mxu1 %v9995_v27  ;;  %v9832_v61 = vld [vmem:[%s14469_s29 + $0x830] sm:$0xf0]  ;;  %v13180_v44 = vld [vmem:[%s14469_s29 + $0x924] sm:$0xf]  ;;  %v10235_v49 = vor.u32 %v13248_v16, %v10232_v17  ;;  %v7015_v17 = vpop.f32.mrf.mxu3 }
 0x1be   : > { %7255 = vmatpush.bf16.msra.mxu2 %v10123_v6  ;;  %v9960_v40 = vld [vmem:[%s14469_s29 + $0x930] sm:$0xf0]  ;;  %v13212_v15 = vld [vmem:[%s14469_s29 + $0xa24] sm:$0xf]  ;;  %v9835_v54 = vor.u32 %v13148_v39, %v9832_v61 }
 0x1bf   : > { %7268 = vmatpush.bf16.msra.mxu3 %v10251_v60  ;;  %v10088_v52 = vld [vmem:[%s14469_s29 + $0xa30] sm:$0xf0]  ;;  %v13244_v53 = vld [vmem:[%s14469_s29 + $0xb24] sm:$0xf]  ;;  %v9963_v27 = vor.u32 %v13180_v44, %v9960_v40 }
 0x1c0   : > { %v10216_v1 = vld [vmem:[%s14469_s29 + $0xb30] sm:$0xf0]  ;;  %7230 = vmatpush.bf16.msra.mxu0 %v9851_v19  ;;  %v13144_v58 = vld [vmem:[%s14469_s29 + $0x804] sm:$0xf]  ;;  %v10091_v6 = vor.u32 %v13212_v15, %v10088_v52 }
 0x1c1   : > { %v9816_v59 = vld [vmem:[%s14469_s29 + $0x810] sm:$0xf0]  ;;  %7243 = vmatpush.bf16.msra.mxu1 %v9979_v24  ;;  %v13176_v57 = vld [vmem:[%s14469_s29 + $0x904] sm:$0xf]  ;;  %v10219_v60 = vor.u32 %v13244_v53, %v10216_v1 }
 0x1c2   : > { %7256 = vmatpush.bf16.msra.mxu2 %v10107_v34  ;;  %v9944_v63 = vld [vmem:[%s14469_s29 + $0x910] sm:$0xf0]  ;;  %v13208_v2 = vld [vmem:[%s14469_s29 + $0xa04] sm:$0xf]  ;;  %v9819_v13 = vor.u32 %v13144_v58, %v9816_v59 }
 0x1c3   : > { %7269 = vmatpush.bf16.msra.mxu3 %v10235_v49  ;;  %v10072_v3 = vld [vmem:[%s14469_s29 + $0xa10] sm:$0xf0]  ;;  %v13240_v5 = vld [vmem:[%s14469_s29 + $0xb04] sm:$0xf]  ;;  %v9947_v34 = vor.u32 %v13176_v57, %v9944_v63 }
 0x1c4   : > { %v10200_v7 = vld [vmem:[%s14469_s29 + $0xb10] sm:$0xf0]  ;;  %v13300_v9 = vld [vmem:[%s14469_s29 + $0xce4] sm:$0xf]  ;;  %7231 = vmatpush.bf16.msra.mxu0 %v9835_v54  ;;  %v10075_v39 = vor.u32 %v13208_v2, %v10072_v3 }
 0x1c5   : > { %v10440_v14 = vld [vmem:[%s14469_s29 + $0xcf0] sm:$0xf0]  ;;  %v13332_v16 = vld [vmem:[%s14469_s29 + $0xde4] sm:$0xf]  ;;  %7244 = vmatpush.bf16.msra.mxu1 %v9963_v27  ;;  %v10203_v49 = vor.u32 %v13240_v5, %v10200_v7 }
 0x1c6   : > { %v10568_v19 = vld [vmem:[%s14469_s29 + $0xdf0] sm:$0xf0]  ;;  %v13364_v21 = vld [vmem:[%s14469_s29 + $0xee4] sm:$0xf]  ;;  %7257 = vmatpush.bf16.msra.mxu2 %v10091_v6  ;;  %v10443_v40 = vor.u32 %v13300_v9, %v10440_v14 }
 0x1c7   : > { %v10696_v24 = vld [vmem:[%s14469_s29 + $0xef0] sm:$0xf0]  ;;  %v13396_v61 = vld [vmem:[%s14469_s29 + $0xfe4] sm:$0xf]  ;;  %7270 = vmatpush.bf16.msra.mxu3 %v10219_v60  ;;  %v10571_v15 = vor.u32 %v13332_v16, %v10568_v19 }
 0x1c8   : > { %v10824_v44 = vld [vmem:[%s14469_s29 + $0xff0] sm:$0xf0]  ;;  %v10699_v52 = vor.u32 %v13364_v21, %v10696_v24  ;;  %v13296_v53 = vld [vmem:[%s14469_s29 + $0xcc4] sm:$0xf]  ;;  %7232 = vmatpush.bf16.msra.mxu0 %v9819_v13 }
 0x1c9   : > { %v10424_v1 = vld [vmem:[%s14469_s29 + $0xcd0] sm:$0xf0]  ;;  %v13328_v54 = vld [vmem:[%s14469_s29 + $0xdc4] sm:$0xf]  ;;  %v10827_v58 = vor.u32 %v13396_v61, %v10824_v44  ;;  %7245 = vmatpush.bf16.msra.mxu1 %v9947_v34 }
 0x1ca   : > { %v10552_v59 = vld [vmem:[%s14469_s29 + $0xdd0] sm:$0xf0]  ;;  %v13360_v27 = vld [vmem:[%s14469_s29 + $0xec4] sm:$0xf]  ;;  %7258 = vmatpush.bf16.msra.mxu2 %v10075_v39  ;;  %v10427_v2 = vor.u32 %v13296_v53, %v10424_v1  ;;  %v7026_v53 = vpop.f32.mrf.mxu0 }
 0x1cb   : > { %v10680_v6 = vld [vmem:[%s14469_s29 + $0xed0] sm:$0xf0]  ;;  %v13392_v57 = vld [vmem:[%s14469_s29 + $0xfc4] sm:$0xf]  ;;  %7271 = vmatpush.bf16.msra.mxu3 %v10203_v49  ;;  %v10555_v60 = vor.u32 %v13328_v54, %v10552_v59  ;;  %7233 = vmatmul.bf16.vlgmr.msra.gmra.mxu0 %v14753_v26 }
 0x1cc   : > { %v10808_v63 = vld [vmem:[%s14469_s29 + $0xfd0] sm:$0xf0]  ;;  %7277 = vmatpush.bf16.msrb.mxu0 %v10443_v40  ;;  %v10683_v3 = vor.u32 %v13360_v27, %v10680_v6  ;;  %v13292_v5 = vld [vmem:[%s14469_s29 + $0xca4] sm:$0xf]  ;;  %7246 = vmatmul.bf16.vlgmr.msra.gmra.mxu1 %v14764_v33  ;;  %v7039_v27 = vpop.f32.mrf.mxu1 }
 0x1cd   : > { %7290 = vmatpush.bf16.msrb.mxu1 %v10571_v15  ;;  %v10408_v7 = vld [vmem:[%s14469_s29 + $0xcb0] sm:$0xf0]  ;;  %v13324_v0 = vld [vmem:[%s14469_s29 + $0xda4] sm:$0xf]  ;;  %v10811_v9 = vor.u32 %v13392_v57, %v10808_v63  ;;  %7259 = vmatmul.bf16.vlgmr.msra.gmra.mxu2 %v14760_v31 }
 0x1ce   : > { %7303 = vmatpush.bf16.msrb.mxu2 %v10699_v52  ;;  %v10536_v14 = vld [vmem:[%s14469_s29 + $0xdb0] sm:$0xf0]  ;;  %v13356_v16 = vld [vmem:[%s14469_s29 + $0xea4] sm:$0xf]  ;;  %7272 = vmatmul.bf16.vlgmr.msra.gmra.mxu3 %v14770_v37  ;;  %v10411_v21 = vor.u32 %v13292_v5, %v10408_v7 }
 0x1cf   : > { %7316 = vmatpush.bf16.msrb.mxu3 %v10827_v58  ;;  %v10664_v17 = vld [vmem:[%s14469_s29 + $0xeb0] sm:$0xf0]  ;;  %v13388_v13 = vld [vmem:[%s14469_s29 + $0xfa4] sm:$0xf]  ;;  %v10539_v24 = vor.u32 %v13324_v0, %v10536_v14  ;;  %v7027_v58 = vadd.f32 %v7026_v53, %v15393_v23 }
 0x1d0   : > { %v10792_v19 = vld [vmem:[%s14469_s29 + $0xfb0] sm:$0xf0]  ;;  %7278 = vmatpush.bf16.msrb.mxu0 %v10427_v2  ;;  %v10667_v34 = vor.u32 %v13356_v16, %v10664_v17  ;;  %v13288_v39 = vld [vmem:[%s14469_s29 + $0xc84] sm:$0xf] }
 0x1d1   : > { %7291 = vmatpush.bf16.msrb.mxu1 %v10555_v60  ;;  %v10392_v61 = vld [vmem:[%s14469_s29 + $0xc90] sm:$0xf0]  ;;  %v13320_v44 = vld [vmem:[%s14469_s29 + $0xd84] sm:$0xf]  ;;  %v10795_v49 = vor.u32 %v13388_v13, %v10792_v19  ;;  %v7040_v5 = vadd.f32 %v7039_v27, %v7027_v58 }
 0x1d2   : > { %7304 = vmatpush.bf16.msrb.mxu2 %v10683_v3  ;;  %v10520_v40 = vld [vmem:[%s14469_s29 + $0xd90] sm:$0xf0]  ;;  %v13352_v15 = vld [vmem:[%s14469_s29 + $0xe84] sm:$0xf]  ;;  %v10395_v59 = vor.u32 %v13288_v39, %v10392_v61  ;;  %v7052_v39 = vpop.f32.mrf.mxu2 }
 0x1d3   : > { %7317 = vmatpush.bf16.msrb.mxu3 %v10811_v9  ;;  %v10648_v52 = vld [vmem:[%s14469_s29 + $0xe90] sm:$0xf0]  ;;  %v13384_v1 = vld [vmem:[%s14469_s29 + $0xf84] sm:$0xf]  ;;  %v10523_v6 = vor.u32 %v13320_v44, %v10520_v40  ;;  %v7053_v40 = vadd.f32 %v7052_v39, %v7040_v5 }
 0x1d4   : > { %v10776_v54 = vld [vmem:[%s14469_s29 + $0xf90] sm:$0xf0]  ;;  %7279 = vmatpush.bf16.msrb.mxu0 %v10411_v21  ;;  %v10651_v57 = vor.u32 %v13352_v15, %v10648_v52  ;;  %v13284_v63 = vld [vmem:[%s14469_s29 + $0xc64] sm:$0xf]  ;;  %v7065_v15 = vpop.f32.mrf.mxu3  ;;  %v7041_v58 = vpop.f32.mrf.mxu1 }
 0x1d5   : > { %7292 = vmatpush.bf16.msrb.mxu1 %v10539_v24  ;;  %v10376_v2 = vld [vmem:[%s14469_s29 + $0xc70] sm:$0xf0]  ;;  %v13316_v60 = vld [vmem:[%s14469_s29 + $0xd64] sm:$0xf]  ;;  %v10779_v3 = vor.u32 %v13384_v1, %v10776_v54  ;;  %v7028_v1 = vpop.f32.mrf.mxu0 }
 0x1d6   : > { %7305 = vmatpush.bf16.msrb.mxu2 %v10667_v34  ;;  %v10504_v7 = vld [vmem:[%s14469_s29 + $0xd70] sm:$0xf0]  ;;  %v13348_v0 = vld [vmem:[%s14469_s29 + $0xe64] sm:$0xf]  ;;  %v10379_v16 = vor.u32 %v13284_v63, %v10376_v2 }
 0x1d7   : > { %7318 = vmatpush.bf16.msrb.mxu3 %v10795_v49  ;;  %v10632_v23 = vld [vmem:[%s14469_s29 + $0xe70] sm:$0xf0]  ;;  %v13380_v9 = vld [vmem:[%s14469_s29 + $0xf64] sm:$0xf]  ;;  %v10507_v17 = vor.u32 %v13316_v60, %v10504_v7 }
 0x1d8   : > { %v10760_v14 = vld [vmem:[%s14469_s29 + $0xf70] sm:$0xf0]  ;;  %7280 = vmatpush.bf16.msrb.mxu0 %v10395_v59  ;;  %v10635_v13 = vor.u32 %v13348_v0, %v10632_v23  ;;  %v13280_v19 = vld [vmem:[%s14469_s29 + $0xc44] sm:$0xf]  ;;  %v15464_v59 = vadd.f32 %v7065_v15, %v7053_v40 }
 0x1d9   : > { %7293 = vmatpush.bf16.msrb.mxu1 %v10523_v6  ;;  %v10360_v21 = vld [vmem:[%s14469_s29 + $0xc50] sm:$0xf0]  ;;  %v13312_v24 = vld [vmem:[%s14469_s29 + $0xd44] sm:$0xf]  ;;  %v10763_v34 = vor.u32 %v13380_v9, %v10760_v14 }
 0x1da   : > { %7306 = vmatpush.bf16.msrb.mxu2 %v10651_v57  ;;  %v10488_v61 = vld [vmem:[%s14469_s29 + $0xd50] sm:$0xf0]  ;;  %v13344_v44 = vld [vmem:[%s14469_s29 + $0xe44] sm:$0xf]  ;;  %v10363_v54 = vor.u32 %v13280_v19, %v10360_v21 }
 0x1db   : > { %7319 = vmatpush.bf16.msrb.mxu3 %v10779_v3  ;;  %v10616_v49 = vld [vmem:[%s14469_s29 + $0xe50] sm:$0xf0]  ;;  %v13376_v52 = vld [vmem:[%s14469_s29 + $0xf44] sm:$0xf]  ;;  %v10491_v27 = vor.u32 %v13312_v24, %v10488_v61 }
 0x1dc   : > { %v10744_v53 = vld [vmem:[%s14469_s29 + $0xf50] sm:$0xf0]  ;;  %7281 = vmatpush.bf16.msrb.mxu0 %v10379_v16  ;;  %v10619_v6 = vor.u32 %v13344_v44, %v10616_v49  ;;  %v13276_v57 = vld [vmem:[%s14469_s29 + $0xc24] sm:$0xf]  ;;  %v7054_v49 = vpop.f32.mrf.mxu2 }
 0x1dd   : > { %7294 = vmatpush.bf16.msrb.mxu1 %v10507_v17  ;;  %v10344_v63 = vld [vmem:[%s14469_s29 + $0xc30] sm:$0xf0]  ;;  %v13308_v2 = vld [vmem:[%s14469_s29 + $0xd24] sm:$0xf]  ;;  %v10747_v60 = vor.u32 %v13376_v52, %v10744_v53  ;;  %v7067_v53 = vpop.f32.mrf.mxu3 }
 0x1de   : > { %7307 = vmatpush.bf16.msrb.mxu2 %v10635_v13  ;;  %v10472_v3 = vld [vmem:[%s14469_s29 + $0xd30] sm:$0xf0]  ;;  %v13340_v5 = vld [vmem:[%s14469_s29 + $0xe24] sm:$0xf]  ;;  %v10347_v9 = vor.u32 %v13276_v57, %v10344_v63 }
 0x1df   : > { %7320 = vmatpush.bf16.msrb.mxu3 %v10763_v34  ;;  %v10600_v7 = vld [vmem:[%s14469_s29 + $0xe30] sm:$0xf0]  ;;  %v13372_v0 = vld [vmem:[%s14469_s29 + $0xf24] sm:$0xf]  ;;  %v10475_v17 = vor.u32 %v13308_v2, %v10472_v3 }
 0x1e0   : > { %v10728_v23 = vld [vmem:[%s14469_s29 + $0xf30] sm:$0xf0]  ;;  %7282 = vmatpush.bf16.msrb.mxu0 %v10363_v54  ;;  %v13272_v14 = vld [vmem:[%s14469_s29 + $0xc04] sm:$0xf]  ;;  %v10603_v13 = vor.u32 %v13340_v5, %v10600_v7 }
 0x1e1   : > { %v10328_v16 = vld [vmem:[%s14469_s29 + $0xc10] sm:$0xf0]  ;;  %7295 = vmatpush.bf16.msrb.mxu1 %v10491_v27  ;;  %v13304_v19 = vld [vmem:[%s14469_s29 + $0xd04] sm:$0xf]  ;;  %v10731_v34 = vor.u32 %v13372_v0, %v10728_v23 }
 0x1e2   : > { %7308 = vmatpush.bf16.msrb.mxu2 %v10619_v6  ;;  %v10456_v21 = vld [vmem:[%s14469_s29 + $0xd10] sm:$0xf0]  ;;  %v13336_v24 = vld [vmem:[%s14469_s29 + $0xe04] sm:$0xf]  ;;  %v10331_v1 = vor.u32 %v13272_v14, %v10328_v16 }
 0x1e3   : > { %7321 = vmatpush.bf16.msrb.mxu3 %v10747_v60  ;;  %v10584_v39 = vld [vmem:[%s14469_s29 + $0xe10] sm:$0xf0]  ;;  %v13368_v61 = vld [vmem:[%s14469_s29 + $0xf04] sm:$0xf]  ;;  %v10459_v6 = vor.u32 %v13304_v19, %v10456_v21 }
 0x1e4   : > { %v10712_v44 = vld [vmem:[%s14469_s29 + $0xf10] sm:$0xf0]  ;;  %v13428_v40 = vld [vmem:[%s14469_s29 + $0x10e4] sm:$0xf]  ;;  %7283 = vmatpush.bf16.msrb.mxu0 %v10347_v9  ;;  %v10587_v57 = vor.u32 %v13336_v24, %v10584_v39 }
 0x1e5   : > { %v10952_v15 = vld [vmem:[%s14469_s29 + $0x10f0] sm:$0xf0]  ;;  %v13460_v52 = vld [vmem:[%s14469_s29 + $0x11e4] sm:$0xf]  ;;  %7296 = vmatpush.bf16.msrb.mxu1 %v10475_v17  ;;  %v10715_v60 = vor.u32 %v13368_v61, %v10712_v44 }
 0x1e6   : > { %v11080_v54 = vld [vmem:[%s14469_s29 + $0x11f0] sm:$0xf0]  ;;  %v13492_v58 = vld [vmem:[%s14469_s29 + $0x12e4] sm:$0xf]  ;;  %7309 = vmatpush.bf16.msrb.mxu2 %v10603_v13  ;;  %v10955_v3 = vor.u32 %v13428_v40, %v10952_v15 }
 0x1e7   : > { %v11208_v27 = vld [vmem:[%s14469_s29 + $0x12f0] sm:$0xf0]  ;;  %v13524_v63 = vld [vmem:[%s14469_s29 + $0x13e4] sm:$0xf]  ;;  %7322 = vmatpush.bf16.msrb.mxu3 %v10731_v34  ;;  %v11083_v5 = vor.u32 %v13460_v52, %v11080_v54 }
 0x1e8   : > { %v11336_v2 = vld [vmem:[%s14469_s29 + $0x13f0] sm:$0xf0]  ;;  %v11211_v7 = vor.u32 %v13492_v58, %v11208_v27  ;;  %v13424_v0 = vld [vmem:[%s14469_s29 + $0x10c4] sm:$0xf]  ;;  %7284 = vmatpush.bf16.msrb.mxu0 %v10331_v1 }
 0x1e9   : > { %v10936_v23 = vld [vmem:[%s14469_s29 + $0x10d0] sm:$0xf0]  ;;  %v13456_v9 = vld [vmem:[%s14469_s29 + $0x11c4] sm:$0xf]  ;;  %v11339_v14 = vor.u32 %v13524_v63, %v11336_v2  ;;  %7297 = vmatpush.bf16.msrb.mxu1 %v10459_v6 }
 0x1ea   : > { %v11064_v16 = vld [vmem:[%s14469_s29 + $0x11d0] sm:$0xf0]  ;;  %v13488_v17 = vld [vmem:[%s14469_s29 + $0x12c4] sm:$0xf]  ;;  %7310 = vmatpush.bf16.msrb.mxu2 %v10587_v57  ;;  %v10939_v24 = vor.u32 %v13424_v0, %v10936_v23  ;;  %v7078_v0 = vpop.f32.mrf.mxu0 }
 0x1eb   : > { %v11192_v13 = vld [vmem:[%s14469_s29 + $0x12d0] sm:$0xf0]  ;;  %v13520_v19 = vld [vmem:[%s14469_s29 + $0x13c4] sm:$0xf]  ;;  %7323 = vmatpush.bf16.msrb.mxu3 %v10715_v60  ;;  %v11067_v34 = vor.u32 %v13456_v9, %v11064_v16  ;;  %7285 = vmatmul.bf16.vlgmr.msrb.gmra.mxu0 %v14847_v30 }
 0x1ec   : > { %v11320_v21 = vld [vmem:[%s14469_s29 + $0x13d0] sm:$0xf0]  ;;  %7329 = vmatpush.bf16.msra.mxu0 %v10955_v3  ;;  %v11195_v39 = vor.u32 %v13488_v17, %v11192_v13  ;;  %v13420_v61 = vld [vmem:[%s14469_s29 + $0x10a4] sm:$0xf]  ;;  %7298 = vmatmul.bf16.vlgmr.msrb.gmra.mxu1 %v14858_v42  ;;  %v7091_v17 = vpop.f32.mrf.mxu1 }
 0x1ed   : > { %7342 = vmatpush.bf16.msra.mxu1 %v11083_v5  ;;  %v10920_v44 = vld [vmem:[%s14469_s29 + $0x10b0] sm:$0xf0]  ;;  %v13452_v49 = vld [vmem:[%s14469_s29 + $0x11a4] sm:$0xf]  ;;  %v11323_v40 = vor.u32 %v13520_v19, %v11320_v21  ;;  %7311 = vmatmul.bf16.vlgmr.msrb.gmra.mxu2 %v14854_v35 }
 0x1ee   : > { %7355 = vmatpush.bf16.msra.mxu2 %v11211_v7  ;;  %v11048_v15 = vld [vmem:[%s14469_s29 + $0x11b0] sm:$0xf0]  ;;  %v13484_v52 = vld [vmem:[%s14469_s29 + $0x12a4] sm:$0xf]  ;;  %7324 = vmatmul.bf16.vlgmr.msrb.gmra.mxu3 %v14865_v47  ;;  %v10923_v58 = vor.u32 %v13420_v61, %v10920_v44 }
 0x1ef   : > { %7368 = vmatpush.bf16.msra.mxu3 %v11339_v14  ;;  %v11176_v53 = vld [vmem:[%s14469_s29 + $0x12b0] sm:$0xf0]  ;;  %v13516_v1 = vld [vmem:[%s14469_s29 + $0x13a4] sm:$0xf]  ;;  %v11051_v27 = vor.u32 %v13452_v49, %v11048_v15  ;;  %v7079_v14 = vadd.f32 %v7078_v0, %v15464_v59 }
 0x1f0   : > { %v11304_v54 = vld [vmem:[%s14469_s29 + $0x13b0] sm:$0xf0]  ;;  %7330 = vmatpush.bf16.msra.mxu0 %v10939_v24  ;;  %v11179_v6 = vor.u32 %v13484_v52, %v11176_v53  ;;  %v13416_v57 = vld [vmem:[%s14469_s29 + $0x1084] sm:$0xf] }
 0x1f1   : > { %7343 = vmatpush.bf16.msra.mxu1 %v11067_v34  ;;  %v10904_v63 = vld [vmem:[%s14469_s29 + $0x1090] sm:$0xf0]  ;;  %v13448_v2 = vld [vmem:[%s14469_s29 + $0x1184] sm:$0xf]  ;;  %v11307_v60 = vor.u32 %v13516_v1, %v11304_v54  ;;  %v7092_v61 = vadd.f32 %v7091_v17, %v7079_v14 }
 0x1f2   : > { %7356 = vmatpush.bf16.msra.mxu2 %v11195_v39  ;;  %v11032_v3 = vld [vmem:[%s14469_s29 + $0x1190] sm:$0xf0]  ;;  %v13480_v5 = vld [vmem:[%s14469_s29 + $0x1284] sm:$0xf]  ;;  %v10907_v16 = vor.u32 %v13416_v57, %v10904_v63  ;;  %v7104_v57 = vpop.f32.mrf.mxu2 }
 0x1f3   : > { %7369 = vmatpush.bf16.msra.mxu3 %v11323_v40  ;;  %v11160_v7 = vld [vmem:[%s14469_s29 + $0x1290] sm:$0xf0]  ;;  %v13512_v23 = vld [vmem:[%s14469_s29 + $0x1384] sm:$0xf]  ;;  %v11035_v13 = vor.u32 %v13448_v2, %v11032_v3  ;;  %v7105_v3 = vadd.f32 %v7104_v57, %v7092_v61 }
 0x1f4   : > { %v11288_v9 = vld [vmem:[%s14469_s29 + $0x1390] sm:$0xf0]  ;;  %7331 = vmatpush.bf16.msra.mxu0 %v10923_v58  ;;  %v11163_v19 = vor.u32 %v13480_v5, %v11160_v7  ;;  %v13412_v21 = vld [vmem:[%s14469_s29 + $0x1064] sm:$0xf]  ;;  %v7117_v5 = vpop.f32.mrf.mxu3  ;;  %v7093_v14 = vpop.f32.mrf.mxu1 }
 0x1f5   : > { %7344 = vmatpush.bf16.msra.mxu1 %v11051_v27  ;;  %v10888_v24 = vld [vmem:[%s14469_s29 + $0x1070] sm:$0xf0]  ;;  %v13444_v34 = vld [vmem:[%s14469_s29 + $0x1164] sm:$0xf]  ;;  %v11291_v39 = vor.u32 %v13512_v23, %v11288_v9  ;;  %v7080_v23 = vpop.f32.mrf.mxu0 }
 0x1f6   : > { %7357 = vmatpush.bf16.msra.mxu2 %v11179_v6  ;;  %v11016_v44 = vld [vmem:[%s14469_s29 + $0x1170] sm:$0xf0]  ;;  %v13476_v49 = vld [vmem:[%s14469_s29 + $0x1264] sm:$0xf]  ;;  %v10891_v52 = vor.u32 %v13412_v21, %v10888_v24 }
 0x1f7   : > { %7370 = vmatpush.bf16.msra.mxu3 %v11307_v60  ;;  %v11144_v59 = vld [vmem:[%s14469_s29 + $0x1270] sm:$0xf0]  ;;  %v13508_v40 = vld [vmem:[%s14469_s29 + $0x1364] sm:$0xf]  ;;  %v11019_v53 = vor.u32 %v13444_v34, %v11016_v44 }
 0x1f8   : > { %v11272_v15 = vld [vmem:[%s14469_s29 + $0x1370] sm:$0xf0]  ;;  %7332 = vmatpush.bf16.msra.mxu0 %v10907_v16  ;;  %v11147_v1 = vor.u32 %v13476_v49, %v11144_v59  ;;  %v13408_v54 = vld [vmem:[%s14469_s29 + $0x1044] sm:$0xf]  ;;  %v15535_v16 = vadd.f32 %v7117_v5, %v7105_v3 }
 0x1f9   : > { %7345 = vmatpush.bf16.msra.mxu1 %v11035_v13  ;;  %v10872_v58 = vld [vmem:[%s14469_s29 + $0x1050] sm:$0xf0]  ;;  %v13440_v27 = vld [vmem:[%s14469_s29 + $0x1144] sm:$0xf]  ;;  %v11275_v6 = vor.u32 %v13508_v40, %v11272_v15 }
 0x1fa   : > { %7358 = vmatpush.bf16.msra.mxu2 %v11163_v19  ;;  %v11000_v63 = vld [vmem:[%s14469_s29 + $0x1150] sm:$0xf0]  ;;  %v13472_v2 = vld [vmem:[%s14469_s29 + $0x1244] sm:$0xf]  ;;  %v10875_v9 = vor.u32 %v13408_v54, %v10872_v58 }
 0x1fb   : > { %7371 = vmatpush.bf16.msra.mxu3 %v11291_v39  ;;  %v11128_v60 = vld [vmem:[%s14469_s29 + $0x1250] sm:$0xf0]  ;;  %v13504_v7 = vld [vmem:[%s14469_s29 + $0x1344] sm:$0xf]  ;;  %v11003_v17 = vor.u32 %v13440_v27, %v11000_v63 }
 0x1fc   : > { %v11256_v0 = vld [vmem:[%s14469_s29 + $0x1350] sm:$0xf0]  ;;  %7333 = vmatpush.bf16.msra.mxu0 %v10891_v52  ;;  %v11131_v13 = vor.u32 %v13472_v2, %v11128_v60  ;;  %v13404_v19 = vld [vmem:[%s14469_s29 + $0x1024] sm:$0xf]  ;;  %v7106_v60 = vpop.f32.mrf.mxu2 }
 0x1fd   : > { %7346 = vmatpush.bf16.msra.mxu1 %v11019_v53  ;;  %v10856_v21 = vld [vmem:[%s14469_s29 + $0x1030] sm:$0xf0]  ;;  %v13436_v24 = vld [vmem:[%s14469_s29 + $0x1124] sm:$0xf]  ;;  %v11259_v34 = vor.u32 %v13504_v7, %v11256_v0  ;;  %v7119_v0 = vpop.f32.mrf.mxu3 }
 0x1fe   : > { %7359 = vmatpush.bf16.msra.mxu2 %v11147_v1  ;;  %v10984_v39 = vld [vmem:[%s14469_s29 + $0x1130] sm:$0xf0]  ;;  %v13468_v61 = vld [vmem:[%s14469_s29 + $0x1224] sm:$0xf]  ;;  %v10859_v40 = vor.u32 %v13404_v19, %v10856_v21 }
 0x1ff   : > { %7372 = vmatpush.bf16.msra.mxu3 %v11275_v6  ;;  %v11112_v44 = vld [vmem:[%s14469_s29 + $0x1230] sm:$0xf0]  ;;  %v13500_v49 = vld [vmem:[%s14469_s29 + $0x1324] sm:$0xf]  ;;  %v10987_v53 = vor.u32 %v13436_v24, %v10984_v39 }
 0x200   : > { %v11240_v59 = vld [vmem:[%s14469_s29 + $0x1330] sm:$0xf0]  ;;  %7334 = vmatpush.bf16.msra.mxu0 %v10875_v9  ;;  %v13400_v15 = vld [vmem:[%s14469_s29 + $0x1004] sm:$0xf]  ;;  %v11115_v1 = vor.u32 %v13468_v61, %v11112_v44 }
 0x201   : > { %v10840_v52 = vld [vmem:[%s14469_s29 + $0x1010] sm:$0xf0]  ;;  %7347 = vmatpush.bf16.msra.mxu1 %v11003_v17  ;;  %v13432_v54 = vld [vmem:[%s14469_s29 + $0x1104] sm:$0xf]  ;;  %v11243_v6 = vor.u32 %v13500_v49, %v11240_v59 }
 0x202   : > { %7360 = vmatpush.bf16.msra.mxu2 %v11131_v13  ;;  %v10968_v58 = vld [vmem:[%s14469_s29 + $0x1110] sm:$0xf0]  ;;  %v13464_v27 = vld [vmem:[%s14469_s29 + $0x1204] sm:$0xf]  ;;  %v10843_v23 = vor.u32 %v13400_v15, %v10840_v52 }
 0x203   : > { %7373 = vmatpush.bf16.msra.mxu3 %v11259_v34  ;;  %v11096_v57 = vld [vmem:[%s14469_s29 + $0x1210] sm:$0xf0]  ;;  %v13496_v63 = vld [vmem:[%s14469_s29 + $0x1304] sm:$0xf]  ;;  %v10971_v13 = vor.u32 %v13432_v54, %v10968_v58 }
 0x204   : > { %v11224_v2 = vld [vmem:[%s14469_s29 + $0x1310] sm:$0xf0]  ;;  %v13556_v3 = vld [vmem:[%s14469_s29 + $0x14e4] sm:$0xf]  ;;  %7335 = vmatpush.bf16.msra.mxu0 %v10859_v40  ;;  %v11099_v19 = vor.u32 %v13464_v27, %v11096_v57 }
 0x205   : > { %v11464_v5 = vld [vmem:[%s14469_s29 + $0x14f0] sm:$0xf0]  ;;  %v13588_v7 = vld [vmem:[%s14469_s29 + $0x15e4] sm:$0xf]  ;;  %7348 = vmatpush.bf16.msra.mxu1 %v10987_v53  ;;  %v11227_v34 = vor.u32 %v13496_v63, %v11224_v2 }
 0x206   : > { %v11592_v9 = vld [vmem:[%s14469_s29 + $0x15f0] sm:$0xf0]  ;;  %v13620_v14 = vld [vmem:[%s14469_s29 + $0x16e4] sm:$0xf]  ;;  %7361 = vmatpush.bf16.msra.mxu2 %v11115_v1  ;;  %v11467_v39 = vor.u32 %v13556_v3, %v11464_v5 }
 0x207   : > { %v11720_v17 = vld [vmem:[%s14469_s29 + $0x16f0] sm:$0xf0]  ;;  %v13652_v21 = vld [vmem:[%s14469_s29 + $0x17e4] sm:$0xf]  ;;  %7374 = vmatpush.bf16.msra.mxu3 %v11243_v6  ;;  %v11595_v61 = vor.u32 %v13588_v7, %v11592_v9 }
 0x208   : > { %v11848_v24 = vld [vmem:[%s14469_s29 + $0x17f0] sm:$0xf0]  ;;  %v11723_v44 = vor.u32 %v13620_v14, %v11720_v17  ;;  %v13552_v49 = vld [vmem:[%s14469_s29 + $0x14c4] sm:$0xf]  ;;  %7336 = vmatpush.bf16.msra.mxu0 %v10843_v23 }
 0x209   : > { %v11448_v59 = vld [vmem:[%s14469_s29 + $0x14d0] sm:$0xf0]  ;;  %v13584_v40 = vld [vmem:[%s14469_s29 + $0x15c4] sm:$0xf]  ;;  %v11851_v15 = vor.u32 %v13652_v21, %v11848_v24  ;;  %7349 = vmatpush.bf16.msra.mxu1 %v10971_v13 }
 0x20a   : > { %v11576_v52 = vld [vmem:[%s14469_s29 + $0x15d0] sm:$0xf0]  ;;  %v13616_v53 = vld [vmem:[%s14469_s29 + $0x16c4] sm:$0xf]  ;;  %7362 = vmatpush.bf16.msra.mxu2 %v11099_v19  ;;  %v11451_v27 = vor.u32 %v13552_v49, %v11448_v59 }
 0x20b   : > { %v11704_v1 = vld [vmem:[%s14469_s29 + $0x16d0] sm:$0xf0]  ;;  %v13648_v54 = vld [vmem:[%s14469_s29 + $0x17c4] sm:$0xf]  ;;  %7375 = vmatpush.bf16.msra.mxu3 %v11227_v34  ;;  %v11579_v6 = vor.u32 %v13584_v40, %v11576_v52  ;;  %7337 = vmatmul.bf16.vlgmr.msra.gmra.mxu0 %v14942_v51 }
 0x20c   : > { %v11832_v58 = vld [vmem:[%s14469_s29 + $0x17d0] sm:$0xf0]  ;;  %7381 = vmatpush.bf16.msrb.mxu0 %v11467_v39  ;;  %v11707_v57 = vor.u32 %v13616_v53, %v11704_v1  ;;  %v13548_v63 = vld [vmem:[%s14469_s29 + $0x14a4] sm:$0xf]  ;;  %7350 = vmatmul.bf16.vlgmr.msra.gmra.mxu1 %v14953_v18 }
 0x20d   : > { %7394 = vmatpush.bf16.msrb.mxu1 %v11595_v61  ;;  %v11432_v2 = vld [vmem:[%s14469_s29 + $0x14b0] sm:$0xf0]  ;;  %v13580_v60 = vld [vmem:[%s14469_s29 + $0x15a4] sm:$0xf]  ;;  %v11835_v3 = vor.u32 %v13648_v54, %v11832_v58  ;;  %7363 = vmatmul.bf16.vlgmr.msra.gmra.mxu2 %v14949_v56 }
 0x20e   : > { %7407 = vmatpush.bf16.msrb.mxu2 %v11723_v44  ;;  %v11560_v5 = vld [vmem:[%s14469_s29 + $0x15b0] sm:$0xf0]  ;;  %v13612_v7 = vld [vmem:[%s14469_s29 + $0x16a4] sm:$0xf]  ;;  %7376 = vmatmul.bf16.vlgmr.msra.gmra.mxu3 %v14960_v62  ;;  %v11435_v14 = vor.u32 %v13548_v63, %v11432_v2 }
 0x20f   : > { %7420 = vmatpush.bf16.msrb.mxu3 %v11851_v15  ;;  %v11688_v0 = vld [vmem:[%s14469_s29 + $0x16b0] sm:$0xf0]  ;;  %v13644_v23 = vld [vmem:[%s14469_s29 + $0x17a4] sm:$0xf]  ;;  %v11563_v17 = vor.u32 %v13580_v60, %v11560_v5  ;;  %v7130_v15 = vpop.f32.mrf.mxu0 }
 0x210   : > { %v11816_v9 = vld [vmem:[%s14469_s29 + $0x17b0] sm:$0xf0]  ;;  %7382 = vmatpush.bf16.msrb.mxu0 %v11451_v27  ;;  %v11691_v13 = vor.u32 %v13612_v7, %v11688_v0  ;;  %v13544_v19 = vld [vmem:[%s14469_s29 + $0x1484] sm:$0xf]  ;;  %v7143_v27 = vpop.f32.mrf.mxu1 }
 0x211   : > { %7395 = vmatpush.bf16.msrb.mxu1 %v11579_v6  ;;  %v11416_v21 = vld [vmem:[%s14469_s29 + $0x1490] sm:$0xf0]  ;;  %v13576_v24 = vld [vmem:[%s14469_s29 + $0x1584] sm:$0xf]  ;;  %v11819_v34 = vor.u32 %v13644_v23, %v11816_v9  ;;  %v7144_v60 = vadd.f32 %v7143_v27, %v7130_v15 }
 0x212   : > { %7408 = vmatpush.bf16.msrb.mxu2 %v11707_v57  ;;  %v11544_v39 = vld [vmem:[%s14469_s29 + $0x1590] sm:$0xf0]  ;;  %v13608_v61 = vld [vmem:[%s14469_s29 + $0x1684] sm:$0xf]  ;;  %v11419_v40 = vor.u32 %v13544_v19, %v11416_v21 }
 0x213   : > { %7421 = vmatpush.bf16.msrb.mxu3 %v11835_v3  ;;  %v11672_v44 = vld [vmem:[%s14469_s29 + $0x1690] sm:$0xf0]  ;;  %v13640_v49 = vld [vmem:[%s14469_s29 + $0x1784] sm:$0xf]  ;;  %v11547_v52 = vor.u32 %v13576_v24, %v11544_v39 }
 0x214   : > { %v11800_v59 = vld [vmem:[%s14469_s29 + $0x1790] sm:$0xf0]  ;;  %7383 = vmatpush.bf16.msrb.mxu0 %v11435_v14  ;;  %v11675_v53 = vor.u32 %v13608_v61, %v11672_v44  ;;  %v13540_v1 = vld [vmem:[%s14469_s29 + $0x1464] sm:$0xf]  ;;  %v7169_v61 = vpop.f32.mrf.mxu3 }
 0x215   : > { %7396 = vmatpush.bf16.msrb.mxu1 %v11563_v17  ;;  %v11400_v54 = vld [vmem:[%s14469_s29 + $0x1470] sm:$0xf0]  ;;  %v13572_v58 = vld [vmem:[%s14469_s29 + $0x1564] sm:$0xf]  ;;  %v11803_v6 = vor.u32 %v13640_v49, %v11800_v59 }
 0x216   : > { %7409 = vmatpush.bf16.msrb.mxu2 %v11691_v13  ;;  %v11528_v57 = vld [vmem:[%s14469_s29 + $0x1570] sm:$0xf0]  ;;  %v13604_v63 = vld [vmem:[%s14469_s29 + $0x1664] sm:$0xf]  ;;  %v11403_v7 = vor.u32 %v13540_v1, %v11400_v54  ;;  %v7156_v13 = vpop.f32.mrf.mxu2 }
 0x217   : > { %7422 = vmatpush.bf16.msrb.mxu3 %v11819_v34  ;;  %v11656_v2 = vld [vmem:[%s14469_s29 + $0x1670] sm:$0xf0]  ;;  %v13636_v3 = vld [vmem:[%s14469_s29 + $0x1764] sm:$0xf]  ;;  %v11531_v0 = vor.u32 %v13572_v58, %v11528_v57  ;;  %v7157_v39 = vadd.f32 %v7156_v13, %v7144_v60  ;;  %v7132_v15 = vpop.f32.mrf.mxu0 }
 0x218   : > { %v11784_v5 = vld [vmem:[%s14469_s29 + $0x1770] sm:$0xf0]  ;;  %7384 = vmatpush.bf16.msrb.mxu0 %v11419_v40  ;;  %v11659_v23 = vor.u32 %v13604_v63, %v11656_v2  ;;  %v13536_v9 = vld [vmem:[%s14469_s29 + $0x1444] sm:$0xf]  ;;  %v7145_v27 = vpop.f32.mrf.mxu1 }
 0x219   : > { %7397 = vmatpush.bf16.msrb.mxu1 %v11547_v52  ;;  %v11384_v14 = vld [vmem:[%s14469_s29 + $0x1450] sm:$0xf0]  ;;  %v13568_v17 = vld [vmem:[%s14469_s29 + $0x1544] sm:$0xf]  ;;  %v11787_v19 = vor.u32 %v13636_v3, %v11784_v5  ;;  %v15605_v40 = vadd.f32 %v7169_v61, %v7157_v39 }
 0x21a   : > { %7410 = vmatpush.bf16.msrb.mxu2 %v11675_v53  ;;  %v11512_v21 = vld [vmem:[%s14469_s29 + $0x1550] sm:$0xf0]  ;;  %v13600_v24 = vld [vmem:[%s14469_s29 + $0x1644] sm:$0xf]  ;;  %v11387_v59 = vor.u32 %v13536_v9, %v11384_v14 }
 0x21b   : > { %7423 = vmatpush.bf16.msrb.mxu3 %v11803_v6  ;;  %v11640_v34 = vld [vmem:[%s14469_s29 + $0x1650] sm:$0xf0]  ;;  %v13632_v44 = vld [vmem:[%s14469_s29 + $0x1744] sm:$0xf]  ;;  %v11515_v52 = vor.u32 %v13568_v17, %v11512_v21 }
 0x21c   : > { %v11768_v49 = vld [vmem:[%s14469_s29 + $0x1750] sm:$0xf0]  ;;  %7385 = vmatpush.bf16.msrb.mxu0 %v11403_v7  ;;  %v11643_v53 = vor.u32 %v13600_v24, %v11640_v34  ;;  %v13532_v1 = vld [vmem:[%s14469_s29 + $0x1424] sm:$0xf]  ;;  %v7171_v61 = vpop.f32.mrf.mxu3 }
 0x21d   : > { %7398 = vmatpush.bf16.msrb.mxu1 %v11531_v0  ;;  %v11368_v54 = vld [vmem:[%s14469_s29 + $0x1430] sm:$0xf0]  ;;  %v13564_v58 = vld [vmem:[%s14469_s29 + $0x1524] sm:$0xf]  ;;  %v11771_v6 = vor.u32 %v13632_v44, %v11768_v49 }
 0x21e   : > { %7411 = vmatpush.bf16.msrb.mxu2 %v11659_v23  ;;  %v11496_v57 = vld [vmem:[%s14469_s29 + $0x1530] sm:$0xf0]  ;;  %v13596_v63 = vld [vmem:[%s14469_s29 + $0x1624] sm:$0xf]  ;;  %v11371_v5 = vor.u32 %v13532_v1, %v11368_v54 }
 0x21f   : > { %7424 = vmatpush.bf16.msrb.mxu3 %v11787_v19  ;;  %v11624_v2 = vld [vmem:[%s14469_s29 + $0x1630] sm:$0xf0]  ;;  %v13628_v60 = vld [vmem:[%s14469_s29 + $0x1724] sm:$0xf]  ;;  %v11499_v23 = vor.u32 %v13564_v58, %v11496_v57  ;;  %v7158_v19 = vpop.f32.mrf.mxu2 }
 0x220   : > { %v11752_v3 = vld [vmem:[%s14469_s29 + $0x1730] sm:$0xf0]  ;;  %7386 = vmatpush.bf16.msrb.mxu0 %v11387_v59  ;;  %v13528_v7 = vld [vmem:[%s14469_s29 + $0x1404] sm:$0xf]  ;;  %v11627_v9 = vor.u32 %v13596_v63, %v11624_v2 }
 0x221   : > { %v11352_v0 = vld [vmem:[%s14469_s29 + $0x1410] sm:$0xf0]  ;;  %7399 = vmatpush.bf16.msrb.mxu1 %v11515_v52  ;;  %v13560_v14 = vld [vmem:[%s14469_s29 + $0x1504] sm:$0xf]  ;;  %v11755_v21 = vor.u32 %v13628_v60, %v11752_v3 }
 0x222   : > { %7412 = vmatpush.bf16.msrb.mxu2 %v11643_v53  ;;  %v11480_v17 = vld [vmem:[%s14469_s29 + $0x1510] sm:$0xf0]  ;;  %v13592_v13 = vld [vmem:[%s14469_s29 + $0x1604] sm:$0xf]  ;;  %v11355_v15 = vor.u32 %v13528_v7, %v11352_v0 }
 0x223   : > { %7425 = vmatpush.bf16.msrb.mxu3 %v11771_v6  ;;  %v11608_v24 = vld [vmem:[%s14469_s29 + $0x1610] sm:$0xf0]  ;;  %v13624_v34 = vld [vmem:[%s14469_s29 + $0x1704] sm:$0xf]  ;;  %v11483_v54 = vor.u32 %v13560_v14, %v11480_v17 }
 0x224   : > { %v11736_v39 = vld [vmem:[%s14469_s29 + $0x1710] sm:$0xf0]  ;;  %v13684_v44 = vld [vmem:[%s14469_s29 + $0x18e4] sm:$0xf]  ;;  %7387 = vmatpush.bf16.msrb.mxu0 %v11371_v5  ;;  %v11611_v58 = vor.u32 %v13592_v13, %v11608_v24 }
 0x225   : > { %v11976_v49 = vld [vmem:[%s14469_s29 + $0x18f0] sm:$0xf0]  ;;  %v13716_v59 = vld [vmem:[%s14469_s29 + $0x19e4] sm:$0xf]  ;;  %7400 = vmatpush.bf16.msrb.mxu1 %v11499_v23  ;;  %v11739_v57 = vor.u32 %v13624_v34, %v11736_v39 }
 0x226   : > { %v12104_v52 = vld [vmem:[%s14469_s29 + $0x19f0] sm:$0xf0]  ;;  %v13748_v53 = vld [vmem:[%s14469_s29 + $0x1ae4] sm:$0xf]  ;;  %7413 = vmatpush.bf16.msrb.mxu2 %v11627_v9  ;;  %v11979_v63 = vor.u32 %v13684_v44, %v11976_v49 }
 0x227   : > { %v12232_v1 = vld [vmem:[%s14469_s29 + $0x1af0] sm:$0xf0]  ;;  %v13780_v27 = vld [vmem:[%s14469_s29 + $0x1be4] sm:$0xf]  ;;  %7426 = vmatpush.bf16.msrb.mxu3 %v11755_v21  ;;  %v12107_v2 = vor.u32 %v13716_v59, %v12104_v52 }
 0x228   : > { %v12360_v6 = vld [vmem:[%s14469_s29 + $0x1bf0] sm:$0xf0]  ;;  %v12235_v60 = vor.u32 %v13748_v53, %v12232_v1  ;;  %v13680_v3 = vld [vmem:[%s14469_s29 + $0x18c4] sm:$0xf]  ;;  %7388 = vmatpush.bf16.msrb.mxu0 %v11355_v15 }
 0x229   : > { %v11960_v5 = vld [vmem:[%s14469_s29 + $0x18d0] sm:$0xf0]  ;;  %v13712_v7 = vld [vmem:[%s14469_s29 + $0x19c4] sm:$0xf]  ;;  %v12363_v0 = vor.u32 %v13780_v27, %v12360_v6  ;;  %7401 = vmatpush.bf16.msrb.mxu1 %v11483_v54 }
 0x22a   : > { %v12088_v23 = vld [vmem:[%s14469_s29 + $0x19d0] sm:$0xf0]  ;;  %v13744_v9 = vld [vmem:[%s14469_s29 + $0x1ac4] sm:$0xf]  ;;  %7414 = vmatpush.bf16.msrb.mxu2 %v11611_v58  ;;  %v11963_v19 = vor.u32 %v13680_v3, %v11960_v5 }
 0x22b   : > { %v12216_v14 = vld [vmem:[%s14469_s29 + $0x1ad0] sm:$0xf0]  ;;  %v13776_v17 = vld [vmem:[%s14469_s29 + $0x1bc4] sm:$0xf]  ;;  %7427 = vmatpush.bf16.msrb.mxu3 %v11739_v57  ;;  %v12091_v21 = vor.u32 %v13712_v7, %v12088_v23  ;;  %7389 = vmatmul.bf16.vlgmr.msrb.gmra.mxu0 %v15035_v22  ;;  %v7182_v23 = vpop.f32.mrf.mxu0 }
 0x22c   : > { %v12344_v13 = vld [vmem:[%s14469_s29 + $0x1bd0] sm:$0xf0]  ;;  %7433 = vmatpush.bf16.msra.mxu0 %v11979_v63  ;;  %v12219_v24 = vor.u32 %v13744_v9, %v12216_v14  ;;  %v13676_v34 = vld [vmem:[%s14469_s29 + $0x18a4] sm:$0xf]  ;;  %7402 = vmatmul.bf16.vlgmr.msrb.gmra.mxu1 %v15048_v36 }
 0x22d   : > { %7446 = vmatpush.bf16.msra.mxu1 %v12107_v2  ;;  %v11944_v39 = vld [vmem:[%s14469_s29 + $0x18b0] sm:$0xf0]  ;;  %v13708_v61 = vld [vmem:[%s14469_s29 + $0x19a4] sm:$0xf]  ;;  %v12347_v44 = vor.u32 %v13776_v17, %v12344_v13  ;;  %7415 = vmatmul.bf16.vlgmr.msrb.gmra.mxu2 %v15044_v28 }
 0x22e   : > { %7459 = vmatpush.bf16.msra.mxu2 %v12235_v60  ;;  %v12072_v49 = vld [vmem:[%s14469_s29 + $0x19b0] sm:$0xf0]  ;;  %v13740_v59 = vld [vmem:[%s14469_s29 + $0x1aa4] sm:$0xf]  ;;  %7428 = vmatmul.bf16.vlgmr.msrb.gmra.mxu3 %v15054_v38  ;;  %v11947_v1 = vor.u32 %v13676_v34, %v11944_v39 }
 0x22f   : > { %7472 = vmatpush.bf16.msra.mxu3 %v12363_v0  ;;  %v12200_v15 = vld [vmem:[%s14469_s29 + $0x1ab0] sm:$0xf0]  ;;  %v13772_v52 = vld [vmem:[%s14469_s29 + $0x1ba4] sm:$0xf]  ;;  %v12075_v54 = vor.u32 %v13708_v61, %v12072_v49 }
 0x230   : > { %v12328_v53 = vld [vmem:[%s14469_s29 + $0x1bb0] sm:$0xf0]  ;;  %7434 = vmatpush.bf16.msra.mxu0 %v11963_v19  ;;  %v12203_v58 = vor.u32 %v13740_v59, %v12200_v15  ;;  %v13672_v27 = vld [vmem:[%s14469_s29 + $0x1884] sm:$0xf] }
 0x231   : > { %7447 = vmatpush.bf16.msra.mxu1 %v12091_v21  ;;  %v11928_v6 = vld [vmem:[%s14469_s29 + $0x1890] sm:$0xf0]  ;;  %v13704_v57 = vld [vmem:[%s14469_s29 + $0x1984] sm:$0xf]  ;;  %v12331_v63 = vor.u32 %v13772_v52, %v12328_v53  ;;  %v7183_v21 = vadd.f32 %v7182_v23, %v15605_v40 }
 0x232   : > { %7460 = vmatpush.bf16.msra.mxu2 %v12219_v24  ;;  %v12056_v2 = vld [vmem:[%s14469_s29 + $0x1990] sm:$0xf0]  ;;  %v13736_v60 = vld [vmem:[%s14469_s29 + $0x1a84] sm:$0xf]  ;;  %v11931_v0 = vor.u32 %v13672_v27, %v11928_v6  ;;  %v7195_v24 = vpop.f32.mrf.mxu1  ;;  %v7208_v27 = vpop.f32.mrf.mxu2 }
 0x233   : > { %7473 = vmatpush.bf16.msra.mxu3 %v12347_v44  ;;  %v12184_v3 = vld [vmem:[%s14469_s29 + $0x1a90] sm:$0xf0]  ;;  %v13768_v5 = vld [vmem:[%s14469_s29 + $0x1b84] sm:$0xf]  ;;  %v12059_v9 = vor.u32 %v13704_v57, %v12056_v2  ;;  %v7196_v15 = vadd.f32 %v7195_v24, %v7183_v21 }
 0x234   : > { %v12312_v7 = vld [vmem:[%s14469_s29 + $0x1b90] sm:$0xf0]  ;;  %7435 = vmatpush.bf16.msra.mxu0 %v11947_v1  ;;  %v12187_v14 = vor.u32 %v13736_v60, %v12184_v3  ;;  %v13668_v17 = vld [vmem:[%s14469_s29 + $0x1864] sm:$0xf]  ;;  %v7221_v3 = vpop.f32.mrf.mxu3 }
 0x235   : > { %7448 = vmatpush.bf16.msra.mxu1 %v12075_v54  ;;  %v11912_v13 = vld [vmem:[%s14469_s29 + $0x1870] sm:$0xf0]  ;;  %v13700_v19 = vld [vmem:[%s14469_s29 + $0x1964] sm:$0xf]  ;;  %v12315_v34 = vor.u32 %v13768_v5, %v12312_v7  ;;  %v7209_v60 = vadd.f32 %v7208_v27, %v7196_v15 }
 0x236   : > { %7461 = vmatpush.bf16.msra.mxu2 %v12203_v58  ;;  %v12040_v39 = vld [vmem:[%s14469_s29 + $0x1970] sm:$0xf0]  ;;  %v13732_v61 = vld [vmem:[%s14469_s29 + $0x1a64] sm:$0xf]  ;;  %v11915_v52 = vor.u32 %v13668_v17, %v11912_v13 }
 0x237   : > { %7474 = vmatpush.bf16.msra.mxu3 %v12331_v63  ;;  %v12168_v44 = vld [vmem:[%s14469_s29 + $0x1a70] sm:$0xf0]  ;;  %v13764_v49 = vld [vmem:[%s14469_s29 + $0x1b64] sm:$0xf]  ;;  %v12043_v40 = vor.u32 %v13700_v19, %v12040_v39  ;;  %v15676_v23 = vadd.f32 %v7221_v3, %v7209_v60 }
 0x238   : > { %v12296_v59 = vld [vmem:[%s14469_s29 + $0x1b70] sm:$0xf0]  ;;  %7436 = vmatpush.bf16.msra.mxu0 %v11931_v0  ;;  %v12171_v53 = vor.u32 %v13732_v61, %v12168_v44  ;;  %v13664_v1 = vld [vmem:[%s14469_s29 + $0x1844] sm:$0xf] }
 0x239   : > { %7449 = vmatpush.bf16.msra.mxu1 %v12059_v9  ;;  %v11896_v54 = vld [vmem:[%s14469_s29 + $0x1850] sm:$0xf0]  ;;  %v13696_v58 = vld [vmem:[%s14469_s29 + $0x1944] sm:$0xf]  ;;  %v12299_v6 = vor.u32 %v13764_v49, %v12296_v59  ;;  %v7184_v9 = vpop.f32.mrf.mxu0 }
 0x23a   : > { %7462 = vmatpush.bf16.msra.mxu2 %v12187_v14  ;;  %v12024_v57 = vld [vmem:[%s14469_s29 + $0x1950] sm:$0xf0]  ;;  %v13728_v63 = vld [vmem:[%s14469_s29 + $0x1a44] sm:$0xf]  ;;  %v11899_v0 = vor.u32 %v13664_v1, %v11896_v54  ;;  %v7197_v24 = vpop.f32.mrf.mxu1 }
 0x23b   : > { %7475 = vmatpush.bf16.msra.mxu3 %v12315_v34  ;;  %v12152_v2 = vld [vmem:[%s14469_s29 + $0x1a50] sm:$0xf0]  ;;  %v13760_v5 = vld [vmem:[%s14469_s29 + $0x1b44] sm:$0xf]  ;;  %v12027_v14 = vor.u32 %v13696_v58, %v12024_v57 }
 0x23c   : > { %v12280_v7 = vld [vmem:[%s14469_s29 + $0x1b50] sm:$0xf0]  ;;  %7437 = vmatpush.bf16.msra.mxu0 %v11915_v52  ;;  %v12155_v17 = vor.u32 %v13728_v63, %v12152_v2  ;;  %v13660_v13 = vld [vmem:[%s14469_s29 + $0x1824] sm:$0xf]  ;;  %v7223_v3 = vpop.f32.mrf.mxu3 }
 0x23d   : > { %7450 = vmatpush.bf16.msra.mxu1 %v12043_v40  ;;  %v11880_v19 = vld [vmem:[%s14469_s29 + $0x1830] sm:$0xf0]  ;;  %v13692_v21 = vld [vmem:[%s14469_s29 + $0x1924] sm:$0xf]  ;;  %v12283_v34 = vor.u32 %v13760_v5, %v12280_v7 }
 0x23e   : > { %7463 = vmatpush.bf16.msra.mxu2 %v12171_v53  ;;  %v12008_v39 = vld [vmem:[%s14469_s29 + $0x1930] sm:$0xf0]  ;;  %v13724_v61 = vld [vmem:[%s14469_s29 + $0x1a24] sm:$0xf]  ;;  %v11883_v15 = vor.u32 %v13660_v13, %v11880_v19 }
 0x23f   : > { %7476 = vmatpush.bf16.msra.mxu3 %v12299_v6  ;;  %v12136_v44 = vld [vmem:[%s14469_s29 + $0x1a30] sm:$0xf0]  ;;  %v13756_v49 = vld [vmem:[%s14469_s29 + $0x1b24] sm:$0xf]  ;;  %v12011_v53 = vor.u32 %v13692_v21, %v12008_v39  ;;  %v7210_v6 = vpop.f32.mrf.mxu2 }
 0x240   : > { %v12264_v59 = vld [vmem:[%s14469_s29 + $0x1b30] sm:$0xf0]  ;;  %7438 = vmatpush.bf16.msra.mxu0 %v11899_v0  ;;  %v13656_v52 = vld [vmem:[%s14469_s29 + $0x1804] sm:$0xf]  ;;  %v12139_v1 = vor.u32 %v13724_v61, %v12136_v44 }
 0x241   : > { %v11864_v40 = vld [vmem:[%s14469_s29 + $0x1810] sm:$0xf0]  ;;  %7451 = vmatpush.bf16.msra.mxu1 %v12027_v14  ;;  %v13688_v54 = vld [vmem:[%s14469_s29 + $0x1904] sm:$0xf]  ;;  %v12267_v57 = vor.u32 %v13756_v49, %v12264_v59 }
 0x242   : > { %7464 = vmatpush.bf16.msra.mxu2 %v12155_v17  ;;  %v11992_v58 = vld [vmem:[%s14469_s29 + $0x1910] sm:$0xf0]  ;;  %v13720_v27 = vld [vmem:[%s14469_s29 + $0x1a04] sm:$0xf]  ;;  %v11867_v9 = vor.u32 %v13656_v52, %v11864_v40 }
 0x243   : > { %7477 = vmatpush.bf16.msra.mxu3 %v12283_v34  ;;  %v12120_v63 = vld [vmem:[%s14469_s29 + $0x1a10] sm:$0xf0]  ;;  %v13752_v2 = vld [vmem:[%s14469_s29 + $0x1b04] sm:$0xf]  ;;  %v11995_v19 = vor.u32 %v13688_v54, %v11992_v58 }
 0x244   : > { %v12248_v60 = vld [vmem:[%s14469_s29 + $0x1b10] sm:$0xf0]  ;;  %v13812_v5 = vld [vmem:[%s14469_s29 + $0x1ce4] sm:$0xf]  ;;  %7439 = vmatpush.bf16.msra.mxu0 %v11883_v15  ;;  %v12123_v21 = vor.u32 %v13720_v27, %v12120_v63 }
 0x245   : > { %v12488_v7 = vld [vmem:[%s14469_s29 + $0x1cf0] sm:$0xf0]  ;;  %v13844_v0 = vld [vmem:[%s14469_s29 + $0x1de4] sm:$0xf]  ;;  %7452 = vmatpush.bf16.msra.mxu1 %v12011_v53  ;;  %v12251_v39 = vor.u32 %v13752_v2, %v12248_v60 }
 0x246   : > { %v12616_v14 = vld [vmem:[%s14469_s29 + $0x1df0] sm:$0xf0]  ;;  %v13876_v17 = vld [vmem:[%s14469_s29 + $0x1ee4] sm:$0xf]  ;;  %7465 = vmatpush.bf16.msra.mxu2 %v12139_v1  ;;  %v12491_v61 = vor.u32 %v13812_v5, %v12488_v7 }
 0x247   : > { %v12744_v13 = vld [vmem:[%s14469_s29 + $0x1ef0] sm:$0xf0]  ;;  %v13908_v24 = vld [vmem:[%s14469_s29 + $0x1fe4] sm:$0xf]  ;;  %7478 = vmatpush.bf16.msra.mxu3 %v12267_v57  ;;  %v12619_v44 = vor.u32 %v13844_v0, %v12616_v14 }
 0x248   : > { %v12872_v34 = vld [vmem:[%s14469_s29 + $0x1ff0] sm:$0xf0]  ;;  %v12747_v49 = vor.u32 %v13876_v17, %v12744_v13  ;;  %v13808_v59 = vld [vmem:[%s14469_s29 + $0x1cc4] sm:$0xf]  ;;  %7440 = vmatpush.bf16.msra.mxu0 %v11867_v9 }
 0x249   : > { %v12472_v15 = vld [vmem:[%s14469_s29 + $0x1cd0] sm:$0xf0]  ;;  %v13840_v52 = vld [vmem:[%s14469_s29 + $0x1dc4] sm:$0xf]  ;;  %v12875_v40 = vor.u32 %v13908_v24, %v12872_v34  ;;  %7453 = vmatpush.bf16.msra.mxu1 %v11995_v19 }
 0x24a   : > { %v12600_v53 = vld [vmem:[%s14469_s29 + $0x1dd0] sm:$0xf0]  ;;  %v13872_v1 = vld [vmem:[%s14469_s29 + $0x1ec4] sm:$0xf]  ;;  %7466 = vmatpush.bf16.msra.mxu2 %v12123_v21  ;;  %v12475_v6 = vor.u32 %v13808_v59, %v12472_v15  ;;  %v7234_v15 = vpop.f32.mrf.mxu0 }
 0x24b   : > { %v12728_v54 = vld [vmem:[%s14469_s29 + $0x1ed0] sm:$0xf0]  ;;  %v13904_v58 = vld [vmem:[%s14469_s29 + $0x1fc4] sm:$0xf]  ;;  %7479 = vmatpush.bf16.msra.mxu3 %v12251_v39  ;;  %v12603_v57 = vor.u32 %v13840_v52, %v12600_v53  ;;  %7441 = vmatmul.bf16.vlgmr.msra.gmra.mxu0 %v15122_v20  ;;  %v7235_v53 = vadd.f32 %v7234_v15, %v15676_v23 }
 0x24c   : > { %v12856_v27 = vld [vmem:[%s14469_s29 + $0x1fd0] sm:$0xf0]  ;;  %7485 = vmatpush.bf16.msrb.mxu0 %v12491_v61  ;;  %v12731_v63 = vor.u32 %v13872_v1, %v12728_v54  ;;  %v13804_v2 = vld [vmem:[%s14469_s29 + $0x1ca4] sm:$0xf]  ;;  %7454 = vmatmul.bf16.vlgmr.msra.gmra.mxu1 %v15129_v4  ;;  %v7247_v54 = vpop.f32.mrf.mxu1 }
 0x24d   : > { %7498 = vmatpush.bf16.msrb.mxu1 %v12619_v44  ;;  %v12456_v60 = vld [vmem:[%s14469_s29 + $0x1cb0] sm:$0xf0]  ;;  %v13836_v3 = vld [vmem:[%s14469_s29 + $0x1da4] sm:$0xf]  ;;  %v12859_v5 = vor.u32 %v13904_v58, %v12856_v27  ;;  %7467 = vmatmul.bf16.vlgmr.msra.gmra.mxu2 %v15127_v25 }
 0x24e   : > { %7511 = vmatpush.bf16.msrb.mxu2 %v12747_v49  ;;  %v12584_v7 = vld [vmem:[%s14469_s29 + $0x1db0] sm:$0xf0]  ;;  %v13868_v0 = vld [vmem:[%s14469_s29 + $0x1ea4] sm:$0xf]  ;;  %7480 = vmatmul.bf16.vlgmr.msra.gmra.mxu3 %v15133_v10  ;;  %v12459_v13 = vor.u32 %v13804_v2, %v12456_v60  ;;  %v7248_v60 = vadd.f32 %v7247_v54, %v7235_v53 }
 0x24f   : > { %7524 = vmatpush.bf16.msrb.mxu3 %v12875_v40  ;;  %v12712_v9 = vld [vmem:[%s14469_s29 + $0x1eb0] sm:$0xf0]  ;;  %v13900_v14 = vld [vmem:[%s14469_s29 + $0x1fa4] sm:$0xf]  ;;  %v12587_v19 = vor.u32 %v13836_v3, %v12584_v7 }
 0x250   : > { %v12840_v17 = vld [vmem:[%s14469_s29 + $0x1fb0] sm:$0xf0]  ;;  %7486 = vmatpush.bf16.msrb.mxu0 %v12475_v6  ;;  %v12715_v21 = vor.u32 %v13868_v0, %v12712_v9  ;;  %v13800_v24 = vld [vmem:[%s14469_s29 + $0x1c84] sm:$0xf] }
 0x251   : > { %7499 = vmatpush.bf16.msrb.mxu1 %v12603_v57  ;;  %v12440_v34 = vld [vmem:[%s14469_s29 + $0x1c90] sm:$0xf0]  ;;  %v13832_v39 = vld [vmem:[%s14469_s29 + $0x1d84] sm:$0xf]  ;;  %v12843_v61 = vor.u32 %v13900_v14, %v12840_v17 }
 0x252   : > { %7512 = vmatpush.bf16.msrb.mxu2 %v12731_v63  ;;  %v12568_v44 = vld [vmem:[%s14469_s29 + $0x1d90] sm:$0xf0]  ;;  %v13864_v49 = vld [vmem:[%s14469_s29 + $0x1e84] sm:$0xf]  ;;  %v12443_v1 = vor.u32 %v13800_v24, %v12440_v34  ;;  %v7260_v34 = vpop.f32.mrf.mxu2 }
 0x253   : > { %7525 = vmatpush.bf16.msrb.mxu3 %v12859_v5  ;;  %v12696_v59 = vld [vmem:[%s14469_s29 + $0x1e90] sm:$0xf0]  ;;  %v13896_v52 = vld [vmem:[%s14469_s29 + $0x1f84] sm:$0xf]  ;;  %v12571_v58 = vor.u32 %v13832_v39, %v12568_v44 }
 0x254   : > { %v12824_v40 = vld [vmem:[%s14469_s29 + $0x1f90] sm:$0xf0]  ;;  %7487 = vmatpush.bf16.msrb.mxu0 %v12459_v13  ;;  %v12699_v27 = vor.u32 %v13864_v49, %v12696_v59  ;;  %v13796_v6 = vld [vmem:[%s14469_s29 + $0x1c64] sm:$0xf]  ;;  %v7261_v49 = vadd.f32 %v7260_v34, %v7248_v60  ;;  %v7273_v59 = vpop.f32.mrf.mxu3 }
 0x255   : > { %7500 = vmatpush.bf16.msrb.mxu1 %v12587_v19  ;;  %v12424_v57 = vld [vmem:[%s14469_s29 + $0x1c70] sm:$0xf0]  ;;  %v13828_v63 = vld [vmem:[%s14469_s29 + $0x1d64] sm:$0xf]  ;;  %v12827_v2 = vor.u32 %v13896_v52, %v12824_v40  ;;  %v7236_v40 = vpop.f32.mrf.mxu0 }
 0x256   : > { %7513 = vmatpush.bf16.msrb.mxu2 %v12715_v21  ;;  %v12552_v3 = vld [vmem:[%s14469_s29 + $0x1d70] sm:$0xf0]  ;;  %v13860_v5 = vld [vmem:[%s14469_s29 + $0x1e64] sm:$0xf]  ;;  %v12427_v9 = vor.u32 %v13796_v6, %v12424_v57  ;;  %v15747_v54 = vadd.f32 %v7273_v59, %v7261_v49  ;;  %v8910_v59 = vld [vmem:[%s14469_s29 + $0xe8] sm:$0xf] }
 0x257   : > { %7526 = vmatpush.bf16.msrb.mxu3 %v12843_v61  ;;  %v12680_v23 = vld [vmem:[%s14469_s29 + $0x1e70] sm:$0xf0]  ;;  %v13892_v7 = vld [vmem:[%s14469_s29 + $0x1f64] sm:$0xf]  ;;  %v12555_v14 = vor.u32 %v13828_v63, %v12552_v3 }
 0x258   : > { %v12808_v0 = vld [vmem:[%s14469_s29 + $0x1f70] sm:$0xf0]  ;;  %7488 = vmatpush.bf16.msrb.mxu0 %v12443_v1  ;;  %v12683_v17 = vor.u32 %v13860_v5, %v12680_v23  ;;  %v13792_v13 = vld [vmem:[%s14469_s29 + $0x1c44] sm:$0xf]  ;;  %v7249_v1 = vpop.f32.mrf.mxu1 }
 0x259   : > { %7501 = vmatpush.bf16.msrb.mxu1 %v12571_v58  ;;  %v12408_v19 = vld [vmem:[%s14469_s29 + $0x1c50] sm:$0xf0]  ;;  %v13824_v21 = vld [vmem:[%s14469_s29 + $0x1d44] sm:$0xf]  ;;  %v12811_v24 = vor.u32 %v13892_v7, %v12808_v0  ;;  %v12951_v1 = vld [vmem:[%s14469_s29 + $0x1f4] sm:$0xf0] }
 0x25a   : > { %7514 = vmatpush.bf16.msrb.mxu2 %v12699_v27  ;;  %v12536_v39 = vld [vmem:[%s14469_s29 + $0x1d50] sm:$0xf0]  ;;  %v13856_v61 = vld [vmem:[%s14469_s29 + $0x1e44] sm:$0xf]  ;;  %v12411_v53 = vor.u32 %v13792_v13, %v12408_v19  ;;  %v7262_v49 = vpop.f32.mrf.mxu2 }
 0x25b   : > { %7527 = vmatpush.bf16.msrb.mxu3 %v12827_v2  ;;  %v12664_v44 = vld [vmem:[%s14469_s29 + $0x1e50] sm:$0xf0]  ;;  %v13888_v15 = vld [vmem:[%s14469_s29 + $0x1f44] sm:$0xf]  ;;  %v12539_v58 = vor.u32 %v13824_v21, %v12536_v39  ;;  %v12911_v49 = vld [vmem:[%s14469_s29 + $0xb4] sm:$0xf0] }
 0x25c   : > { %v12792_v52 = vld [vmem:[%s14469_s29 + $0x1f50] sm:$0xf0]  ;;  %7489 = vmatpush.bf16.msrb.mxu0 %v12427_v9  ;;  %v12667_v27 = vor.u32 %v13856_v61, %v12664_v44  ;;  %v13788_v6 = vld [vmem:[%s14469_s29 + $0x1c24] sm:$0xf]  ;;  %v7275_v40 = vpop.f32.mrf.mxu3 }
 0x25d   : > { %7502 = vmatpush.bf16.msrb.mxu1 %v12555_v14  ;;  %v12392_v57 = vld [vmem:[%s14469_s29 + $0x1c30] sm:$0xf0]  ;;  %v13820_v63 = vld [vmem:[%s14469_s29 + $0x1d24] sm:$0xf]  ;;  %v12795_v2 = vor.u32 %v13888_v15, %v12792_v52  ;;  %v12919_v15 = vld [vmem:[%s14469_s29 + $0xf4] sm:$0xf0] }
 0x25e   : > { %7515 = vmatpush.bf16.msrb.mxu2 %v12683_v17  ;;  %v12520_v60 = vld [vmem:[%s14469_s29 + $0x1d30] sm:$0xf0]  ;;  %v13852_v3 = vld [vmem:[%s14469_s29 + $0x1e24] sm:$0xf]  ;;  %v12395_v0 = vor.u32 %v13788_v6, %v12392_v57  ;;  %v9038_v52 = vld [vmem:[%s14469_s29 + $0x1e8] sm:$0xf] }
 0x25f   : > { %7528 = vmatpush.bf16.msrb.mxu3 %v12811_v24  ;;  %v12648_v5 = vld [vmem:[%s14469_s29 + $0x1e30] sm:$0xf0]  ;;  %v13884_v23 = vld [vmem:[%s14469_s29 + $0x1f24] sm:$0xf]  ;;  %v12523_v17 = vor.u32 %v13820_v63, %v12520_v60  ;;  %v9294_v63 = vld [vmem:[%s14469_s29 + $0x3e8] sm:$0xf] }
 0x260   : > { %v12776_v7 = vld [vmem:[%s14469_s29 + $0x1f30] sm:$0xf0]  ;;  %7490 = vmatpush.bf16.msrb.mxu0 %v12411_v53  ;;  %v13784_v9 = vld [vmem:[%s14469_s29 + $0x1c04] sm:$0xf]  ;;  %v12651_v13 = vor.u32 %v13852_v3, %v12648_v5  ;;  %v8911_v3 = vor.u32 %v12919_v15, %v8910_v59  ;;  %v9039_v5 = vor.u32 %v12951_v1, %v9038_v52  ;;  %v9006_v59 = vld [vmem:[%s14469_s29 + $0x1a8] sm:$0xf] }
 0x261   : > { %v12376_v14 = vld [vmem:[%s14469_s29 + $0x1c10] sm:$0xf0]  ;;  %7503 = vmatpush.bf16.msrb.mxu1 %v12539_v58  ;;  %v13816_v19 = vld [vmem:[%s14469_s29 + $0x1d04] sm:$0xf]  ;;  %v12779_v34 = vor.u32 %v13884_v23, %v12776_v7  ;;  %v9166_v58 = vld [vmem:[%s14469_s29 + $0x2e8] sm:$0xf] }
 0x262   : > { %7516 = vmatpush.bf16.msrb.mxu2 %v12667_v27  ;;  %v12504_v21 = vld [vmem:[%s14469_s29 + $0x1d10] sm:$0xf0]  ;;  %v13848_v24 = vld [vmem:[%s14469_s29 + $0x1e04] sm:$0xf]  ;;  %v12379_v53 = vor.u32 %v13784_v9, %v12376_v14  ;;  %v12983_v27 = vld [vmem:[%s14469_s29 + $0x2f4] sm:$0xf0] }
 0x263   : > { %7529 = vmatpush.bf16.msrb.mxu3 %v12795_v2  ;;  %v12632_v39 = vld [vmem:[%s14469_s29 + $0x1e10] sm:$0xf0]  ;;  %v13880_v61 = vld [vmem:[%s14469_s29 + $0x1f04] sm:$0xf]  ;;  %v12507_v6 = vor.u32 %v13816_v19, %v12504_v21  ;;  %v13015_v2 = vld [vmem:[%s14469_s29 + $0x3f4] sm:$0xf0]  ;;  %v9167_v23 = vor.u32 %v12983_v27, %v9166_v58 }
 0x264   : > { %v12760_v44 = vld [vmem:[%s14469_s29 + $0x1f10] sm:$0xf0]  ;;  %7491 = vmatpush.bf16.msrb.mxu0 %v12395_v0  ;;  %v12635_v57 = vor.u32 %v13848_v24, %v12632_v39  ;;  %v8894_v7 = vld [vmem:[%s14469_s29 + $0xc8] sm:$0xf]  ;;  %v12915_v0 = vld [vmem:[%s14469_s29 + $0xd4] sm:$0xf0]  ;;  %v9295_v14 = vor.u32 %v13015_v2, %v9294_v63 }
 0x265   : > { %7504 = vmatpush.bf16.msrb.mxu1 %v12523_v17  ;;  %v12763_v60 = vor.u32 %v13880_v61, %v12760_v44  ;;  %v9022_v9 = vld [vmem:[%s14469_s29 + $0x1c8] sm:$0xf]  ;;  %v12947_v17 = vld [vmem:[%s14469_s29 + $0x1d4] sm:$0xf0] }
 0x266   : > { %7517 = vmatpush.bf16.msrb.mxu2 %v12651_v13  ;;  %v9150_v13 = vld [vmem:[%s14469_s29 + $0x2c8] sm:$0xf]  ;;  %v12979_v19 = vld [vmem:[%s14469_s29 + $0x2d4] sm:$0xf0]  ;;  %v9023_v39 = vor.u32 %v12947_v17, %v9022_v9 }
 0x267   : > { %7530 = vmatpush.bf16.msrb.mxu3 %v12779_v34  ;;  %v9278_v21 = vld [vmem:[%s14469_s29 + $0x3c8] sm:$0xf]  ;;  %v13011_v24 = vld [vmem:[%s14469_s29 + $0x3d4] sm:$0xf0]  ;;  %v8895_v34 = vor.u32 %v12915_v0, %v8894_v7  ;;  %v9151_v61 = vor.u32 %v12979_v19, %v9150_v13 }
 0x268   : > { %7492 = vmatpush.bf16.msrb.mxu0 %v12379_v53  ;;  %v8878_v44 = vld [vmem:[%s14469_s29 + $0xa8] sm:$0xf]  ;;  %v9279_v15 = vor.u32 %v13011_v24, %v9278_v21  ;;  %v12943_v52 = vld [vmem:[%s14469_s29 + $0x1b4] sm:$0xf0]  ;;  %v7286_v0 = vpop.f32.mrf.mxu0 }
 0x269   : > { %7505 = vmatpush.bf16.msrb.mxu1 %v12507_v6  ;;  %v9134_v40 = vld [vmem:[%s14469_s29 + $0x2a8] sm:$0xf]  ;;  %v12975_v53 = vld [vmem:[%s14469_s29 + $0x2b4] sm:$0xf0]  ;;  %v8879_v27 = vor.u32 %v12911_v49, %v8878_v44  ;;  %v9007_v6 = vor.u32 %v12943_v52, %v9006_v59  ;;  %v7287_v17 = vadd.f32 %v7286_v0, %v15747_v54  ;;  %v7299_v19 = vpop.f32.mrf.mxu1 }
 0x26a   : > { %7518 = vmatpush.bf16.msrb.mxu2 %v12635_v57  ;;  %v9262_v1 = vld [vmem:[%s14469_s29 + $0x3a8] sm:$0xf]  ;;  %v13007_v58 = vld [vmem:[%s14469_s29 + $0x3b4] sm:$0xf0]  ;;  %v9135_v57 = vor.u32 %v12975_v53, %v9134_v40 }
 0x26b   : > { %7531 = vmatpush.bf16.msrb.mxu3 %v12763_v60  ;;  %7493 = vmatmul.bf16.vlgmr.msrb.gmra.mxu0 %v15201_v8  ;;  %v8862_v63 = vld [vmem:[%s14469_s29 + $0x88] sm:$0xf]  ;;  %v12907_v2 = vld [vmem:[%s14469_s29 + $0x94] sm:$0xf0]  ;;  %v7300_v49 = vadd.f32 %v7299_v19, %v7287_v17 }
 0x26c   : > { %7537 = vmatpush.bf16.msra.mxu0 %v8911_v3  ;;  %7506 = vmatmul.bf16.vlgmr.msrb.gmra.mxu1 %v15208_v50  ;;  %v8990_v60 = vld [vmem:[%s14469_s29 + $0x188] sm:$0xf]  ;;  %v9263_v3 = vor.u32 %v13007_v58, %v9262_v1  ;;  %v12971_v7 = vld [vmem:[%s14469_s29 + $0x294] sm:$0xf0]  ;;  %v8863_v13 = vor.u32 %v12907_v2, %v8862_v63 }
 0x26d   : > { %7550 = vmatpush.bf16.msra.mxu1 %v9039_v5  ;;  %7519 = vmatmul.bf16.vlgmr.msrb.gmra.mxu2 %v15206_v11  ;;  %v12939_v5 = vld [vmem:[%s14469_s29 + $0x194] sm:$0xf0]  ;;  %v9246_v9 = vld [vmem:[%s14469_s29 + $0x388] sm:$0xf] }
 0x26e   : > { %7563 = vmatpush.bf16.msra.mxu2 %v9167_v23  ;;  %7532 = vmatmul.bf16.vlgmr.msrb.gmra.mxu3 %v15212_v12  ;;  %v9118_v23 = vld [vmem:[%s14469_s29 + $0x288] sm:$0xf]  ;;  %v8991_v21 = vor.u32 %v12939_v5, %v8990_v60  ;;  %v12935_v59 = vld [vmem:[%s14469_s29 + $0x174] sm:$0xf0] }
 0x26f   : > { %7576 = vmatpush.bf16.msra.mxu3 %v9295_v14  ;;  %v13003_v14 = vld [vmem:[%s14469_s29 + $0x394] sm:$0xf0]  ;;  %v9119_v24 = vor.u32 %v12971_v7, %v9118_v23  ;;  %v9230_v52 = vld [vmem:[%s14469_s29 + $0x368] sm:$0xf] }
 0x270   : > { %7538 = vmatpush.bf16.msra.mxu0 %v8895_v34  ;;  %v8846_v34 = vld [vmem:[%s14469_s29 + $0x68] sm:$0xf]  ;;  %v9247_v44 = vor.u32 %v13003_v14, %v9246_v9  ;;  %v12967_v54 = vld [vmem:[%s14469_s29 + $0x274] sm:$0xf0]  ;;  %v7312_v2 = vpop.f32.mrf.mxu2  ;;  %v7288_v14 = vpop.f32.mrf.mxu0 }
 0x271   : > { %7551 = vmatpush.bf16.msra.mxu1 %v9023_v39  ;;  %v12903_v39 = vld [vmem:[%s14469_s29 + $0x74] sm:$0xf0]  ;;  %v7313_v23 = vadd.f32 %v7312_v2, %v7300_v49  ;;  %v7325_v7 = vpop.f32.mrf.mxu3  ;;  %v9214_v0 = vld [vmem:[%s14469_s29 + $0x348] sm:$0xf] }
 0x272   : > { %7564 = vmatpush.bf16.msra.mxu2 %v9151_v61  ;;  %v8974_v61 = vld [vmem:[%s14469_s29 + $0x168] sm:$0xf]  ;;  %v12999_v40 = vld [vmem:[%s14469_s29 + $0x374] sm:$0xf0]  ;;  %v8847_v53 = vor.u32 %v12903_v39, %v8846_v34 }
 0x273   : > { %7577 = vmatpush.bf16.msra.mxu3 %v9279_v15  ;;  %v9102_v15 = vld [vmem:[%s14469_s29 + $0x268] sm:$0xf]  ;;  %v8975_v1 = vor.u32 %v12935_v59, %v8974_v61  ;;  %v9231_v63 = vor.u32 %v12999_v40, %v9230_v52  ;;  %v12931_v60 = vld [vmem:[%s14469_s29 + $0x154] sm:$0xf0]  ;;  %v15818_v19 = vadd.f32 %v7325_v7, %v7313_v23 }
 0x274   : > { %7539 = vmatpush.bf16.msra.mxu0 %v8879_v27  ;;  %v9103_v58 = vor.u32 %v12967_v54, %v9102_v15  ;;  %v8830_v27 = vld [vmem:[%s14469_s29 + $0x48] sm:$0xf]  ;;  %v12963_v5 = vld [vmem:[%s14469_s29 + $0x254] sm:$0xf0] }
 0x275   : > { %7552 = vmatpush.bf16.msra.mxu1 %v9007_v6  ;;  %v12899_v6 = vld [vmem:[%s14469_s29 + $0x54] sm:$0xf0]  ;;  %v8814_v34 = vld [vmem:[%s14469_s29 + $0x28] sm:$0xf] }
 0x276   : > { %7565 = vmatpush.bf16.msra.mxu2 %v9135_v57  ;;  %v8958_v57 = vld [vmem:[%s14469_s29 + $0x148] sm:$0xf]  ;;  %v12995_v9 = vld [vmem:[%s14469_s29 + $0x354] sm:$0xf0]  ;;  %v8831_v17 = vor.u32 %v12899_v6, %v8830_v27 }
 0x277   : > { %7578 = vmatpush.bf16.msra.mxu3 %v9263_v3  ;;  %v9086_v3 = vld [vmem:[%s14469_s29 + $0x248] sm:$0xf]  ;;  %v12895_v39 = vld [vmem:[%s14469_s29 + $0x34] sm:$0xf0] }
 0x278   : > { %7540 = vmatpush.bf16.msra.mxu0 %v8863_v13  ;;  %v7301_v13 = vpop.f32.mrf.mxu1  ;;  %v8942_v61 = vld [vmem:[%s14469_s29 + $0x128] sm:$0xf]  ;;  %v12927_v49 = vld [vmem:[%s14469_s29 + $0x134] sm:$0xf0]  ;;  %v8815_v40 = vor.u32 %v12895_v39, %v8814_v34  ;;  %v7314_v23 = vpop.f32.mrf.mxu2 }
 0x279   : > { %7553 = vmatpush.bf16.msra.mxu1 %v8991_v21  ;;  %v8959_v21 = vor.u32 %v12931_v60, %v8958_v57  ;;  %v9070_v59 = vld [vmem:[%s14469_s29 + $0x228] sm:$0xf]  ;;  %v12959_v15 = vld [vmem:[%s14469_s29 + $0x234] sm:$0xf0]  ;;  %v7327_v14 = vpop.f32.mrf.mxu3 }
 0x27a   : > { %7566 = vmatpush.bf16.msra.mxu2 %v9119_v24  ;;  %v9087_v24 = vor.u32 %v12963_v5, %v9086_v3  ;;  %v9198_v54 = vld [vmem:[%s14469_s29 + $0x328] sm:$0xf]  ;;  %v12991_v52 = vld [vmem:[%s14469_s29 + $0x334] sm:$0xf0]  ;;  %v9071_v27 = vor.u32 %v12959_v15, %v9070_v59 }
 0x27b   : > { %7579 = vmatpush.bf16.msra.mxu3 %v9247_v44  ;;  %v9215_v44 = vor.u32 %v12995_v9, %v9214_v0  ;;  %v8926_v6 = vld [vmem:[%s14469_s29 + $0x108] sm:$0xf]  ;;  %v12923_v57 = vld [vmem:[%s14469_s29 + $0x114] sm:$0xf0]  ;;  %v9199_v2 = vor.u32 %v12991_v52, %v9198_v54 }
 0x27c   : > { %7541 = vmatpush.bf16.msra.mxu0 %v8847_v53  ;;  %v8798_v53 = vld [vmem:[%s14469_s29 + $0x8] sm:$0xf]  ;;  %v12955_v60 = vld [vmem:[%s14469_s29 + $0x214] sm:$0xf0]  ;;  %v8927_v34 = vor.u32 %v12923_v57, %v8926_v6 }
 0x27d   : > { %7554 = vmatpush.bf16.msra.mxu1 %v8975_v1  ;;  %v12891_v1 = vld [vmem:[%s14469_s29 + $0x14] sm:$0xf0]  ;;  %v9182_v3 = vld [vmem:[%s14469_s29 + $0x308] sm:$0xf] }
 0x27e   : > { %7567 = vmatpush.bf16.msra.mxu2 %v9103_v58  ;;  %v8943_v58 = vor.u32 %v12927_v49, %v8942_v61  ;;  %v12987_v5 = vld [vmem:[%s14469_s29 + $0x314] sm:$0xf0]  ;;  %v9422_v7 = vld [vmem:[%s14469_s29 + $0x4e8] sm:$0xf] }
 0x27f   : > { %7580 = vmatpush.bf16.msra.mxu3 %v9231_v63  ;;  %v9054_v63 = vld [vmem:[%s14469_s29 + $0x208] sm:$0xf]  ;;  %v13047_v0 = vld [vmem:[%s14469_s29 + $0x4f4] sm:$0xf0]  ;;  %v9183_v49 = vor.u32 %v12987_v5, %v9182_v3 }
 0x280   : > { %7542 = vmatpush.bf16.msra.mxu0 %v8831_v17  ;;  %v9550_v9 = vld [vmem:[%s14469_s29 + $0x5e8] sm:$0xf]  ;;  %v8799_v17 = vor.u32 %v12891_v1, %v8798_v53  ;;  %v13079_v13 = vld [vmem:[%s14469_s29 + $0x5f4] sm:$0xf0]  ;;  %v9055_v39 = vor.u32 %v12955_v60, %v9054_v63  ;;  %v9423_v59 = vor.u32 %v13047_v0, %v9422_v7 }
 0x281   : > { %7555 = vmatpush.bf16.msra.mxu1 %v8959_v21  ;;  %v9678_v21 = vld [vmem:[%s14469_s29 + $0x6e8] sm:$0xf]  ;;  %v9551_v15 = vor.u32 %v13079_v13, %v9550_v9  ;;  %v13107_v6 = vld [vmem:[%s14469_s29 + $0x6d4] sm:$0xf0] }
 0x282   : > { %7568 = vmatpush.bf16.msra.mxu2 %v9087_v24  ;;  %v13111_v24 = vld [vmem:[%s14469_s29 + $0x6f4] sm:$0xf0]  ;;  %v9806_v61 = vld [vmem:[%s14469_s29 + $0x7e8] sm:$0xf] }
 0x283   : > { %7581 = vmatpush.bf16.msra.mxu3 %v9215_v44  ;;  %v13143_v44 = vld [vmem:[%s14469_s29 + $0x7f4] sm:$0xf0]  ;;  %v9679_v54 = vor.u32 %v13111_v24, %v9678_v21  ;;  %v9406_v52 = vld [vmem:[%s14469_s29 + $0x4c8] sm:$0xf] }
 0x284   : > { %7543 = vmatpush.bf16.msra.mxu0 %v8815_v40  ;;  %v13043_v40 = vld [vmem:[%s14469_s29 + $0x4d4] sm:$0xf0]  ;;  %v9534_v53 = vld [vmem:[%s14469_s29 + $0x5c8] sm:$0xf]  ;;  %v9807_v1 = vor.u32 %v13143_v44, %v9806_v61 }
 0x285   : > { %7556 = vmatpush.bf16.msra.mxu1 %v8943_v58  ;;  %v13075_v58 = vld [vmem:[%s14469_s29 + $0x5d4] sm:$0xf0]  ;;  %v9790_v57 = vld [vmem:[%s14469_s29 + $0x7c8] sm:$0xf] }
 0x286   : > { %7569 = vmatpush.bf16.msra.mxu2 %v9071_v27  ;;  %v9662_v27 = vld [vmem:[%s14469_s29 + $0x6c8] sm:$0xf]  ;;  %v13139_v63 = vld [vmem:[%s14469_s29 + $0x7d4] sm:$0xf0]  ;;  %v9535_v60 = vor.u32 %v13075_v58, %v9534_v53 }
 0x287   : > { %7582 = vmatpush.bf16.msra.mxu3 %v9199_v2  ;;  %v9407_v2 = vor.u32 %v13043_v40, %v9406_v52  ;;  %v9663_v3 = vor.u32 %v13107_v6, %v9662_v27  ;;  %v9390_v5 = vld [vmem:[%s14469_s29 + $0x4a8] sm:$0xf]  ;;  %v13039_v23 = vld [vmem:[%s14469_s29 + $0x4b4] sm:$0xf0]  ;;  %v9791_v0 = vor.u32 %v13139_v63, %v9790_v57 }
 0x288   : > { %7544 = vmatpush.bf16.msra.mxu0 %v8799_v17  ;;  %v9518_v7 = vld [vmem:[%s14469_s29 + $0x5a8] sm:$0xf]  ;;  %v13071_v9 = vld [vmem:[%s14469_s29 + $0x5b4] sm:$0xf0]  ;;  %v9391_v24 = vor.u32 %v13039_v23, %v9390_v5  ;;  %v7338_v40 = vpop.f32.mrf.mxu0 }
 0x289   : > { %7557 = vmatpush.bf16.msra.mxu1 %v8927_v34  ;;  %v9646_v14 = vld [vmem:[%s14469_s29 + $0x6a8] sm:$0xf]  ;;  %v13103_v17 = vld [vmem:[%s14469_s29 + $0x6b4] sm:$0xf0]  ;;  %v9519_v34 = vor.u32 %v13071_v9, %v9518_v7  ;;  %v7339_v58 = vadd.f32 %v7338_v40, %v15818_v19  ;;  %v7351_v6 = vpop.f32.mrf.mxu1 }
 0x28a   : > { %7570 = vmatpush.bf16.msra.mxu2 %v9055_v39  ;;  %v9774_v13 = vld [vmem:[%s14469_s29 + $0x7a8] sm:$0xf]  ;;  %v13135_v21 = vld [vmem:[%s14469_s29 + $0x7b4] sm:$0xf0]  ;;  %v9647_v39 = vor.u32 %v13103_v17, %v9646_v14 }
 0x28b   : > { %7583 = vmatpush.bf16.msra.mxu3 %v9183_v49  ;;  %7545 = vmatmul.bf16.vlgmr.msra.gmra.mxu0 %v14625_v45  ;;  %v9374_v61 = vld [vmem:[%s14469_s29 + $0x488] sm:$0xf]  ;;  %v13035_v44 = vld [vmem:[%s14469_s29 + $0x494] sm:$0xf0]  ;;  %v7352_v23 = vadd.f32 %v7351_v6, %v7339_v58 }
 0x28c   : > { %7589 = vmatpush.bf16.msrb.mxu0 %v9423_v59  ;;  %7558 = vmatmul.bf16.vlgmr.msra.gmra.mxu1 %v14627_v46  ;;  %v9502_v49 = vld [vmem:[%s14469_s29 + $0x588] sm:$0xf]  ;;  %v9775_v59 = vor.u32 %v13135_v21, %v9774_v13  ;;  %v13099_v52 = vld [vmem:[%s14469_s29 + $0x694] sm:$0xf0]  ;;  %v9375_v27 = vor.u32 %v13035_v44, %v9374_v61 }
 0x28d   : > { %7602 = vmatpush.bf16.msrb.mxu1 %v9551_v15  ;;  %7571 = vmatmul.bf16.vlgmr.msra.gmra.mxu2 %v14612_v29  ;;  %v13067_v15 = vld [vmem:[%s14469_s29 + $0x594] sm:$0xf0]  ;;  %v9758_v53 = vld [vmem:[%s14469_s29 + $0x788] sm:$0xf] }
 0x28e   : > { %7615 = vmatpush.bf16.msrb.mxu2 %v9679_v54  ;;  %7584 = vmatmul.bf16.vlgmr.msra.gmra.mxu3 %v14616_v32  ;;  %v9630_v54 = vld [vmem:[%s14469_s29 + $0x688] sm:$0xf]  ;;  %v9503_v57 = vor.u32 %v13067_v15, %v9502_v49  ;;  %v13063_v7 = vld [vmem:[%s14469_s29 + $0x574] sm:$0xf0] }
 0x28f   : > { %7628 = vmatpush.bf16.msrb.mxu3 %v9807_v1  ;;  %v13131_v1 = vld [vmem:[%s14469_s29 + $0x794] sm:$0xf0]  ;;  %v9631_v63 = vor.u32 %v13099_v52, %v9630_v54  ;;  %v9742_v9 = vld [vmem:[%s14469_s29 + $0x768] sm:$0xf] }
 0x290   : > { %7590 = vmatpush.bf16.msrb.mxu0 %v9407_v2  ;;  %v9358_v2 = vld [vmem:[%s14469_s29 + $0x468] sm:$0xf]  ;;  %v9759_v5 = vor.u32 %v13131_v1, %v9758_v53  ;;  %v13095_v19 = vld [vmem:[%s14469_s29 + $0x674] sm:$0xf0]  ;;  %v7364_v44 = vpop.f32.mrf.mxu2  ;;  %v7340_v1 = vpop.f32.mrf.mxu0 }
 0x291   : > { %7603 = vmatpush.bf16.msrb.mxu1 %v9535_v60  ;;  %v13031_v60 = vld [vmem:[%s14469_s29 + $0x474] sm:$0xf0]  ;;  %v7365_v54 = vadd.f32 %v7364_v44, %v7352_v23  ;;  %v7377_v52 = vpop.f32.mrf.mxu3  ;;  %v9726_v40 = vld [vmem:[%s14469_s29 + $0x748] sm:$0xf] }
 0x292   : > { %7616 = vmatpush.bf16.msrb.mxu2 %v9663_v3  ;;  %v9486_v3 = vld [vmem:[%s14469_s29 + $0x568] sm:$0xf]  ;;  %v13127_v14 = vld [vmem:[%s14469_s29 + $0x774] sm:$0xf0]  ;;  %v9359_v17 = vor.u32 %v13031_v60, %v9358_v2 }
 0x293   : > { %7629 = vmatpush.bf16.msrb.mxu3 %v9791_v0  ;;  %v9614_v0 = vld [vmem:[%s14469_s29 + $0x668] sm:$0xf]  ;;  %v9487_v13 = vor.u32 %v13063_v7, %v9486_v3  ;;  %v9743_v61 = vor.u32 %v13127_v14, %v9742_v9  ;;  %v13059_v49 = vld [vmem:[%s14469_s29 + $0x554] sm:$0xf0]  ;;  %v15889_v6 = vadd.f32 %v7377_v52, %v7365_v54 }
 0x294   : > { %7591 = vmatpush.bf16.msrb.mxu0 %v9391_v24  ;;  %v9615_v21 = vor.u32 %v13095_v19, %v9614_v0  ;;  %v9342_v24 = vld [vmem:[%s14469_s29 + $0x448] sm:$0xf]  ;;  %v13091_v15 = vld [vmem:[%s14469_s29 + $0x654] sm:$0xf0] }
 0x295   : > { %7604 = vmatpush.bf16.msrb.mxu1 %v9519_v34  ;;  %v13027_v34 = vld [vmem:[%s14469_s29 + $0x454] sm:$0xf0]  ;;  %v9326_v2 = vld [vmem:[%s14469_s29 + $0x428] sm:$0xf] }
 0x296   : > { %7617 = vmatpush.bf16.msrb.mxu2 %v9647_v39  ;;  %v9470_v39 = vld [vmem:[%s14469_s29 + $0x548] sm:$0xf]  ;;  %v13123_v53 = vld [vmem:[%s14469_s29 + $0x754] sm:$0xf0]  ;;  %v9343_v58 = vor.u32 %v13027_v34, %v9342_v24 }
 0x297   : > { %7630 = vmatpush.bf16.msrb.mxu3 %v9775_v59  ;;  %v9598_v59 = vld [vmem:[%s14469_s29 + $0x648] sm:$0xf]  ;;  %v13023_v60 = vld [vmem:[%s14469_s29 + $0x434] sm:$0xf0] }
 0x298   : > { %7592 = vmatpush.bf16.msrb.mxu0 %v9375_v27  ;;  %v7353_v27 = vpop.f32.mrf.mxu1  ;;  %v9454_v3 = vld [vmem:[%s14469_s29 + $0x528] sm:$0xf]  ;;  %v13055_v23 = vld [vmem:[%s14469_s29 + $0x534] sm:$0xf0]  ;;  %v9327_v14 = vor.u32 %v13023_v60, %v9326_v2  ;;  %v7366_v54 = vpop.f32.mrf.mxu2 }
 0x299   : > { %7605 = vmatpush.bf16.msrb.mxu1 %v9503_v57  ;;  %v9471_v57 = vor.u32 %v13059_v49, %v9470_v39  ;;  %v9582_v7 = vld [vmem:[%s14469_s29 + $0x628] sm:$0xf]  ;;  %v13087_v0 = vld [vmem:[%s14469_s29 + $0x634] sm:$0xf0]  ;;  %v7379_v1 = vpop.f32.mrf.mxu3 }
 0x29a   : > { %7618 = vmatpush.bf16.msrb.mxu2 %v9631_v63  ;;  %v9599_v63 = vor.u32 %v13091_v15, %v9598_v59  ;;  %v9710_v19 = vld [vmem:[%s14469_s29 + $0x728] sm:$0xf]  ;;  %v13119_v9 = vld [vmem:[%s14469_s29 + $0x734] sm:$0xf0]  ;;  %v9583_v24 = vor.u32 %v13087_v0, %v9582_v7 }
 0x29b   : > { %7631 = vmatpush.bf16.msrb.mxu3 %v9759_v5  ;;  %v9727_v5 = vor.u32 %v13123_v53, %v9726_v40  ;;  %v9438_v34 = vld [vmem:[%s14469_s29 + $0x508] sm:$0xf]  ;;  %v13051_v39 = vld [vmem:[%s14469_s29 + $0x514] sm:$0xf0]  ;;  %v9711_v44 = vor.u32 %v13119_v9, %v9710_v19 }
 0x29c   : > { %7593 = vmatpush.bf16.msrb.mxu0 %v9359_v17  ;;  %v9310_v17 = vld [vmem:[%s14469_s29 + $0x408] sm:$0xf]  ;;  %v13083_v49 = vld [vmem:[%s14469_s29 + $0x614] sm:$0xf0]  ;;  %v9439_v2 = vor.u32 %v13051_v39, %v9438_v34 }
 0x29d   : > { %7606 = vmatpush.bf16.msrb.mxu1 %v9487_v13  ;;  %v13019_v13 = vld [vmem:[%s14469_s29 + $0x414] sm:$0xf0]  ;;  %v9694_v59 = vld [vmem:[%s14469_s29 + $0x708] sm:$0xf] }
 0x29e   : > { %7619 = vmatpush.bf16.msrb.mxu2 %v9615_v21  ;;  %v9455_v21 = vor.u32 %v13055_v23, %v9454_v3  ;;  %v13115_v15 = vld [vmem:[%s14469_s29 + $0x714] sm:$0xf0]  ;;  %v9934_v52 = vld [vmem:[%s14469_s29 + $0x8e8] sm:$0xf] }
 0x29f   : > { %7632 = vmatpush.bf16.msrb.mxu3 %v9743_v61  ;;  %v9566_v61 = vld [vmem:[%s14469_s29 + $0x608] sm:$0xf]  ;;  %v13175_v40 = vld [vmem:[%s14469_s29 + $0x8f4] sm:$0xf0]  ;;  %v9695_v23 = vor.u32 %v13115_v15, %v9694_v59 }
 0x2a0   : > { %7594 = vmatpush.bf16.msrb.mxu0 %v9343_v58  ;;  %v10062_v53 = vld [vmem:[%s14469_s29 + $0x9e8] sm:$0xf]  ;;  %v9311_v58 = vor.u32 %v13019_v13, %v9310_v17  ;;  %v13207_v27 = vld [vmem:[%s14469_s29 + $0x9f4] sm:$0xf0]  ;;  %v9567_v60 = vor.u32 %v13083_v49, %v9566_v61  ;;  %v9935_v7 = vor.u32 %v13175_v40, %v9934_v52 }
 0x2a1   : > { %7607 = vmatpush.bf16.msrb.mxu1 %v9471_v57  ;;  %v10190_v57 = vld [vmem:[%s14469_s29 + $0xae8] sm:$0xf]  ;;  %v10063_v0 = vor.u32 %v13207_v27, %v10062_v53  ;;  %v13235_v34 = vld [vmem:[%s14469_s29 + $0xad4] sm:$0xf0] }
 0x2a2   : > { %7620 = vmatpush.bf16.msrb.mxu2 %v9599_v63  ;;  %v13239_v63 = vld [vmem:[%s14469_s29 + $0xaf4] sm:$0xf0]  ;;  %v10318_v3 = vld [vmem:[%s14469_s29 + $0xbe8] sm:$0xf] }
 0x2a3   : > { %7633 = vmatpush.bf16.msrb.mxu3 %v9727_v5  ;;  %v13271_v5 = vld [vmem:[%s14469_s29 + $0xbf4] sm:$0xf0]  ;;  %v10191_v19 = vor.u32 %v13239_v63, %v10190_v57  ;;  %v9918_v9 = vld [vmem:[%s14469_s29 + $0x8c8] sm:$0xf] }
 0x2a4   : > { %7595 = vmatpush.bf16.msrb.mxu0 %v9327_v14  ;;  %v13171_v14 = vld [vmem:[%s14469_s29 + $0x8d4] sm:$0xf0]  ;;  %v10046_v17 = vld [vmem:[%s14469_s29 + $0x9c8] sm:$0xf]  ;;  %v10319_v13 = vor.u32 %v13271_v5, %v10318_v3 }
 0x2a5   : > { %7608 = vmatpush.bf16.msrb.mxu1 %v9455_v21  ;;  %v13203_v21 = vld [vmem:[%s14469_s29 + $0x9d4] sm:$0xf0]  ;;  %v10302_v39 = vld [vmem:[%s14469_s29 + $0xbc8] sm:$0xf] }
 0x2a6   : > { %7621 = vmatpush.bf16.msrb.mxu2 %v9583_v24  ;;  %v10174_v24 = vld [vmem:[%s14469_s29 + $0xac8] sm:$0xf]  ;;  %v13267_v61 = vld [vmem:[%s14469_s29 + $0xbd4] sm:$0xf0]  ;;  %v10047_v49 = vor.u32 %v13203_v21, %v10046_v17 }
 0x2a7   : > { %7634 = vmatpush.bf16.msrb.mxu3 %v9711_v44  ;;  %v9919_v44 = vor.u32 %v13171_v14, %v9918_v9  ;;  %v10175_v59 = vor.u32 %v13235_v34, %v10174_v24  ;;  %v9902_v15 = vld [vmem:[%s14469_s29 + $0x8a8] sm:$0xf]  ;;  %v13167_v54 = vld [vmem:[%s14469_s29 + $0x8b4] sm:$0xf0]  ;;  %v10303_v40 = vor.u32 %v13267_v61, %v10302_v39 }
 0x2a8   : > { %7596 = vmatpush.bf16.msrb.mxu0 %v9311_v58  ;;  %v10030_v52 = vld [vmem:[%s14469_s29 + $0x9a8] sm:$0xf]  ;;  %v13199_v53 = vld [vmem:[%s14469_s29 + $0x9b4] sm:$0xf0]  ;;  %v9903_v63 = vor.u32 %v13167_v54, %v9902_v15  ;;  %v15941_v14 = vpop.f32.mrf.mxu0 }
 0x2a9   : > { %7609 = vmatpush.bf16.msrb.mxu1 %v9439_v2  ;;  %v10158_v1 = vld [vmem:[%s14469_s29 + $0xaa8] sm:$0xf]  ;;  %v13231_v58 = vld [vmem:[%s14469_s29 + $0xab4] sm:$0xf0]  ;;  %v10031_v2 = vor.u32 %v13199_v53, %v10030_v52  ;;  %v15945_v24 = vpop.f32.mrf.mxu1 }
 0x2aa   : > { %7622 = vmatpush.bf16.msrb.mxu2 %v9567_v60  ;;  %v10286_v27 = vld [vmem:[%s14469_s29 + $0xba8] sm:$0xf]  ;;  %v13263_v57 = vld [vmem:[%s14469_s29 + $0xbb4] sm:$0xf0]  ;;  %v10159_v60 = vor.u32 %v13231_v58, %v10158_v1 }
 0x2ab   : > { %7635 = vmatpush.bf16.msrb.mxu3 %v9695_v23  ;;  %7597 = vmatmul.bf16.vlgmr.msrb.gmra.mxu0 %v14680_v55  ;;  %v9886_v3 = vld [vmem:[%s14469_s29 + $0x888] sm:$0xf]  ;;  %v13163_v5 = vld [vmem:[%s14469_s29 + $0x894] sm:$0xf0] }
 0x2ac   : > { %7641 = vmatpush.bf16.msra.mxu0 %v9935_v7  ;;  %7610 = vmatmul.bf16.vlgmr.msrb.gmra.mxu1 %v14674_v48  ;;  %v10014_v23 = vld [vmem:[%s14469_s29 + $0x988] sm:$0xf]  ;;  %v10287_v7 = vor.u32 %v13263_v57, %v10286_v27  ;;  %v13227_v9 = vld [vmem:[%s14469_s29 + $0xa94] sm:$0xf0]  ;;  %v9887_v21 = vor.u32 %v13163_v5, %v9886_v3 }
 0x2ad   : > { %7654 = vmatpush.bf16.msra.mxu1 %v10063_v0  ;;  %7623 = vmatmul.bf16.vlgmr.msrb.gmra.mxu2 %v14670_v41  ;;  %v13195_v0 = vld [vmem:[%s14469_s29 + $0x994] sm:$0xf0]  ;;  %v10270_v17 = vld [vmem:[%s14469_s29 + $0xb88] sm:$0xf] }
 0x2ae   : > { %7667 = vmatpush.bf16.msra.mxu2 %v10191_v19  ;;  %7636 = vmatmul.bf16.vlgmr.msrb.gmra.mxu3 %v14672_v43  ;;  %v10142_v19 = vld [vmem:[%s14469_s29 + $0xa88] sm:$0xf]  ;;  %v10015_v34 = vor.u32 %v13195_v0, %v10014_v23  ;;  %v13191_v15 = vld [vmem:[%s14469_s29 + $0x974] sm:$0xf0] }
 0x2af   : > { %7680 = vmatpush.bf16.msra.mxu3 %v10319_v13  ;;  %v13259_v13 = vld [vmem:[%s14469_s29 + $0xb94] sm:$0xf0]  ;;  %v10143_v39 = vor.u32 %v13227_v9, %v10142_v19  ;;  %v9870_v61 = vld [vmem:[%s14469_s29 + $0x868] sm:$0xf] }
 0x2b0   : > { %7642 = vmatpush.bf16.msra.mxu0 %v9919_v44  ;;  %v13159_v44 = vld [vmem:[%s14469_s29 + $0x874] sm:$0xf0]  ;;  %v10126_v54 = vld [vmem:[%s14469_s29 + $0xa68] sm:$0xf]  ;;  %v15958_v3 = vpop.f32.mrf.mxu2 }
 0x2b1   : > { %7655 = vmatpush.bf16.msra.mxu1 %v10047_v49  ;;  %v9998_v49 = vld [vmem:[%s14469_s29 + $0x968] sm:$0xf]  ;;  %v13223_v52 = vld [vmem:[%s14469_s29 + $0xa74] sm:$0xf0]  ;;  %v9871_v1 = vor.u32 %v13159_v44, %v9870_v61  ;;  %v15963_v0 = vpop.f32.mrf.mxu3 }
 0x2b2   : > { %7668 = vmatpush.bf16.msra.mxu2 %v10175_v59  ;;  %v10271_v59 = vor.u32 %v13259_v13, %v10270_v17  ;;  %v13255_v53 = vld [vmem:[%s14469_s29 + $0xb74] sm:$0xf0]  ;;  %v9999_v58 = vor.u32 %v13191_v15, %v9998_v49  ;;  %v10127_v27 = vor.u32 %v13223_v52, %v10126_v54  ;;  %v9854_v57 = vld [vmem:[%s14469_s29 + $0x848] sm:$0xf]  ;;  %v7392_v17 = vpop.f32.mrf.mxu0 }
 0x2b3   : > { %7681 = vmatpush.bf16.msra.mxu3 %v10303_v40  ;;  %v10254_v40 = vld [vmem:[%s14469_s29 + $0xb68] sm:$0xf]  ;;  %v13187_v5 = vld [vmem:[%s14469_s29 + $0x954] sm:$0xf0] }
 0x2b4   : > { %7643 = vmatpush.bf16.msra.mxu0 %v9903_v63  ;;  %v13155_v63 = vld [vmem:[%s14469_s29 + $0x854] sm:$0xf0]  ;;  %v10110_v23 = vld [vmem:[%s14469_s29 + $0xa48] sm:$0xf] }
 0x2b5   : > { %7656 = vmatpush.bf16.msra.mxu1 %v10031_v2  ;;  %v9982_v2 = vld [vmem:[%s14469_s29 + $0x948] sm:$0xf]  ;;  %v13251_v9 = vld [vmem:[%s14469_s29 + $0xb54] sm:$0xf0]  ;;  %v9855_v13 = vor.u32 %v13155_v63, %v9854_v57 }
 0x2b6   : > { %7669 = vmatpush.bf16.msra.mxu2 %v10159_v60  ;;  %v10255_v60 = vor.u32 %v13255_v53, %v10254_v40  ;;  %v10238_v19 = vld [vmem:[%s14469_s29 + $0xb48] sm:$0xf]  ;;  %v13151_v44 = vld [vmem:[%s14469_s29 + $0x834] sm:$0xf0] }
 0x2b7   : > { %7682 = vmatpush.bf16.msra.mxu3 %v10287_v7  ;;  %v13219_v7 = vld [vmem:[%s14469_s29 + $0xa54] sm:$0xf0]  ;;  %v9838_v61 = vld [vmem:[%s14469_s29 + $0x828] sm:$0xf] }
 0x2b8   : > { %7644 = vmatpush.bf16.msra.mxu0 %v9887_v21  ;;  %v7405_v21 = vpop.f32.mrf.mxu1  ;;  %v9966_v49 = vld [vmem:[%s14469_s29 + $0x928] sm:$0xf]  ;;  %v13183_v15 = vld [vmem:[%s14469_s29 + $0x934] sm:$0xf0]  ;;  %v7418_v17 = vpop.f32.mrf.mxu2 }
 0x2b9   : > { %7657 = vmatpush.bf16.msra.mxu1 %v10015_v34  ;;  %v9983_v34 = vor.u32 %v13187_v5, %v9982_v2  ;;  %v10094_v54 = vld [vmem:[%s14469_s29 + $0xa28] sm:$0xf]  ;;  %v13215_v52 = vld [vmem:[%s14469_s29 + $0xa34] sm:$0xf0]  ;;  %v9967_v57 = vor.u32 %v13183_v15, %v9966_v49 }
 0x2ba   : > { %7670 = vmatpush.bf16.msra.mxu2 %v10143_v39  ;;  %v10111_v39 = vor.u32 %v13219_v7, %v10110_v23  ;;  %v10222_v40 = vld [vmem:[%s14469_s29 + $0xb28] sm:$0xf]  ;;  %v13247_v53 = vld [vmem:[%s14469_s29 + $0xb34] sm:$0xf0]  ;;  %v10095_v63 = vor.u32 %v13215_v52, %v10094_v54 }
 0x2bb   : > { %7683 = vmatpush.bf16.msra.mxu3 %v10271_v59  ;;  %v10239_v59 = vor.u32 %v13251_v9, %v10238_v19  ;;  %v9950_v2 = vld [vmem:[%s14469_s29 + $0x908] sm:$0xf]  ;;  %v10223_v23 = vor.u32 %v13247_v53, %v10222_v40  ;;  %v13211_v7 = vld [vmem:[%s14469_s29 + $0xa14] sm:$0xf0] }
 0x2bc   : > { %7645 = vmatpush.bf16.msra.mxu0 %v9871_v1  ;;  %v9839_v1 = vor.u32 %v13151_v44, %v9838_v61  ;;  %v10078_v5 = vld [vmem:[%s14469_s29 + $0xa08] sm:$0xf]  ;;  %v13243_v9 = vld [vmem:[%s14469_s29 + $0xb14] sm:$0xf0] }
 0x2bd   : > { %7658 = vmatpush.bf16.msra.mxu1 %v9999_v58  ;;  %v9822_v58 = vld [vmem:[%s14469_s29 + $0x808] sm:$0xf]  ;;  %v13303_v21 = vld [vmem:[%s14469_s29 + $0xcf4] sm:$0xf0]  ;;  %v10079_v54 = vor.u32 %v13211_v7, %v10078_v5 }
 0x2be   : > { %7671 = vmatpush.bf16.msra.mxu2 %v10127_v27  ;;  %v13147_v27 = vld [vmem:[%s14469_s29 + $0x814] sm:$0xf0]  ;;  %v10206_v19 = vld [vmem:[%s14469_s29 + $0xb08] sm:$0xf] }
 0x2bf   : > { %7684 = vmatpush.bf16.msra.mxu3 %v10255_v60  ;;  %v13179_v60 = vld [vmem:[%s14469_s29 + $0x914] sm:$0xf0]  ;;  %v9823_v61 = vor.u32 %v13147_v27, %v9822_v58  ;;  %v10702_v49 = vld [vmem:[%s14469_s29 + $0xee8] sm:$0xf]  ;;  %v10207_v53 = vor.u32 %v13243_v9, %v10206_v19 }
 0x2c0   : > { %7646 = vmatpush.bf16.msra.mxu0 %v9855_v13  ;;  %v10446_v13 = vld [vmem:[%s14469_s29 + $0xce8] sm:$0xf]  ;;  %v13335_v44 = vld [vmem:[%s14469_s29 + $0xdf4] sm:$0xf0] }
 0x2c1   : > { %7659 = vmatpush.bf16.msra.mxu1 %v9983_v34  ;;  %v10574_v34 = vld [vmem:[%s14469_s29 + $0xde8] sm:$0xf]  ;;  %v13367_v15 = vld [vmem:[%s14469_s29 + $0xef4] sm:$0xf0] }
 0x2c2   : > { %7672 = vmatpush.bf16.msra.mxu2 %v10111_v39  ;;  %v7431_v39 = vpop.f32.mrf.mxu3  ;;  %v10830_v52 = vld [vmem:[%s14469_s29 + $0xfe8] sm:$0xf]  ;;  %v13399_v40 = vld [vmem:[%s14469_s29 + $0xff4] sm:$0xf0]  ;;  %v10575_v58 = vor.u32 %v13335_v44, %v10574_v34  ;;  %v10703_v27 = vor.u32 %v13367_v15, %v10702_v49 }
 0x2c3   : > { %7685 = vmatpush.bf16.msra.mxu3 %v10239_v59  ;;  %v9951_v59 = vor.u32 %v13179_v60, %v9950_v2  ;;  %v10430_v17 = vld [vmem:[%s14469_s29 + $0xcc8] sm:$0xf]  ;;  %v13299_v39 = vld [vmem:[%s14469_s29 + $0xcd4] sm:$0xf0] }
 0x2c4   : > { %7647 = vmatpush.bf16.msra.mxu0 %v9839_v1  ;;  %v10447_v1 = vor.u32 %v13303_v21, %v10446_v13  ;;  %v10558_v48 = vld [vmem:[%s14469_s29 + $0xdc8] sm:$0xf]  ;;  %v13363_v60 = vld [vmem:[%s14469_s29 + $0xed4] sm:$0xf0]  ;;  %v10431_v7 = vor.u32 %v13299_v39, %v10430_v17 }
 0x2c5   : > { %7660 = vmatpush.bf16.msra.mxu1 %v9967_v57  ;;  %v10831_v57 = vor.u32 %v13399_v40, %v10830_v52  ;;  %v10686_v2 = vld [vmem:[%s14469_s29 + $0xec8] sm:$0xf]  ;;  %v13295_v21 = vld [vmem:[%s14469_s29 + $0xcb4] sm:$0xf0] }
 0x2c6   : > { %7673 = vmatpush.bf16.msra.mxu2 %v10095_v63  ;;  %v13331_v63 = vld [vmem:[%s14469_s29 + $0xdd4] sm:$0xf0]  ;;  %v10814_v5 = vld [vmem:[%s14469_s29 + $0xfc8] sm:$0xf]  ;;  %v10687_v9 = vor.u32 %v13363_v60, %v10686_v2 }
 0x2c7   : > { %7686 = vmatpush.bf16.msra.mxu3 %v10223_v23  ;;  %v13395_v23 = vld [vmem:[%s14469_s29 + $0xfd4] sm:$0xf0]  ;;  %v10559_v19 = vor.u32 %v13331_v63, %v10558_v48  ;;  %v10414_v13 = vld [vmem:[%s14469_s29 + $0xca8] sm:$0xf] }
 0x2c8   : > { %7648 = vmatpush.bf16.msra.mxu0 %v9823_v61  ;;  %v10542_v34 = vld [vmem:[%s14469_s29 + $0xda8] sm:$0xf]  ;;  %v10815_v61 = vor.u32 %v13395_v23, %v10814_v5  ;;  %v13327_v44 = vld [vmem:[%s14469_s29 + $0xdb4] sm:$0xf0]  ;;  %v16017_v63 = vpop.f32.mrf.mxu0 }
 0x2c9   : > { %7661 = vmatpush.bf16.msra.mxu1 %v9951_v59  ;;  %v10670_v49 = vld [vmem:[%s14469_s29 + $0xea8] sm:$0xf]  ;;  %v13359_v15 = vld [vmem:[%s14469_s29 + $0xeb4] sm:$0xf0]  ;;  %v10543_v52 = vor.u32 %v13327_v44, %v10542_v34  ;;  %v16021_v23 = vpop.f32.mrf.mxu1 }
 0x2ca   : > { %7674 = vmatpush.bf16.msra.mxu2 %v10079_v54  ;;  %v10798_v48 = vld [vmem:[%s14469_s29 + $0xfa8] sm:$0xf]  ;;  %v13391_v59 = vld [vmem:[%s14469_s29 + $0xfb4] sm:$0xf0]  ;;  %v10415_v54 = vor.u32 %v13295_v21, %v10414_v13  ;;  %v10671_v40 = vor.u32 %v13359_v15, %v10670_v49 }
 0x2cb   : > { %7687 = vmatpush.bf16.msra.mxu3 %v10207_v53  ;;  %7649 = vmatmul.bf16.vlgmr.msra.gmra.mxu0 %v14753_v26  ;;  %v10398_v53 = vld [vmem:[%s14469_s29 + $0xc88] sm:$0xf]  ;;  %v13323_v17 = vld [vmem:[%s14469_s29 + $0xd94] sm:$0xf0] }
 0x2cc   : > { %7693 = vmatpush.bf16.msrb.mxu0 %v10447_v1  ;;  %7662 = vmatmul.bf16.vlgmr.msra.gmra.mxu1 %v14764_v33  ;;  %v13291_v1 = vld [vmem:[%s14469_s29 + $0xc94] sm:$0xf0]  ;;  %v10654_v39 = vld [vmem:[%s14469_s29 + $0xe88] sm:$0xf] }
 0x2cd   : > { %7706 = vmatpush.bf16.msrb.mxu1 %v10575_v58  ;;  %7675 = vmatmul.bf16.vlgmr.msra.gmra.mxu2 %v14760_v31  ;;  %v10526_v58 = vld [vmem:[%s14469_s29 + $0xd88] sm:$0xf]  ;;  %v13387_v60 = vld [vmem:[%s14469_s29 + $0xf94] sm:$0xf0]  ;;  %v10399_v5 = vor.u32 %v13291_v1, %v10398_v53 }
 0x2ce   : > { %7719 = vmatpush.bf16.msrb.mxu2 %v10703_v27  ;;  %7688 = vmatmul.bf16.vlgmr.msra.gmra.mxu3 %v14770_v37  ;;  %v10799_v27 = vor.u32 %v13391_v59, %v10798_v48  ;;  %v10782_v2 = vld [vmem:[%s14469_s29 + $0xf88] sm:$0xf]  ;;  %v13287_v13 = vld [vmem:[%s14469_s29 + $0xc74] sm:$0xf0] }
 0x2cf   : > { %7732 = vmatpush.bf16.msrb.mxu3 %v10831_v57  ;;  %v13355_v57 = vld [vmem:[%s14469_s29 + $0xe94] sm:$0xf0]  ;;  %v10510_v21 = vld [vmem:[%s14469_s29 + $0xd68] sm:$0xf]  ;;  %v10783_v34 = vor.u32 %v13387_v60, %v10782_v2  ;;  %v7391_v2 = vadd.f32 %v15941_v14, %v15889_v6 }
 0x2d0   : > { %7694 = vmatpush.bf16.msrb.mxu0 %v10431_v7  ;;  %v10527_v7 = vor.u32 %v13323_v17, %v10526_v58  ;;  %v10638_v44 = vld [vmem:[%s14469_s29 + $0xe68] sm:$0xf]  ;;  %v13351_v49 = vld [vmem:[%s14469_s29 + $0xe74] sm:$0xf0] }
 0x2d1   : > { %7707 = vmatpush.bf16.msrb.mxu1 %v10559_v19  ;;  %v10655_v19 = vor.u32 %v13355_v57, %v10654_v39  ;;  %v10766_v15 = vld [vmem:[%s14469_s29 + $0xf68] sm:$0xf]  ;;  %v13383_v48 = vld [vmem:[%s14469_s29 + $0xf74] sm:$0xf0]  ;;  %v16041_v60 = vpop.f32.mrf.mxu3 }
 0x2d2   : > { %7720 = vmatpush.bf16.msrb.mxu2 %v10687_v9  ;;  %v10382_v9 = vld [vmem:[%s14469_s29 + $0xc68] sm:$0xf]  ;;  %v13283_v53 = vld [vmem:[%s14469_s29 + $0xc54] sm:$0xf0]  ;;  %v10767_v58 = vor.u32 %v13383_v48, %v10766_v15 }
 0x2d3   : > { %7733 = vmatpush.bf16.msrb.mxu3 %v10815_v61  ;;  %v13319_v61 = vld [vmem:[%s14469_s29 + $0xd74] sm:$0xf0]  ;;  %v10383_v59 = vor.u32 %v13287_v13, %v10382_v9  ;;  %v10494_v1 = vld [vmem:[%s14469_s29 + $0xd48] sm:$0xf]  ;;  %v7457_v13 = vpop.f32.mrf.mxu1 }
 0x2d4   : > { %7695 = vmatpush.bf16.msrb.mxu0 %v10415_v54  ;;  %v10511_v54 = vor.u32 %v13319_v61, %v10510_v21  ;;  %v13315_v17 = vld [vmem:[%s14469_s29 + $0xd54] sm:$0xf0]  ;;  %v10622_v39 = vld [vmem:[%s14469_s29 + $0xe48] sm:$0xf] }
 0x2d5   : > { %7708 = vmatpush.bf16.msrb.mxu1 %v10543_v52  ;;  %v10639_v52 = vor.u32 %v13351_v49, %v10638_v44  ;;  %v13347_v57 = vld [vmem:[%s14469_s29 + $0xe54] sm:$0xf0]  ;;  %v10495_v21 = vor.u32 %v13315_v17, %v10494_v1  ;;  %v10350_v6 = vld [vmem:[%s14469_s29 + $0xc28] sm:$0xf] }
 0x2d6   : > { %7721 = vmatpush.bf16.msrb.mxu2 %v10671_v40  ;;  %v10366_v40 = vld [vmem:[%s14469_s29 + $0xc48] sm:$0xf]  ;;  %v13279_v14 = vld [vmem:[%s14469_s29 + $0xc34] sm:$0xf0] }
 0x2d7   : > { %7734 = vmatpush.bf16.msrb.mxu3 %v10799_v27  ;;  %v16034_v27 = vpop.f32.mrf.mxu2  ;;  %v10367_v9 = vor.u32 %v13283_v53, %v10366_v40  ;;  %v10478_v61 = vld [vmem:[%s14469_s29 + $0xd28] sm:$0xf]  ;;  %v13311_v49 = vld [vmem:[%s14469_s29 + $0xd34] sm:$0xf0] }
 0x2d8   : > { %7696 = vmatpush.bf16.msrb.mxu0 %v10399_v5  ;;  %v10750_v5 = vld [vmem:[%s14469_s29 + $0xf48] sm:$0xf]  ;;  %v13343_v48 = vld [vmem:[%s14469_s29 + $0xe34] sm:$0xf0]  ;;  %v10479_v17 = vor.u32 %v13311_v49, %v10478_v61 }
 0x2d9   : > { %7709 = vmatpush.bf16.msrb.mxu1 %v10527_v7  ;;  %v13379_v7 = vld [vmem:[%s14469_s29 + $0xf54] sm:$0xf0]  ;;  %v10606_v15 = vld [vmem:[%s14469_s29 + $0xe28] sm:$0xf] }
 0x2da   : > { %7722 = vmatpush.bf16.msrb.mxu2 %v10655_v19  ;;  %v7444_v19 = vpop.f32.mrf.mxu0  ;;  %v10751_v44 = vor.u32 %v13379_v7, %v10750_v5  ;;  %v10734_v40 = vld [vmem:[%s14469_s29 + $0xf28] sm:$0xf]  ;;  %v13275_v1 = vld [vmem:[%s14469_s29 + $0xc14] sm:$0xf0] }
 0x2db   : > { %7735 = vmatpush.bf16.msrb.mxu3 %v10783_v34  ;;  %v10623_v34 = vor.u32 %v13347_v57, %v10622_v39  ;;  %v10334_v53 = vld [vmem:[%s14469_s29 + $0xc08] sm:$0xf]  ;;  %v10607_v39 = vor.u32 %v13343_v48, %v10606_v15  ;;  %v13307_v57 = vld [vmem:[%s14469_s29 + $0xd14] sm:$0xf0] }
 0x2dc   : > { %7697 = vmatpush.bf16.msrb.mxu0 %v10383_v59  ;;  %v7404_v59 = vadd.f32 %v15945_v24, %v7391_v2  ;;  %v10462_v24 = vld [vmem:[%s14469_s29 + $0xd08] sm:$0xf]  ;;  %v13339_v7 = vld [vmem:[%s14469_s29 + $0xe14] sm:$0xf0] }
 0x2dd   : > { %7710 = vmatpush.bf16.msrb.mxu1 %v10511_v54  ;;  %v13375_v54 = vld [vmem:[%s14469_s29 + $0xf34] sm:$0xf0]  ;;  %v10590_v2 = vld [vmem:[%s14469_s29 + $0xe08] sm:$0xf]  ;;  %v10463_v48 = vor.u32 %v13307_v57, %v10462_v24 }
 0x2de   : > { %7723 = vmatpush.bf16.msrb.mxu2 %v10639_v52  ;;  %v10351_v52 = vor.u32 %v13279_v14, %v10350_v6  ;;  %v10735_v5 = vor.u32 %v13375_v54, %v10734_v40  ;;  %v10718_v19 = vld [vmem:[%s14469_s29 + $0xf08] sm:$0xf]  ;;  %v13431_v6 = vld [vmem:[%s14469_s29 + $0x10f4] sm:$0xf0]  ;;  %v10335_v14 = vor.u32 %v13275_v1, %v10334_v53 }
 0x2df   : > { %7736 = vmatpush.bf16.msrb.mxu3 %v10767_v58  ;;  %v7417_v58 = vadd.f32 %v15958_v3, %v7404_v59  ;;  %v7470_v13 = vpop.f32.mrf.mxu2  ;;  %v10958_v3 = vld [vmem:[%s14469_s29 + $0x10e8] sm:$0xf]  ;;  %v13463_v61 = vld [vmem:[%s14469_s29 + $0x11f4] sm:$0xf0]  ;;  %v10591_v59 = vor.u32 %v13339_v7, %v10590_v2 }
 0x2e0   : > { %7698 = vmatpush.bf16.msrb.mxu0 %v10367_v9  ;;  %v13371_v9 = vld [vmem:[%s14469_s29 + $0xf14] sm:$0xf0]  ;;  %v11214_v49 = vld [vmem:[%s14469_s29 + $0x12e8] sm:$0xf]  ;;  %v10959_v53 = vor.u32 %v13431_v6, %v10958_v3 }
 0x2e1   : > { %7711 = vmatpush.bf16.msrb.mxu1 %v10495_v21  ;;  %v11086_v21 = vld [vmem:[%s14469_s29 + $0x11e8] sm:$0xf]  ;;  %v13495_v15 = vld [vmem:[%s14469_s29 + $0x12f4] sm:$0xf0] }
 0x2e2   : > { %7724 = vmatpush.bf16.msrb.mxu2 %v10623_v34  ;;  %v7483_v34 = vpop.f32.mrf.mxu3  ;;  %v11342_v40 = vld [vmem:[%s14469_s29 + $0x13e8] sm:$0xf]  ;;  %v13527_v54 = vld [vmem:[%s14469_s29 + $0x13f4] sm:$0xf0]  ;;  %v11087_v13 = vor.u32 %v13463_v61, %v11086_v21 }
 0x2e3   : > { %7737 = vmatpush.bf16.msrb.mxu3 %v10751_v44  ;;  %v7430_v44 = vadd.f32 %v15963_v0, %v7417_v58  ;;  %v11215_v34 = vor.u32 %v13495_v15, %v11214_v49  ;;  %v10942_v37 = vld [vmem:[%s14469_s29 + $0x10c8] sm:$0xf]  ;;  %v13427_v0 = vld [vmem:[%s14469_s29 + $0x10d4] sm:$0xf0] }
 0x2e4   : > { %7699 = vmatpush.bf16.msrb.mxu0 %v10351_v52  ;;  %v10719_v52 = vor.u32 %v13371_v9, %v10718_v19  ;;  %v11070_v58 = vld [vmem:[%s14469_s29 + $0x11c8] sm:$0xf]  ;;  %v13491_v57 = vld [vmem:[%s14469_s29 + $0x12d4] sm:$0xf0] }
 0x2e5   : > { %7712 = vmatpush.bf16.msrb.mxu1 %v10479_v17  ;;  %v7443_v1 = vadd.f32 %v16017_v63, %v7430_v44  ;;  %v11343_v17 = vor.u32 %v13527_v54, %v11342_v40  ;;  %v11198_v24 = vld [vmem:[%s14469_s29 + $0x12c8] sm:$0xf]  ;;  %v10943_v63 = vor.u32 %v13427_v0, %v10942_v37  ;;  %v13423_v6 = vld [vmem:[%s14469_s29 + $0x10b4] sm:$0xf0] }
 0x2e6   : > { %7725 = vmatpush.bf16.msrb.mxu2 %v10607_v39  ;;  %v13459_v39 = vld [vmem:[%s14469_s29 + $0x11d4] sm:$0xf0]  ;;  %v11326_v2 = vld [vmem:[%s14469_s29 + $0x13c8] sm:$0xf]  ;;  %v11199_v9 = vor.u32 %v13491_v57, %v11198_v24 }
 0x2e7   : > { %7738 = vmatpush.bf16.msrb.mxu3 %v10735_v5  ;;  %v13523_v5 = vld [vmem:[%s14469_s29 + $0x13d4] sm:$0xf0]  ;;  %v7456_v7 = vadd.f32 %v16021_v23, %v7443_v1  ;;  %v11071_v19 = vor.u32 %v13459_v39, %v11070_v58  ;;  %v10926_v3 = vld [vmem:[%s14469_s29 + $0x10a8] sm:$0xf] }
 0x2e8   : > { %7700 = vmatpush.bf16.msrb.mxu0 %v10335_v14  ;;  %v11054_v21 = vld [vmem:[%s14469_s29 + $0x11a8] sm:$0xf]  ;;  %v11327_v14 = vor.u32 %v13523_v5, %v11326_v2  ;;  %v13455_v61 = vld [vmem:[%s14469_s29 + $0x11b4] sm:$0xf0]  ;;  %v7494_v58 = vpop.f32.mrf.mxu0 }
 0x2e9   : > { %7713 = vmatpush.bf16.msrb.mxu1 %v10463_v48  ;;  %v11182_v49 = vld [vmem:[%s14469_s29 + $0x12a8] sm:$0xf]  ;;  %v13487_v37 = vld [vmem:[%s14469_s29 + $0x12b4] sm:$0xf0]  ;;  %v7469_v23 = vadd.f32 %v16034_v27, %v7456_v7  ;;  %v10927_v48 = vor.u32 %v13423_v6, %v10926_v3  ;;  %v7507_v57 = vpop.f32.mrf.mxu1 }
 0x2ea   : > { %7726 = vmatpush.bf16.msrb.mxu2 %v10591_v59  ;;  %v11310_v15 = vld [vmem:[%s14469_s29 + $0x13a8] sm:$0xf]  ;;  %v13519_v44 = vld [vmem:[%s14469_s29 + $0x13b4] sm:$0xf0]  ;;  %v11055_v59 = vor.u32 %v13455_v61, %v11054_v21  ;;  %v11183_v40 = vor.u32 %v13487_v37, %v11182_v49 }
 0x2eb   : > { %7739 = vmatpush.bf16.msrb.mxu3 %v10719_v52  ;;  %7701 = vmatmul.bf16.vlgmr.msrb.gmra.mxu0 %v14847_v30  ;;  %v10910_v27 = vld [vmem:[%s14469_s29 + $0x1088] sm:$0xf]  ;;  %v13419_v54 = vld [vmem:[%s14469_s29 + $0x1094] sm:$0xf0]  ;;  %v7482_v0 = vadd.f32 %v16041_v60, %v7469_v23 }
 0x2ec   : > { %7745 = vmatpush.bf16.msra.mxu0 %v10959_v53  ;;  %7714 = vmatmul.bf16.vlgmr.msrb.gmra.mxu1 %v14858_v42  ;;  %v11038_v52 = vld [vmem:[%s14469_s29 + $0x1188] sm:$0xf]  ;;  %v11311_v53 = vor.u32 %v13519_v44, %v11310_v15  ;;  %v13451_v1 = vld [vmem:[%s14469_s29 + $0x1194] sm:$0xf0]  ;;  %v10911_v24 = vor.u32 %v13419_v54, %v10910_v27 }
 0x2ed   : > { %7758 = vmatpush.bf16.msra.mxu1 %v11087_v13  ;;  %7727 = vmatmul.bf16.vlgmr.msrb.gmra.mxu2 %v14854_v35  ;;  %v11166_v13 = vld [vmem:[%s14469_s29 + $0x1288] sm:$0xf]  ;;  %v13515_v39 = vld [vmem:[%s14469_s29 + $0x1394] sm:$0xf0]  ;;  %v7495_v2 = vadd.f32 %v7494_v58, %v7482_v0  ;;  %v11039_v5 = vor.u32 %v13451_v1, %v11038_v52 }
 0x2ee   : > { %7771 = vmatpush.bf16.msra.mxu2 %v11215_v34  ;;  %7740 = vmatmul.bf16.vlgmr.msrb.gmra.mxu3 %v14865_v47  ;;  %v13483_v34 = vld [vmem:[%s14469_s29 + $0x1294] sm:$0xf0]  ;;  %v10894_v7 = vld [vmem:[%s14469_s29 + $0x1068] sm:$0xf] }
 0x2ef   : > { %7784 = vmatpush.bf16.msra.mxu3 %v11343_v17  ;;  %v11294_v17 = vld [vmem:[%s14469_s29 + $0x1388] sm:$0xf]  ;;  %v13447_v3 = vld [vmem:[%s14469_s29 + $0x1174] sm:$0xf0]  ;;  %v7508_v37 = vadd.f32 %v7507_v57, %v7495_v2 }
 0x2f0   : > { %7746 = vmatpush.bf16.msra.mxu0 %v10943_v63  ;;  %v11167_v63 = vor.u32 %v13483_v34, %v11166_v13  ;;  %v11022_v60 = vld [vmem:[%s14469_s29 + $0x1168] sm:$0xf]  ;;  %v13479_v21 = vld [vmem:[%s14469_s29 + $0x1274] sm:$0xf0]  ;;  %v7520_v27 = vpop.f32.mrf.mxu2  ;;  %v7496_v58 = vpop.f32.mrf.mxu0 }
 0x2f1   : > { %7759 = vmatpush.bf16.msra.mxu1 %v11071_v19  ;;  %v13415_v19 = vld [vmem:[%s14469_s29 + $0x1074] sm:$0xf0]  ;;  %v11150_v6 = vld [vmem:[%s14469_s29 + $0x1268] sm:$0xf]  ;;  %v11023_v23 = vor.u32 %v13447_v3, %v11022_v60  ;;  %v7521_v1 = vadd.f32 %v7520_v27, %v7508_v37  ;;  %v7533_v13 = vpop.f32.mrf.mxu3 }
 0x2f2   : > { %7772 = vmatpush.bf16.msra.mxu2 %v11199_v9  ;;  %v11295_v9 = vor.u32 %v13515_v39, %v11294_v17  ;;  %v13511_v61 = vld [vmem:[%s14469_s29 + $0x1374] sm:$0xf0]  ;;  %v10895_v49 = vor.u32 %v13415_v19, %v10894_v7  ;;  %v11151_v15 = vor.u32 %v13479_v21, %v11150_v6  ;;  %v10878_v44 = vld [vmem:[%s14469_s29 + $0x1048] sm:$0xf]  ;;  %v7509_v39 = vpop.f32.mrf.mxu1 }
 0x2f3   : > { %7785 = vmatpush.bf16.msra.mxu3 %v11327_v14  ;;  %v11278_v14 = vld [vmem:[%s14469_s29 + $0x1368] sm:$0xf]  ;;  %v13443_v54 = vld [vmem:[%s14469_s29 + $0x1154] sm:$0xf0] }
 0x2f4   : > { %7747 = vmatpush.bf16.msra.mxu0 %v10927_v48  ;;  %v13411_v48 = vld [vmem:[%s14469_s29 + $0x1054] sm:$0xf0]  ;;  %v11134_v52 = vld [vmem:[%s14469_s29 + $0x1248] sm:$0xf] }
 0x2f5   : > { %7760 = vmatpush.bf16.msra.mxu1 %v11055_v59  ;;  %v11006_v59 = vld [vmem:[%s14469_s29 + $0x1148] sm:$0xf]  ;;  %v13507_v0 = vld [vmem:[%s14469_s29 + $0x1354] sm:$0xf0]  ;;  %v10879_v17 = vor.u32 %v13411_v48, %v10878_v44 }
 0x2f6   : > { %7773 = vmatpush.bf16.msra.mxu2 %v11183_v40  ;;  %v11279_v40 = vor.u32 %v13511_v61, %v11278_v14  ;;  %v11262_v34 = vld [vmem:[%s14469_s29 + $0x1348] sm:$0xf]  ;;  %v11007_v57 = vor.u32 %v13443_v54, %v11006_v59  ;;  %v13439_v60 = vld [vmem:[%s14469_s29 + $0x1134] sm:$0xf0]  ;;  %v16137_v54 = vld [vmem:[%s14501_s8 + $0x8] sm:$0xff] }
 0x2f7   : > { %7786 = vmatpush.bf16.msra.mxu3 %v11311_v53  ;;  %v13475_v53 = vld [vmem:[%s14469_s29 + $0x1254] sm:$0xf0]  ;;  %v10990_v7 = vld [vmem:[%s14469_s29 + $0x1128] sm:$0xf]  ;;  %v11263_v19 = vor.u32 %v13507_v0, %v11262_v34 }
 0x2f8   : > { %7748 = vmatpush.bf16.msra.mxu0 %v10911_v24  ;;  %v7534_v24 = vadd.f32 %v7533_v13, %v7521_v1  ;;  %v11135_v2 = vor.u32 %v13475_v53, %v11134_v52  ;;  %v13471_v3 = vld [vmem:[%s14469_s29 + $0x1234] sm:$0xf0]  ;;  %v11246_v14 = vld [vmem:[%s14469_s29 + $0x1328] sm:$0xf]  ;;  %v10991_v48 = vor.u32 %v13439_v60, %v10990_v7  ;;  %v7522_v34 = vpop.f32.mrf.mxu2 }
 0x2f9   : > { %7761 = vmatpush.bf16.msra.mxu1 %v11039_v5  ;;  %v10862_v5 = vld [vmem:[%s14469_s29 + $0x1028] sm:$0xf]  ;;  %v412_v6 = vld [vmem:[%s14501_s8] sm:$0xff]  ;;  %v7535_v39 = vpop.f32.mrf.mxu3 }
 0x2fa   : > { %7774 = vmatpush.bf16.msra.mxu2 %v11167_v63  ;;  %v13407_v63 = vld [vmem:[%s14469_s29 + $0x1034] sm:$0xf0]  ;;  %v8373_v21 = vrot.slane %v7534_v24, 4  ;;  %v10846_v37 = vld [vmem:[%s14469_s29 + $0x1008] sm:$0xf] }
 0x2fb   : > { %7787 = vmatpush.bf16.msra.mxu3 %v11295_v9  ;;  %v11118_v9 = vld [vmem:[%s14469_s29 + $0x1228] sm:$0xf]  ;;  %v13503_v61 = vld [vmem:[%s14469_s29 + $0x1334] sm:$0xf0] }
 0x2fc   : > { %7749 = vmatpush.bf16.msra.mxu0 %v10895_v49  ;;  %v10863_v49 = vor.u32 %v13407_v63, %v10862_v5  ;;  %v8376_v44 = vsel %vm8375_vm0, %v15535_v16, %v8373_v21  ;;  %v11119_v59 = vor.u32 %v13471_v3, %v11118_v9  ;;  %v11102_v27 = vld [vmem:[%s14469_s29 + $0x1208] sm:$0xf]  ;;  %v11247_v53 = vor.u32 %v13503_v61, %v11246_v14  ;;  %v13467_v1 = vld [vmem:[%s14469_s29 + $0x1214] sm:$0xf0] }
 0x2fd   : > { %7762 = vmatpush.bf16.msra.mxu1 %v11023_v23  ;;  %v13403_v23 = vld [vmem:[%s14469_s29 + $0x1014] sm:$0xf0]  ;;  %v8380_v52 = vadd.f32 %v8376_v44, %v412_v6  ;;  %v11230_v13 = vld [vmem:[%s14469_s29 + $0x1308] sm:$0xf]  ;;  %v11103_v7 = vor.u32 %v13467_v1, %v11102_v27 }
 0x2fe   : > { %7775 = vmatpush.bf16.msra.mxu2 %v11151_v15  ;;  %v10974_v15 = vld [vmem:[%s14469_s29 + $0x1108] sm:$0xf]  ;;  %v13499_v16 = vld [vmem:[%s14469_s29 + $0x1314] sm:$0xf0]  ;;  %v10847_v24 = vor.u32 %v13403_v23, %v10846_v37 }
 0x2ff   : > { %7788 = vmatpush.bf16.msra.mxu3 %v11279_v40  ;;  %v13435_v40 = vld [vmem:[%s14469_s29 + $0x1114] sm:$0xf0]  ;;  %v11470_v0 = vld [vmem:[%s14469_s29 + $0x14e8] sm:$0xf]  ;;  %8382 = vst [vmem:[%s14501_s8] sm:$0xff] %v8380_v52  ;;  %v11231_v9 = vor.u32 %v13499_v16, %v11230_v13 }
 0x300   : > { %7750 = vmatpush.bf16.msra.mxu0 %v10879_v17  ;;  %v13559_v58 = vld [vmem:[%s14469_s29 + $0x14f4] sm:$0xf0]  ;;  %v11598_v17 = vld [vmem:[%s14469_s29 + $0x15e8] sm:$0xf]  ;;  %v10975_v63 = vor.u32 %v13435_v40, %v10974_v15 }
 0x301   : > { %7763 = vmatpush.bf16.msra.mxu1 %v11007_v57  ;;  %v13591_v57 = vld [vmem:[%s14469_s29 + $0x15f4] sm:$0xf0]  ;;  %v11471_v3 = vor.u32 %v13559_v58, %v11470_v0  ;;  %v11454_v14 = vld [vmem:[%s14469_s29 + $0x14c8] sm:$0xf] }
 0x302   : > { %7776 = vmatpush.bf16.msra.mxu2 %v11135_v2  ;;  %v11726_v2 = vld [vmem:[%s14469_s29 + $0x16e8] sm:$0xf]  ;;  %v13623_v5 = vld [vmem:[%s14469_s29 + $0x16f4] sm:$0xf0]  ;;  %v11599_v6 = vor.u32 %v13591_v57, %v11598_v17 }
 0x303   : > { %7789 = vmatpush.bf16.msra.mxu3 %v11263_v19  ;;  %v11854_v19 = vld [vmem:[%s14469_s29 + $0x17e8] sm:$0xf]  ;;  %v13655_v60 = vld [vmem:[%s14469_s29 + $0x17f4] sm:$0xf0]  ;;  %v11727_v21 = vor.u32 %v13623_v5, %v11726_v2 }
 0x304   : > { %7751 = vmatpush.bf16.msra.mxu0 %v10863_v49  ;;  %v13555_v61 = vld [vmem:[%s14469_s29 + $0x14d4] sm:$0xf0]  ;;  %v11582_v49 = vld [vmem:[%s14469_s29 + $0x15c8] sm:$0xf]  ;;  %v11855_v37 = vor.u32 %v13655_v60, %v11854_v19 }
 0x305   : > { %7764 = vmatpush.bf16.msra.mxu1 %v10991_v48  ;;  %v13587_v23 = vld [vmem:[%s14469_s29 + $0x15d4] sm:$0xf0]  ;;  %v11710_v15 = vld [vmem:[%s14469_s29 + $0x16c8] sm:$0xf]  ;;  %v11455_v40 = vor.u32 %v13555_v61, %v11454_v14 }
 0x306   : > { %7777 = vmatpush.bf16.msra.mxu2 %v11119_v59  ;;  %v13619_v44 = vld [vmem:[%s14469_s29 + $0x16d4] sm:$0xf0]  ;;  %v11838_v48 = vld [vmem:[%s14469_s29 + $0x17c8] sm:$0xf]  ;;  %v11583_v27 = vor.u32 %v13587_v23, %v11582_v49 }
 0x307   : > { %7790 = vmatpush.bf16.msra.mxu3 %v11247_v53  ;;  %v13651_v59 = vld [vmem:[%s14469_s29 + $0x17d4] sm:$0xf0]  ;;  %v11711_v52 = vor.u32 %v13619_v44, %v11710_v15  ;;  %v11438_v53 = vld [vmem:[%s14469_s29 + $0x14a8] sm:$0xf] }
 0x308   : > { %7752 = vmatpush.bf16.msra.mxu0 %v10847_v24  ;;  %v13551_v1 = vld [vmem:[%s14469_s29 + $0x14b4] sm:$0xf0]  ;;  %v11566_v13 = vld [vmem:[%s14469_s29 + $0x15a8] sm:$0xf]  ;;  %v11839_v16 = vor.u32 %v13651_v59, %v11838_v48  ;;  %v7546_v61 = vpop.f32.mrf.mxu0 }
 0x309   : > { %7765 = vmatpush.bf16.msra.mxu1 %v10975_v63  ;;  %v13583_v34 = vld [vmem:[%s14469_s29 + $0x15b4] sm:$0xf0]  ;;  %v11694_v0 = vld [vmem:[%s14469_s29 + $0x16a8] sm:$0xf]  ;;  %v11439_v24 = vor.u32 %v13551_v1, %v11438_v53  ;;  %v7559_v48 = vpop.f32.mrf.mxu1 }
 0x30a   : > { %7778 = vmatpush.bf16.msra.mxu2 %v11103_v7  ;;  %v13615_v58 = vld [vmem:[%s14469_s29 + $0x16b4] sm:$0xf0]  ;;  %v11822_v17 = vld [vmem:[%s14469_s29 + $0x17a8] sm:$0xf]  ;;  %v11567_v57 = vor.u32 %v13583_v34, %v11566_v13  ;;  %v7560_v53 = vadd.f32 %v7559_v48, %v7546_v61 }
 0x30b   : > { %7791 = vmatpush.bf16.msra.mxu3 %v11231_v9  ;;  %7753 = vmatmul.bf16.vlgmr.msra.gmra.mxu0 %v14942_v51  ;;  %v13647_v39 = vld [vmem:[%s14469_s29 + $0x17b4] sm:$0xf0]  ;;  %v11695_v2 = vor.u32 %v13615_v58, %v11694_v0  ;;  %v11422_v5 = vld [vmem:[%s14469_s29 + $0x1488] sm:$0xf] }
 0x30c   : > { %7797 = vmatpush.bf16.msrb.mxu0 %v11471_v3  ;;  %7766 = vmatmul.bf16.vlgmr.msra.gmra.mxu1 %v14953_v18  ;;  %v13547_v63 = vld [vmem:[%s14469_s29 + $0x1494] sm:$0xf0]  ;;  %v11550_v7 = vld [vmem:[%s14469_s29 + $0x1588] sm:$0xf]  ;;  %v11823_v19 = vor.u32 %v13647_v39, %v11822_v17 }
 0x30d   : > { %7810 = vmatpush.bf16.msrb.mxu1 %v11599_v6  ;;  %7779 = vmatmul.bf16.vlgmr.msra.gmra.mxu2 %v14949_v56  ;;  %v13579_v60 = vld [vmem:[%s14469_s29 + $0x1594] sm:$0xf0]  ;;  %v11678_v9 = vld [vmem:[%s14469_s29 + $0x1688] sm:$0xf]  ;;  %v11423_v14 = vor.u32 %v13547_v63, %v11422_v5 }
 0x30e   : > { %7823 = vmatpush.bf16.msrb.mxu2 %v11727_v21  ;;  %7792 = vmatmul.bf16.vlgmr.msra.gmra.mxu3 %v14960_v62  ;;  %v13611_v3 = vld [vmem:[%s14469_s29 + $0x1694] sm:$0xf0]  ;;  %v11806_v6 = vld [vmem:[%s14469_s29 + $0x1788] sm:$0xf]  ;;  %v11551_v49 = vor.u32 %v13579_v60, %v11550_v7 }
 0x30f   : > { %7836 = vmatpush.bf16.msrb.mxu3 %v11855_v37  ;;  %v13643_v21 = vld [vmem:[%s14469_s29 + $0x1794] sm:$0xf0]  ;;  %v11679_v37 = vor.u32 %v13611_v3, %v11678_v9  ;;  %v11406_v23 = vld [vmem:[%s14469_s29 + $0x1468] sm:$0xf] }
 0x310   : > { %7798 = vmatpush.bf16.msrb.mxu0 %v11455_v40  ;;  %v13543_v15 = vld [vmem:[%s14469_s29 + $0x1474] sm:$0xf0]  ;;  %v11534_v44 = vld [vmem:[%s14469_s29 + $0x1568] sm:$0xf]  ;;  %v11807_v59 = vor.u32 %v13643_v21, %v11806_v6  ;;  %v7548_v21 = vpop.f32.mrf.mxu0 }
 0x311   : > { %7811 = vmatpush.bf16.msrb.mxu1 %v11583_v27  ;;  %v13575_v40 = vld [vmem:[%s14469_s29 + $0x1574] sm:$0xf0]  ;;  %v11662_v27 = vld [vmem:[%s14469_s29 + $0x1668] sm:$0xf] }
 0x312   : > { %7824 = vmatpush.bf16.msrb.mxu2 %v11711_v52  ;;  %v13607_v52 = vld [vmem:[%s14469_s29 + $0x1674] sm:$0xf0]  ;;  %v11790_v1 = vld [vmem:[%s14469_s29 + $0x1768] sm:$0xf]  ;;  %v11535_v34 = vor.u32 %v13575_v40, %v11534_v44 }
 0x313   : > { %7837 = vmatpush.bf16.msrb.mxu3 %v11839_v16  ;;  %v13639_v13 = vld [vmem:[%s14469_s29 + $0x1774] sm:$0xf0]  ;;  %v11407_v16 = vor.u32 %v13543_v15, %v11406_v23  ;;  %v11663_v0 = vor.u32 %v13607_v52, %v11662_v27  ;;  %v11390_v58 = vld [vmem:[%s14469_s29 + $0x1448] sm:$0xf]  ;;  %v7561_v15 = vpop.f32.mrf.mxu1 }
 0x314   : > { %7799 = vmatpush.bf16.msrb.mxu0 %v11439_v24  ;;  %v13539_v17 = vld [vmem:[%s14469_s29 + $0x1454] sm:$0xf0]  ;;  %v11518_v39 = vld [vmem:[%s14469_s29 + $0x1548] sm:$0xf]  ;;  %v7572_v24 = vpop.f32.mrf.mxu2 }
 0x315   : > { %7812 = vmatpush.bf16.msrb.mxu1 %v11567_v57  ;;  %v11791_v57 = vor.u32 %v13639_v13, %v11790_v1  ;;  %v11646_v5 = vld [vmem:[%s14469_s29 + $0x1648] sm:$0xf]  ;;  %v13603_v63 = vld [vmem:[%s14469_s29 + $0x1654] sm:$0xf0]  ;;  %v7573_v7 = vadd.f32 %v7572_v24, %v7560_v53  ;;  %v11391_v3 = vor.u32 %v13539_v17, %v11390_v58 }
 0x316   : > { %7825 = vmatpush.bf16.msrb.mxu2 %v11695_v2  ;;  %v13571_v2 = vld [vmem:[%s14469_s29 + $0x1554] sm:$0xf0]  ;;  %v11774_v60 = vld [vmem:[%s14469_s29 + $0x1748] sm:$0xf]  ;;  %v11647_v61 = vor.u32 %v13603_v63, %v11646_v5 }
 0x317   : > { %7838 = vmatpush.bf16.msrb.mxu3 %v11823_v19  ;;  %v7585_v19 = vpop.f32.mrf.mxu3  ;;  %v13635_v9 = vld [vmem:[%s14469_s29 + $0x1754] sm:$0xf0]  ;;  %v11502_v23 = vld [vmem:[%s14469_s29 + $0x1528] sm:$0xf] }
 0x318   : > { %7800 = vmatpush.bf16.msrb.mxu0 %v11423_v14  ;;  %v16195_v6 = vadd.f32 %v7585_v19, %v7573_v7  ;;  %v11519_v14 = vor.u32 %v13571_v2, %v11518_v39  ;;  %v11775_v44 = vor.u32 %v13635_v9, %v11774_v60  ;;  %v13567_v48 = vld [vmem:[%s14469_s29 + $0x1534] sm:$0xf0]  ;;  %v11758_v27 = vld [vmem:[%s14469_s29 + $0x1728] sm:$0xf] }
 0x319   : > { %7813 = vmatpush.bf16.msrb.mxu1 %v11551_v49  ;;  %v11374_v49 = vld [vmem:[%s14469_s29 + $0x1428] sm:$0xf]  ;;  %v13599_v40 = vld [vmem:[%s14469_s29 + $0x1634] sm:$0xf0] }
 0x31a   : > { %7826 = vmatpush.bf16.msrb.mxu2 %v11679_v37  ;;  %v13535_v37 = vld [vmem:[%s14469_s29 + $0x1434] sm:$0xf0]  ;;  %v11358_v1 = vld [vmem:[%s14469_s29 + $0x1408] sm:$0xf] }
 0x31b   : > { %7839 = vmatpush.bf16.msrb.mxu3 %v11807_v59  ;;  %v11630_v59 = vld [vmem:[%s14469_s29 + $0x1628] sm:$0xf]  ;;  %v13631_v52 = vld [vmem:[%s14469_s29 + $0x1734] sm:$0xf0]  ;;  %v11375_v53 = vor.u32 %v13535_v37, %v11374_v49 }
 0x31c   : > { %7801 = vmatpush.bf16.msrb.mxu0 %v11407_v16  ;;  %v13531_v13 = vld [vmem:[%s14469_s29 + $0x1414] sm:$0xf0]  ;;  %v11503_v16 = vor.u32 %v13567_v48, %v11502_v23  ;;  %v11614_v17 = vld [vmem:[%s14469_s29 + $0x1608] sm:$0xf]  ;;  %v7574_v39 = vpop.f32.mrf.mxu2  ;;  %v11759_v24 = vor.u32 %v13631_v52, %v11758_v27 }
 0x31d   : > { %7814 = vmatpush.bf16.msrb.mxu1 %v11535_v34  ;;  %v11631_v34 = vor.u32 %v13599_v40, %v11630_v59  ;;  %v13563_v58 = vld [vmem:[%s14469_s29 + $0x1514] sm:$0xf0]  ;;  %v11742_v2 = vld [vmem:[%s14469_s29 + $0x1708] sm:$0xf]  ;;  %v11359_v9 = vor.u32 %v13531_v13, %v11358_v1 }
 0x31e   : > { %7827 = vmatpush.bf16.msrb.mxu2 %v11663_v0  ;;  %v11486_v0 = vld [vmem:[%s14469_s29 + $0x1508] sm:$0xf]  ;;  %v13627_v5 = vld [vmem:[%s14469_s29 + $0x1714] sm:$0xf0] }
 0x31f   : > { %7840 = vmatpush.bf16.msrb.mxu3 %v11791_v57  ;;  %v13595_v57 = vld [vmem:[%s14469_s29 + $0x1614] sm:$0xf0]  ;;  %v7587_v63 = vpop.f32.mrf.mxu3  ;;  %v11982_v7 = vld [vmem:[%s14469_s29 + $0x18e8] sm:$0xf]  ;;  %v11743_v15 = vor.u32 %v13627_v5, %v11742_v2 }
 0x320   : > { %7802 = vmatpush.bf16.msrb.mxu0 %v11391_v3  ;;  %v13687_v19 = vld [vmem:[%s14469_s29 + $0x18f4] sm:$0xf0]  ;;  %v12110_v60 = vld [vmem:[%s14469_s29 + $0x19e8] sm:$0xf]  ;;  %v11615_v49 = vor.u32 %v13595_v57, %v11614_v17 }
 0x321   : > { %7815 = vmatpush.bf16.msrb.mxu1 %v11519_v14  ;;  %v13719_v3 = vld [vmem:[%s14469_s29 + $0x19f4] sm:$0xf0]  ;;  %v12238_v21 = vld [vmem:[%s14469_s29 + $0x1ae8] sm:$0xf] }
 0x322   : > { %7828 = vmatpush.bf16.msrb.mxu2 %v11647_v61  ;;  %v13751_v14 = vld [vmem:[%s14469_s29 + $0x1af4] sm:$0xf0]  ;;  %v11487_v61 = vor.u32 %v13563_v58, %v11486_v0  ;;  %v12366_v37 = vld [vmem:[%s14469_s29 + $0x1be8] sm:$0xf]  ;;  %v12111_v48 = vor.u32 %v13719_v3, %v12110_v60 }
 0x323   : > { %7841 = vmatpush.bf16.msrb.mxu3 %v11775_v44  ;;  %v13783_v23 = vld [vmem:[%s14469_s29 + $0x1bf4] sm:$0xf0]  ;;  %v11983_v44 = vor.u32 %v13687_v19, %v11982_v7  ;;  %v12239_v59 = vor.u32 %v13751_v14, %v12238_v21  ;;  %v11966_v40 = vld [vmem:[%s14469_s29 + $0x18c8] sm:$0xf] }
 0x324   : > { %7803 = vmatpush.bf16.msrb.mxu0 %v11375_v53  ;;  %v13683_v27 = vld [vmem:[%s14469_s29 + $0x18d4] sm:$0xf0]  ;;  %v12094_v52 = vld [vmem:[%s14469_s29 + $0x19c8] sm:$0xf]  ;;  %v12367_v53 = vor.u32 %v13783_v23, %v12366_v37 }
 0x325   : > { %7816 = vmatpush.bf16.msrb.mxu1 %v11503_v16  ;;  %v13715_v1 = vld [vmem:[%s14469_s29 + $0x19d4] sm:$0xf0]  ;;  %v12222_v13 = vld [vmem:[%s14469_s29 + $0x1ac8] sm:$0xf]  ;;  %v11967_v58 = vor.u32 %v13683_v27, %v11966_v40 }
 0x326   : > { %7829 = vmatpush.bf16.msrb.mxu2 %v11631_v34  ;;  %v13747_v16 = vld [vmem:[%s14469_s29 + $0x1ad4] sm:$0xf0]  ;;  %v12350_v34 = vld [vmem:[%s14469_s29 + $0x1bc8] sm:$0xf]  ;;  %v12095_v17 = vor.u32 %v13715_v1, %v12094_v52 }
 0x327   : > { %7842 = vmatpush.bf16.msrb.mxu3 %v11759_v24  ;;  %v13779_v0 = vld [vmem:[%s14469_s29 + $0x1bd4] sm:$0xf0]  ;;  %v12223_v39 = vor.u32 %v13747_v16, %v12222_v13  ;;  %v11950_v24 = vld [vmem:[%s14469_s29 + $0x18a8] sm:$0xf] }
 0x328   : > { %7804 = vmatpush.bf16.msrb.mxu0 %v11359_v9  ;;  %v13679_v57 = vld [vmem:[%s14469_s29 + $0x18b4] sm:$0xf0]  ;;  %v12078_v2 = vld [vmem:[%s14469_s29 + $0x19a8] sm:$0xf]  ;;  %v12351_v5 = vor.u32 %v13779_v0, %v12350_v34  ;;  %v7598_v52 = vpop.f32.mrf.mxu0 }
 0x329   : > { %7817 = vmatpush.bf16.msrb.mxu1 %v11487_v61  ;;  %v13711_v63 = vld [vmem:[%s14469_s29 + $0x19b4] sm:$0xf0]  ;;  %v12206_v7 = vld [vmem:[%s14469_s29 + $0x1aa8] sm:$0xf]  ;;  %v11951_v3 = vor.u32 %v13679_v57, %v11950_v24  ;;  %v7599_v0 = vadd.f32 %v7598_v52, %v16195_v6 }
 0x32a   : > { %7830 = vmatpush.bf16.msrb.mxu2 %v11615_v49  ;;  %v13743_v19 = vld [vmem:[%s14469_s29 + $0x1ab4] sm:$0xf0]  ;;  %v12334_v60 = vld [vmem:[%s14469_s29 + $0x1ba8] sm:$0xf]  ;;  %v12079_v21 = vor.u32 %v13711_v63, %v12078_v2 }
 0x32b   : > { %7843 = vmatpush.bf16.msrb.mxu3 %v11743_v15  ;;  %7805 = vmatmul.bf16.vlgmr.msrb.gmra.mxu0 %v15035_v22  ;;  %v13775_v9 = vld [vmem:[%s14469_s29 + $0x1bb4] sm:$0xf0]  ;;  %v12207_v14 = vor.u32 %v13743_v19, %v12206_v7  ;;  %v11934_v61 = vld [vmem:[%s14469_s29 + $0x1888] sm:$0xf] }
 0x32c   : > { %7849 = vmatpush.bf16.msra.mxu0 %v11983_v44  ;;  %7818 = vmatmul.bf16.vlgmr.msrb.gmra.mxu1 %v15048_v36  ;;  %v13675_v49 = vld [vmem:[%s14469_s29 + $0x1894] sm:$0xf0]  ;;  %v12062_v37 = vld [vmem:[%s14469_s29 + $0x1988] sm:$0xf]  ;;  %v12335_v23 = vor.u32 %v13775_v9, %v12334_v60 }
 0x32d   : > { %7862 = vmatpush.bf16.msra.mxu1 %v12111_v48  ;;  %7831 = vmatmul.bf16.vlgmr.msrb.gmra.mxu2 %v15044_v28  ;;  %v13707_v15 = vld [vmem:[%s14469_s29 + $0x1994] sm:$0xf0]  ;;  %v12190_v44 = vld [vmem:[%s14469_s29 + $0x1a88] sm:$0xf]  ;;  %v11935_v27 = vor.u32 %v13675_v49, %v11934_v61 }
 0x32e   : > { %7875 = vmatpush.bf16.msra.mxu2 %v12239_v59  ;;  %7844 = vmatmul.bf16.vlgmr.msrb.gmra.mxu3 %v15054_v38  ;;  %v13739_v48 = vld [vmem:[%s14469_s29 + $0x1a94] sm:$0xf0]  ;;  %v12318_v59 = vld [vmem:[%s14469_s29 + $0x1b88] sm:$0xf] }
 0x32f   : > { %7888 = vmatpush.bf16.msra.mxu3 %v12367_v53  ;;  %v13771_v40 = vld [vmem:[%s14469_s29 + $0x1b94] sm:$0xf0]  ;;  %v12063_v53 = vor.u32 %v13707_v15, %v12062_v37  ;;  %v12191_v1 = vor.u32 %v13739_v48, %v12190_v44  ;;  %v11918_v13 = vld [vmem:[%s14469_s29 + $0x1868] sm:$0xf] }
 0x330   : > { %7850 = vmatpush.bf16.msra.mxu0 %v11967_v58  ;;  %v13671_v16 = vld [vmem:[%s14469_s29 + $0x1874] sm:$0xf0]  ;;  %v12046_v34 = vld [vmem:[%s14469_s29 + $0x1968] sm:$0xf]  ;;  %v7611_v58 = vpop.f32.mrf.mxu1 }
 0x331   : > { %7863 = vmatpush.bf16.msra.mxu1 %v12095_v17  ;;  %v12319_v17 = vor.u32 %v13771_v40, %v12318_v59  ;;  %v12174_v24 = vld [vmem:[%s14469_s29 + $0x1a68] sm:$0xf]  ;;  %v13735_v57 = vld [vmem:[%s14469_s29 + $0x1a74] sm:$0xf0]  ;;  %v7612_v63 = vadd.f32 %v7611_v58, %v7599_v0  ;;  %v11919_v7 = vor.u32 %v13671_v16, %v11918_v13  ;;  %v7637_v15 = vpop.f32.mrf.mxu3 }
 0x332   : > { %7876 = vmatpush.bf16.msra.mxu2 %v12223_v39  ;;  %v13703_v39 = vld [vmem:[%s14469_s29 + $0x1974] sm:$0xf0]  ;;  %v12302_v2 = vld [vmem:[%s14469_s29 + $0x1b68] sm:$0xf]  ;;  %v12175_v19 = vor.u32 %v13735_v57, %v12174_v24 }
 0x333   : > { %7889 = vmatpush.bf16.msra.mxu3 %v12351_v5  ;;  %v13767_v5 = vld [vmem:[%s14469_s29 + $0x1b74] sm:$0xf0]  ;;  %v12047_v6 = vor.u32 %v13703_v39, %v12046_v34  ;;  %v11902_v60 = vld [vmem:[%s14469_s29 + $0x1848] sm:$0xf] }
 0x334   : > { %7851 = vmatpush.bf16.msra.mxu0 %v11951_v3  ;;  %v13667_v9 = vld [vmem:[%s14469_s29 + $0x1854] sm:$0xf0]  ;;  %v12030_v3 = vld [vmem:[%s14469_s29 + $0x1948] sm:$0xf] }
 0x335   : > { %7864 = vmatpush.bf16.msra.mxu1 %v12079_v21  ;;  %v7624_v21 = vpop.f32.mrf.mxu2  ;;  %v13699_v61 = vld [vmem:[%s14469_s29 + $0x1954] sm:$0xf0]  ;;  %v12158_v49 = vld [vmem:[%s14469_s29 + $0x1a48] sm:$0xf]  ;;  %v11903_v59 = vor.u32 %v13667_v9, %v11902_v60 }
 0x336   : > { %7877 = vmatpush.bf16.msra.mxu2 %v12207_v14  ;;  %v12303_v14 = vor.u32 %v13767_v5, %v12302_v2  ;;  %v13731_v37 = vld [vmem:[%s14469_s29 + $0x1a54] sm:$0xf0]  ;;  %v12286_v44 = vld [vmem:[%s14469_s29 + $0x1b48] sm:$0xf]  ;;  %v12031_v52 = vor.u32 %v13699_v61, %v12030_v3 }
 0x337   : > { %7890 = vmatpush.bf16.msra.mxu3 %v12335_v23  ;;  %v7625_v23 = vadd.f32 %v7624_v21, %v7612_v63  ;;  %v13763_v48 = vld [vmem:[%s14469_s29 + $0x1b54] sm:$0xf0]  ;;  %v12014_v16 = vld [vmem:[%s14469_s29 + $0x1928] sm:$0xf] }
 0x338   : > { %7852 = vmatpush.bf16.msra.mxu0 %v11935_v27  ;;  %v7600_v27 = vpop.f32.mrf.mxu0  ;;  %v13663_v13 = vld [vmem:[%s14469_s29 + $0x1834] sm:$0xf0]  ;;  %v7613_v34 = vpop.f32.mrf.mxu1  ;;  %v12287_v0 = vor.u32 %v13763_v48, %v12286_v44  ;;  %v12270_v24 = vld [vmem:[%s14469_s29 + $0x1b28] sm:$0xf] }
 0x339   : > { %7865 = vmatpush.bf16.msra.mxu1 %v12063_v53  ;;  %v16266_v40 = vadd.f32 %v7637_v15, %v7625_v23  ;;  %v12159_v53 = vor.u32 %v13731_v37, %v12158_v49  ;;  %v13695_v58 = vld [vmem:[%s14469_s29 + $0x1934] sm:$0xf0]  ;;  %v11870_v5 = vld [vmem:[%s14469_s29 + $0x1808] sm:$0xf]  ;;  %v7639_v37 = vpop.f32.mrf.mxu3 }
 0x33a   : > { %7878 = vmatpush.bf16.msra.mxu2 %v12191_v1  ;;  %v11886_v1 = vld [vmem:[%s14469_s29 + $0x1828] sm:$0xf]  ;;  %v13727_v39 = vld [vmem:[%s14469_s29 + $0x1a34] sm:$0xf0] }
 0x33b   : > { %7891 = vmatpush.bf16.msra.mxu3 %v12319_v17  ;;  %v12142_v17 = vld [vmem:[%s14469_s29 + $0x1a28] sm:$0xf]  ;;  %v13759_v57 = vld [vmem:[%s14469_s29 + $0x1b34] sm:$0xf0]  ;;  %v11887_v2 = vor.u32 %v13663_v13, %v11886_v1 }
 0x33c   : > { %7853 = vmatpush.bf16.msra.mxu0 %v11919_v7  ;;  %v13659_v63 = vld [vmem:[%s14469_s29 + $0x1814] sm:$0xf0]  ;;  %v12015_v7 = vor.u32 %v13695_v58, %v12014_v16  ;;  %v12126_v9 = vld [vmem:[%s14469_s29 + $0x1a08] sm:$0xf]  ;;  %v12271_v21 = vor.u32 %v13759_v57, %v12270_v24 }
 0x33d   : > { %7866 = vmatpush.bf16.msra.mxu1 %v12047_v6  ;;  %v12143_v6 = vor.u32 %v13727_v39, %v12142_v17  ;;  %v13691_v60 = vld [vmem:[%s14469_s29 + $0x1914] sm:$0xf0]  ;;  %v7626_v3 = vpop.f32.mrf.mxu2  ;;  %v12254_v61 = vld [vmem:[%s14469_s29 + $0x1b08] sm:$0xf]  ;;  %v11871_v48 = vor.u32 %v13659_v63, %v11870_v5 }
 0x33e   : > { %7879 = vmatpush.bf16.msra.mxu2 %v12175_v19  ;;  %v11998_v19 = vld [vmem:[%s14469_s29 + $0x1908] sm:$0xf]  ;;  %v13755_v49 = vld [vmem:[%s14469_s29 + $0x1b14] sm:$0xf0] }
 0x33f   : > { %7892 = vmatpush.bf16.msra.mxu3 %v12303_v14  ;;  %v13723_v14 = vld [vmem:[%s14469_s29 + $0x1a14] sm:$0xf0]  ;;  %v12494_v23 = vld [vmem:[%s14469_s29 + $0x1ce8] sm:$0xf]  ;;  %v12255_v34 = vor.u32 %v13755_v49, %v12254_v61 }
 0x340   : > { %7854 = vmatpush.bf16.msra.mxu0 %v11903_v59  ;;  %v13815_v15 = vld [vmem:[%s14469_s29 + $0x1cf4] sm:$0xf0]  ;;  %v12622_v44 = vld [vmem:[%s14469_s29 + $0x1de8] sm:$0xf]  ;;  %v12127_v1 = vor.u32 %v13723_v14, %v12126_v9 }
 0x341   : > { %7867 = vmatpush.bf16.msra.mxu1 %v12031_v52  ;;  %v13847_v59 = vld [vmem:[%s14469_s29 + $0x1df4] sm:$0xf0]  ;;  %v12750_v27 = vld [vmem:[%s14469_s29 + $0x1ee8] sm:$0xf] }
 0x342   : > { %7880 = vmatpush.bf16.msra.mxu2 %v12159_v53  ;;  %v13879_v52 = vld [vmem:[%s14469_s29 + $0x1ef4] sm:$0xf0]  ;;  %v11999_v53 = vor.u32 %v13691_v60, %v11998_v19  ;;  %v12878_v13 = vld [vmem:[%s14469_s29 + $0x1fe8] sm:$0xf]  ;;  %v12623_v58 = vor.u32 %v13847_v59, %v12622_v44 }
 0x343   : > { %7893 = vmatpush.bf16.msra.mxu3 %v12287_v0  ;;  %v13911_v16 = vld [vmem:[%s14469_s29 + $0x1ff4] sm:$0xf0]  ;;  %v12495_v0 = vor.u32 %v13815_v15, %v12494_v23  ;;  %v12751_v17 = vor.u32 %v13879_v52, %v12750_v27  ;;  %v12478_v39 = vld [vmem:[%s14469_s29 + $0x1cc8] sm:$0xf] }
 0x344   : > { %7855 = vmatpush.bf16.msra.mxu0 %v11887_v2  ;;  %v13811_v24 = vld [vmem:[%s14469_s29 + $0x1cd4] sm:$0xf0]  ;;  %v12606_v57 = vld [vmem:[%s14469_s29 + $0x1dc8] sm:$0xf]  ;;  %v12879_v2 = vor.u32 %v13911_v16, %v12878_v13 }
 0x345   : > { %7868 = vmatpush.bf16.msra.mxu1 %v12015_v7  ;;  %v13843_v5 = vld [vmem:[%s14469_s29 + $0x1dd4] sm:$0xf0]  ;;  %v12734_v63 = vld [vmem:[%s14469_s29 + $0x1ec8] sm:$0xf]  ;;  %v12479_v60 = vor.u32 %v13811_v24, %v12478_v39 }
 0x346   : > { %7881 = vmatpush.bf16.msra.mxu2 %v12143_v6  ;;  %v13875_v7 = vld [vmem:[%s14469_s29 + $0x1ed4] sm:$0xf0]  ;;  %v12862_v6 = vld [vmem:[%s14469_s29 + $0x1fc8] sm:$0xf]  ;;  %v12607_v9 = vor.u32 %v13843_v5, %v12606_v57 }
 0x347   : > { %7894 = vmatpush.bf16.msra.mxu3 %v12271_v21  ;;  %v13907_v19 = vld [vmem:[%s14469_s29 + $0x1fd4] sm:$0xf0]  ;;  %v12735_v3 = vor.u32 %v13875_v7, %v12734_v63  ;;  %v12462_v21 = vld [vmem:[%s14469_s29 + $0x1ca8] sm:$0xf] }
 0x348   : > { %7856 = vmatpush.bf16.msra.mxu0 %v11871_v48  ;;  %v13807_v14 = vld [vmem:[%s14469_s29 + $0x1cb4] sm:$0xf0]  ;;  %v12590_v61 = vld [vmem:[%s14469_s29 + $0x1da8] sm:$0xf]  ;;  %v12863_v49 = vor.u32 %v13907_v19, %v12862_v6 }
 0x349   : > { %7869 = vmatpush.bf16.msra.mxu1 %v11999_v53  ;;  %v13839_v37 = vld [vmem:[%s14469_s29 + $0x1db4] sm:$0xf0]  ;;  %v12718_v23 = vld [vmem:[%s14469_s29 + $0x1ea8] sm:$0xf]  ;;  %v12463_v59 = vor.u32 %v13807_v14, %v12462_v21  ;;  %v7663_v5 = vpop.f32.mrf.mxu1 }
 0x34a   : > { %7882 = vmatpush.bf16.msra.mxu2 %v12127_v1  ;;  %v13871_v15 = vld [vmem:[%s14469_s29 + $0x1eb4] sm:$0xf0]  ;;  %v12846_v44 = vld [vmem:[%s14469_s29 + $0x1fa8] sm:$0xf]  ;;  %v12591_v27 = vor.u32 %v13839_v37, %v12590_v61 }
 0x34b   : > { %7895 = vmatpush.bf16.msra.mxu3 %v12255_v34  ;;  %7857 = vmatmul.bf16.vlgmr.msra.gmra.mxu0 %v15122_v20  ;;  %v13903_v48 = vld [vmem:[%s14469_s29 + $0x1fb4] sm:$0xf0]  ;;  %v12719_v52 = vor.u32 %v13871_v15, %v12718_v23  ;;  %v12446_v53 = vld [vmem:[%s14469_s29 + $0x1c88] sm:$0xf] }
 0x34c   : > { %7901 = vmatpush.bf16.msrb.mxu0 %v12495_v0  ;;  %7870 = vmatmul.bf16.vlgmr.msra.gmra.mxu1 %v15129_v4  ;;  %v13803_v1 = vld [vmem:[%s14469_s29 + $0x1c94] sm:$0xf0]  ;;  %v12574_v13 = vld [vmem:[%s14469_s29 + $0x1d88] sm:$0xf]  ;;  %v12847_v16 = vor.u32 %v13903_v48, %v12846_v44 }
 0x34d   : > { %7914 = vmatpush.bf16.msrb.mxu1 %v12623_v58  ;;  %7883 = vmatmul.bf16.vlgmr.msra.gmra.mxu2 %v15127_v25  ;;  %v13835_v34 = vld [vmem:[%s14469_s29 + $0x1d94] sm:$0xf0]  ;;  %v12702_v0 = vld [vmem:[%s14469_s29 + $0x1e88] sm:$0xf] }
 0x34e   : > { %7927 = vmatpush.bf16.msrb.mxu2 %v12751_v17  ;;  %7896 = vmatmul.bf16.vlgmr.msra.gmra.mxu3 %v15133_v10  ;;  %v13867_v58 = vld [vmem:[%s14469_s29 + $0x1e94] sm:$0xf0]  ;;  %v7650_v17 = vpop.f32.mrf.mxu0  ;;  %v12830_v39 = vld [vmem:[%s14469_s29 + $0x1f88] sm:$0xf]  ;;  %v12575_v63 = vor.u32 %v13835_v34, %v12574_v13 }
 0x34f   : > { %7940 = vmatpush.bf16.msrb.mxu3 %v12879_v2  ;;  %v13899_v24 = vld [vmem:[%s14469_s29 + $0x1f94] sm:$0xf0]  ;;  %v7651_v57 = vadd.f32 %v7650_v17, %v16266_v40  ;;  %v12447_v2 = vor.u32 %v13803_v1, %v12446_v53  ;;  %v12703_v7 = vor.u32 %v13867_v58, %v12702_v0  ;;  %v12430_v6 = vld [vmem:[%s14469_s29 + $0x1c68] sm:$0xf] }
 0x350   : > { %7902 = vmatpush.bf16.msrb.mxu0 %v12479_v60  ;;  %v13799_v19 = vld [vmem:[%s14469_s29 + $0x1c74] sm:$0xf0]  ;;  %v12558_v60 = vld [vmem:[%s14469_s29 + $0x1d68] sm:$0xf] }
 0x351   : > { %7915 = vmatpush.bf16.msrb.mxu1 %v12607_v9  ;;  %v12831_v9 = vor.u32 %v13899_v24, %v12830_v39  ;;  %v13831_v21 = vld [vmem:[%s14469_s29 + $0x1d74] sm:$0xf0]  ;;  %v12686_v14 = vld [vmem:[%s14469_s29 + $0x1e68] sm:$0xf]  ;;  %v12431_v37 = vor.u32 %v13799_v19, %v12430_v6  ;;  %v7689_v34 = vpop.f32.mrf.mxu3  ;;  %v7665_v24 = vpop.f32.mrf.mxu1 }
 0x352   : > { %7928 = vmatpush.bf16.msrb.mxu2 %v12735_v3  ;;  %v7664_v3 = vadd.f32 %v7663_v5, %v7651_v57  ;;  %v13863_v40 = vld [vmem:[%s14469_s29 + $0x1e74] sm:$0xf0]  ;;  %v12814_v61 = vld [vmem:[%s14469_s29 + $0x1f68] sm:$0xf]  ;;  %v12559_v23 = vor.u32 %v13831_v21, %v12558_v60  ;;  %v9168_v24 = vld [vmem:[%s14469_s29 + $0x2f8] sm:$0xf0] }
 0x353   : > { %7941 = vmatpush.bf16.msrb.mxu3 %v12863_v49  ;;  %v13895_v49 = vld [vmem:[%s14469_s29 + $0x1f74] sm:$0xf0]  ;;  %v12687_v15 = vor.u32 %v13863_v40, %v12686_v14  ;;  %v12414_v44 = vld [vmem:[%s14469_s29 + $0x1c48] sm:$0xf] }
 0x354   : > { %7903 = vmatpush.bf16.msrb.mxu0 %v12463_v59  ;;  %v13795_v48 = vld [vmem:[%s14469_s29 + $0x1c54] sm:$0xf0]  ;;  %v12542_v59 = vld [vmem:[%s14469_s29 + $0x1d48] sm:$0xf] }
 0x355   : > { %7916 = vmatpush.bf16.msrb.mxu1 %v12591_v27  ;;  %v12815_v27 = vor.u32 %v13895_v49, %v12814_v61  ;;  %v13827_v53 = vld [vmem:[%s14469_s29 + $0x1d54] sm:$0xf0]  ;;  %v12670_v1 = vld [vmem:[%s14469_s29 + $0x1e48] sm:$0xf]  ;;  %v12415_v39 = vor.u32 %v13795_v48, %v12414_v44 }
 0x356   : > { %7929 = vmatpush.bf16.msrb.mxu2 %v12719_v52  ;;  %v7676_v52 = vpop.f32.mrf.mxu2  ;;  %v13859_v13 = vld [vmem:[%s14469_s29 + $0x1e54] sm:$0xf0]  ;;  %v12798_v0 = vld [vmem:[%s14469_s29 + $0x1f48] sm:$0xf]  ;;  %v7652_v17 = vpop.f32.mrf.mxu0 }
 0x357   : > { %7942 = vmatpush.bf16.msrb.mxu3 %v12847_v16  ;;  %v7677_v16 = vadd.f32 %v7676_v52, %v7664_v3  ;;  %v13891_v58 = vld [vmem:[%s14469_s29 + $0x1f54] sm:$0xf0]  ;;  %v12671_v5 = vor.u32 %v13859_v13, %v12670_v1  ;;  %v12526_v6 = vld [vmem:[%s14469_s29 + $0x1d28] sm:$0xf]  ;;  %v12917_v13 = vld [vmem:[%s14469_s29 + $0xec] sm:$0xf] }
 0x358   : > { %7904 = vmatpush.bf16.msrb.mxu0 %v12447_v2  ;;  %v12543_v2 = vor.u32 %v13827_v53, %v12542_v59  ;;  %v12799_v19 = vor.u32 %v13891_v58, %v12798_v0  ;;  %v13823_v60 = vld [vmem:[%s14469_s29 + $0x1d34] sm:$0xf0]  ;;  %v12782_v21 = vld [vmem:[%s14469_s29 + $0x1f28] sm:$0xf]  ;;  %v9040_v17 = vld [vmem:[%s14469_s29 + $0x1f8] sm:$0xf0] }
 0x359   : > { %7917 = vmatpush.bf16.msrb.mxu1 %v12575_v63  ;;  %v16337_v57 = vadd.f32 %v7689_v34, %v7677_v16  ;;  %v12398_v63 = vld [vmem:[%s14469_s29 + $0x1c28] sm:$0xf]  ;;  %v13855_v3 = vld [vmem:[%s14469_s29 + $0x1e34] sm:$0xf0]  ;;  %v8912_v16 = vld [vmem:[%s14469_s29 + $0xf8] sm:$0xf0]  ;;  %v7691_v0 = vpop.f32.mrf.mxu3 }
 0x35a   : > { %7930 = vmatpush.bf16.msrb.mxu2 %v12703_v7  ;;  %v13791_v7 = vld [vmem:[%s14469_s29 + $0x1c34] sm:$0xf0]  ;;  %v12382_v61 = vld [vmem:[%s14469_s29 + $0x1c08] sm:$0xf]  ;;  %v12949_v34 = vld [vmem:[%s14469_s29 + $0x1ec] sm:$0xf] }
 0x35b   : > { %7943 = vmatpush.bf16.msrb.mxu3 %v12831_v9  ;;  %v12654_v9 = vld [vmem:[%s14469_s29 + $0x1e28] sm:$0xf]  ;;  %v13887_v14 = vld [vmem:[%s14469_s29 + $0x1f34] sm:$0xf0]  ;;  %v12399_v40 = vor.u32 %v13791_v7, %v12398_v63  ;;  %v13013_v63 = vld [vmem:[%s14469_s29 + $0x3ec] sm:$0xf] }
 0x35c   : > { %7905 = vmatpush.bf16.msrb.mxu0 %v12431_v37  ;;  %v13787_v49 = vld [vmem:[%s14469_s29 + $0x1c14] sm:$0xf0]  ;;  %v12527_v37 = vor.u32 %v13823_v60, %v12526_v6  ;;  %v12638_v48 = vld [vmem:[%s14469_s29 + $0x1e08] sm:$0xf]  ;;  %v12783_v59 = vor.u32 %v13887_v14, %v12782_v21  ;;  %v9296_v7 = vld [vmem:[%s14469_s29 + $0x3f8] sm:$0xf0]  ;;  %v9043_v60 = vor.u32 %v12949_v34, %v9040_v17 }
 0x35d   : > { %7918 = vmatpush.bf16.msrb.mxu1 %v12559_v23  ;;  %v12655_v23 = vor.u32 %v13855_v3, %v12654_v9  ;;  %v13819_v44 = vld [vmem:[%s14469_s29 + $0x1d14] sm:$0xf0]  ;;  %v12766_v52 = vld [vmem:[%s14469_s29 + $0x1f08] sm:$0xf]  ;;  %v12383_v58 = vor.u32 %v13787_v49, %v12382_v61  ;;  %v12913_v3 = vld [vmem:[%s14469_s29 + $0xcc] sm:$0xf] }
 0x35e   : > { %7931 = vmatpush.bf16.msrb.mxu2 %v12687_v15  ;;  %v12510_v15 = vld [vmem:[%s14469_s29 + $0x1d08] sm:$0xf]  ;;  %v13883_v53 = vld [vmem:[%s14469_s29 + $0x1f14] sm:$0xf0]  ;;  %v7678_v1 = vpop.f32.mrf.mxu2  ;;  %v8896_v21 = vld [vmem:[%s14469_s29 + $0xd8] sm:$0xf0] }
 0x35f   : > { %7944 = vmatpush.bf16.msrb.mxu3 %v12815_v27  ;;  %v13851_v27 = vld [vmem:[%s14469_s29 + $0x1e14] sm:$0xf0]  ;;  %v12767_v6 = vor.u32 %v13883_v53, %v12766_v52  ;;  %v12945_v14 = vld [vmem:[%s14469_s29 + $0x1cc] sm:$0xf]  ;;  %v9024_v61 = vld [vmem:[%s14469_s29 + $0x1d8] sm:$0xf0] }
 0x360   : > { %7906 = vmatpush.bf16.msrb.mxu0 %v12415_v39  ;;  %v12981_v39 = vld [vmem:[%s14469_s29 + $0x2ec] sm:$0xf]  ;;  %v8880_v52 = vld [vmem:[%s14469_s29 + $0xb8] sm:$0xf0] }
 0x361   : > { %7919 = vmatpush.bf16.msrb.mxu1 %v12543_v2  ;;  %v12511_v2 = vor.u32 %v13819_v44, %v12510_v15  ;;  %v9171_v9 = vor.u32 %v12981_v39, %v9168_v24  ;;  %v12977_v49 = vld [vmem:[%s14469_s29 + $0x2cc] sm:$0xf]  ;;  %v9280_v15 = vld [vmem:[%s14469_s29 + $0x3d8] sm:$0xf0]  ;;  %v8899_v44 = vor.u32 %v12913_v3, %v8896_v21 }
 0x362   : > { %7932 = vmatpush.bf16.msrb.mxu2 %v12671_v5  ;;  %v12639_v5 = vor.u32 %v13851_v27, %v12638_v48  ;;  %v9027_v48 = vor.u32 %v12945_v14, %v9024_v61  ;;  %v12909_v27 = vld [vmem:[%s14469_s29 + $0xac] sm:$0xf]  ;;  %v9136_v34 = vld [vmem:[%s14469_s29 + $0x2b8] sm:$0xf0] }
 0x363   : > { %7945 = vmatpush.bf16.msrb.mxu3 %v12799_v19  ;;  %v8915_v19 = vor.u32 %v12917_v13, %v8912_v16  ;;  %v12941_v53 = vld [vmem:[%s14469_s29 + $0x1ac] sm:$0xf]  ;;  %v9008_v13 = vld [vmem:[%s14469_s29 + $0x1b8] sm:$0xf0]  ;;  %v8883_v17 = vor.u32 %v12909_v27, %v8880_v52 }
 0x364   : > { %7907 = vmatpush.bf16.msrb.mxu0 %v12399_v40  ;;  %v9299_v40 = vor.u32 %v13013_v63, %v9296_v7  ;;  %v12973_v16 = vld [vmem:[%s14469_s29 + $0x2ac] sm:$0xf]  ;;  %v9011_v39 = vor.u32 %v12941_v53, %v9008_v13  ;;  %v9248_v21 = vld [vmem:[%s14469_s29 + $0x398] sm:$0xf0] }
 0x365   : > { %7920 = vmatpush.bf16.msrb.mxu1 %v12527_v37  ;;  %v9152_v37 = vld [vmem:[%s14469_s29 + $0x2d8] sm:$0xf0]  ;;  %v13005_v0 = vld [vmem:[%s14469_s29 + $0x3ac] sm:$0xf]  ;;  %v9139_v24 = vor.u32 %v12973_v16, %v9136_v34 }
 0x366   : > { %7933 = vmatpush.bf16.msrb.mxu2 %v12655_v23  ;;  %v13009_v23 = vld [vmem:[%s14469_s29 + $0x3cc] sm:$0xf]  ;;  %v8976_v27 = vld [vmem:[%s14469_s29 + $0x178] sm:$0xf0] }
 0x367   : > { %7946 = vmatpush.bf16.msrb.mxu3 %v12783_v59  ;;  %v9155_v59 = vor.u32 %v12977_v49, %v9152_v37  ;;  %v9283_v1 = vor.u32 %v13009_v23, %v9280_v15  ;;  %v12937_v63 = vld [vmem:[%s14469_s29 + $0x18c] sm:$0xf]  ;;  %v8848_v15 = vld [vmem:[%s14469_s29 + $0x78] sm:$0xf0] }
 0x368   : > { %7908 = vmatpush.bf16.msrb.mxu0 %v12383_v58  ;;  %v9264_v58 = vld [vmem:[%s14469_s29 + $0x3b8] sm:$0xf0]  ;;  %v13001_v3 = vld [vmem:[%s14469_s29 + $0x38c] sm:$0xf] }
 0x369   : > { %7921 = vmatpush.bf16.msrb.mxu1 %v12511_v2  ;;  %v12905_v2 = vld [vmem:[%s14469_s29 + $0x8c] sm:$0xf]  ;;  %v9267_v7 = vor.u32 %v13005_v0, %v9264_v58  ;;  %v7715_v61 = vpop.f32.mrf.mxu1  ;;  %v8832_v58 = vld [vmem:[%s14469_s29 + $0x58] sm:$0xf0] }
 0x36a   : > { %7934 = vmatpush.bf16.msrb.mxu2 %v12639_v5  ;;  %v8864_v5 = vld [vmem:[%s14469_s29 + $0x98] sm:$0xf0]  ;;  %v12901_v23 = vld [vmem:[%s14469_s29 + $0x6c] sm:$0xf] }
 0x36b   : > { %7947 = vmatpush.bf16.msrb.mxu3 %v12767_v6  ;;  %7909 = vmatmul.bf16.vlgmr.msrb.gmra.mxu0 %v15201_v8  ;;  %v8992_v6 = vld [vmem:[%s14469_s29 + $0x198] sm:$0xf0]  ;;  %v12965_v52 = vld [vmem:[%s14469_s29 + $0x26c] sm:$0xf]  ;;  %v8851_v13 = vor.u32 %v12901_v23, %v8848_v15 }
 0x36c   : > { %7953 = vmatpush.bf16.msra.mxu0 %v8915_v19  ;;  %7922 = vmatmul.bf16.vlgmr.msrb.gmra.mxu1 %v15208_v50  ;;  %v12969_v19 = vld [vmem:[%s14469_s29 + $0x28c] sm:$0xf]  ;;  %v8995_v49 = vor.u32 %v12937_v63, %v8992_v6  ;;  %v9088_v63 = vld [vmem:[%s14469_s29 + $0x258] sm:$0xf0] }
 0x36d   : > { %7966 = vmatpush.bf16.msra.mxu1 %v9043_v60  ;;  %7935 = vmatmul.bf16.vlgmr.msrb.gmra.mxu2 %v15206_v11  ;;  %v9120_v60 = vld [vmem:[%s14469_s29 + $0x298] sm:$0xf0]  ;;  %v12997_v53 = vld [vmem:[%s14469_s29 + $0x36c] sm:$0xf] }
 0x36e   : > { %7979 = vmatpush.bf16.msra.mxu2 %v9171_v9  ;;  %7948 = vmatmul.bf16.vlgmr.msrb.gmra.mxu3 %v15212_v12  ;;  %v7702_v9 = vpop.f32.mrf.mxu0  ;;  %v9123_v37 = vor.u32 %v12969_v19, %v9120_v60  ;;  %v12897_v0 = vld [vmem:[%s14469_s29 + $0x4c] sm:$0xf]  ;;  %v9216_v60 = vld [vmem:[%s14469_s29 + $0x358] sm:$0xf0] }
 0x36f   : > { %7992 = vmatpush.bf16.msra.mxu3 %v9299_v40  ;;  %v7703_v14 = vadd.f32 %v7702_v9, %v16337_v57  ;;  %v8867_v40 = vor.u32 %v12905_v2, %v8864_v5  ;;  %v9104_v57 = vld [vmem:[%s14469_s29 + $0x278] sm:$0xf0]  ;;  %v12961_v5 = vld [vmem:[%s14469_s29 + $0x24c] sm:$0xf] }
 0x370   : > { %7954 = vmatpush.bf16.msra.mxu0 %v8899_v44  ;;  %v12933_v44 = vld [vmem:[%s14469_s29 + $0x16c] sm:$0xf]  ;;  %v9107_v34 = vor.u32 %v12965_v52, %v9104_v57  ;;  %v8960_v2 = vld [vmem:[%s14469_s29 + $0x158] sm:$0xf0] }
 0x371   : > { %7967 = vmatpush.bf16.msra.mxu1 %v9027_v48  ;;  %v9251_v48 = vor.u32 %v13001_v3, %v9248_v21  ;;  %v8979_v16 = vor.u32 %v12933_v44, %v8976_v27  ;;  %v7741_v6 = vpop.f32.mrf.mxu3  ;;  %v12993_v19 = vld [vmem:[%s14469_s29 + $0x34c] sm:$0xf]  ;;  %v8835_v3 = vor.u32 %v12897_v0, %v8832_v58  ;;  %v7717_v21 = vpop.f32.mrf.mxu1  ;;  %v8944_v44 = vld [vmem:[%s14469_s29 + $0x138] sm:$0xf0] }
 0x372   : > { %7980 = vmatpush.bf16.msra.mxu2 %v9155_v59  ;;  %v7716_v59 = vadd.f32 %v7715_v61, %v7703_v14  ;;  %v9091_v61 = vor.u32 %v12961_v5, %v9088_v63  ;;  %v12925_v23 = vld [vmem:[%s14469_s29 + $0x12c] sm:$0xf]  ;;  %v9219_v15 = vor.u32 %v12993_v19, %v9216_v60  ;;  %v9200_v52 = vld [vmem:[%s14469_s29 + $0x338] sm:$0xf0] }
 0x373   : > { %7993 = vmatpush.bf16.msra.mxu3 %v9283_v1  ;;  %v9232_v1 = vld [vmem:[%s14469_s29 + $0x378] sm:$0xf0]  ;;  %v12989_v27 = vld [vmem:[%s14469_s29 + $0x32c] sm:$0xf] }
 0x374   : > { %7955 = vmatpush.bf16.msra.mxu0 %v8883_v17  ;;  %v12929_v17 = vld [vmem:[%s14469_s29 + $0x14c] sm:$0xf]  ;;  %v8928_v0 = vld [vmem:[%s14469_s29 + $0x118] sm:$0xf0] }
 0x375   : > { %7968 = vmatpush.bf16.msra.mxu1 %v9011_v39  ;;  %v9235_v39 = vor.u32 %v12997_v53, %v9232_v1  ;;  %v12889_v53 = vld [vmem:[%s14469_s29 + $0xc] sm:$0xf]  ;;  %v8800_v1 = vld [vmem:[%s14469_s29 + $0x18] sm:$0xf0] }
 0x376   : > { %7981 = vmatpush.bf16.msra.mxu2 %v9139_v24  ;;  %v7728_v24 = vpop.f32.mrf.mxu2  ;;  %v7704_v9 = vpop.f32.mrf.mxu0  ;;  %v12953_v58 = vld [vmem:[%s14469_s29 + $0x20c] sm:$0xf]  ;;  %v8803_v60 = vor.u32 %v12889_v53, %v8800_v1  ;;  %v9680_v21 = vld [vmem:[%s14469_s29 + $0x6f8] sm:$0xf0] }
 0x377   : > { %7994 = vmatpush.bf16.msra.mxu3 %v9267_v7  ;;  %v7729_v7 = vadd.f32 %v7728_v24, %v7716_v59  ;;  %v9072_v59 = vld [vmem:[%s14469_s29 + $0x238] sm:$0xf0]  ;;  %v12985_v24 = vld [vmem:[%s14469_s29 + $0x30c] sm:$0xf] }
 0x378   : > { %7956 = vmatpush.bf16.msra.mxu0 %v8867_v40  ;;  %v8963_v40 = vor.u32 %v12929_v17, %v8960_v2  ;;  %v9203_v17 = vor.u32 %v12989_v27, %v9200_v52  ;;  %v9184_v2 = vld [vmem:[%s14469_s29 + $0x318] sm:$0xf0]  ;;  %v13045_v63 = vld [vmem:[%s14469_s29 + $0x4ec] sm:$0xf] }
 0x379   : > { %7969 = vmatpush.bf16.msra.mxu1 %v8995_v49  ;;  %v16408_v14 = vadd.f32 %v7741_v6, %v7729_v7  ;;  %v12893_v49 = vld [vmem:[%s14469_s29 + $0x2c] sm:$0xf]  ;;  %v9424_v7 = vld [vmem:[%s14469_s29 + $0x4f8] sm:$0xf0]  ;;  %v7743_v19 = vpop.f32.mrf.mxu3 }
 0x37a   : > { %7982 = vmatpush.bf16.msra.mxu2 %v9123_v37  ;;  %v8816_v37 = vld [vmem:[%s14469_s29 + $0x38] sm:$0xf0]  ;;  %v13077_v6 = vld [vmem:[%s14469_s29 + $0x5ec] sm:$0xf] }
 0x37b   : > { %7995 = vmatpush.bf16.msra.mxu3 %v9251_v48  ;;  %v12957_v48 = vld [vmem:[%s14469_s29 + $0x22c] sm:$0xf]  ;;  %v8819_v57 = vor.u32 %v12893_v49, %v8816_v37  ;;  %v9552_v9 = vld [vmem:[%s14469_s29 + $0x5f8] sm:$0xf0] }
 0x37c   : > { %7957 = vmatpush.bf16.msra.mxu0 %v8851_v13  ;;  %v8947_v13 = vor.u32 %v12925_v23, %v8944_v44  ;;  %v13141_v49 = vld [vmem:[%s14469_s29 + $0x7ec] sm:$0xf]  ;;  %v9808_v37 = vld [vmem:[%s14469_s29 + $0x7f8] sm:$0xf0]  ;;  %v9187_v23 = vor.u32 %v12985_v24, %v9184_v2  ;;  %v9555_v44 = vor.u32 %v13077_v6, %v9552_v9 }
 0x37d   : > { %7970 = vmatpush.bf16.msra.mxu1 %v8979_v16  ;;  %v9075_v16 = vor.u32 %v12957_v48, %v9072_v59  ;;  %v13041_v59 = vld [vmem:[%s14469_s29 + $0x4cc] sm:$0xf]  ;;  %v9408_v27 = vld [vmem:[%s14469_s29 + $0x4d8] sm:$0xf0] }
 0x37e   : > { %7983 = vmatpush.bf16.msra.mxu2 %v9107_v34  ;;  %v12921_v34 = vld [vmem:[%s14469_s29 + $0x10c] sm:$0xf]  ;;  %v7730_v5 = vpop.f32.mrf.mxu2  ;;  %v9536_v53 = vld [vmem:[%s14469_s29 + $0x5d8] sm:$0xf0] }
 0x37f   : > { %7996 = vmatpush.bf16.msra.mxu3 %v9235_v39  ;;  %v9056_v39 = vld [vmem:[%s14469_s29 + $0x218] sm:$0xf0]  ;;  %v13073_v52 = vld [vmem:[%s14469_s29 + $0x5cc] sm:$0xf] }
 0x380   : > { %7958 = vmatpush.bf16.msra.mxu0 %v8835_v3  ;;  %v13109_v3 = vld [vmem:[%s14469_s29 + $0x6ec] sm:$0xf]  ;;  %v9392_v24 = vld [vmem:[%s14469_s29 + $0x4b8] sm:$0xf0] }
 0x381   : > { %7971 = vmatpush.bf16.msra.mxu1 %v8963_v40  ;;  %v8931_v40 = vor.u32 %v12921_v34, %v8928_v0  ;;  %v9683_v48 = vor.u32 %v13109_v3, %v9680_v21  ;;  %v13105_v1 = vld [vmem:[%s14469_s29 + $0x6cc] sm:$0xf]  ;;  %v9792_v34 = vld [vmem:[%s14469_s29 + $0x7d8] sm:$0xf0]  ;;  %v9411_v0 = vor.u32 %v13041_v59, %v9408_v27 }
 0x382   : > { %7984 = vmatpush.bf16.msra.mxu2 %v9091_v61  ;;  %v9059_v61 = vor.u32 %v12953_v58, %v9056_v39  ;;  %v9539_v58 = vor.u32 %v13073_v52, %v9536_v53  ;;  %v13037_v39 = vld [vmem:[%s14469_s29 + $0x4ac] sm:$0xf]  ;;  %v9648_v6 = vld [vmem:[%s14469_s29 + $0x6b8] sm:$0xf0] }
 0x383   : > { %7997 = vmatpush.bf16.msra.mxu3 %v9219_v15  ;;  %v9427_v15 = vor.u32 %v13045_v63, %v9424_v7  ;;  %v13069_v2 = vld [vmem:[%s14469_s29 + $0x5ac] sm:$0xf]  ;;  %v9520_v63 = vld [vmem:[%s14469_s29 + $0x5b8] sm:$0xf0]  ;;  %v9395_v9 = vor.u32 %v13037_v39, %v9392_v24 }
 0x384   : > { %7959 = vmatpush.bf16.msra.mxu0 %v8819_v57  ;;  %v9811_v57 = vor.u32 %v13141_v49, %v9808_v37  ;;  %v13101_v7 = vld [vmem:[%s14469_s29 + $0x6ac] sm:$0xf]  ;;  %v9523_v3 = vor.u32 %v13069_v2, %v9520_v63  ;;  %v9632_v37 = vld [vmem:[%s14469_s29 + $0x698] sm:$0xf0] }
 0x385   : > { %7972 = vmatpush.bf16.msra.mxu1 %v8947_v13  ;;  %v9664_v13 = vld [vmem:[%s14469_s29 + $0x6d8] sm:$0xf0]  ;;  %v13133_v19 = vld [vmem:[%s14469_s29 + $0x7ac] sm:$0xf]  ;;  %v9651_v21 = vor.u32 %v13101_v7, %v9648_v6 }
 0x386   : > { %7985 = vmatpush.bf16.msra.mxu2 %v9075_v16  ;;  %v13137_v16 = vld [vmem:[%s14469_s29 + $0x7cc] sm:$0xf]  ;;  %v9360_v53 = vld [vmem:[%s14469_s29 + $0x478] sm:$0xf0] }
 0x387   : > { %7998 = vmatpush.bf16.msra.mxu3 %v9203_v17  ;;  %v9667_v17 = vor.u32 %v13105_v1, %v9664_v13  ;;  %v9795_v5 = vor.u32 %v13137_v16, %v9792_v34  ;;  %v13061_v1 = vld [vmem:[%s14469_s29 + $0x56c] sm:$0xf]  ;;  %v9488_v34 = vld [vmem:[%s14469_s29 + $0x578] sm:$0xf0] }
 0x388   : > { %7960 = vmatpush.bf16.msra.mxu0 %v8803_v60  ;;  %v9776_v60 = vld [vmem:[%s14469_s29 + $0x7b8] sm:$0xf0]  ;;  %v9491_v24 = vor.u32 %v13061_v1, %v9488_v34  ;;  %v13057_v7 = vld [vmem:[%s14469_s29 + $0x54c] sm:$0xf] }
 0x389   : > { %7973 = vmatpush.bf16.msra.mxu1 %v8931_v40  ;;  %v9376_v40 = vld [vmem:[%s14469_s29 + $0x498] sm:$0xf0]  ;;  %v9779_v49 = vor.u32 %v13133_v19, %v9776_v60  ;;  %v7767_v59 = vpop.f32.mrf.mxu1 }
 0x38a   : > { %7986 = vmatpush.bf16.msra.mxu2 %v9059_v61  ;;  %v13065_v61 = vld [vmem:[%s14469_s29 + $0x58c] sm:$0xf]  ;;  %v9344_v63 = vld [vmem:[%s14469_s29 + $0x458] sm:$0xf0] }
 0x38b   : > { %7999 = vmatpush.bf16.msra.mxu3 %v9187_v23  ;;  %7961 = vmatmul.bf16.vlgmr.msra.gmra.mxu0 %v14625_v45  ;;  %v9504_v45 = vld [vmem:[%s14469_s29 + $0x598] sm:$0xf0]  ;;  %v7754_v23 = vpop.f32.mrf.mxu0 }
 0x38c   : > { %8005 = vmatpush.bf16.msrb.mxu0 %v9427_v15  ;;  %7974 = vmatmul.bf16.vlgmr.msra.gmra.mxu1 %v14627_v46  ;;  %v13129_v15 = vld [vmem:[%s14469_s29 + $0x78c] sm:$0xf]  ;;  %v7755_v46 = vadd.f32 %v7754_v23, %v16408_v14  ;;  %v9507_v27 = vor.u32 %v13065_v61, %v9504_v45  ;;  %v9616_v14 = vld [vmem:[%s14469_s29 + $0x678] sm:$0xf0] }
 0x38d   : > { %8018 = vmatpush.bf16.msrb.mxu1 %v9555_v44  ;;  %7987 = vmatmul.bf16.vlgmr.msra.gmra.mxu2 %v14612_v29  ;;  %v13033_v29 = vld [vmem:[%s14469_s29 + $0x48c] sm:$0xf]  ;;  %v9760_v44 = vld [vmem:[%s14469_s29 + $0x798] sm:$0xf0] }
 0x38e   : > { %8031 = vmatpush.bf16.msrb.mxu2 %v9683_v48  ;;  %8000 = vmatmul.bf16.vlgmr.msra.gmra.mxu3 %v14616_v32  ;;  %v13097_v32 = vld [vmem:[%s14469_s29 + $0x68c] sm:$0xf]  ;;  %v9379_v48 = vor.u32 %v13033_v29, %v9376_v40  ;;  %v9763_v13 = vor.u32 %v13129_v15, %v9760_v44  ;;  %v7768_v16 = vadd.f32 %v7767_v59, %v7755_v46  ;;  %v9472_v60 = vld [vmem:[%s14469_s29 + $0x558] sm:$0xf0] }
 0x38f   : > { %8044 = vmatpush.bf16.msrb.mxu3 %v9811_v57  ;;  %v9635_v52 = vor.u32 %v13097_v32, %v9632_v37  ;;  %v13029_v57 = vld [vmem:[%s14469_s29 + $0x46c] sm:$0xf]  ;;  %v9728_v61 = vld [vmem:[%s14469_s29 + $0x758] sm:$0xf0]  ;;  %v9475_v23 = vor.u32 %v13057_v7, %v9472_v60 }
 0x390   : > { %8006 = vmatpush.bf16.msrb.mxu0 %v9411_v0  ;;  %v13093_v0 = vld [vmem:[%s14469_s29 + $0x66c] sm:$0xf]  ;;  %v9363_v39 = vor.u32 %v13029_v57, %v9360_v53  ;;  %v7780_v19 = vpop.f32.mrf.mxu2  ;;  %v9328_v46 = vld [vmem:[%s14469_s29 + $0x438] sm:$0xf0] }
 0x391   : > { %8019 = vmatpush.bf16.msrb.mxu1 %v9539_v58  ;;  %v13125_v58 = vld [vmem:[%s14469_s29 + $0x76c] sm:$0xf]  ;;  %v9619_v2 = vor.u32 %v13093_v0, %v9616_v14  ;;  %v7793_v29 = vpop.f32.mrf.mxu3  ;;  %v7769_v32 = vpop.f32.mrf.mxu1  ;;  %v9584_v57 = vld [vmem:[%s14469_s29 + $0x638] sm:$0xf0] }
 0x392   : > { %8032 = vmatpush.bf16.msrb.mxu2 %v9667_v17  ;;  %v9744_v17 = vld [vmem:[%s14469_s29 + $0x778] sm:$0xf0]  ;;  %v13121_v40 = vld [vmem:[%s14469_s29 + $0x74c] sm:$0xf] }
 0x393   : > { %8045 = vmatpush.bf16.msrb.mxu3 %v9795_v5  ;;  %v13025_v5 = vld [vmem:[%s14469_s29 + $0x44c] sm:$0xf]  ;;  %v9747_v6 = vor.u32 %v13125_v58, %v9744_v17  ;;  %v9731_v59 = vor.u32 %v13121_v40, %v9728_v61  ;;  %v9712_v1 = vld [vmem:[%s14469_s29 + $0x738] sm:$0xf0] }
 0x394   : > { %8007 = vmatpush.bf16.msrb.mxu0 %v9395_v9  ;;  %v13089_v9 = vld [vmem:[%s14469_s29 + $0x64c] sm:$0xf]  ;;  %v9347_v45 = vor.u32 %v13025_v5, %v9344_v63  ;;  %v9312_v34 = vld [vmem:[%s14469_s29 + $0x418] sm:$0xf0] }
 0x395   : > { %8020 = vmatpush.bf16.msrb.mxu1 %v9523_v3  ;;  %v9600_v3 = vld [vmem:[%s14469_s29 + $0x658] sm:$0xf0]  ;;  %v13021_v44 = vld [vmem:[%s14469_s29 + $0x42c] sm:$0xf] }
 0x396   : > { %8033 = vmatpush.bf16.msrb.mxu2 %v9651_v21  ;;  %v7781_v21 = vadd.f32 %v7780_v19, %v7768_v16  ;;  %v9603_v15 = vor.u32 %v13089_v9, %v9600_v3  ;;  %v13117_v53 = vld [vmem:[%s14469_s29 + $0x72c] sm:$0xf]  ;;  %v9440_v17 = vld [vmem:[%s14469_s29 + $0x518] sm:$0xf0] }
 0x397   : > { %8046 = vmatpush.bf16.msrb.mxu3 %v9779_v49  ;;  %v7756_v49 = vpop.f32.mrf.mxu0  ;;  %v13017_v16 = vld [vmem:[%s14469_s29 + $0x40c] sm:$0xf]  ;;  %v9696_v63 = vld [vmem:[%s14469_s29 + $0x718] sm:$0xf0] }
 0x398   : > { %8008 = vmatpush.bf16.msrb.mxu0 %v9379_v48  ;;  %v16479_v37 = vadd.f32 %v7793_v29, %v7781_v21  ;;  %v13053_v48 = vld [vmem:[%s14469_s29 + $0x52c] sm:$0xf]  ;;  %v7782_v7 = vpop.f32.mrf.mxu2  ;;  %v9936_v19 = vld [vmem:[%s14469_s29 + $0x8f8] sm:$0xf0]  ;;  %v9315_v3 = vor.u32 %v13017_v16, %v9312_v34 }
 0x399   : > { %8021 = vmatpush.bf16.msrb.mxu1 %v9507_v27  ;;  %v9456_v27 = vld [vmem:[%s14469_s29 + $0x538] sm:$0xf0]  ;;  %v13049_v58 = vld [vmem:[%s14469_s29 + $0x50c] sm:$0xf]  ;;  %v7795_v9 = vpop.f32.mrf.mxu3 }
 0x39a   : > { %8034 = vmatpush.bf16.msrb.mxu2 %v9635_v52  ;;  %v13085_v52 = vld [vmem:[%s14469_s29 + $0x62c] sm:$0xf]  ;;  %v9459_v0 = vor.u32 %v13053_v48, %v9456_v27  ;;  %v10064_v21 = vld [vmem:[%s14469_s29 + $0x9f8] sm:$0xf0]  ;;  %v9443_v61 = vor.u32 %v13049_v58, %v9440_v17 }
 0x39b   : > { %8047 = vmatpush.bf16.msrb.mxu3 %v9763_v13  ;;  %v9331_v13 = vor.u32 %v13021_v44, %v9328_v46  ;;  %v9587_v14 = vor.u32 %v13085_v52, %v9584_v57  ;;  %v13113_v5 = vld [vmem:[%s14469_s29 + $0x70c] sm:$0xf]  ;;  %v10192_v40 = vld [vmem:[%s14469_s29 + $0xaf8] sm:$0xf0] }
 0x39c   : > { %8009 = vmatpush.bf16.msrb.mxu0 %v9363_v39  ;;  %v13081_v39 = vld [vmem:[%s14469_s29 + $0x60c] sm:$0xf]  ;;  %v10320_v32 = vld [vmem:[%s14469_s29 + $0xbf8] sm:$0xf0] }
 0x39d   : > { %8022 = vmatpush.bf16.msrb.mxu1 %v9491_v24  ;;  %v9715_v24 = vor.u32 %v13117_v53, %v9712_v1  ;;  %v13205_v60 = vld [vmem:[%s14469_s29 + $0x9ec] sm:$0xf]  ;;  %v10048_v57 = vld [vmem:[%s14469_s29 + $0x9d8] sm:$0xf0] }
 0x39e   : > { %8035 = vmatpush.bf16.msrb.mxu2 %v9619_v2  ;;  %v9568_v2 = vld [vmem:[%s14469_s29 + $0x618] sm:$0xf0]  ;;  %v13237_v29 = vld [vmem:[%s14469_s29 + $0xaec] sm:$0xf]  ;;  %v10067_v44 = vor.u32 %v13205_v60, %v10064_v21 }
 0x39f   : > { %8048 = vmatpush.bf16.msrb.mxu3 %v9747_v6  ;;  %v13173_v6 = vld [vmem:[%s14469_s29 + $0x8ec] sm:$0xf]  ;;  %v9571_v49 = vor.u32 %v13081_v39, %v9568_v2  ;;  %v10195_v46 = vor.u32 %v13237_v29, %v10192_v40  ;;  %v10176_v1 = vld [vmem:[%s14469_s29 + $0xad8] sm:$0xf0] }
 0x3a0   : > { %8010 = vmatpush.bf16.msrb.mxu0 %v9347_v45  ;;  %v13269_v45 = vld [vmem:[%s14469_s29 + $0xbec] sm:$0xf]  ;;  %v10304_v16 = vld [vmem:[%s14469_s29 + $0xbd8] sm:$0xf0] }
 0x3a1   : > { %8023 = vmatpush.bf16.msrb.mxu1 %v9475_v23  ;;  %v9699_v23 = vor.u32 %v13113_v5, %v9696_v63  ;;  %v13169_v48 = vld [vmem:[%s14469_s29 + $0x8cc] sm:$0xf]  ;;  %v10323_v52 = vor.u32 %v13269_v45, %v10320_v32  ;;  %v9904_v17 = vld [vmem:[%s14469_s29 + $0x8b8] sm:$0xf0] }
 0x3a2   : > { %8036 = vmatpush.bf16.msrb.mxu2 %v9603_v15  ;;  %v9939_v15 = vor.u32 %v13173_v6, %v9936_v19  ;;  %v13201_v27 = vld [vmem:[%s14469_s29 + $0x9cc] sm:$0xf]  ;;  %v10032_v2 = vld [vmem:[%s14469_s29 + $0x9b8] sm:$0xf0] }
 0x3a3   : > { %8049 = vmatpush.bf16.msrb.mxu3 %v9731_v59  ;;  %v9920_v59 = vld [vmem:[%s14469_s29 + $0x8d8] sm:$0xf0]  ;;  %v13233_v53 = vld [vmem:[%s14469_s29 + $0xacc] sm:$0xf] }
 0x3a4   : > { %8011 = vmatpush.bf16.msrb.mxu0 %v9331_v13  ;;  %v13265_v13 = vld [vmem:[%s14469_s29 + $0xbcc] sm:$0xf]  ;;  %v9923_v34 = vor.u32 %v13169_v48, %v9920_v59  ;;  %v10160_v63 = vld [vmem:[%s14469_s29 + $0xab8] sm:$0xf0] }
 0x3a5   : > { %8024 = vmatpush.bf16.msrb.mxu1 %v9459_v0  ;;  %v10051_v0 = vor.u32 %v13201_v27, %v10048_v57  ;;  %v13165_v58 = vld [vmem:[%s14469_s29 + $0x8ac] sm:$0xf]  ;;  %v10288_v6 = vld [vmem:[%s14469_s29 + $0xbb8] sm:$0xf0] }
 0x3a6   : > { %8037 = vmatpush.bf16.msrb.mxu2 %v9587_v14  ;;  %v10179_v14 = vor.u32 %v13233_v53, %v10176_v1  ;;  %v13197_v39 = vld [vmem:[%s14469_s29 + $0x9ac] sm:$0xf]  ;;  %v9907_v19 = vor.u32 %v13165_v58, %v9904_v17  ;;  %v17047_v60 = vld [vmem:[#allocation21_spill] sm:$0xff] }
 0x3a7   : > { %8050 = vmatpush.bf16.msrb.mxu3 %v9715_v24  ;;  %v10307_v24 = vor.u32 %v13265_v13, %v10304_v16  ;;  %v13229_v5 = vld [vmem:[%s14469_s29 + $0xaac] sm:$0xf]  ;;  %v9888_v21 = vld [vmem:[%s14469_s29 + $0x898] sm:$0xf0] }
 0x3a8   : > { %8012 = vmatpush.bf16.msrb.mxu0 %v9315_v3  ;;  %v13261_v7 = vld [vmem:[%s14469_s29 + $0xbac] sm:$0xf]  ;;  %v10163_v9 = vor.u32 %v13229_v5, %v10160_v63  ;;  %v10016_v29 = vld [vmem:[%s14469_s29 + $0x998] sm:$0xf0] }
 0x3a9   : > { %8025 = vmatpush.bf16.msrb.mxu1 %v9443_v61  ;;  %v13161_v3 = vld [vmem:[%s14469_s29 + $0x88c] sm:$0xf]  ;;  %v10144_v61 = vld [vmem:[%s14469_s29 + $0xa98] sm:$0xf0] }
 0x3aa   : > { %8038 = vmatpush.bf16.msrb.mxu2 %v9571_v49  ;;  %v13225_v40 = vld [vmem:[%s14469_s29 + $0xa8c] sm:$0xf]  ;;  %v7806_v49 = vpop.f32.mrf.mxu0  ;;  %v10272_v32 = vld [vmem:[%s14469_s29 + $0xb98] sm:$0xf0] }
 0x3ab   : > { %8051 = vmatpush.bf16.msrb.mxu3 %v9699_v23  ;;  %8013 = vmatmul.bf16.vlgmr.msrb.gmra.mxu0 %v14680_v55  ;;  %v13193_v55 = vld [vmem:[%s14469_s29 + $0x98c] sm:$0xf]  ;;  %v7807_v23 = vadd.f32 %v7806_v49, %v16479_v37  ;;  %v10147_v48 = vor.u32 %v13225_v40, %v10144_v61  ;;  %v9872_v27 = vld [vmem:[%s14469_s29 + $0x878] sm:$0xf0] }
 0x3ac   : > { %8057 = vmatpush.bf16.msra.mxu0 %v9939_v15  ;;  %8026 = vmatmul.bf16.vlgmr.msrb.gmra.mxu1 %v17047_v60  ;;  %v13257_v45 = vld [vmem:[%s14469_s29 + $0xb8c] sm:$0xf]  ;;  %v9891_v15 = vor.u32 %v13161_v3, %v9888_v21  ;;  %v10000_v1 = vld [vmem:[%s14469_s29 + $0x978] sm:$0xf0] }
 0x3ad   : > { %8070 = vmatpush.bf16.msra.mxu1 %v10067_v44  ;;  %8039 = vmatmul.bf16.vlgmr.msrb.gmra.mxu2 %v14670_v41  ;;  %v10035_v41 = vor.u32 %v13197_v39, %v10032_v2  ;;  %v7819_v44 = vpop.f32.mrf.mxu1  ;;  %v13157_v59 = vld [vmem:[%s14469_s29 + $0x86c] sm:$0xf]  ;;  %v10275_v57 = vor.u32 %v13257_v45, %v10272_v32  ;;  %v10128_v37 = vld [vmem:[%s14469_s29 + $0xa78] sm:$0xf0] }
 0x3ae   : > { %8083 = vmatpush.bf16.msra.mxu2 %v10195_v46  ;;  %8052 = vmatmul.bf16.vlgmr.msrb.gmra.mxu3 %v14672_v43  ;;  %v10291_v43 = vor.u32 %v13261_v7, %v10288_v6  ;;  %v10019_v46 = vor.u32 %v13193_v55, %v10016_v29  ;;  %v7820_v53 = vadd.f32 %v7819_v44, %v7807_v23  ;;  %v13221_v13 = vld [vmem:[%s14469_s29 + $0xa6c] sm:$0xf]  ;;  %v9856_v39 = vld [vmem:[%s14469_s29 + $0x858] sm:$0xf0] }
 0x3af   : > { %8096 = vmatpush.bf16.msra.mxu3 %v10323_v52  ;;  %v13189_v52 = vld [vmem:[%s14469_s29 + $0x96c] sm:$0xf]  ;;  %v10131_v58 = vor.u32 %v13221_v13, %v10128_v37  ;;  %v9984_v63 = vld [vmem:[%s14469_s29 + $0x958] sm:$0xf0] }
 0x3b0   : > { %8058 = vmatpush.bf16.msra.mxu0 %v9923_v34  ;;  %v13253_v16 = vld [vmem:[%s14469_s29 + $0xb6c] sm:$0xf]  ;;  %v10256_v34 = vld [vmem:[%s14469_s29 + $0xb78] sm:$0xf0]  ;;  %v7832_v5 = vpop.f32.mrf.mxu2 }
 0x3b1   : > { %8071 = vmatpush.bf16.msra.mxu1 %v10051_v0  ;;  %v9875_v0 = vor.u32 %v13157_v59, %v9872_v27  ;;  %v13153_v17 = vld [vmem:[%s14469_s29 + $0x84c] sm:$0xf]  ;;  %v10259_v2 = vor.u32 %v13253_v16, %v10256_v34  ;;  %v10112_v6 = vld [vmem:[%s14469_s29 + $0xa58] sm:$0xf0]  ;;  %v7845_v60 = vpop.f32.mrf.mxu3 }
 0x3b2   : > { %8084 = vmatpush.bf16.msra.mxu2 %v10179_v14  ;;  %v10003_v14 = vor.u32 %v13189_v52, %v10000_v1  ;;  %v13217_v7 = vld [vmem:[%s14469_s29 + $0xa4c] sm:$0xf]  ;;  %v7808_v3 = vpop.f32.mrf.mxu0  ;;  %v9859_v21 = vor.u32 %v13153_v17, %v9856_v39  ;;  %v9840_v49 = vld [vmem:[%s14469_s29 + $0x838] sm:$0xf0] }
 0x3b3   : > { %8097 = vmatpush.bf16.msra.mxu3 %v10307_v24  ;;  %v13185_v24 = vld [vmem:[%s14469_s29 + $0x94c] sm:$0xf]  ;;  %v10115_v40 = vor.u32 %v13217_v7, %v10112_v6  ;;  %v9968_v23 = vld [vmem:[%s14469_s29 + $0x938] sm:$0xf0] }
 0x3b4   : > { %8059 = vmatpush.bf16.msra.mxu0 %v9907_v19  ;;  %v7833_v19 = vadd.f32 %v7832_v5, %v7820_v53  ;;  %v9987_v29 = vor.u32 %v13185_v24, %v9984_v63  ;;  %v13149_v61 = vld [vmem:[%s14469_s29 + $0x82c] sm:$0xf]  ;;  %v10096_v44 = vld [vmem:[%s14469_s29 + $0xa38] sm:$0xf0] }
 0x3b5   : > { %8072 = vmatpush.bf16.msra.mxu1 %v10035_v41  ;;  %v13249_v41 = vld [vmem:[%s14469_s29 + $0xb4c] sm:$0xf]  ;;  %v7821_v55 = vpop.f32.mrf.mxu1  ;;  %v9843_v59 = vor.u32 %v13149_v61, %v9840_v49  ;;  %v9824_v52 = vld [vmem:[%s14469_s29 + $0x818] sm:$0xf0] }
 0x3b6   : > { %8085 = vmatpush.bf16.msra.mxu2 %v10163_v9  ;;  %v10240_v9 = vld [vmem:[%s14469_s29 + $0xb58] sm:$0xf0]  ;;  %v13181_v45 = vld [vmem:[%s14469_s29 + $0x92c] sm:$0xf] }
 0x3b7   : > { %8098 = vmatpush.bf16.msra.mxu3 %v10291_v43  ;;  %v16550_v43 = vadd.f32 %v7845_v60, %v7833_v19  ;;  %v10243_v32 = vor.u32 %v13249_v41, %v10240_v9  ;;  %v13145_v27 = vld [vmem:[%s14469_s29 + $0x80c] sm:$0xf]  ;;  %v9952_v13 = vld [vmem:[%s14469_s29 + $0x918] sm:$0xf0] }
 0x3b8   : > { %8060 = vmatpush.bf16.msra.mxu0 %v9891_v15  ;;  %v13213_v15 = vld [vmem:[%s14469_s29 + $0xa2c] sm:$0xf]  ;;  %v10080_v34 = vld [vmem:[%s14469_s29 + $0xa18] sm:$0xf0]  ;;  %v9827_v5 = vor.u32 %v13145_v27, %v9824_v52 }
 0x3b9   : > { %8073 = vmatpush.bf16.msra.mxu1 %v10019_v46  ;;  %v13245_v46 = vld [vmem:[%s14469_s29 + $0xb2c] sm:$0xf]  ;;  %v10099_v53 = vor.u32 %v13213_v15, %v10096_v44  ;;  %v10448_v39 = vld [vmem:[%s14469_s29 + $0xcf8] sm:$0xf0] }
 0x3ba   : > { %8086 = vmatpush.bf16.msra.mxu2 %v10147_v48  ;;  %v10224_v48 = vld [vmem:[%s14469_s29 + $0xb38] sm:$0xf0]  ;;  %v13177_v1 = vld [vmem:[%s14469_s29 + $0x90c] sm:$0xf] }
 0x3bb   : > { %8099 = vmatpush.bf16.msra.mxu3 %v10275_v57  ;;  %v9971_v57 = vor.u32 %v13181_v45, %v9968_v23  ;;  %v13209_v37 = vld [vmem:[%s14469_s29 + $0xa0c] sm:$0xf]  ;;  %v10227_v16 = vor.u32 %v13245_v46, %v10224_v48  ;;  %v10576_v63 = vld [vmem:[%s14469_s29 + $0xdf8] sm:$0xf0]  ;;  %v9955_v19 = vor.u32 %v13177_v1, %v9952_v13 }
 0x3bc   : > { %8061 = vmatpush.bf16.msra.mxu0 %v9875_v0  ;;  %v13241_v0 = vld [vmem:[%s14469_s29 + $0xb0c] sm:$0xf]  ;;  %v10704_v6 = vld [vmem:[%s14469_s29 + $0xef8] sm:$0xf0]  ;;  %v10083_v60 = vor.u32 %v13209_v37, %v10080_v34 }
 0x3bd   : > { %8074 = vmatpush.bf16.msra.mxu1 %v10003_v14  ;;  %v10208_v14 = vld [vmem:[%s14469_s29 + $0xb18] sm:$0xf0]  ;;  %v13301_v17 = vld [vmem:[%s14469_s29 + $0xcec] sm:$0xf] }
 0x3be   : > { %8087 = vmatpush.bf16.msra.mxu2 %v10131_v58  ;;  %v7834_v58 = vpop.f32.mrf.mxu2  ;;  %v13333_v24 = vld [vmem:[%s14469_s29 + $0xdec] sm:$0xf]  ;;  %v10832_v9 = vld [vmem:[%s14469_s29 + $0xff8] sm:$0xf0]  ;;  %v10211_v3 = vor.u32 %v13241_v0, %v10208_v14  ;;  %v17048_v14 = vld [vmem:[#allocation22_spill] sm:$0xff] }
 0x3bf   : > { %8100 = vmatpush.bf16.msra.mxu3 %v10259_v2  ;;  %v7847_v2 = vpop.f32.mrf.mxu3  ;;  %v13365_v7 = vld [vmem:[%s14469_s29 + $0xeec] sm:$0xf]  ;;  %v10579_v55 = vor.u32 %v13333_v24, %v10576_v63  ;;  %v10432_v61 = vld [vmem:[%s14469_s29 + $0xcd8] sm:$0xf0] }
 0x3c0   : > { %8062 = vmatpush.bf16.msra.mxu0 %v9859_v21  ;;  %v13397_v41 = vld [vmem:[%s14469_s29 + $0xfec] sm:$0xf]  ;;  %v10451_v21 = vor.u32 %v13301_v17, %v10448_v39  ;;  %v10688_v15 = vld [vmem:[%s14469_s29 + $0xed8] sm:$0xf0] }
 0x3c1   : > { %8075 = vmatpush.bf16.msra.mxu1 %v9987_v29  ;;  %v10707_v29 = vor.u32 %v13365_v7, %v10704_v6  ;;  %v13329_v49 = vld [vmem:[%s14469_s29 + $0xdcc] sm:$0xf]  ;;  %v10835_v45 = vor.u32 %v13397_v41, %v10832_v9  ;;  %v10816_v46 = vld [vmem:[%s14469_s29 + $0xfd8] sm:$0xf0] }
 0x3c2   : > { %8088 = vmatpush.bf16.msra.mxu2 %v10115_v40  ;;  %v13297_v40 = vld [vmem:[%s14469_s29 + $0xccc] sm:$0xf]  ;;  %v10544_v13 = vld [vmem:[%s14469_s29 + $0xdb8] sm:$0xf0] }
 0x3c3   : > { %8101 = vmatpush.bf16.msra.mxu3 %v10243_v32  ;;  %v10560_v32 = vld [vmem:[%s14469_s29 + $0xdd8] sm:$0xf0]  ;;  %v13361_v23 = vld [vmem:[%s14469_s29 + $0xecc] sm:$0xf]  ;;  %v10435_v48 = vor.u32 %v13297_v40, %v10432_v61 }
 0x3c4   : > { %8063 = vmatpush.bf16.msra.mxu0 %v9843_v59  ;;  %v13393_v44 = vld [vmem:[%s14469_s29 + $0xfcc] sm:$0xf]  ;;  %v10563_v59 = vor.u32 %v13329_v49, %v10560_v32  ;;  %v10691_v27 = vor.u32 %v13361_v23, %v10688_v15  ;;  %v10800_v0 = vld [vmem:[%s14469_s29 + $0xfb8] sm:$0xf0] }
 0x3c5   : > { %8076 = vmatpush.bf16.msra.mxu1 %v9971_v57  ;;  %v13293_v52 = vld [vmem:[%s14469_s29 + $0xcac] sm:$0xf]  ;;  %v10416_v57 = vld [vmem:[%s14469_s29 + $0xcb8] sm:$0xf0]  ;;  %v10819_v1 = vor.u32 %v13393_v44, %v10816_v46 }
 0x3c6   : > { %8089 = vmatpush.bf16.msra.mxu2 %v10099_v53  ;;  %v13325_v53 = vld [vmem:[%s14469_s29 + $0xdac] sm:$0xf]  ;;  %v10400_v24 = vld [vmem:[%s14469_s29 + $0xc98] sm:$0xf0] }
 0x3c7   : > { %8102 = vmatpush.bf16.msra.mxu3 %v10227_v16  ;;  %v13357_v37 = vld [vmem:[%s14469_s29 + $0xeac] sm:$0xf]  ;;  %v10672_v16 = vld [vmem:[%s14469_s29 + $0xeb8] sm:$0xf0]  ;;  %v10547_v58 = vor.u32 %v13325_v53, %v10544_v13 }
 0x3c8   : > { %8064 = vmatpush.bf16.msra.mxu0 %v9827_v5  ;;  %v13389_v34 = vld [vmem:[%s14469_s29 + $0xfac] sm:$0xf]  ;;  %v10675_v17 = vor.u32 %v13357_v37, %v10672_v16  ;;  %v10528_v2 = vld [vmem:[%s14469_s29 + $0xd98] sm:$0xf0]  ;;  %v7858_v7 = vpop.f32.mrf.mxu0 }
 0x3c9   : > { %8077 = vmatpush.bf16.msra.mxu1 %v9955_v19  ;;  %v13289_v39 = vld [vmem:[%s14469_s29 + $0xc8c] sm:$0xf]  ;;  %v10656_v63 = vld [vmem:[%s14469_s29 + $0xe98] sm:$0xf0]  ;;  %v7871_v9 = vpop.f32.mrf.mxu1 }
 0x3ca   : > { %8090 = vmatpush.bf16.msra.mxu2 %v10083_v60  ;;  %v13353_v5 = vld [vmem:[%s14469_s29 + $0xe8c] sm:$0xf]  ;;  %v10784_v19 = vld [vmem:[%s14469_s29 + $0xf98] sm:$0xf0]  ;;  %v7859_v60 = vadd.f32 %v7858_v7, %v16550_v43  ;;  %v10403_v41 = vor.u32 %v13289_v39, %v10400_v24 }
 0x3cb   : > { %8103 = vmatpush.bf16.msra.mxu3 %v10211_v3  ;;  %8065 = vmatmul.bf16.vlgmr.msra.gmra.mxu0 %v14753_v26  ;;  %v10419_v26 = vor.u32 %v13293_v52, %v10416_v57  ;;  %v13385_v6 = vld [vmem:[%s14469_s29 + $0xf8c] sm:$0xf]  ;;  %v10640_v43 = vld [vmem:[%s14469_s29 + $0xe78] sm:$0xf0] }
 0x3cc   : > { %8109 = vmatpush.bf16.msrb.mxu0 %v10451_v21  ;;  %8078 = vmatmul.bf16.vlgmr.msra.gmra.mxu1 %v14764_v33  ;;  %v10803_v33 = vor.u32 %v13389_v34, %v10800_v0  ;;  %v10659_v21 = vor.u32 %v13353_v5, %v10656_v63  ;;  %v13317_v40 = vld [vmem:[%s14469_s29 + $0xd6c] sm:$0xf]  ;;  %v10787_v61 = vor.u32 %v13385_v6, %v10784_v19  ;;  %v10768_v15 = vld [vmem:[%s14469_s29 + $0xf78] sm:$0xf0] }
 0x3cd   : > { %8122 = vmatpush.bf16.msrb.mxu1 %v10579_v55  ;;  %8091 = vmatmul.bf16.vlgmr.msra.gmra.mxu2 %v14760_v31  ;;  %v13321_v31 = vld [vmem:[%s14469_s29 + $0xd8c] sm:$0xf]  ;;  %v7872_v49 = vadd.f32 %v7871_v9, %v7859_v60  ;;  %v10624_v37 = vld [vmem:[%s14469_s29 + $0xe58] sm:$0xf0] }
 0x3ce   : > { %8135 = vmatpush.bf16.msrb.mxu2 %v10707_v29  ;;  %8104 = vmatmul.bf16.vlgmr.msra.gmra.mxu3 %v17048_v14  ;;  %v10531_v3 = vor.u32 %v13321_v31, %v10528_v2  ;;  %v13285_v55 = vld [vmem:[%s14469_s29 + $0xc6c] sm:$0xf]  ;;  %v10384_v29 = vld [vmem:[%s14469_s29 + $0xc78] sm:$0xf0] }
 0x3cf   : > { %8148 = vmatpush.bf16.msrb.mxu3 %v10835_v45  ;;  %v10512_v45 = vld [vmem:[%s14469_s29 + $0xd78] sm:$0xf0]  ;;  %v13349_v32 = vld [vmem:[%s14469_s29 + $0xe6c] sm:$0xf]  ;;  %v10387_v44 = vor.u32 %v13285_v55, %v10384_v29 }
 0x3d0   : > { %8110 = vmatpush.bf16.msrb.mxu0 %v10435_v48  ;;  %v13381_v23 = vld [vmem:[%s14469_s29 + $0xf6c] sm:$0xf]  ;;  %v10515_v46 = vor.u32 %v13317_v40, %v10512_v45  ;;  %v10643_v48 = vor.u32 %v13349_v32, %v10640_v43  ;;  %v7884_v53 = vpop.f32.mrf.mxu2  ;;  %v10752_v14 = vld [vmem:[%s14469_s29 + $0xf58] sm:$0xf0] }
 0x3d1   : > { %8123 = vmatpush.bf16.msrb.mxu1 %v10563_v59  ;;  %v13281_v59 = vld [vmem:[%s14469_s29 + $0xc4c] sm:$0xf]  ;;  %v10771_v57 = vor.u32 %v13381_v23, %v10768_v15  ;;  %v7885_v16 = vadd.f32 %v7884_v53, %v7872_v49  ;;  %v7897_v34 = vpop.f32.mrf.mxu3  ;;  %v10352_v2 = vld [vmem:[%s14469_s29 + $0xc38] sm:$0xf0] }
 0x3d2   : > { %8136 = vmatpush.bf16.msrb.mxu2 %v10691_v27  ;;  %v10368_v27 = vld [vmem:[%s14469_s29 + $0xc58] sm:$0xf0]  ;;  %v13313_v52 = vld [vmem:[%s14469_s29 + $0xd4c] sm:$0xf] }
 0x3d3   : > { %8149 = vmatpush.bf16.msrb.mxu3 %v10819_v1  ;;  %v10496_v1 = vld [vmem:[%s14469_s29 + $0xd58] sm:$0xf0]  ;;  %v13345_v13 = vld [vmem:[%s14469_s29 + $0xe4c] sm:$0xf]  ;;  %v16621_v39 = vadd.f32 %v7897_v34, %v7885_v16 }
 0x3d4   : > { %8111 = vmatpush.bf16.msrb.mxu0 %v10419_v26  ;;  %v13377_v0 = vld [vmem:[%s14469_s29 + $0xf4c] sm:$0xf]  ;;  %v7860_v26 = vpop.f32.mrf.mxu0  ;;  %v10499_v24 = vor.u32 %v13313_v52, %v10496_v1  ;;  %v10627_v31 = vor.u32 %v13345_v13, %v10624_v37  ;;  %v10480_v7 = vld [vmem:[%s14469_s29 + $0xd38] sm:$0xf0] }
 0x3d5   : > { %8124 = vmatpush.bf16.msrb.mxu1 %v10547_v58  ;;  %v10371_v58 = vor.u32 %v13281_v59, %v10368_v27  ;;  %v13309_v5 = vld [vmem:[%s14469_s29 + $0xd2c] sm:$0xf]  ;;  %v10755_v63 = vor.u32 %v13377_v0, %v10752_v14  ;;  %v10608_v19 = vld [vmem:[%s14469_s29 + $0xe38] sm:$0xf0] }
 0x3d6   : > { %8137 = vmatpush.bf16.msrb.mxu2 %v10675_v17  ;;  %v7873_v17 = vpop.f32.mrf.mxu1  ;;  %v13341_v6 = vld [vmem:[%s14469_s29 + $0xe2c] sm:$0xf]  ;;  %v10483_v55 = vor.u32 %v13309_v5, %v10480_v7  ;;  %v10592_v32 = vld [vmem:[%s14469_s29 + $0xe18] sm:$0xf0] }
 0x3d7   : > { %8150 = vmatpush.bf16.msrb.mxu3 %v10803_v33  ;;  %v13277_v33 = vld [vmem:[%s14469_s29 + $0xc2c] sm:$0xf]  ;;  %v10611_v29 = vor.u32 %v13341_v6, %v10608_v19  ;;  %v10720_v23 = vld [vmem:[%s14469_s29 + $0xf18] sm:$0xf0] }
 0x3d8   : > { %8112 = vmatpush.bf16.msrb.mxu0 %v10403_v41  ;;  %v13373_v60 = vld [vmem:[%s14469_s29 + $0xf2c] sm:$0xf]  ;;  %v10736_v41 = vld [vmem:[%s14469_s29 + $0xf38] sm:$0xf0]  ;;  %v10355_v9 = vor.u32 %v13277_v33, %v10352_v2  ;;  %v7886_v15 = vpop.f32.mrf.mxu2 }
 0x3d9   : > { %8125 = vmatpush.bf16.msrb.mxu1 %v10531_v3  ;;  %v13273_v3 = vld [vmem:[%s14469_s29 + $0xc0c] sm:$0xf]  ;;  %v10739_v45 = vor.u32 %v13373_v60, %v10736_v41  ;;  %v7899_v59 = vpop.f32.mrf.mxu3  ;;  %v11088_v52 = vld [vmem:[%s14469_s29 + $0x11f8] sm:$0xf0] }
 0x3da   : > { %8138 = vmatpush.bf16.msrb.mxu2 %v10659_v21  ;;  %v10336_v21 = vld [vmem:[%s14469_s29 + $0xc18] sm:$0xf0]  ;;  %v13305_v40 = vld [vmem:[%s14469_s29 + $0xd0c] sm:$0xf] }
 0x3db   : > { %8151 = vmatpush.bf16.msrb.mxu3 %v10787_v61  ;;  %v10464_v61 = vld [vmem:[%s14469_s29 + $0xd18] sm:$0xf0]  ;;  %v13337_v49 = vld [vmem:[%s14469_s29 + $0xe0c] sm:$0xf]  ;;  %v10339_v27 = vor.u32 %v13273_v3, %v10336_v21 }
 0x3dc   : > { %8113 = vmatpush.bf16.msrb.mxu0 %v10387_v44  ;;  %v13369_v43 = vld [vmem:[%s14469_s29 + $0xf0c] sm:$0xf]  ;;  %v11216_v53 = vld [vmem:[%s14469_s29 + $0x12f8] sm:$0xf0]  ;;  %v10467_v1 = vor.u32 %v13305_v40, %v10464_v61  ;;  %v10595_v13 = vor.u32 %v13337_v49, %v10592_v32 }
 0x3dd   : > { %8126 = vmatpush.bf16.msrb.mxu1 %v10515_v46  ;;  %v13429_v44 = vld [vmem:[%s14469_s29 + $0x10ec] sm:$0xf]  ;;  %v10960_v46 = vld [vmem:[%s14469_s29 + $0x10f8] sm:$0xf0]  ;;  %v10723_v34 = vor.u32 %v13369_v43, %v10720_v23 }
 0x3de   : > { %8139 = vmatpush.bf16.msrb.mxu2 %v10643_v48  ;;  %v13461_v48 = vld [vmem:[%s14469_s29 + $0x11ec] sm:$0xf]  ;;  %v11344_v16 = vld [vmem:[%s14469_s29 + $0x13f8] sm:$0xf0]  ;;  %v10963_v0 = vor.u32 %v13429_v44, %v10960_v46 }
 0x3df   : > { %8152 = vmatpush.bf16.msrb.mxu3 %v10771_v57  ;;  %v13493_v57 = vld [vmem:[%s14469_s29 + $0x12ec] sm:$0xf]  ;;  %v11091_v14 = vor.u32 %v13461_v48, %v11088_v52  ;;  %v10944_v17 = vld [vmem:[%s14469_s29 + $0x10d8] sm:$0xf0] }
 0x3e0   : > { %8114 = vmatpush.bf16.msrb.mxu0 %v10371_v58  ;;  %v13525_v37 = vld [vmem:[%s14469_s29 + $0x13ec] sm:$0xf]  ;;  %v11219_v26 = vor.u32 %v13493_v57, %v11216_v53  ;;  %v11072_v33 = vld [vmem:[%s14469_s29 + $0x11d8] sm:$0xf0] }
 0x3e1   : > { %8127 = vmatpush.bf16.msrb.mxu1 %v10499_v24  ;;  %v13425_v58 = vld [vmem:[%s14469_s29 + $0x10cc] sm:$0xf]  ;;  %v11200_v5 = vld [vmem:[%s14469_s29 + $0x12d8] sm:$0xf0] }
 0x3e2   : > { %8140 = vmatpush.bf16.msrb.mxu2 %v10627_v31  ;;  %v13457_v24 = vld [vmem:[%s14469_s29 + $0x11cc] sm:$0xf]  ;;  %v11347_v31 = vor.u32 %v13525_v37, %v11344_v16  ;;  %v11328_v7 = vld [vmem:[%s14469_s29 + $0x13d8] sm:$0xf0]  ;;  %v10947_v6 = vor.u32 %v13425_v58, %v10944_v17 }
 0x3e3   : > { %8153 = vmatpush.bf16.msrb.mxu3 %v10755_v63  ;;  %v13489_v2 = vld [vmem:[%s14469_s29 + $0x12cc] sm:$0xf]  ;;  %v11075_v19 = vor.u32 %v13457_v24, %v11072_v33  ;;  %v11184_v40 = vld [vmem:[%s14469_s29 + $0x12b8] sm:$0xf0] }
 0x3e4   : > { %8115 = vmatpush.bf16.msrb.mxu0 %v10355_v9  ;;  %v13521_v63 = vld [vmem:[%s14469_s29 + $0x13cc] sm:$0xf]  ;;  %v11203_v60 = vor.u32 %v13489_v2, %v11200_v5  ;;  %v10928_v9 = vld [vmem:[%s14469_s29 + $0x10b8] sm:$0xf0] }
 0x3e5   : > { %8128 = vmatpush.bf16.msrb.mxu1 %v10483_v55  ;;  %v13421_v41 = vld [vmem:[%s14469_s29 + $0x10ac] sm:$0xf]  ;;  %v11331_v21 = vor.u32 %v13521_v63, %v11328_v7  ;;  %v11056_v55 = vld [vmem:[%s14469_s29 + $0x11b8] sm:$0xf0] }
 0x3e6   : > { %8141 = vmatpush.bf16.msrb.mxu2 %v10611_v29  ;;  %v13453_v3 = vld [vmem:[%s14469_s29 + $0x11ac] sm:$0xf]  ;;  %v11312_v49 = vld [vmem:[%s14469_s29 + $0x13b8] sm:$0xf0] }
 0x3e7   : > { %8154 = vmatpush.bf16.msrb.mxu3 %v10739_v45  ;;  %v13485_v29 = vld [vmem:[%s14469_s29 + $0x12ac] sm:$0xf]  ;;  %v11059_v45 = vor.u32 %v13453_v3, %v11056_v55  ;;  %v10912_v23 = vld [vmem:[%s14469_s29 + $0x1098] sm:$0xf0] }
 0x3e8   : > { %8116 = vmatpush.bf16.msrb.mxu0 %v10339_v27  ;;  %v13517_v61 = vld [vmem:[%s14469_s29 + $0x13ac] sm:$0xf]  ;;  %v11187_v32 = vor.u32 %v13485_v29, %v11184_v40  ;;  %v11040_v15 = vld [vmem:[%s14469_s29 + $0x1198] sm:$0xf0] }
 0x3e9   : > { %8129 = vmatpush.bf16.msrb.mxu1 %v10467_v1  ;;  %v13417_v43 = vld [vmem:[%s14469_s29 + $0x108c] sm:$0xf]  ;;  %v11168_v46 = vld [vmem:[%s14469_s29 + $0x1298] sm:$0xf0]  ;;  %v7923_v57 = vpop.f32.mrf.mxu1 }
 0x3ea   : > { %8142 = vmatpush.bf16.msrb.mxu2 %v10595_v13  ;;  %v13481_v44 = vld [vmem:[%s14469_s29 + $0x128c] sm:$0xf]  ;;  %v11296_v59 = vld [vmem:[%s14469_s29 + $0x1398] sm:$0xf0]  ;;  %v10915_v52 = vor.u32 %v13417_v43, %v10912_v23 }
 0x3eb   : > { %8155 = vmatpush.bf16.msrb.mxu3 %v10723_v34  ;;  %8117 = vmatmul.bf16.vlgmr.msrb.gmra.mxu0 %v14847_v30  ;;  %v10931_v30 = vor.u32 %v13421_v41, %v10928_v9  ;;  %v13513_v48 = vld [vmem:[%s14469_s29 + $0x138c] sm:$0xf]  ;;  %v11171_v1 = vor.u32 %v13481_v44, %v11168_v46  ;;  %v10896_v37 = vld [vmem:[%s14469_s29 + $0x1078] sm:$0xf0] }
 0x3ec   : > { %8161 = vmatpush.bf16.msra.mxu0 %v10963_v0  ;;  %8130 = vmatmul.bf16.vlgmr.msrb.gmra.mxu1 %v14858_v42  ;;  %v11315_v42 = vor.u32 %v13517_v61, %v11312_v49  ;;  %v13413_v13 = vld [vmem:[%s14469_s29 + $0x106c] sm:$0xf]  ;;  %v11299_v34 = vor.u32 %v13513_v48, %v11296_v59  ;;  %v11280_v17 = vld [vmem:[%s14469_s29 + $0x1378] sm:$0xf0] }
 0x3ed   : > { %8174 = vmatpush.bf16.msra.mxu1 %v11091_v14  ;;  %8143 = vmatmul.bf16.vlgmr.msrb.gmra.mxu2 %v14854_v35  ;;  %v13449_v35 = vld [vmem:[%s14469_s29 + $0x118c] sm:$0xf]  ;;  %v11024_v14 = vld [vmem:[%s14469_s29 + $0x1178] sm:$0xf0]  ;;  %v10899_v24 = vor.u32 %v13413_v13, %v10896_v37 }
 0x3ee   : > { %8187 = vmatpush.bf16.msra.mxu2 %v11219_v26  ;;  %8156 = vmatmul.bf16.vlgmr.msrb.gmra.mxu3 %v14865_v47  ;;  %v7910_v47 = vpop.f32.mrf.mxu0  ;;  %v11043_v53 = vor.u32 %v13449_v35, %v11040_v15  ;;  %v13445_v16 = vld [vmem:[%s14469_s29 + $0x116c] sm:$0xf]  ;;  %v10880_v5 = vld [vmem:[%s14469_s29 + $0x1058] sm:$0xf0] }
 0x3ef   : > { %8200 = vmatpush.bf16.msra.mxu3 %v11347_v31  ;;  %v7911_v27 = vadd.f32 %v7910_v47, %v16621_v39  ;;  %v13477_v26 = vld [vmem:[%s14469_s29 + $0x126c] sm:$0xf]  ;;  %v11152_v39 = vld [vmem:[%s14469_s29 + $0x1278] sm:$0xf0]  ;;  %v11027_v31 = vor.u32 %v13445_v16, %v11024_v14 }
 0x3f0   : > { %8162 = vmatpush.bf16.msra.mxu0 %v10947_v6  ;;  %v13509_v58 = vld [vmem:[%s14469_s29 + $0x136c] sm:$0xf]  ;;  %v11155_v33 = vor.u32 %v13477_v26, %v11152_v39  ;;  %v7936_v6 = vpop.f32.mrf.mxu2  ;;  %v11136_v41 = vld [vmem:[%s14469_s29 + $0x1258] sm:$0xf0] }
 0x3f1   : > { %8175 = vmatpush.bf16.msra.mxu1 %v11075_v19  ;;  %v7924_v0 = vadd.f32 %v7923_v57, %v7911_v27  ;;  %v13409_v2 = vld [vmem:[%s14469_s29 + $0x104c] sm:$0xf]  ;;  %v11283_v7 = vor.u32 %v13509_v58, %v11280_v17  ;;  %v11008_v19 = vld [vmem:[%s14469_s29 + $0x1158] sm:$0xf0]  ;;  %v7949_v3 = vpop.f32.mrf.mxu3  ;;  %v7925_v61 = vpop.f32.mrf.mxu1 }
 0x3f2   : > { %8188 = vmatpush.bf16.msra.mxu2 %v11203_v60  ;;  %v13441_v63 = vld [vmem:[%s14469_s29 + $0x114c] sm:$0xf]  ;;  %v11264_v55 = vld [vmem:[%s14469_s29 + $0x1358] sm:$0xf0]  ;;  %v10883_v40 = vor.u32 %v13409_v2, %v10880_v5 }
 0x3f3   : > { %8201 = vmatpush.bf16.msra.mxu3 %v11331_v21  ;;  %v13473_v60 = vld [vmem:[%s14469_s29 + $0x124c] sm:$0xf]  ;;  %v7937_v9 = vadd.f32 %v7936_v6, %v7924_v0  ;;  %v10864_v43 = vld [vmem:[%s14469_s29 + $0x1038] sm:$0xf0] }
 0x3f4   : > { %8163 = vmatpush.bf16.msra.mxu0 %v10931_v30  ;;  %v13505_v21 = vld [vmem:[%s14469_s29 + $0x134c] sm:$0xf]  ;;  %v11011_v30 = vor.u32 %v13441_v63, %v11008_v19  ;;  %v11120_v44 = vld [vmem:[%s14469_s29 + $0x1238] sm:$0xf0] }
 0x3f5   : > { %8176 = vmatpush.bf16.msra.mxu1 %v11059_v45  ;;  %v16692_v49 = vadd.f32 %v7949_v3, %v7937_v9  ;;  %v11139_v45 = vor.u32 %v13473_v60, %v11136_v41  ;;  %v13437_v23 = vld [vmem:[%s14469_s29 + $0x112c] sm:$0xf]  ;;  %v11267_v35 = vor.u32 %v13505_v21, %v11264_v55  ;;  %v11248_v47 = vld [vmem:[%s14469_s29 + $0x1338] sm:$0xf0] }
 0x3f6   : > { %8189 = vmatpush.bf16.msra.mxu2 %v11187_v32  ;;  %v7912_v29 = vpop.f32.mrf.mxu0  ;;  %v13405_v32 = vld [vmem:[%s14469_s29 + $0x102c] sm:$0xf]  ;;  %v10848_v27 = vld [vmem:[%s14469_s29 + $0x1018] sm:$0xf0] }
 0x3f7   : > { %8202 = vmatpush.bf16.msra.mxu3 %v11315_v42  ;;  %v10992_v42 = vld [vmem:[%s14469_s29 + $0x1138] sm:$0xf0]  ;;  %v13469_v15 = vld [vmem:[%s14469_s29 + $0x122c] sm:$0xf]  ;;  %v10867_v48 = vor.u32 %v13405_v32, %v10864_v43 }
 0x3f8   : > { %8164 = vmatpush.bf16.msra.mxu0 %v10915_v52  ;;  %v13501_v46 = vld [vmem:[%s14469_s29 + $0x132c] sm:$0xf]  ;;  %v10995_v52 = vor.u32 %v13437_v23, %v10992_v42  ;;  %v11123_v57 = vor.u32 %v13469_v15, %v11120_v44  ;;  %v11104_v16 = vld [vmem:[%s14469_s29 + $0x1218] sm:$0xf0]  ;;  %v7938_v14 = vpop.f32.mrf.mxu2 }
 0x3f9   : > { %8177 = vmatpush.bf16.msra.mxu1 %v11043_v53  ;;  %v13401_v59 = vld [vmem:[%s14469_s29 + $0x100c] sm:$0xf]  ;;  %v11251_v37 = vor.u32 %v13501_v46, %v11248_v47  ;;  %v11232_v0 = vld [vmem:[%s14469_s29 + $0x1318] sm:$0xf0]  ;;  %v7951_v17 = vpop.f32.mrf.mxu3 }
 0x3fa   : > { %8190 = vmatpush.bf16.msra.mxu2 %v11171_v1  ;;  %v13433_v53 = vld [vmem:[%s14469_s29 + $0x110c] sm:$0xf]  ;;  %v10976_v1 = vld [vmem:[%s14469_s29 + $0x1118] sm:$0xf0] }
 0x3fb   : > { %8203 = vmatpush.bf16.msra.mxu3 %v11299_v34  ;;  %v13465_v13 = vld [vmem:[%s14469_s29 + $0x120c] sm:$0xf]  ;;  %v11472_v39 = vld [vmem:[%s14469_s29 + $0x14f8] sm:$0xf0]  ;;  %v10979_v5 = vor.u32 %v13433_v53, %v10976_v1 }
 0x3fc   : > { %8165 = vmatpush.bf16.msra.mxu0 %v10899_v24  ;;  %v13497_v34 = vld [vmem:[%s14469_s29 + $0x130c] sm:$0xf]  ;;  %v10851_v24 = vor.u32 %v13401_v59, %v10848_v27  ;;  %v11728_v2 = vld [vmem:[%s14469_s29 + $0x16f8] sm:$0xf0]  ;;  %v11107_v63 = vor.u32 %v13465_v13, %v11104_v16 }
 0x3fd   : > { %8178 = vmatpush.bf16.msra.mxu1 %v11027_v31  ;;  %v13557_v26 = vld [vmem:[%s14469_s29 + $0x14ec] sm:$0xf]  ;;  %v11600_v31 = vld [vmem:[%s14469_s29 + $0x15f8] sm:$0xf0]  ;;  %v11235_v19 = vor.u32 %v13497_v34, %v11232_v0 }
 0x3fe   : > { %8191 = vmatpush.bf16.msra.mxu2 %v11155_v33  ;;  %v13589_v58 = vld [vmem:[%s14469_s29 + $0x15ec] sm:$0xf]  ;;  %v11856_v6 = vld [vmem:[%s14469_s29 + $0x17f8] sm:$0xf0]  ;;  %v11475_v60 = vor.u32 %v13557_v26, %v11472_v39 }
 0x3ff   : > { %8204 = vmatpush.bf16.msra.mxu3 %v11283_v7  ;;  %v13621_v33 = vld [vmem:[%s14469_s29 + $0x16ec] sm:$0xf]  ;;  %v11603_v41 = vor.u32 %v13589_v58, %v11600_v31  ;;  %v11456_v21 = vld [vmem:[%s14469_s29 + $0x14d8] sm:$0xf0] }
 0x400   : > { %8166 = vmatpush.bf16.msra.mxu0 %v10883_v40  ;;  %v13653_v7 = vld [vmem:[%s14469_s29 + $0x17ec] sm:$0xf]  ;;  %v11731_v9 = vor.u32 %v13621_v33, %v11728_v2  ;;  %v11584_v40 = vld [vmem:[%s14469_s29 + $0x15d8] sm:$0xf0] }
 0x401   : > { %8179 = vmatpush.bf16.msra.mxu1 %v11011_v30  ;;  %v13553_v3 = vld [vmem:[%s14469_s29 + $0x14cc] sm:$0xf]  ;;  %v11859_v29 = vor.u32 %v13653_v7, %v11856_v6  ;;  %v11712_v30 = vld [vmem:[%s14469_s29 + $0x16d8] sm:$0xf0] }
 0x402   : > { %8192 = vmatpush.bf16.msra.mxu2 %v11139_v45  ;;  %v13585_v55 = vld [vmem:[%s14469_s29 + $0x15cc] sm:$0xf]  ;;  %v11840_v32 = vld [vmem:[%s14469_s29 + $0x17d8] sm:$0xf0]  ;;  %v11459_v43 = vor.u32 %v13553_v3, %v11456_v21 }
 0x403   : > { %8205 = vmatpush.bf16.msra.mxu3 %v11267_v35  ;;  %v13617_v61 = vld [vmem:[%s14469_s29 + $0x16cc] sm:$0xf]  ;;  %v11587_v23 = vor.u32 %v13585_v55, %v11584_v40  ;;  %v11440_v15 = vld [vmem:[%s14469_s29 + $0x14b8] sm:$0xf0] }
 0x404   : > { %8167 = vmatpush.bf16.msra.mxu0 %v10867_v48  ;;  %v13649_v45 = vld [vmem:[%s14469_s29 + $0x17cc] sm:$0xf]  ;;  %v11715_v35 = vor.u32 %v13617_v61, %v11712_v30  ;;  %v11568_v47 = vld [vmem:[%s14469_s29 + $0x15b8] sm:$0xf0] }
 0x405   : > { %8180 = vmatpush.bf16.msra.mxu1 %v10995_v52  ;;  %v13549_v42 = vld [vmem:[%s14469_s29 + $0x14ac] sm:$0xf]  ;;  %v11843_v46 = vor.u32 %v13649_v45, %v11840_v32  ;;  %v11696_v59 = vld [vmem:[%s14469_s29 + $0x16b8] sm:$0xf0] }
 0x406   : > { %8193 = vmatpush.bf16.msra.mxu2 %v11123_v57  ;;  %v13581_v44 = vld [vmem:[%s14469_s29 + $0x15ac] sm:$0xf]  ;;  %v11824_v52 = vld [vmem:[%s14469_s29 + $0x17b8] sm:$0xf0] }
 0x407   : > { %8206 = vmatpush.bf16.msra.mxu3 %v11251_v37  ;;  %v13613_v48 = vld [vmem:[%s14469_s29 + $0x16ac] sm:$0xf]  ;;  %v11571_v57 = vor.u32 %v13581_v44, %v11568_v47  ;;  %v11424_v13 = vld [vmem:[%s14469_s29 + $0x1498] sm:$0xf0] }
 0x408   : > { %8168 = vmatpush.bf16.msra.mxu0 %v10851_v24  ;;  %v13645_v27 = vld [vmem:[%s14469_s29 + $0x17ac] sm:$0xf]  ;;  %v11699_v53 = vor.u32 %v13613_v48, %v11696_v59  ;;  %v11552_v37 = vld [vmem:[%s14469_s29 + $0x1598] sm:$0xf0]  ;;  %v7962_v26 = vpop.f32.mrf.mxu0 }
 0x409   : > { %8181 = vmatpush.bf16.msra.mxu1 %v10979_v5  ;;  %v13545_v1 = vld [vmem:[%s14469_s29 + $0x148c] sm:$0xf]  ;;  %v11680_v34 = vld [vmem:[%s14469_s29 + $0x1698] sm:$0xf0]  ;;  %v7975_v33 = vpop.f32.mrf.mxu1 }
 0x40a   : > { %8194 = vmatpush.bf16.msra.mxu2 %v11107_v63  ;;  %v13609_v16 = vld [vmem:[%s14469_s29 + $0x168c] sm:$0xf]  ;;  %v11808_v0 = vld [vmem:[%s14469_s29 + $0x1798] sm:$0xf0]  ;;  %v11427_v14 = vor.u32 %v13545_v1, %v11424_v13  ;;  %v7976_v6 = vadd.f32 %v7975_v33, %v7962_v26 }
 0x40b   : > { %8207 = vmatpush.bf16.msra.mxu3 %v11235_v19  ;;  %8169 = vmatmul.bf16.vlgmr.msra.gmra.mxu0 %v14942_v51  ;;  %v11443_v51 = vor.u32 %v13549_v42, %v11440_v15  ;;  %v11683_v58 = vor.u32 %v13609_v16, %v11680_v34  ;;  %v13541_v17 = vld [vmem:[%s14469_s29 + $0x146c] sm:$0xf]  ;;  %v11408_v24 = vld [vmem:[%s14469_s29 + $0x1478] sm:$0xf0] }
 0x40c   : > { %8213 = vmatpush.bf16.msrb.mxu0 %v11475_v60  ;;  %8182 = vmatmul.bf16.vlgmr.msra.gmra.mxu1 %v14953_v18  ;;  %v11827_v18 = vor.u32 %v13645_v27, %v11824_v52  ;;  %v13573_v31 = vld [vmem:[%s14469_s29 + $0x156c] sm:$0xf]  ;;  %v11536_v5 = vld [vmem:[%s14469_s29 + $0x1578] sm:$0xf0] }
 0x40d   : > { %8226 = vmatpush.bf16.msrb.mxu1 %v11603_v41  ;;  %8195 = vmatmul.bf16.vlgmr.msra.gmra.mxu2 %v14949_v56  ;;  %v13577_v56 = vld [vmem:[%s14469_s29 + $0x158c] sm:$0xf]  ;;  %v11664_v7 = vld [vmem:[%s14469_s29 + $0x1678] sm:$0xf0]  ;;  %v11411_v41 = vor.u32 %v13541_v17, %v11408_v24 }
 0x40e   : > { %8239 = vmatpush.bf16.msrb.mxu2 %v11731_v9  ;;  %8208 = vmatmul.bf16.vlgmr.msra.gmra.mxu3 %v14960_v62  ;;  %v13641_v62 = vld [vmem:[%s14469_s29 + $0x178c] sm:$0xf]  ;;  %v11555_v39 = vor.u32 %v13577_v56, %v11552_v37  ;;  %v11792_v60 = vld [vmem:[%s14469_s29 + $0x1778] sm:$0xf0]  ;;  %v11539_v9 = vor.u32 %v13573_v31, %v11536_v5 }
 0x40f   : > { %8252 = vmatpush.bf16.msrb.mxu3 %v11859_v29  ;;  %v11811_v2 = vor.u32 %v13641_v62, %v11808_v0  ;;  %v13605_v63 = vld [vmem:[%s14469_s29 + $0x166c] sm:$0xf]  ;;  %v11392_v55 = vld [vmem:[%s14469_s29 + $0x1458] sm:$0xf0] }
 0x410   : > { %8214 = vmatpush.bf16.msrb.mxu0 %v11459_v43  ;;  %v13637_v19 = vld [vmem:[%s14469_s29 + $0x176c] sm:$0xf]  ;;  %v11667_v3 = vor.u32 %v13605_v63, %v11664_v7  ;;  %v7988_v40 = vpop.f32.mrf.mxu2  ;;  %v11520_v30 = vld [vmem:[%s14469_s29 + $0x1558] sm:$0xf0] }
 0x411   : > { %8227 = vmatpush.bf16.msrb.mxu1 %v11587_v23  ;;  %v13537_v21 = vld [vmem:[%s14469_s29 + $0x144c] sm:$0xf]  ;;  %v11795_v61 = vor.u32 %v13637_v19, %v11792_v60  ;;  %v11648_v32 = vld [vmem:[%s14469_s29 + $0x1658] sm:$0xf0]  ;;  %v7989_v43 = vadd.f32 %v7988_v40, %v7976_v6  ;;  %v8001_v23 = vpop.f32.mrf.mxu3 }
 0x412   : > { %8240 = vmatpush.bf16.msrb.mxu2 %v11715_v35  ;;  %v13569_v29 = vld [vmem:[%s14469_s29 + $0x154c] sm:$0xf]  ;;  %v11776_v42 = vld [vmem:[%s14469_s29 + $0x1758] sm:$0xf0]  ;;  %v11395_v15 = vor.u32 %v13537_v21, %v11392_v55 }
 0x413   : > { %8253 = vmatpush.bf16.msrb.mxu3 %v11843_v46  ;;  %v13601_v45 = vld [vmem:[%s14469_s29 + $0x164c] sm:$0xf]  ;;  %v16762_v44 = vadd.f32 %v8001_v23, %v7989_v43  ;;  %v7964_v46 = vpop.f32.mrf.mxu0  ;;  %v11523_v47 = vor.u32 %v13569_v29, %v11520_v30  ;;  %v11376_v27 = vld [vmem:[%s14469_s29 + $0x1438] sm:$0xf0] }
 0x414   : > { %8215 = vmatpush.bf16.msrb.mxu0 %v11443_v51  ;;  %v13633_v35 = vld [vmem:[%s14469_s29 + $0x174c] sm:$0xf]  ;;  %v11651_v48 = vor.u32 %v13601_v45, %v11648_v32  ;;  %v7977_v51 = vpop.f32.mrf.mxu1  ;;  %v11632_v13 = vld [vmem:[%s14469_s29 + $0x1638] sm:$0xf0] }
 0x415   : > { %8228 = vmatpush.bf16.msrb.mxu1 %v11571_v57  ;;  %v13533_v59 = vld [vmem:[%s14469_s29 + $0x142c] sm:$0xf]  ;;  %v11779_v57 = vor.u32 %v13633_v35, %v11776_v42  ;;  %v11360_v34 = vld [vmem:[%s14469_s29 + $0x1418] sm:$0xf0] }
 0x416   : > { %8241 = vmatpush.bf16.msrb.mxu2 %v11699_v53  ;;  %v13565_v52 = vld [vmem:[%s14469_s29 + $0x152c] sm:$0xf]  ;;  %v11504_v53 = vld [vmem:[%s14469_s29 + $0x1538] sm:$0xf0]  ;;  %v11379_v37 = vor.u32 %v13533_v59, %v11376_v27 }
 0x417   : > { %8254 = vmatpush.bf16.msrb.mxu3 %v11827_v18  ;;  %v13597_v1 = vld [vmem:[%s14469_s29 + $0x162c] sm:$0xf]  ;;  %v11760_v18 = vld [vmem:[%s14469_s29 + $0x1738] sm:$0xf0]  ;;  %v11507_v62 = vor.u32 %v13565_v52, %v11504_v53 }
 0x418   : > { %8216 = vmatpush.bf16.msrb.mxu0 %v11427_v14  ;;  %v13629_v56 = vld [vmem:[%s14469_s29 + $0x172c] sm:$0xf]  ;;  %v11635_v0 = vor.u32 %v13597_v1, %v11632_v13  ;;  %v11488_v26 = vld [vmem:[%s14469_s29 + $0x1518] sm:$0xf0] }
 0x419   : > { %8229 = vmatpush.bf16.msrb.mxu1 %v11555_v39  ;;  %v13529_v16 = vld [vmem:[%s14469_s29 + $0x140c] sm:$0xf]  ;;  %v11763_v17 = vor.u32 %v13629_v56, %v11760_v18  ;;  %v11616_v24 = vld [vmem:[%s14469_s29 + $0x1618] sm:$0xf0] }
 0x41a   : > { %8242 = vmatpush.bf16.msrb.mxu2 %v11683_v58  ;;  %v13561_v14 = vld [vmem:[%s14469_s29 + $0x150c] sm:$0xf]  ;;  %v7990_v58 = vpop.f32.mrf.mxu2  ;;  %v11744_v33 = vld [vmem:[%s14469_s29 + $0x1718] sm:$0xf0]  ;;  %v11363_v6 = vor.u32 %v13529_v16, %v11360_v34 }
 0x41b   : > { %8255 = vmatpush.bf16.msrb.mxu3 %v11811_v2  ;;  %v13593_v39 = vld [vmem:[%s14469_s29 + $0x160c] sm:$0xf]  ;;  %v8003_v2 = vpop.f32.mrf.mxu3  ;;  %v11984_v63 = vld [vmem:[%s14469_s29 + $0x18f8] sm:$0xf0] }
 0x41c   : > { %8217 = vmatpush.bf16.msrb.mxu0 %v11411_v41  ;;  %v13625_v31 = vld [vmem:[%s14469_s29 + $0x170c] sm:$0xf]  ;;  %v12112_v19 = vld [vmem:[%s14469_s29 + $0x19f8] sm:$0xf0] }
 0x41d   : > { %8230 = vmatpush.bf16.msrb.mxu1 %v11539_v9  ;;  %v13685_v5 = vld [vmem:[%s14469_s29 + $0x18ec] sm:$0xf]  ;;  %v12240_v41 = vld [vmem:[%s14469_s29 + $0x1af8] sm:$0xf0]  ;;  %v11491_v9 = vor.u32 %v13561_v14, %v11488_v26  ;;  %v11747_v29 = vor.u32 %v13625_v31, %v11744_v33 }
 0x41e   : > { %8243 = vmatpush.bf16.msrb.mxu2 %v11667_v3  ;;  %v13717_v7 = vld [vmem:[%s14469_s29 + $0x19ec] sm:$0xf]  ;;  %v11619_v3 = vor.u32 %v13593_v39, %v11616_v24  ;;  %v12368_v55 = vld [vmem:[%s14469_s29 + $0x1bf8] sm:$0xf0]  ;;  %v11987_v40 = vor.u32 %v13685_v5, %v11984_v63 }
 0x41f   : > { %8256 = vmatpush.bf16.msrb.mxu3 %v11795_v61  ;;  %v13749_v60 = vld [vmem:[%s14469_s29 + $0x1aec] sm:$0xf]  ;;  %v12115_v61 = vor.u32 %v13717_v7, %v12112_v19  ;;  %v11968_v32 = vld [vmem:[%s14469_s29 + $0x18d8] sm:$0xf0] }
 0x420   : > { %8218 = vmatpush.bf16.msrb.mxu0 %v11395_v15  ;;  %v13781_v21 = vld [vmem:[%s14469_s29 + $0x1bec] sm:$0xf]  ;;  %v12243_v30 = vor.u32 %v13749_v60, %v12240_v41  ;;  %v12096_v35 = vld [vmem:[%s14469_s29 + $0x19d8] sm:$0xf0] }
 0x421   : > { %8231 = vmatpush.bf16.msrb.mxu1 %v11523_v47  ;;  %v13681_v45 = vld [vmem:[%s14469_s29 + $0x18cc] sm:$0xf]  ;;  %v12371_v23 = vor.u32 %v13781_v21, %v12368_v55  ;;  %v12224_v15 = vld [vmem:[%s14469_s29 + $0x1ad8] sm:$0xf0] }
 0x422   : > { %8244 = vmatpush.bf16.msrb.mxu2 %v11651_v48  ;;  %v13713_v43 = vld [vmem:[%s14469_s29 + $0x19cc] sm:$0xf]  ;;  %v12352_v47 = vld [vmem:[%s14469_s29 + $0x1bd8] sm:$0xf0]  ;;  %v11971_v48 = vor.u32 %v13681_v45, %v11968_v32 }
 0x423   : > { %8257 = vmatpush.bf16.msrb.mxu3 %v11779_v57  ;;  %v13745_v42 = vld [vmem:[%s14469_s29 + $0x1acc] sm:$0xf]  ;;  %v12099_v59 = vor.u32 %v13713_v43, %v12096_v35  ;;  %v11952_v51 = vld [vmem:[%s14469_s29 + $0x18b8] sm:$0xf0] }
 0x424   : > { %8219 = vmatpush.bf16.msrb.mxu0 %v11379_v37  ;;  %v13777_v46 = vld [vmem:[%s14469_s29 + $0x1bcc] sm:$0xf]  ;;  %v12227_v27 = vor.u32 %v13745_v42, %v12224_v15  ;;  %v12080_v1 = vld [vmem:[%s14469_s29 + $0x19b8] sm:$0xf0] }
 0x425   : > { %8232 = vmatpush.bf16.msrb.mxu1 %v11507_v62  ;;  %v13677_v52 = vld [vmem:[%s14469_s29 + $0x18ac] sm:$0xf]  ;;  %v12355_v53 = vor.u32 %v13777_v46, %v12352_v47  ;;  %v12208_v56 = vld [vmem:[%s14469_s29 + $0x1ab8] sm:$0xf0] }
 0x426   : > { %8245 = vmatpush.bf16.msrb.mxu2 %v11635_v0  ;;  %v13709_v57 = vld [vmem:[%s14469_s29 + $0x19ac] sm:$0xf]  ;;  %v12336_v37 = vld [vmem:[%s14469_s29 + $0x1bb8] sm:$0xf0] }
 0x427   : > { %8258 = vmatpush.bf16.msrb.mxu3 %v11763_v17  ;;  %v13741_v13 = vld [vmem:[%s14469_s29 + $0x1aac] sm:$0xf]  ;;  %v12083_v16 = vor.u32 %v13709_v57, %v12080_v1  ;;  %v11936_v0 = vld [vmem:[%s14469_s29 + $0x1898] sm:$0xf0] }
 0x428   : > { %8220 = vmatpush.bf16.msrb.mxu0 %v11363_v6  ;;  %v13773_v18 = vld [vmem:[%s14469_s29 + $0x1bac] sm:$0xf]  ;;  %v12211_v34 = vor.u32 %v13741_v13, %v12208_v56  ;;  %v12064_v14 = vld [vmem:[%s14469_s29 + $0x1998] sm:$0xf0]  ;;  %v8014_v24 = vpop.f32.mrf.mxu0 }
 0x429   : > { %8233 = vmatpush.bf16.msrb.mxu1 %v11491_v9  ;;  %v13673_v62 = vld [vmem:[%s14469_s29 + $0x188c] sm:$0xf]  ;;  %v12192_v39 = vld [vmem:[%s14469_s29 + $0x1a98] sm:$0xf0]  ;;  %v8015_v7 = vadd.f32 %v8014_v24, %v16762_v44  ;;  %v8027_v6 = vpop.f32.mrf.mxu1 }
 0x42a   : > { %8246 = vmatpush.bf16.msrb.mxu2 %v11619_v3  ;;  %v13737_v26 = vld [vmem:[%s14469_s29 + $0x1a8c] sm:$0xf]  ;;  %v11939_v17 = vor.u32 %v13673_v62, %v11936_v0  ;;  %v11920_v5 = vld [vmem:[%s14469_s29 + $0x1878] sm:$0xf0] }
 0x42b   : > { %8259 = vmatpush.bf16.msrb.mxu3 %v11747_v29  ;;  %8221 = vmatmul.bf16.vlgmr.msrb.gmra.mxu0 %v15035_v22  ;;  %v11955_v22 = vor.u32 %v13677_v52, %v11952_v51  ;;  %v13769_v58 = vld [vmem:[%s14469_s29 + $0x1b8c] sm:$0xf]  ;;  %v12195_v33 = vor.u32 %v13737_v26, %v12192_v39  ;;  %v12048_v60 = vld [vmem:[%s14469_s29 + $0x1978] sm:$0xf0]  ;;  %v8028_v55 = vadd.f32 %v8027_v6, %v8015_v7 }
 0x42c   : > { %8265 = vmatpush.bf16.msra.mxu0 %v11987_v40  ;;  %8234 = vmatmul.bf16.vlgmr.msrb.gmra.mxu1 %v15048_v36  ;;  %v12339_v36 = vor.u32 %v13773_v18, %v12336_v37  ;;  %v13669_v2 = vld [vmem:[%s14469_s29 + $0x186c] sm:$0xf]  ;;  %v12176_v9 = vld [vmem:[%s14469_s29 + $0x1a78] sm:$0xf0] }
 0x42d   : > { %8278 = vmatpush.bf16.msra.mxu1 %v12115_v61  ;;  %8247 = vmatmul.bf16.vlgmr.msrb.gmra.mxu2 %v15044_v28  ;;  %v13705_v28 = vld [vmem:[%s14469_s29 + $0x198c] sm:$0xf]  ;;  %v12304_v21 = vld [vmem:[%s14469_s29 + $0x1b78] sm:$0xf0]  ;;  %v11923_v29 = vor.u32 %v13669_v2, %v11920_v5 }
 0x42e   : > { %8291 = vmatpush.bf16.msra.mxu2 %v12243_v30  ;;  %8260 = vmatmul.bf16.vlgmr.msrb.gmra.mxu3 %v15054_v38  ;;  %v12320_v38 = vld [vmem:[%s14469_s29 + $0x1b98] sm:$0xf0]  ;;  %v12067_v31 = vor.u32 %v13705_v28, %v12064_v14  ;;  %v13701_v63 = vld [vmem:[%s14469_s29 + $0x196c] sm:$0xf] }
 0x42f   : > { %8304 = vmatpush.bf16.msra.mxu3 %v12371_v23  ;;  %v12323_v19 = vor.u32 %v13769_v58, %v12320_v38  ;;  %v13733_v41 = vld [vmem:[%s14469_s29 + $0x1a6c] sm:$0xf]  ;;  %v12051_v44 = vor.u32 %v13701_v63, %v12048_v60  ;;  %v11904_v30 = vld [vmem:[%s14469_s29 + $0x1858] sm:$0xf0] }
 0x430   : > { %8266 = vmatpush.bf16.msra.mxu0 %v11971_v48  ;;  %v13765_v3 = vld [vmem:[%s14469_s29 + $0x1b6c] sm:$0xf]  ;;  %v12179_v40 = vor.u32 %v13733_v41, %v12176_v9  ;;  %v8040_v32 = vpop.f32.mrf.mxu2  ;;  %v12032_v23 = vld [vmem:[%s14469_s29 + $0x1958] sm:$0xf0]  ;;  %v8016_v52 = vpop.f32.mrf.mxu0 }
 0x431   : > { %8279 = vmatpush.bf16.msra.mxu1 %v12099_v59  ;;  %v13665_v61 = vld [vmem:[%s14469_s29 + $0x184c] sm:$0xf]  ;;  %v12307_v43 = vor.u32 %v13765_v3, %v12304_v21  ;;  %v12160_v42 = vld [vmem:[%s14469_s29 + $0x1a58] sm:$0xf0]  ;;  %v8041_v15 = vadd.f32 %v8040_v32, %v8028_v55  ;;  %v8053_v46 = vpop.f32.mrf.mxu3  ;;  %v8029_v56 = vpop.f32.mrf.mxu1 }
 0x432   : > { %8292 = vmatpush.bf16.msra.mxu2 %v12227_v27  ;;  %v13697_v45 = vld [vmem:[%s14469_s29 + $0x194c] sm:$0xf]  ;;  %v12288_v48 = vld [vmem:[%s14469_s29 + $0x1b58] sm:$0xf0]  ;;  %v11907_v59 = vor.u32 %v13665_v61, %v11904_v30 }
 0x433   : > { %8305 = vmatpush.bf16.msra.mxu3 %v12355_v53  ;;  %v13729_v35 = vld [vmem:[%s14469_s29 + $0x1a4c] sm:$0xf]  ;;  %v16833_v27 = vadd.f32 %v8053_v46, %v8041_v15  ;;  %v12035_v51 = vor.u32 %v13697_v45, %v12032_v23  ;;  %v11888_v1 = vld [vmem:[%s14469_s29 + $0x1838] sm:$0xf0] }
 0x434   : > { %8267 = vmatpush.bf16.msra.mxu0 %v11955_v22  ;;  %v13761_v47 = vld [vmem:[%s14469_s29 + $0x1b4c] sm:$0xf]  ;;  %v12163_v57 = vor.u32 %v13729_v35, %v12160_v42  ;;  %v12016_v37 = vld [vmem:[%s14469_s29 + $0x1938] sm:$0xf0] }
 0x435   : > { %8280 = vmatpush.bf16.msra.mxu1 %v12083_v16  ;;  %v13661_v53 = vld [vmem:[%s14469_s29 + $0x182c] sm:$0xf]  ;;  %v12291_v18 = vor.u32 %v13761_v47, %v12288_v48  ;;  %v12144_v16 = vld [vmem:[%s14469_s29 + $0x1a38] sm:$0xf0] }
 0x436   : > { %8293 = vmatpush.bf16.msra.mxu2 %v12211_v34  ;;  %v13693_v13 = vld [vmem:[%s14469_s29 + $0x192c] sm:$0xf]  ;;  %v12272_v62 = vld [vmem:[%s14469_s29 + $0x1b38] sm:$0xf0]  ;;  %v11891_v0 = vor.u32 %v13661_v53, %v11888_v1 }
 0x437   : > { %8306 = vmatpush.bf16.msra.mxu3 %v12339_v36  ;;  %v13725_v22 = vld [vmem:[%s14469_s29 + $0x1a2c] sm:$0xf]  ;;  %v11872_v36 = vld [vmem:[%s14469_s29 + $0x1818] sm:$0xf0]  ;;  %v12019_v14 = vor.u32 %v13693_v13, %v12016_v37 }
 0x438   : > { %8268 = vmatpush.bf16.msra.mxu0 %v11939_v17  ;;  %v13757_v34 = vld [vmem:[%s14469_s29 + $0x1b2c] sm:$0xf]  ;;  %v12147_v26 = vor.u32 %v13725_v22, %v12144_v16  ;;  %v12000_v58 = vld [vmem:[%s14469_s29 + $0x1918] sm:$0xf0]  ;;  %v8042_v17 = vpop.f32.mrf.mxu2 }
 0x439   : > { %8281 = vmatpush.bf16.msra.mxu1 %v12067_v31  ;;  %v13657_v28 = vld [vmem:[%s14469_s29 + $0x180c] sm:$0xf]  ;;  %v12275_v24 = vor.u32 %v13757_v34, %v12272_v62  ;;  %v12128_v31 = vld [vmem:[%s14469_s29 + $0x1a18] sm:$0xf0]  ;;  %v8055_v5 = vpop.f32.mrf.mxu3 }
 0x43a   : > { %8294 = vmatpush.bf16.msra.mxu2 %v12195_v33  ;;  %v13689_v39 = vld [vmem:[%s14469_s29 + $0x190c] sm:$0xf]  ;;  %v12256_v2 = vld [vmem:[%s14469_s29 + $0x1b18] sm:$0xf0] }
 0x43b   : > { %8307 = vmatpush.bf16.msra.mxu3 %v12323_v19  ;;  %v13721_v38 = vld [vmem:[%s14469_s29 + $0x1a0c] sm:$0xf]  ;;  %v12496_v7 = vld [vmem:[%s14469_s29 + $0x1cf8] sm:$0xf0]  ;;  %v11875_v19 = vor.u32 %v13657_v28, %v11872_v36  ;;  %v12003_v3 = vor.u32 %v13689_v39, %v12000_v58 }
 0x43c   : > { %8269 = vmatpush.bf16.msra.mxu0 %v11923_v29  ;;  %v13753_v33 = vld [vmem:[%s14469_s29 + $0x1b0c] sm:$0xf]  ;;  %v12624_v60 = vld [vmem:[%s14469_s29 + $0x1df8] sm:$0xf0]  ;;  %v12131_v21 = vor.u32 %v13721_v38, %v12128_v31 }
 0x43d   : > { %8282 = vmatpush.bf16.msra.mxu1 %v12051_v44  ;;  %v13813_v63 = vld [vmem:[%s14469_s29 + $0x1cec] sm:$0xf]  ;;  %v12752_v9 = vld [vmem:[%s14469_s29 + $0x1ef8] sm:$0xf0]  ;;  %v12259_v44 = vor.u32 %v13753_v33, %v12256_v2 }
 0x43e   : > { %8295 = vmatpush.bf16.msra.mxu2 %v12179_v40  ;;  %v13845_v6 = vld [vmem:[%s14469_s29 + $0x1dec] sm:$0xf]  ;;  %v12880_v29 = vld [vmem:[%s14469_s29 + $0x1ff8] sm:$0xf0]  ;;  %v12499_v40 = vor.u32 %v13813_v63, %v12496_v7 }
 0x43f   : > { %8308 = vmatpush.bf16.msra.mxu3 %v12307_v43  ;;  %v13877_v41 = vld [vmem:[%s14469_s29 + $0x1eec] sm:$0xf]  ;;  %v12627_v61 = vor.u32 %v13845_v6, %v12624_v60  ;;  %v12480_v32 = vld [vmem:[%s14469_s29 + $0x1cd8] sm:$0xf0] }
 0x440   : > { %8270 = vmatpush.bf16.msra.mxu0 %v11907_v59  ;;  %v13909_v55 = vld [vmem:[%s14469_s29 + $0x1fec] sm:$0xf]  ;;  %v12755_v30 = vor.u32 %v13877_v41, %v12752_v9  ;;  %v12608_v35 = vld [vmem:[%s14469_s29 + $0x1dd8] sm:$0xf0] }
 0x441   : > { %8283 = vmatpush.bf16.msra.mxu1 %v12035_v51  ;;  %v13809_v45 = vld [vmem:[%s14469_s29 + $0x1ccc] sm:$0xf]  ;;  %v12883_v23 = vor.u32 %v13909_v55, %v12880_v29  ;;  %v12736_v15 = vld [vmem:[%s14469_s29 + $0x1ed8] sm:$0xf0] }
 0x442   : > { %8296 = vmatpush.bf16.msra.mxu2 %v12163_v57  ;;  %v13841_v43 = vld [vmem:[%s14469_s29 + $0x1dcc] sm:$0xf]  ;;  %v12864_v47 = vld [vmem:[%s14469_s29 + $0x1fd8] sm:$0xf0]  ;;  %v12483_v48 = vor.u32 %v13809_v45, %v12480_v32 }
 0x443   : > { %8309 = vmatpush.bf16.msra.mxu3 %v12291_v18  ;;  %v13873_v42 = vld [vmem:[%s14469_s29 + $0x1ecc] sm:$0xf]  ;;  %v12611_v59 = vor.u32 %v13841_v43, %v12608_v35  ;;  %v12464_v57 = vld [vmem:[%s14469_s29 + $0x1cb8] sm:$0xf0] }
 0x444   : > { %8271 = vmatpush.bf16.msra.mxu0 %v11891_v0  ;;  %v13905_v46 = vld [vmem:[%s14469_s29 + $0x1fcc] sm:$0xf]  ;;  %v12739_v52 = vor.u32 %v13873_v42, %v12736_v15  ;;  %v12592_v13 = vld [vmem:[%s14469_s29 + $0x1db8] sm:$0xf0] }
 0x445   : > { %8284 = vmatpush.bf16.msra.mxu1 %v12019_v14  ;;  %v13805_v51 = vld [vmem:[%s14469_s29 + $0x1cac] sm:$0xf]  ;;  %v12867_v1 = vor.u32 %v13905_v46, %v12864_v47  ;;  %v12720_v18 = vld [vmem:[%s14469_s29 + $0x1eb8] sm:$0xf0] }
 0x446   : > { %8297 = vmatpush.bf16.msra.mxu2 %v12147_v26  ;;  %v13837_v53 = vld [vmem:[%s14469_s29 + $0x1dac] sm:$0xf]  ;;  %v12848_v22 = vld [vmem:[%s14469_s29 + $0x1fb8] sm:$0xf0] }
 0x447   : > { %8310 = vmatpush.bf16.msra.mxu3 %v12275_v24  ;;  %v13869_v56 = vld [vmem:[%s14469_s29 + $0x1eac] sm:$0xf]  ;;  %v12595_v16 = vor.u32 %v13837_v53, %v12592_v13  ;;  %v12448_v0 = vld [vmem:[%s14469_s29 + $0x1c98] sm:$0xf0] }
 0x448   : > { %8272 = vmatpush.bf16.msra.mxu0 %v11875_v19  ;;  %v13901_v37 = vld [vmem:[%s14469_s29 + $0x1fac] sm:$0xf]  ;;  %v12723_v34 = vor.u32 %v13869_v56, %v12720_v18  ;;  %v12576_v28 = vld [vmem:[%s14469_s29 + $0x1d98] sm:$0xf0] }
 0x449   : > { %8285 = vmatpush.bf16.msra.mxu1 %v12003_v3  ;;  %v13801_v62 = vld [vmem:[%s14469_s29 + $0x1c8c] sm:$0xf]  ;;  %v12704_v14 = vld [vmem:[%s14469_s29 + $0x1e98] sm:$0xf0]  ;;  %v8079_v17 = vpop.f32.mrf.mxu1 }
 0x44a   : > { %8298 = vmatpush.bf16.msra.mxu2 %v12131_v21  ;;  %v13865_v36 = vld [vmem:[%s14469_s29 + $0x1e8c] sm:$0xf]  ;;  %v12832_v39 = vld [vmem:[%s14469_s29 + $0x1f98] sm:$0xf0]  ;;  %v12451_v38 = vor.u32 %v13801_v62, %v12448_v0 }
 0x44b   : > { %8311 = vmatpush.bf16.msra.mxu3 %v12259_v44  ;;  %8273 = vmatmul.bf16.vlgmr.msra.gmra.mxu0 %v15122_v20  ;;  %v12467_v20 = vor.u32 %v13805_v51, %v12464_v57  ;;  %v13897_v26 = vld [vmem:[%s14469_s29 + $0x1f8c] sm:$0xf]  ;;  %v12707_v31 = vor.u32 %v13865_v36, %v12704_v14  ;;  %v12432_v2 = vld [vmem:[%s14469_s29 + $0x1c78] sm:$0xf0] }
 0x44c   : > { %8317 = vmatpush.bf16.msrb.mxu0 %v12499_v40  ;;  %8286 = vmatmul.bf16.vlgmr.msra.gmra.mxu1 %v15129_v4  ;;  %v12851_v4 = vor.u32 %v13901_v37, %v12848_v22  ;;  %v13797_v33 = vld [vmem:[%s14469_s29 + $0x1c6c] sm:$0xf]  ;;  %v12835_v63 = vor.u32 %v13897_v26, %v12832_v39  ;;  %v12560_v6 = vld [vmem:[%s14469_s29 + $0x1d78] sm:$0xf0] }
 0x44d   : > { %8330 = vmatpush.bf16.msrb.mxu1 %v12627_v61  ;;  %8299 = vmatmul.bf16.vlgmr.msra.gmra.mxu2 %v15127_v25  ;;  %v13833_v25 = vld [vmem:[%s14469_s29 + $0x1d8c] sm:$0xf]  ;;  %v12816_v41 = vld [vmem:[%s14469_s29 + $0x1f78] sm:$0xf0]  ;;  %v12435_v9 = vor.u32 %v13797_v33, %v12432_v2 }
 0x44e   : > { %8343 = vmatpush.bf16.msrb.mxu2 %v12755_v30  ;;  %8312 = vmatmul.bf16.vlgmr.msra.gmra.mxu3 %v15133_v10  ;;  %v8066_v10 = vpop.f32.mrf.mxu0  ;;  %v12579_v24 = vor.u32 %v13833_v25, %v12576_v28  ;;  %v13829_v5 = vld [vmem:[%s14469_s29 + $0x1d6c] sm:$0xf]  ;;  %v12416_v29 = vld [vmem:[%s14469_s29 + $0x1c58] sm:$0xf0] }
 0x44f   : > { %8356 = vmatpush.bf16.msrb.mxu3 %v12883_v23  ;;  %v8067_v58 = vadd.f32 %v8066_v10, %v16833_v27  ;;  %v13861_v19 = vld [vmem:[%s14469_s29 + $0x1e6c] sm:$0xf]  ;;  %v12688_v27 = vld [vmem:[%s14469_s29 + $0x1e78] sm:$0xf0]  ;;  %v12563_v3 = vor.u32 %v13829_v5, %v12560_v6 }
 0x450   : > { %8318 = vmatpush.bf16.msrb.mxu0 %v12483_v48  ;;  %v13893_v60 = vld [vmem:[%s14469_s29 + $0x1f6c] sm:$0xf]  ;;  %v12691_v21 = vor.u32 %v13861_v19, %v12688_v27  ;;  %v8092_v61 = vpop.f32.mrf.mxu2  ;;  %v12544_v30 = vld [vmem:[%s14469_s29 + $0x1d58] sm:$0xf0] }
 0x451   : > { %8331 = vmatpush.bf16.msrb.mxu1 %v12611_v59  ;;  %v8080_v7 = vadd.f32 %v8079_v17, %v8067_v58  ;;  %v13793_v55 = vld [vmem:[%s14469_s29 + $0x1c4c] sm:$0xf]  ;;  %v12819_v40 = vor.u32 %v13893_v60, %v12816_v41  ;;  %v12672_v32 = vld [vmem:[%s14469_s29 + $0x1e58] sm:$0xf0]  ;;  %v8105_v23 = vpop.f32.mrf.mxu3  ;;  %v8081_v47 = vpop.f32.mrf.mxu1 }
 0x452   : > { %8344 = vmatpush.bf16.msrb.mxu2 %v12739_v52  ;;  %v13825_v44 = vld [vmem:[%s14469_s29 + $0x1d4c] sm:$0xf]  ;;  %v12800_v42 = vld [vmem:[%s14469_s29 + $0x1f58] sm:$0xf0]  ;;  %v12419_v46 = vor.u32 %v13793_v55, %v12416_v29 }
 0x453   : > { %8357 = vmatpush.bf16.msrb.mxu3 %v12867_v1  ;;  %v13857_v45 = vld [vmem:[%s14469_s29 + $0x1e4c] sm:$0xf]  ;;  %v8093_v43 = vadd.f32 %v8092_v61, %v8080_v7  ;;  %v12547_v59 = vor.u32 %v13825_v44, %v12544_v30  ;;  %v12400_v57 = vld [vmem:[%s14469_s29 + $0x1c38] sm:$0xf0] }
 0x454   : > { %8319 = vmatpush.bf16.msrb.mxu0 %v12467_v20  ;;  %v13889_v35 = vld [vmem:[%s14469_s29 + $0x1f4c] sm:$0xf]  ;;  %v12675_v52 = vor.u32 %v13857_v45, %v12672_v32  ;;  %v12528_v13 = vld [vmem:[%s14469_s29 + $0x1d38] sm:$0xf0] }
 0x455   : > { %8332 = vmatpush.bf16.msrb.mxu1 %v12595_v16  ;;  %v8106_v48 = vadd.f32 %v8105_v23, %v8093_v43  ;;  %v13789_v51 = vld [vmem:[%s14469_s29 + $0x1c2c] sm:$0xf]  ;;  %v12803_v1 = vor.u32 %v13889_v35, %v12800_v42  ;;  %v12656_v18 = vld [vmem:[%s14469_s29 + $0x1e38] sm:$0xf0] }
 0x456   : > { %8345 = vmatpush.bf16.msrb.mxu2 %v12723_v34  ;;  %v8068_v15 = vpop.f32.mrf.mxu0  ;;  %v13821_v53 = vld [vmem:[%s14469_s29 + $0x1d2c] sm:$0xf]  ;;  %v12784_v22 = vld [vmem:[%s14469_s29 + $0x1f38] sm:$0xf0]  ;;  %v12403_v20 = vor.u32 %v13789_v51, %v12400_v57 }
 0x457   : > { %8358 = vmatpush.bf16.msrb.mxu3 %v12851_v4  ;;  %v13853_v56 = vld [vmem:[%s14469_s29 + $0x1e2c] sm:$0xf]  ;;  %v12531_v16 = vor.u32 %v13821_v53, %v12528_v13  ;;  %v12384_v0 = vld [vmem:[%s14469_s29 + $0x1c18] sm:$0xf0] }
 0x458   : > { %8320 = vmatpush.bf16.msrb.mxu0 %v12451_v38  ;;  %v13885_v37 = vld [vmem:[%s14469_s29 + $0x1f2c] sm:$0xf]  ;;  %v12659_v34 = vor.u32 %v13853_v56, %v12656_v18  ;;  %v12512_v28 = vld [vmem:[%s14469_s29 + $0x1d18] sm:$0xf0]  ;;  %v8094_v10 = vpop.f32.mrf.mxu2 }
 0x459   : > { %8333 = vmatpush.bf16.msrb.mxu1 %v12579_v24  ;;  %v13785_v62 = vld [vmem:[%s14469_s29 + $0x1c0c] sm:$0xf]  ;;  %v12787_v4 = vor.u32 %v13885_v37, %v12784_v22  ;;  %v12640_v14 = vld [vmem:[%s14469_s29 + $0x1e18] sm:$0xf0]  ;;  %v8107_v58 = vpop.f32.mrf.mxu3 }
 0x45a   : > { %8346 = vmatpush.bf16.msrb.mxu2 %v12707_v31  ;;  %v13817_v25 = vld [vmem:[%s14469_s29 + $0x1d0c] sm:$0xf]  ;;  %v12768_v39 = vld [vmem:[%s14469_s29 + $0x1f18] sm:$0xf0]  ;;  %v12387_v38 = vor.u32 %v13785_v62, %v12384_v0 }
 0x45b   : > { %8359 = vmatpush.bf16.msrb.mxu3 %v12835_v63  ;;  %v13849_v36 = vld [vmem:[%s14469_s29 + $0x1e0c] sm:$0xf]  ;;  %v12515_v17 = vor.u32 %v13817_v25, %v12512_v28 }
 0x45c   : > { %8321 = vmatpush.bf16.msrb.mxu0 %v12435_v9  ;;  %v13881_v26 = vld [vmem:[%s14469_s29 + $0x1f0c] sm:$0xf]  ;;  %v12643_v24 = vor.u32 %v13849_v36, %v12640_v14 }
 0x45d   : > { %8334 = vmatpush.bf16.msrb.mxu1 %v12563_v3  ;;  %v12771_v31 = vor.u32 %v13881_v26, %v12768_v39 }
 0x45e   : > { %8347 = vmatpush.bf16.msrb.mxu2 %v12691_v21 }
 0x45f   : > { %8360 = vmatpush.bf16.msrb.mxu3 %v12819_v40 }
 0x460   : > { %8322 = vmatpush.bf16.msrb.mxu0 %v12419_v46 }
 0x461   : > { %8335 = vmatpush.bf16.msrb.mxu1 %v12547_v59 }
 0x462   : > { %8348 = vmatpush.bf16.msrb.mxu2 %v12675_v52 }
 0x463   : > { %8361 = vmatpush.bf16.msrb.mxu3 %v12803_v1 }
 0x464   : > { %8323 = vmatpush.bf16.msrb.mxu0 %v12403_v20 }
 0x465   : > { %8336 = vmatpush.bf16.msrb.mxu1 %v12531_v16 }
 0x466   : > { %8349 = vmatpush.bf16.msrb.mxu2 %v12659_v34 }
 0x467   : > { %8362 = vmatpush.bf16.msrb.mxu3 %v12787_v4 }
 0x468   : > { %8324 = vmatpush.bf16.msrb.mxu0 %v12387_v38  ;;  %v8118_v33 = vpop.f32.mrf.mxu0 }
 0x469   : > { %8337 = vmatpush.bf16.msrb.mxu1 %v12515_v17  ;;  %v8119_v2 = vadd.f32 %v8118_v33, %v8106_v48  ;;  %v8131_v5 = vpop.f32.mrf.mxu1 }
 0x46a   : > { %8350 = vmatpush.bf16.msrb.mxu2 %v12643_v24 }
 0x46b   : > { %8363 = vmatpush.bf16.msrb.mxu3 %v12771_v31  ;;  %8325 = vmatmul.bf16.vlgmr.msrb.gmra.mxu0 %v15201_v8  ;;  %v8132_v63 = vadd.f32 %v8131_v5, %v8119_v2 }
 0x46c   : > { %8338 = vmatmul.bf16.vlgmr.msrb.gmra.mxu1 %v15208_v50 }
 0x46d   : > { %8351 = vmatmul.bf16.vlgmr.msrb.gmra.mxu2 %v15206_v11 }
 0x46e   : > { %8364 = vmatmul.bf16.vlgmr.msrb.gmra.mxu3 %v15212_v12 }
 0x470   : > { %v8144_v7 = vpop.f32.mrf.mxu2  ;;  %v8120_v27 = vpop.f32.mrf.mxu0 }
 0x471   : > { %v8145_v6 = vadd.f32 %v8144_v7, %v8132_v63  ;;  %v8157_v19 = vpop.f32.mrf.mxu3  ;;  %v8133_v60 = vpop.f32.mrf.mxu1 }
 0x473   : > { %v8158_v41 = vadd.f32 %v8157_v19, %v8145_v6 }
 0x478   : > { %v8146_v9 = vpop.f32.mrf.mxu2 }
 0x479   : > { %v8159_v3 = vpop.f32.mrf.mxu3 }
 0x488   : > { %v8170_v21 = vpop.f32.mrf.mxu0 }
 0x489   : > { %v8171_v8 = vadd.f32 %v8170_v21, %v8158_v41  ;;  %v8183_v55 = vpop.f32.mrf.mxu1 }
 0x48b   : > { %v8184_v50 = vadd.f32 %v8183_v55, %v8171_v8 }
 0x490   : > { %v8196_v29 = vpop.f32.mrf.mxu2  ;;  %v8172_v12 = vpop.f32.mrf.mxu0 }
 0x491   : > { %v8197_v11 = vadd.f32 %v8196_v29, %v8184_v50  ;;  %v8209_v44 = vpop.f32.mrf.mxu3  ;;  %v8185_v40 = vpop.f32.mrf.mxu1 }
 0x493   : > { %v8210_v61 = vadd.f32 %v8209_v44, %v8197_v11 }
 0x498   : > { %v8198_v30 = vpop.f32.mrf.mxu2 }
 0x499   : > { %v8211_v45 = vpop.f32.mrf.mxu3 }
 0x4a8   : > { %v8222_v32 = vpop.f32.mrf.mxu0 }
 0x4a9   : > { %v8235_v43 = vpop.f32.mrf.mxu1  ;;  %v8223_v52 = vadd.f32 %v8222_v32, %v8210_v61 }
 0x4ab   : > { %v8236_v13 = vadd.f32 %v8235_v43, %v8223_v52 }
 0x4b0   : > { %v8248_v23 = vpop.f32.mrf.mxu2  ;;  %v8224_v42 = vpop.f32.mrf.mxu0 }
 0x4b1   : > { %v8261_v35 = vpop.f32.mrf.mxu3  ;;  %v8237_v15 = vpop.f32.mrf.mxu1  ;;  %v8249_v56 = vadd.f32 %v8248_v23, %v8236_v13 }
 0x4b3   : > { %v8262_v22 = vadd.f32 %v8261_v35, %v8249_v56 }
 0x4b8   : > { %v8250_v46 = vpop.f32.mrf.mxu2 }
 0x4b9   : > { %v8263_v47 = vpop.f32.mrf.mxu3 }
 0x4c8   : > { %v8274_v48 = vpop.f32.mrf.mxu0 }
 0x4c9   : > { %v8287_v59 = vpop.f32.mrf.mxu1  ;;  %v8275_v20 = vadd.f32 %v8274_v48, %v8262_v22 }
 0x4cb   : > { %v8288_v16 = vadd.f32 %v8287_v59, %v8275_v20 }
 0x4d0   : > { %v8300_v51 = vpop.f32.mrf.mxu2  ;;  %v8276_v53 = vpop.f32.mrf.mxu0 }
 0x4d1   : > { %v8313_v57 = vpop.f32.mrf.mxu3  ;;  %v8289_v1 = vpop.f32.mrf.mxu1  ;;  %v8301_v34 = vadd.f32 %v8300_v51, %v8288_v16 }
 0x4d3   : > { %v8314_v62 = vadd.f32 %v8313_v57, %v8301_v34 }
 0x4d8   : > { %v8302_v18 = vpop.f32.mrf.mxu2 }
 0x4d9   : > { %v8315_v37 = vpop.f32.mrf.mxu3 }
 0x4e8   : > { %v8326_v0 = vpop.f32.mrf.mxu0 }
 0x4e9   : > { %v8339_v25 = vpop.f32.mrf.mxu1  ;;  %v8327_v4 = vadd.f32 %v8326_v0, %v8314_v62 }
 0x4eb   : > { %v8340_v28 = vadd.f32 %v8339_v25, %v8327_v4 }
 0x4f0   : > { %v8352_v36 = vpop.f32.mrf.mxu2  ;;  %v8328_v26 = vpop.f32.mrf.mxu0 }
 0x4f1   : > { %v8353_v14 = vadd.f32 %v8352_v36, %v8340_v28  ;;  %v8365_v10 = vpop.f32.mrf.mxu3  ;;  %v8341_v39 = vpop.f32.mrf.mxu1 }
 0x4f3   : > { %v8366_v58 = vadd.f32 %v8365_v10, %v8353_v14 }
 0x4f5   : > { %v8374_v38 = vrot.slane %v8366_v58, 4 }
 0x4f6   : > { %8387 = sbr.rel (%p12884_p9) target bundleno = 1371 (0x55b), region = 64 }
 0x4f7   : > { %v8377_v17 = vsel %vm8375_vm0, %v16692_v49, %v8374_v38 }
 0x4f8   : > { %v8381_v24 = vadd.f32 %v8377_v17, %v16137_v54  ;;  %v8354_v31 = vpop.f32.mrf.mxu2 }
 0x4f9   : > { %v8367_v33 = vpop.f32.mrf.mxu3 }
 0x4fa   : > { %8383 = vst [vmem:[%s14501_s8 + $0x8] sm:$0xff] %v8381_v24 }
 0x4fb   : > { %v8390_v2 = vld [vmem:[%s321_s30] sm:$0xf]  ;;  %v14261_v7 = vmov 4.0   ;;  %v8388_v49 = vld [vmem:[%s14501_s8] sm:$0xff] }
 0x4fc   : > { %v8392_v5 = vperm.slane %v8390_v2, 0  ;;  %v8393_v63 = vperm.slane %v8390_v2, 1  ;;  %14027 = vrcp.f32 %v14261_v7  ;;  %v8394_v6 = vperm.slane %v8390_v2, 2 }
 0x4fd   : > { %v8395_v19 = vperm.slane %v8390_v2, 3 }
 0x4fe   : > { %v8396_v27 = vrot.slane %v8393_v63, 4 }
 0x4ff   : > { %v8397_v60 = vrot.slane %v8395_v19, 4 }
 0x500   : > { %v8398_v41 = vsel %vm8375_vm0, %v8392_v5, %v8396_v27 }
 0x501   : > { %v8389_v54 = vld [vmem:[%s14501_s8 + $0x8] sm:$0xff]  ;;  %v8402_v9 = vadd.f32 %v8398_v41, %v8388_v49  ;;  %v8399_v3 = vsel %vm8375_vm0, %v8394_v6, %v8397_v60 }
 0x502   : > { %v14028_v21 = vpop.eup %14027  ;;  %v8403_v8 = vadd.f32 %v8399_v3, %v8389_v54 }
 0x503   : > { %8408 = vst [vmem:[#allocation1] ss:$2 sm:$0xff] %v8402_v9  ;;  %v8448_v55 = vmul.f32 4.0, %v14028_v21  ;;  %vm8452_vm1 = vweird.f32 %v14028_v21 }
 0x504   : > { %8410 = vst [vmem:[#allocation1 + $0x10] ss:$2 sm:$0xff] %v8403_v8 }
 0x505   : > { %v8449_v50 = vsub.f32 1.0, %v8448_v55 }
 0x507   : > { %v8450_v43 = vmul.f32 %v14028_v21, %v8449_v50 }
 0x509   : > { %v8451_v51 = vadd.f32 %v14028_v21, %v8450_v43 }
 0x50a   : > { %v8411_v29 = vld.sshfl [vmem:[#allocation1] sm:$0xff pattern:$0x75316420]  ;;  %v8412_v11 = vld.sshfl [vmem:[#allocation1 + $0x8] sm:$0xff pattern:$0x75316420] }
 0x50b   : > { %v8419_v44 = vsel %vm8375_vm0, %v8411_v29, 0.0  ;;  %v8426_v12 = vsel %vm8375_vm0, %v8412_v11, 0.0  ;;  %v8413_v40 = vld.sshfl [vmem:[#allocation1 + $0x10] sm:$0xff pattern:$0x75316420]  ;;  %v8453_v20 = vsel %vm8452_vm1, %v14028_v21, %v8451_v51 }
 0x50c   : > { %v8420_v61 = vrot.slane %v8419_v44, 4  ;;  %v8427_v30 = vrot.slane %v8426_v12, 4  ;;  %v8414_v45 = vld.sshfl [vmem:[#allocation1 + $0x18] sm:$0xff pattern:$0x75316420]  ;;  %v8433_v32 = vsel %vm8375_vm0, %v8413_v40, 0.0 }
 0x50d   : > { %v8434_v23 = vrot.slane %v8433_v32, 4  ;;  %v8440_v35 = vsel %vm8375_vm0, %v8414_v45, 0.0 }
 0x50e   : > { %v8421_v42 = vadd.f32 %v8420_v61, %v8419_v44  ;;  %v8428_v15 = vadd.f32 %v8427_v30, %v8426_v12  ;;  %v8441_v46 = vrot.slane %v8440_v35, 4 }
 0x50f   : > { %v8435_v47 = vadd.f32 %v8434_v23, %v8433_v32 }
 0x510   : > { %v8422_v48 = vrot.slane %v8421_v42, 2  ;;  %v8429_v59 = vrot.slane %v8428_v15, 2  ;;  %v8442_v52 = vadd.f32 %v8441_v46, %v8440_v35 }
 0x511   : > { %v8436_v57 = vrot.slane %v8435_v47, 2 }
 0x512   : > { %v8423_v53 = vadd.f32 %v8422_v48, %v8421_v42  ;;  %v8430_v1 = vadd.f32 %v8429_v59, %v8428_v15  ;;  %v8443_v13 = vrot.slane %v8442_v52, 2 }
 0x513   : > { %v8437_v56 = vadd.f32 %v8436_v57, %v8435_v47 }
 0x514   : > { %v8424_v18 = vrot.slane %v8423_v53, 1  ;;  %v8431_v37 = vrot.slane %v8430_v1, 1  ;;  %v8444_v22 = vadd.f32 %v8443_v13, %v8442_v52 }
 0x515   : > { %v8438_v16 = vrot.slane %v8437_v56, 1 }
 0x516   : > { %v8425_v34 = vadd.f32 %v8424_v18, %v8423_v53  ;;  %v8432_v62 = vadd.f32 %v8431_v37, %v8430_v1  ;;  %v8445_v0 = vrot.slane %v8444_v22, 1  ;;  %v8404_v37 = vld [vmem:[%s331_s11] sm:$0xf] }
 0x517   : > { %v8439_v4 = vadd.f32 %v8438_v16, %v8437_v56 }
 0x518   : > { %v8455_v25 = vmul.f32 %v8453_v20, %v8432_v62  ;;  %v8446_v28 = vadd.f32 %v8445_v0, %v8444_v22  ;;  %v8454_v36 = vmul.f32 %v8453_v20, %v8425_v34  ;;  %v8405_v0 = vld [vmem:[%s341_s14] sm:$0xf] }
 0x519   : > { %v8456_v39 = vmul.f32 %v8453_v20, %v8439_v4 }
 0x51a   : > { %v8462_v14 = vrot.slane %v8455_v25, 4  ;;  %v8457_v10 = vmul.f32 %v8453_v20, %v8446_v28  ;;  %v8575_v28 = vperm.slane %v8404_v37, 1 }
 0x51c   : > { %v8464_v26 = vsel %vm8375_vm0, %v8454_v36, %v8462_v14  ;;  %v8463_v58 = vrot.slane %v8457_v10, 4 }
 0x51d   : > { %v16940_v38 = vsub.f32 %v8402_v9, %v8464_v26 }
 0x51e   : > { %v8465_v17 = vsel %vm8375_vm0, %v8456_v39, %v8463_v58  ;;  %v8588_v39 = vperm.slane %v8405_v0, 1 }
 0x51f   : > { %v8470_v24 = vmul.f32 %v16940_v38, %v16940_v38  ;;  %v16945_v31 = vsub.f32 %v8403_v8, %v8465_v17 }
 0x521   : > { %8474 = vst [vmem:[#allocation1] ss:$2 sm:$0xff] %v8470_v24  ;;  %v8471_v33 = vmul.f32 %v16945_v31, %v16945_v31  ;;  %v8574_v24 = vperm.slane %v8404_v37, 0 }
 0x523   : > { %8476 = vst [vmem:[#allocation1 + $0x10] ss:$2 sm:$0xff] %v8471_v33 }
 0x528   : > { %v8477_v2 = vld.sshfl [vmem:[#allocation1] sm:$0xff pattern:$0x75316420]  ;;  %v8478_v5 = vld.sshfl [vmem:[#allocation1 + $0x8] sm:$0xff pattern:$0x75316420] }
 0x529   : > { %v8485_v63 = vsel %vm8375_vm0, %v8477_v2, 0.0  ;;  %v8492_v7 = vsel %vm8375_vm0, %v8478_v5, 0.0  ;;  %v8578_v2 = vrot.slane %v8575_v28, 4 }
 0x52a   : > { %v8486_v6 = vrot.slane %v8485_v63, 4  ;;  %v8493_v19 = vrot.slane %v8492_v7, 4  ;;  %v8479_v49 = vld.sshfl [vmem:[#allocation1 + $0x10] sm:$0xff pattern:$0x75316420] }
 0x52b   : > { %v8480_v27 = vld.sshfl [vmem:[#allocation1 + $0x18] sm:$0xff pattern:$0x75316420]  ;;  %v8499_v54 = vsel %vm8375_vm0, %v8479_v49, 0.0  ;;  %v8587_v49 = vperm.slane %v8405_v0, 0 }
 0x52c   : > { %v8487_v60 = vadd.f32 %v8486_v6, %v8485_v63  ;;  %v8494_v41 = vadd.f32 %v8493_v19, %v8492_v7  ;;  %v8500_v9 = vrot.slane %v8499_v54, 4  ;;  %v8506_v3 = vsel %vm8375_vm0, %v8480_v27, 0.0 }
 0x52d   : > { %v8507_v21 = vrot.slane %v8506_v3, 4  ;;  %v8577_v63 = vperm.slane %v8404_v37, 3  ;;  %v8591_v27 = vrot.slane %v8588_v39, 4 }
 0x52e   : > { %v8488_v8 = vrot.slane %v8487_v60, 2  ;;  %v8495_v55 = vrot.slane %v8494_v41, 2  ;;  %v8501_v50 = vadd.f32 %v8500_v9, %v8499_v54 }
 0x52f   : > { %v8508_v29 = vadd.f32 %v8507_v21, %v8506_v3 }
 0x530   : > { %v8489_v11 = vadd.f32 %v8488_v8, %v8487_v60  ;;  %v8496_v44 = vadd.f32 %v8495_v55, %v8494_v41  ;;  %v8502_v12 = vrot.slane %v8501_v50, 2  ;;  %v8590_v41 = vperm.slane %v8405_v0, 3 }
 0x531   : > { %v8509_v40 = vrot.slane %v8508_v29, 2  ;;  %v8576_v55 = vperm.slane %v8404_v37, 2 }
 0x532   : > { %v8490_v61 = vrot.slane %v8489_v11, 1  ;;  %v8497_v30 = vrot.slane %v8496_v44, 1  ;;  %v8503_v45 = vadd.f32 %v8502_v12, %v8501_v50  ;;  %v8579_v50 = vrot.slane %v8577_v63, 4 }
 0x533   : > { %v8510_v32 = vadd.f32 %v8509_v40, %v8508_v29 }
 0x534   : > { %v8491_v43 = vadd.f32 %v8490_v61, %v8489_v11  ;;  %v8498_v23 = vadd.f32 %v8497_v30, %v8496_v44  ;;  %v8504_v35 = vrot.slane %v8503_v45, 1  ;;  %v8580_v11 = vsel %vm8375_vm0, %v8574_v24, %v8578_v2 }
 0x535   : > { %v8511_v42 = vrot.slane %v8510_v32, 1  ;;  %v8589_v61 = vperm.slane %v8405_v0, 2  ;;  %v8592_v30 = vrot.slane %v8590_v41, 4 }
 0x536   : > { %v8513_v15 = vmul.f32 %v8491_v43, %v8453_v20  ;;  %v8514_v46 = vmul.f32 %v8498_v23, %v8453_v20  ;;  %v8505_v47 = vadd.f32 %v8504_v35, %v8503_v45  ;;  %v8593_v45 = vsel %vm8375_vm0, %v8587_v49, %v8591_v27 }
 0x537   : > { %v8512_v48 = vadd.f32 %v8511_v42, %v8510_v32  ;;  %v8581_v35 = vsel %vm8375_vm0, %v8576_v55, %v8579_v50 }
 0x538   : > { %v8517_v59 = vadd.f32 1e-05, %v8513_v15  ;;  %v8518_v52 = vadd.f32 1e-05, %v8514_v46  ;;  %v8515_v51 = vmul.f32 %v8505_v47, %v8453_v20  ;;  %v8594_v46 = vsel %vm8375_vm0, %v8589_v61, %v8592_v30 }
 0x539   : > { %v8516_v57 = vmul.f32 %v8512_v48, %v8453_v20 }
 0x53a   : > { %14029 = vrsqrt.f32 %v8517_v59  ;;  %v8519_v53 = vadd.f32 1e-05, %v8515_v51  ;;  %vm8537_vm3 = vweird.f32 %v8518_v52  ;;  %vm8527_vm7 = vweird.f32 %v8517_v59 }
 0x53b   : > { %14031 = vrsqrt.f32 %v8518_v52  ;;  %v8520_v1 = vadd.f32 1e-05, %v8516_v57 }
 0x53c   : > { %14033 = vrsqrt.f32 %v8519_v53  ;;  %vm8547_vm12 = vweird.f32 %v8519_v53 }
 0x53d   : > { %14035 = vrsqrt.f32 %v8520_v1  ;;  %vm8557_vm8 = vweird.f32 %v8520_v1 }
 0x540   : > { %v14030_v13 = vpop.eup %14029 }
 0x541   : > { %v14032_v56 = vpop.eup %14031  ;;  %v8522_v18 = vmul.f32 %v14030_v13, %v8517_v59  ;;  %vm8528_vm4 = vweird.f32 %v14030_v13 }
 0x542   : > { %v8532_v22 = vmul.f32 %v14032_v56, %v8518_v52  ;;  %v14034_v16 = vpop.eup %14033  ;;  %vm8538_vm2 = vweird.f32 %v14032_v56  ;;  %vm8529_vm9 = vmor %vm8527_vm7, %vm8528_vm4 }
 0x543   : > { %v8523_v34 = vmul.f32 %v14030_v13, %v8522_v18  ;;  %v14036_v62 = vpop.eup %14035  ;;  %v8542_v4 = vmul.f32 %v14034_v16, %v8519_v53  ;;  %vm8539_vm5 = vmor %vm8537_vm3, %vm8538_vm2  ;;  %vm8548_vm10 = vweird.f32 %v14034_v16 }
 0x544   : > { %v8533_v25 = vmul.f32 %v14032_v56, %v8532_v22  ;;  %v8552_v36 = vmul.f32 %v14036_v62, %v8520_v1  ;;  %vm8558_vm6 = vweird.f32 %v14036_v62  ;;  %vm8549_vm13 = vmor %vm8547_vm12, %vm8548_vm10 }
 0x545   : > { %v8524_v20 = vmul.f32 0.5, %v8523_v34  ;;  %v8543_v10 = vmul.f32 %v14034_v16, %v8542_v4  ;;  %vm8559_vm11 = vmor %vm8557_vm8, %vm8558_vm6 }
 0x546   : > { %v8534_v14 = vmul.f32 0.5, %v8533_v25  ;;  %v8553_v58 = vmul.f32 %v14036_v62, %v8552_v36 }
 0x547   : > { %v8525_v26 = vsub.f32 1.5, %v8524_v20  ;;  %v8544_v33 = vmul.f32 0.5, %v8543_v10 }
 0x548   : > { %v8535_v17 = vsub.f32 1.5, %v8534_v14  ;;  %v8554_v5 = vmul.f32 0.5, %v8553_v58 }
 0x549   : > { %v8526_v7 = vmul.f32 %v14030_v13, %v8525_v26  ;;  %v8545_v19 = vsub.f32 1.5, %v8544_v33 }
 0x54a   : > { %v8536_v6 = vmul.f32 %v14032_v56, %v8535_v17  ;;  %v8555_v54 = vsub.f32 1.5, %v8554_v5 }
 0x54b   : > { %v8546_v3 = vmul.f32 %v14034_v16, %v8545_v19  ;;  %v8530_v8 = vsel %vm8529_vm9, %v14030_v13, %v8526_v7 }
 0x54c   : > { %v8540_v60 = vsel %vm8539_vm5, %v14032_v56, %v8536_v6  ;;  %v8556_v21 = vmul.f32 %v14036_v62, %v8555_v54 }
 0x54d   : > { %v8565_v9 = vrot.slane %v8540_v60, 4  ;;  %v8550_v32 = vsel %vm8549_vm13, %v14034_v16, %v8546_v3 }
 0x54e   : > { %v8560_v44 = vsel %vm8559_vm11, %v14036_v62, %v8556_v21 }
 0x54f   : > { %v8567_v29 = vsel %vm8375_vm0, %v8530_v8, %v8565_v9  ;;  %v8566_v40 = vrot.slane %v8560_v44, 4 }
 0x550   : > { %v8571_v12 = vmul.f32 %v8567_v29, %v16940_v38 }
 0x551   : > { %v8568_v23 = vsel %vm8375_vm0, %v8550_v32, %v8566_v40 }
 0x552   : > { %v8584_v43 = vmul.f32 %v8580_v11, %v8571_v12  ;;  %v8572_v42 = vmul.f32 %v8568_v23, %v16945_v31 }
 0x554   : > { %v8597_v15 = vadd.f32 %v8593_v45, %v8584_v43  ;;  %v8585_v38 = vmul.f32 %v8581_v35, %v8572_v42 }
 0x556   : > { %v8599_v47 = vmax.f32 %v8597_v15, 0.0  ;;  %v8598_v48 = vadd.f32 %v8594_v46, %v8585_v38 }
 0x558   : > { %8601 = vst [vmem:[%s14501_s8] sm:$0xff] %v8599_v47  ;;  %v8600_v59 = vmax.f32 %v8598_v48, 0.0 }
 0x55a   : > { %8602 = vst [vmem:[%s14501_s8 + $0x8] sm:$0xff] %v8600_v59 }
 0x55b PF: > { %s24_s28 = sadd.s32 1, %s14255_s28   ;;  %s17050_s29 = sld [smem:[#allocation19_spill]] }
 0x55c   : > { %p21_p10 = scmp.ge.s32.totalorder %s24_s28, 26   ;;  %s17051_s24 = sld [smem:[#allocation12_spill]] }
 0x55d   : > { %s17052_s23 = sld [smem:[#allocation20_spill]]  ;;  %s17057_s18 = smov %s14219_s19 }
 0x55e   : > { %s17053_s1 = sld [smem:[#allocation15_spill]]  ;;  %s17058_s19 = smov %s14223_s20 }
 0x55f   : > { %s17054_s25 = sld [smem:[#allocation16_spill]]  ;;  %s17060_s21 = smov %s14231_s22 }
 0x560   : > { %s17055_s26 = sld [smem:[#allocation17_spill]]  ;;  %23 = sbr.rel (!%p21_p10) target bundleno = 16 (0x10), region = 133 }
 0x561   : > { %s17056_s27 = sld [smem:[#allocation18_spill]]  ;;  %s17059_s20 = smov %s17050_s29 }
 0x562   : > { %s17061_s22 = smov %s17051_s24 }
 0x564   : > { %s17062_s24 = smov %s17053_s1 }
 0x565   :  { %8625 = vsyncpa [#allocation3], 1 }
 0x566   :  { %8627 = vsyncpa [#allocation3 + $0x1], 1 }
 0x567   :  { %8628 = vsyncpa [#allocation5], 1 }
 0x568   :  { %8630 = vsyncpa [#allocation5 + $0x1], 1 }
 0x569   :  { %8631 = vsyncpa [#allocation8], 1 }
 0x56a   :  { %8633 = vsyncpa [#allocation8 + $0x1], 1 }

</bundles_post_ra>
